<compile_context>
chip_gen: v7x
topology: tpu7x:2x2x1
jax: 0.10.0
libtpu: 0.0.40
codegen_flags: <defaults>
</compile_context>

<pallas_src>
import functools

import jax
import jax.numpy as jnp
from jax.experimental import pallas as pl
from jax.experimental.pallas import tpu as pltpu


_VMEM_LIMIT_BYTES = 48 * 1024 * 1024   # <= v7x 64 MiB physical; fine on v5e/v6e
_GEMM_TM = 1024                        # M-tile rows for GEMM-style kernels
_CONV_BAND = 32                        # output rows / step, standalone 3x3 conv
_IMDB_BAND = 16                        # output rows / step, fused IMDB chain
                                       # (reduce for very wide images if the
                                       #  fused chain's f32 temps approach VMEM)


def _apply_act(x, act):
    if act == "relu":
        return jnp.maximum(x, 0.0)
    return x


# ----------------------------------------------------------------------------
# In-kernel helper: valid 3x3 conv with column taps folded into the matmul K.
#   x:     (R, Wd, Cin)   bf16 window (already zero-padded by the wrapper)
#   w_ref: (3, 3*Cin, Cout) bf16  (row tap i -> (col tap, cin) packed K)
#   b_ref: (1, Cout)      f32
# returns (R-2, Wd-2, Cout) f32
# ----------------------------------------------------------------------------
def _conv3x3_valid(x, w_ref, b_ref):
    x = x.astype(jnp.bfloat16)
    r, wd, cin = x.shape
    ro, wo = r - 2, wd - 2
    cout = w_ref.shape[-1]
    acc = jnp.zeros((ro * wo, cout), jnp.float32)
    for i in range(3):
        xi = x[i:i + ro]                                      # (ro, wd, cin)
        slab = jnp.concatenate(
            [xi[:, 0:wo], xi[:, 1:1 + wo], xi[:, 2:2 + wo]], axis=-1)
        acc = acc + jnp.dot(slab.reshape(ro * wo, 3 * cin), w_ref[i],
                            preferred_element_type=jnp.float32)
    return (acc + b_ref[...]).reshape(ro, wo, cout)


# ----------------------------------------------------------------------------
# Banded input-window helper: provide a (band + 2*halo)-row window of the
# zero-padded activation using only Blocked specs (body block + halo block).
# ----------------------------------------------------------------------------
def _band_specs(xp, h, halo, band):
    n, hp, wp, cin = xp.shape
    if h <= band:
        # single band: the window is the whole padded image (full-dim block)
        return [xp], [pl.BlockSpec((1, hp, wp, cin),
                                   lambda nn, b: (nn, 0, 0, 0))], h
    hb = 2 * halo                       # halo rows fetched per step
    max_idx = pl.cdiv(hp, hb) - 1       # clamp so the halo block never starts OOB
    specs = [
        pl.BlockSpec((1, band, wp, cin), lambda nn, b: (nn, b, 0, 0)),
        pl.BlockSpec(
            (1, hb, wp, cin),
            lambda nn, b: (nn, jnp.minimum((b + 1) * (band // hb), max_idx),
                           0, 0)),
    ]
    return [xp, xp], specs, band


# ----------------------------------------------------------------------------
# Kernel 1: banded 3x3 stride-1 conv, fused bias + act (+ residual) epilogue.
# ----------------------------------------------------------------------------
def _conv3x3_band_kernel(*refs, act, has_res, n_x):
    x_refs = refs[:n_x]
    if has_res:
        res_ref, w_ref, b_ref, o_ref = refs[n_x:]
    else:
        w_ref, b_ref, o_ref = refs[n_x:]
        res_ref = None
    if n_x == 1:
        xwin = x_refs[0][0]
    else:
        xwin = jnp.concatenate([r[0] for r in x_refs], axis=0)
    y = _conv3x3_valid(xwin, w_ref, b_ref)          # (band, W, Cout) f32
    y = _apply_act(y, act)
    if res_ref is not None:
        y = y + res_ref[0].astype(jnp.float32)
    o_ref[0] = y.astype(o_ref.dtype)


def conv3x3_s1(x, p, act="none", residual=None):
    """3x3 / stride-1 / pad-1 conv on NHWC bf16, banded over output rows."""
    n, h, w, cin = x.shape
    cout = p["w"].shape[-1]
    # TODO(synk): the remaining per-call jnp.pad (zero halo) could be removed
    # by assembling the halo in a VMEM scratch with pl.when on edge bands.
    xp = jnp.pad(x, ((0, 0), (1, 1), (1, 1), (0, 0)))
    x_inputs, x_specs, band = _band_specs(xp, h, 1, _CONV_BAND)
    nb = pl.cdiv(h, band)

    inputs = list(x_inputs)
    in_specs = list(x_specs)
    if residual is not None:
        inputs.append(residual)
        in_specs.append(pl.BlockSpec((1, band, w, cout),
                                     lambda nn, b: (nn, b, 0, 0)))
    inputs += [p["w"], p["b"]]
    in_specs += [pl.BlockSpec(p["w"].shape, lambda nn, b: (0, 0, 0)),   # resident
                 pl.BlockSpec(p["b"].shape, lambda nn, b: (0, 0))]      # resident

    return pl.pallas_call(
        functools.partial(_conv3x3_band_kernel, act=act,
                          has_res=residual is not None, n_x=len(x_inputs)),
        out_shape=jax.ShapeDtypeStruct((n, h, w, cout), jnp.bfloat16),
        grid=(n, nb),
        in_specs=in_specs,
        out_specs=pl.BlockSpec((1, band, w, cout), lambda nn, b: (nn, b, 0, 0)),
        compiler_params=pltpu.CompilerParams(
            dimension_semantics=("parallel", "parallel"),
            vmem_limit_bytes=_VMEM_LIMIT_BYTES),
    )(*inputs)


# ----------------------------------------------------------------------------
# Kernel 2: fused IMDB conv chain (c1..c4 + channel split + concat) per band.
# Intermediate 64-ch activations never leave VMEM.
# ----------------------------------------------------------------------------
def _imdb_chain_kernel(*refs, dc, n_x, act):
    x_refs = refs[:n_x]
    w1, b1, w2, b2, w3, b3, w4, b4, o_ref = refs[n_x:]
    bo, wo = o_ref.shape[1], o_ref.shape[2]
    if n_x == 1:
        xwin = x_refs[0][0]                         # (bo+8, W+8, 64)
    else:
        xwin = jnp.concatenate([r[0] for r in x_refs], axis=0)

    y1 = _apply_act(_conv3x3_valid(xwin, w1, b1), act)          # (bo+6, wo+6, 64)
    d1 = y1[3:3 + bo, 3:3 + wo, :dc]
    y2 = _apply_act(_conv3x3_valid(y1[:, :, dc:], w2, b2), act)  # (bo+4, wo+4, 64)
    d2 = y2[2:2 + bo, 2:2 + wo, :dc]
    y3 = _apply_act(_conv3x3_valid(y2[:, :, dc:], w3, b3), act)  # (bo+2, wo+2, 64)
    d3 = y3[1:1 + bo, 1:1 + wo, :dc]
    y4 = _conv3x3_valid(y3[:, :, dc:], w4, b4)                   # (bo, wo, dc)

    out = jnp.concatenate([d1, d2, d3, y4], axis=-1)             # (bo, wo, 64)
    o_ref[0] = out.astype(o_ref.dtype)


def imdb_chain(p, x, dc, act="relu"):
    n, h, w, c = x.shape
    xp = jnp.pad(x, ((0, 0), (4, 4), (4, 4), (0, 0)))
    x_inputs, x_specs, band = _band_specs(xp, h, 4, _IMDB_BAND)
    nb = pl.cdiv(h, band)

    inputs = list(x_inputs)
    in_specs = list(x_specs)
    for cp in (p["c1"], p["c2"], p["c3"], p["c4"]):
        inputs += [cp["w"], cp["b"]]
        in_specs += [pl.BlockSpec(cp["w"].shape, lambda nn, b: (0, 0, 0)),
                     pl.BlockSpec(cp["b"].shape, lambda nn, b: (0, 0))]

    return pl.pallas_call(
        functools.partial(_imdb_chain_kernel, dc=dc, n_x=len(x_inputs), act=act),
        out_shape=jax.ShapeDtypeStruct((n, h, w, c), jnp.bfloat16),
        grid=(n, nb),
        in_specs=in_specs,
        out_specs=pl.BlockSpec((1, band, w, c), lambda nn, b: (nn, b, 0, 0)),
        compiler_params=pltpu.CompilerParams(
            dimension_semantics=("parallel", "parallel"),
            vmem_limit_bytes=_VMEM_LIMIT_BYTES),
    )(*inputs)


# ----------------------------------------------------------------------------
# Kernel 3: fused CCA-scale * x  @ W5 + bias + module residual (1x1 conv).
# ----------------------------------------------------------------------------
def _cca_c5_kernel(a_ref, s_ref, w_ref, b_ref, res_ref, o_ref):
    a = a_ref[0].astype(jnp.float32) * s_ref[0]                  # (tm, 64)
    acc = jnp.dot(a.astype(jnp.bfloat16), w_ref[...],
                  preferred_element_type=jnp.float32)
    acc = acc + b_ref[...] + res_ref[0].astype(jnp.float32)
    o_ref[0] = acc.astype(o_ref.dtype)


def cca_c5_residual(x, scale, p5, residual):
    n, h, w, c = x.shape
    cout = p5["w"].shape[-1]
    hw = h * w
    tm = hw if hw <= _GEMM_TM else _GEMM_TM
    mt = pl.cdiv(hw, tm)
    a = x.reshape(n, hw, c)
    r = residual.reshape(n, hw, cout)
    out = pl.pallas_call(
        _cca_c5_kernel,
        out_shape=jax.ShapeDtypeStruct((n, hw, cout), jnp.bfloat16),
        grid=(n, mt),
        in_specs=[pl.BlockSpec((1, tm, c), lambda nn, i: (nn, i, 0)),
                  pl.BlockSpec((1, 1, c), lambda nn, i: (nn, 0, 0)),
                  pl.BlockSpec(p5["w"].shape, lambda nn, i: (0, 0)),
                  pl.BlockSpec(p5["b"].shape, lambda nn, i: (0, 0)),
                  pl.BlockSpec((1, tm, cout), lambda nn, i: (nn, i, 0))],
        out_specs=pl.BlockSpec((1, tm, cout), lambda nn, i: (nn, i, 0)),
        compiler_params=pltpu.CompilerParams(
            dimension_semantics=("parallel", "parallel"),
            vmem_limit_bytes=_VMEM_LIMIT_BYTES),
    )(a, scale, p5["w"], p5["b"], r)
    return out.reshape(n, h, w, cout)


# ----------------------------------------------------------------------------
# Kernel 4: conv_cat without materializing the 1024-channel concat in HBM.
# Reads the 16 module outputs directly and accumulates 16 (64 x 64) slices.
# ----------------------------------------------------------------------------
def _concat_gemm_kernel(*refs):
    n_mod = len(refs) - 3
    a_refs = refs[:n_mod]
    w_ref, b_ref, o_ref = refs[n_mod:]
    kc = w_ref.shape[0] // n_mod
    acc = jnp.zeros(o_ref.shape, jnp.float32)
    for k in range(n_mod):
        acc = acc + jnp.dot(a_refs[k][...], w_ref[k * kc:(k + 1) * kc, :],
                            preferred_element_type=jnp.float32)
    acc = jnp.maximum(acc + b_ref[...], 0.0)                     # conv_cat act=relu
    o_ref[...] = acc.astype(o_ref.dtype)


def concat_conv1x1(xs, p):
    n, h, w, c = xs[0].shape
    cout = p["w"].shape[-1]
    m = n * h * w
    tm = m if m <= _GEMM_TM else _GEMM_TM
    flat = [x.reshape(m, c) for x in xs]
    in_specs = [pl.BlockSpec((tm, c), lambda i: (i, 0)) for _ in xs]
    in_specs += [pl.BlockSpec(p["w"].shape, lambda i: (0, 0)),
                 pl.BlockSpec(p["b"].shape, lambda i: (0, 0))]
    out = pl.pallas_call(
        _concat_gemm_kernel,
        out_shape=jax.ShapeDtypeStruct((m, cout), jnp.bfloat16),
        grid=(pl.cdiv(m, tm),),
        in_specs=in_specs,
        out_specs=pl.BlockSpec((tm, cout), lambda i: (i, 0)),
        compiler_params=pltpu.CompilerParams(
            dimension_semantics=("parallel",),
            vmem_limit_bytes=_VMEM_LIMIT_BYTES),
    )(*flat, p["w"], p["b"])
    return out.reshape(n, h, w, cout)


# ----------------------------------------------------------------------------
# Kernel 5: plain tiled GEMM + bias + act (stride-2 downsampler convs, im2col).
# ----------------------------------------------------------------------------
def _gemm_kernel(a_ref, b_ref, bias_ref, o_ref, *, act):
    acc = jnp.dot(a_ref[...], b_ref[...], preferred_element_type=jnp.float32)
    acc = _apply_act(acc + bias_ref[...], act)
    o_ref[...] = acc.astype(o_ref.dtype)


def pallas_gemm(a, bmat, bias, act="none"):
    m, k = a.shape
    _, ncol = bmat.shape
    tm = m if m <= _GEMM_TM else _GEMM_TM
    return pl.pallas_call(
        functools.partial(_gemm_kernel, act=act),
        out_shape=jax.ShapeDtypeStruct((m, ncol), jnp.bfloat16),
        grid=(pl.cdiv(m, tm),),
        in_specs=[pl.BlockSpec((tm, k), lambda i: (i, 0)),
                  pl.BlockSpec((k, ncol), lambda i: (0, 0)),
                  pl.BlockSpec((1, ncol), lambda i: (0, 0))],
        out_specs=pl.BlockSpec((tm, ncol), lambda i: (i, 0)),
        compiler_params=pltpu.CompilerParams(
            dimension_semantics=("parallel",),
            vmem_limit_bytes=_VMEM_LIMIT_BYTES),
    )(a, bmat, bias)


def conv3x3_s2(x, p, act="none"):
    """Stride-2 3x3 conv via im2col + tiled GEMM (only the 4 downsampler convs).
    TODO(synk): replace with a direct banded stride-2 kernel to drop im2col."""
    n, h, w, cin = x.shape
    cout = p["w"].shape[-1]
    xp = jnp.pad(x, ((0, 0), (1, 1), (1, 1), (0, 0)))
    hp, wp = h + 2, w + 2
    ho = (hp - 3) // 2 + 1
    wo = (wp - 3) // 2 + 1
    patches = [xp[:, i:i + 2 * ho:2, j:j + 2 * wo:2, :]
               for i in range(3) for j in range(3)]
    cols = jnp.concatenate(patches, axis=-1).reshape(n * ho * wo, 9 * cin)
    y = pallas_gemm(cols, p["w"], p["b"], act=act)
    return y.reshape(n, ho, wo, cout)


# ----------------------------------------------------------------------------
# Plain-JAX glue: pixel shuffle + tiny CCA squeeze (global stats sync point).
# ----------------------------------------------------------------------------
def pixel_shuffle_nhwc(x, r):
    n, h, w, cr2 = x.shape
    c = cr2 // (r * r)
    x = x.reshape(n, h, w, c, r, r)
    x = x.transpose(0, 1, 4, 2, 5, 3)
    return x.reshape(n, h * r, w * r, c)


def _cca_scale(p, x):
    xf = x.astype(jnp.float32)
    mean = xf.mean(axis=(1, 2))                                   # (N, C)
    var = ((xf - mean[:, None, None, :]) ** 2).mean(axis=(1, 2))  # population var
    y = jnp.sqrt(var) + mean
    y = jnp.maximum(y @ p["cca1_w"] + p["cca1_b"], 0.0)
    y = jax.nn.sigmoid(y @ p["cca2_w"] + p["cca2_b"])
    return y[:, None, :]                                          # (N, 1, C) f32


def imdb_forward(p, x, dc):
    out = imdb_chain(p, x, dc, act="relu")        # fused c1..c4 + split + concat
    scale = _cca_scale(p, out)                    # tiny per-image squeeze (JAX)
    return cca_c5_residual(out, scale, p["c5"], x)   # scale * out @ W5 + b + x


# ----------------------------------------------------------------------------
# Deterministic parameter init (synthetic weights), packed once into the
# kernel-friendly bf16 layouts.
# ----------------------------------------------------------------------------
def _conv3x3_params(key, cin, cout):
    k_w, k_b = jax.random.split(key)
    fan_in = 9 * cin
    w = jax.random.normal(k_w, (3, 3, cin, cout), jnp.float32) / jnp.sqrt(float(fan_in))
    b = jax.random.normal(k_b, (cout,), jnp.float32) * 0.01
    # packed per row tap: (3, 3*Cin, Cout), K ordered (col tap, cin)
    return {"w": w.reshape(3, 3 * cin, cout).astype(jnp.bfloat16),
            "b": b.reshape(1, cout)}


def _conv_gemm_params(key, kh, kw, cin, cout):
    k_w, k_b = jax.random.split(key)
    fan_in = kh * kw * cin
    w = jax.random.normal(k_w, (kh, kw, cin, cout), jnp.float32) / jnp.sqrt(float(fan_in))
    b = jax.random.normal(k_b, (cout,), jnp.float32) * 0.01
    return {"w": w.reshape(kh * kw * cin, cout).astype(jnp.bfloat16),
            "b": b.reshape(1, cout)}


def _cca_params(key, c, red):
    k1, k2, k3, k4 = jax.random.split(key, 4)
    return {
        "cca1_w": jax.random.normal(k1, (c, red), jnp.float32) / jnp.sqrt(float(c)),
        "cca1_b": jax.random.normal(k2, (red,), jnp.float32) * 0.01,
        "cca2_w": jax.random.normal(k3, (red, c), jnp.float32) / jnp.sqrt(float(red)),
        "cca2_b": jax.random.normal(k4, (c,), jnp.float32) * 0.01,
    }


def init_params(key, in_nc=3, nf=64, out_nc=3, num_modules=16):
    keys = iter(jax.random.split(key, 1024))

    def nxt():
        return next(keys)

    def downsampler():
        return {
            "s2a": _conv_gemm_params(nxt(), 3, 3, in_nc, nf // 2),   # s2, relu
            "s1a": _conv3x3_params(nxt(), nf // 2, nf // 2),         # s1, relu
            "s2b": _conv_gemm_params(nxt(), 3, 3, nf // 2, nf),      # s2, relu
            "s1b": _conv3x3_params(nxt(), nf, nf),                   # s1, no act
        }

    dc = nf // 4
    rc = nf - dc
    catc = 4 * dc

    def imdb():
        d = {
            "c1": _conv3x3_params(nxt(), nf, nf),
            "c2": _conv3x3_params(nxt(), rc, nf),
            "c3": _conv3x3_params(nxt(), rc, nf),
            "c4": _conv3x3_params(nxt(), rc, dc),
            "c5": _conv_gemm_params(nxt(), 1, 1, catc, nf),
        }
        d.update(_cca_params(nxt(), catc, max(catc // 16, 1)))
        return d

    return {
        "down_O": downsampler(),
        "down_A": downsampler(),
        "imdb": [imdb() for _ in range(num_modules)],
        "conv_cat": _conv_gemm_params(nxt(), 1, 1, nf * num_modules, nf),
        "lr": _conv3x3_params(nxt(), nf, nf),
        "up1": _conv3x3_params(nxt(), nf, 16 * 4),
        "up2": _conv3x3_params(nxt(), 16, out_nc * 4),
    }


# ----------------------------------------------------------------------------
# Full forward pass (activations NHWC bf16 internally).
# ----------------------------------------------------------------------------
def animenet5_forward(params, x_O, x_A, nf=64, num_modules=16):
    x_O = x_O.astype(jnp.bfloat16)
    x_A = x_A.astype(jnp.bfloat16)

    def downsample(pd, x, residual=None):
        x = conv3x3_s2(x, pd["s2a"], act="relu")
        x = conv3x3_s1(x, pd["s1a"], act="relu")
        x = conv3x3_s2(x, pd["s2b"], act="relu")
        # conv_layer (no act); "in_O + in_A" fused into branch A's epilogue.
        return conv3x3_s1(x, pd["s1b"], act="none", residual=residual)

    in_O = downsample(params["down_O"], x_O)
    in_ = downsample(params["down_A"], x_A, residual=in_O)       # = in_O + in_A

    dc = nf // 4
    outs = []
    cur = in_
    for i in range(num_modules):
        cur = imdb_forward(params["imdb"][i], cur, dc)
        outs.append(cur)

    # conv_cat (relu) without an HBM 1024-channel concat.
    out_B = concat_conv1x1(outs, params["conv_cat"])
    out_lr = conv3x3_s1(out_B, params["lr"], act="none", residual=in_)   # + in_

    ur = pixel_shuffle_nhwc(conv3x3_s1(out_lr, params["up1"], act="none"), 2)
    output = pixel_shuffle_nhwc(conv3x3_s1(ur, params["up2"], act="none"), 2)
    return output.astype(jnp.float32)


if __name__ == "__main__":
    key = jax.random.PRNGKey(0)
    kp, kx1, kx2 = jax.random.split(key, 3)

    params = init_params(kp, in_nc=3, nf=64, out_nc=3)

    # Reference module takes a pair of NCHW images: input[0], input[1].
    x_O_nchw = jax.random.normal(kx1, (2, 3, 16, 16), jnp.float32)
    x_A_nchw = jax.random.normal(kx2, (2, 3, 16, 16), jnp.float32)
    x_O = jnp.transpose(x_O_nchw, (0, 2, 3, 1))   # -> NHWC
    x_A = jnp.transpose(x_A_nchw, (0, 2, 3, 1))

    fwd = jax.jit(animenet5_forward)
    out = fwd(params, x_O, x_A)
    out = jax.block_until_ready(out)
    assert out.shape == (2, 16, 16, 3), out.shape   # NHWC of NCHW (2,3,16,16)
    assert bool(jnp.all(jnp.isfinite(out)))
    print("KERNEL_OK")
</pallas_src>

<mosaic_0001>
module attributes {stable_mosaic.version = 11 : i64} {
  func.func @_gemm_kernel(%arg0: i32, %arg1: memref<128x27xbf16, #tpu.memory_space<vmem>>, %arg2: memref<27x32xbf16, #tpu.memory_space<vmem>>, %arg3: memref<1x32xf32, #tpu.memory_space<vmem>>, %arg4: memref<128x32xbf16, #tpu.memory_space<vmem>>) attributes {dimension_semantics = [#tpu.dimension_semantics<parallel>], iteration_bounds = array<i64: 1>, scalar_prefetch = 0 : i64, scratch_operands = 0 : i64, tpu.core_type = #tpu.core_type<tc>, window_params = [{transform_indices = @transform_0, window_bounds = array<i64: 128, 27>}, {pipeline_mode = #tpu.pipeline_mode<synchronous>, transform_indices = @transform_1, window_bounds = array<i64: 27, 32>}, {pipeline_mode = #tpu.pipeline_mode<synchronous>, transform_indices = @transform_2, window_bounds = array<i64: 1, 32>}, {transform_indices = @transform_3, window_bounds = array<i64: 128, 32>}]} {
    %c0 = arith.constant 0 : index
    %c0_0 = arith.constant 0 : index
    %0 = vector.load %arg1[%c0, %c0_0] : memref<128x27xbf16, #tpu.memory_space<vmem>>, vector<128x27xbf16>
    %c0_1 = arith.constant 0 : index
    %c0_2 = arith.constant 0 : index
    %1 = vector.load %arg2[%c0_1, %c0_2] : memref<27x32xbf16, #tpu.memory_space<vmem>>, vector<27x32xbf16>
    %cst = arith.constant dense<0.000000e+00> : vector<128x32xf32>
    %2 = tpu.matmul %0, %1, %cst {dimension_numbers = #tpu.dot_dimension_numbers<[1], [0], [0], [1], [0, 0, 1, 1], [], []>} : vector<128x27xbf16>, vector<27x32xbf16>, vector<128x32xf32> -> vector<128x32xf32>
    %c0_3 = arith.constant 0 : index
    %c0_4 = arith.constant 0 : index
    %3 = vector.load %arg3[%c0_3, %c0_4] : memref<1x32xf32, #tpu.memory_space<vmem>>, vector<1x32xf32>
    %4 = vector.broadcast %3 : vector<1x32xf32> to vector<128x32xf32>
    %5 = arith.addf %2, %4 : vector<128x32xf32>
    %cst_5 = arith.constant 0.000000e+00 : f32
    %6 = vector.broadcast %cst_5 : f32 to vector<128x32xf32>
    %7 = arith.maximumf %5, %6 : vector<128x32xf32>
    %8 = arith.truncf %7 : vector<128x32xf32> to vector<128x32xbf16>
    %c0_6 = arith.constant 0 : index
    %c0_7 = arith.constant 0 : index
    %9 = vector.load %arg4[%c0_6, %c0_7] : memref<128x32xbf16, #tpu.memory_space<vmem>>, vector<128x32xbf16>
    tpu.vector_store %arg4[%c0_6, %c0_7], %8 {strides = array<i32>} : memref<128x32xbf16, #tpu.memory_space<vmem>>, vector<128x32xbf16>,
    return
  }
  func.func @transform_0(%arg0: i32) -> (i32, i32) {
    %c0_i32 = arith.constant 0 : i32
    %c0_i32_0 = arith.constant 0 : i32
    return %arg0, %c0_i32 : i32, i32
  }
  func.func @transform_1(%arg0: i32) -> (i32, i32) {
    %c0_i32 = arith.constant 0 : i32
    %c0_i32_0 = arith.constant 0 : i32
    %c0_i32_1 = arith.constant 0 : i32
    return %c0_i32, %c0_i32_0 : i32, i32
  }
  func.func @transform_2(%arg0: i32) -> (i32, i32) {
    %c0_i32 = arith.constant 0 : i32
    %c0_i32_0 = arith.constant 0 : i32
    %c0_i32_1 = arith.constant 0 : i32
    return %c0_i32, %c0_i32_0 : i32, i32
  }
  func.func @transform_3(%arg0: i32) -> (i32, i32) {
    %c0_i32 = arith.constant 0 : i32
    %c0_i32_0 = arith.constant 0 : i32
    return %arg0, %c0_i32 : i32, i32
  }
}

module attributes {stable_mosaic.version = 11 : i64} {
  func.func @_conv3x3_band_kernel(%arg0: i32, %arg1: i32, %arg2: memref<1x10x10x32xbf16, #tpu.memory_space<vmem>>, %arg3: memref<3x96x32xbf16, #tpu.memory_space<vmem>>, %arg4: memref<1x32xf32, #tpu.memory_space<vmem>>, %arg5: memref<1x8x8x32xbf16, #tpu.memory_space<vmem>>) attributes {dimension_semantics = [#tpu.dimension_semantics<parallel>, #tpu.dimension_semantics<parallel>], iteration_bounds = array<i64: 2, 1>, scalar_prefetch = 0 : i64, scratch_operands = 0 : i64, tpu.core_type = #tpu.core_type<tc>, window_params = [{transform_indices = @transform_0, window_bounds = array<i64: 1, 10, 10, 32>}, {pipeline_mode = #tpu.pipeline_mode<synchronous>, transform_indices = @transform_1, window_bounds = array<i64: 3, 96, 32>}, {pipeline_mode = #tpu.pipeline_mode<synchronous>, transform_indices = @transform_2, window_bounds = array<i64: 1, 32>}, {transform_indices = @transform_3, window_bounds = array<i64: 1, 8, 8, 32>}]} {
    %c0 = arith.constant 0 : index
    %c0_0 = arith.constant 0 : index
    %c0_1 = arith.constant 0 : index
    %c0_2 = arith.constant 0 : index
    %0 = vector.load %arg2[%c0, %c0_0, %c0_1, %c0_2] : memref<1x10x10x32xbf16, #tpu.memory_space<vmem>>, vector<1x10x10x32xbf16>
    %1 = vector.shape_cast %0 : vector<1x10x10x32xbf16> to vector<10x10x32xbf16>
    %cst = arith.constant 0.000000e+00 : f32
    %2 = vector.broadcast %cst : f32 to vector<64x32xf32>
    %3 = vector.extract_strided_slice %1 {offsets = [0, 0, 0], sizes = [8, 10, 32], strides = [1, 1, 1]} : vector<10x10x32xbf16> to vector<8x10x32xbf16>
    %4 = vector.extract_strided_slice %3 {offsets = [0, 0, 0], sizes = [8, 8, 32], strides = [1, 1, 1]} : vector<8x10x32xbf16> to vector<8x8x32xbf16>
    %5 = vector.extract_strided_slice %3 {offsets = [0, 1, 0], sizes = [8, 8, 32], strides = [1, 1, 1]} : vector<8x10x32xbf16> to vector<8x8x32xbf16>
    %6 = vector.extract_strided_slice %3 {offsets = [0, 2, 0], sizes = [8, 8, 32], strides = [1, 1, 1]} : vector<8x10x32xbf16> to vector<8x8x32xbf16>
    %7 = tpu.concatenate %4, %5, %6 in 2 : vector<8x8x32xbf16>, vector<8x8x32xbf16>, vector<8x8x32xbf16> -> vector<8x8x96xbf16>
    %8 = vector.shape_cast %7 : vector<8x8x96xbf16> to vector<64x96xbf16>
    %c0_3 = arith.constant 0 : index
    %c0_4 = arith.constant 0 : index
    %c0_5 = arith.constant 0 : index
    %9 = vector.load %arg3[%c0_3, %c0_4, %c0_5] : memref<3x96x32xbf16, #tpu.memory_space<vmem>>, vector<1x96x32xbf16>
    %10 = vector.shape_cast %9 : vector<1x96x32xbf16> to vector<96x32xbf16>
    %cst_6 = arith.constant dense<0.000000e+00> : vector<64x32xf32>
    %11 = tpu.matmul %8, %10, %cst_6 {dimension_numbers = #tpu.dot_dimension_numbers<[1], [0], [0], [1], [0, 0, 1, 1], [], []>} : vector<64x96xbf16>, vector<96x32xbf16>, vector<64x32xf32> -> vector<64x32xf32>
    %12 = arith.addf %2, %11 : vector<64x32xf32>
    %13 = vector.extract_strided_slice %1 {offsets = [1, 0, 0], sizes = [8, 10, 32], strides = [1, 1, 1]} : vector<10x10x32xbf16> to vector<8x10x32xbf16>
    %14 = vector.extract_strided_slice %13 {offsets = [0, 0, 0], sizes = [8, 8, 32], strides = [1, 1, 1]} : vector<8x10x32xbf16> to vector<8x8x32xbf16>
    %15 = vector.extract_strided_slice %13 {offsets = [0, 1, 0], sizes = [8, 8, 32], strides = [1, 1, 1]} : vector<8x10x32xbf16> to vector<8x8x32xbf16>
    %16 = vector.extract_strided_slice %13 {offsets = [0, 2, 0], sizes = [8, 8, 32], strides = [1, 1, 1]} : vector<8x10x32xbf16> to vector<8x8x32xbf16>
    %17 = tpu.concatenate %14, %15, %16 in 2 : vector<8x8x32xbf16>, vector<8x8x32xbf16>, vector<8x8x32xbf16> -> vector<8x8x96xbf16>
    %18 = vector.shape_cast %17 : vector<8x8x96xbf16> to vector<64x96xbf16>
    %c1 = arith.constant 1 : index
    %c0_7 = arith.constant 0 : index
    %c0_8 = arith.constant 0 : index
    %19 = vector.load %arg3[%c1, %c0_7, %c0_8] : memref<3x96x32xbf16, #tpu.memory_space<vmem>>, vector<1x96x32xbf16>
    %20 = vector.shape_cast %19 : vector<1x96x32xbf16> to vector<96x32xbf16>
    %cst_9 = arith.constant dense<0.000000e+00> : vector<64x32xf32>
    %21 = tpu.matmul %18, %20, %cst_9 {dimension_numbers = #tpu.dot_dimension_numbers<[1], [0], [0], [1], [0, 0, 1, 1], [], []>} : vector<64x96xbf16>, vector<96x32xbf16>, vector<64x32xf32> -> vector<64x32xf32>
    %22 = arith.addf %12, %21 : vector<64x32xf32>
    %23 = vector.extract_strided_slice %1 {offsets = [2, 0, 0], sizes = [8, 10, 32], strides = [1, 1, 1]} : vector<10x10x32xbf16> to vector<8x10x32xbf16>
    %24 = vector.extract_strided_slice %23 {offsets = [0, 0, 0], sizes = [8, 8, 32], strides = [1, 1, 1]} : vector<8x10x32xbf16> to vector<8x8x32xbf16>
    %25 = vector.extract_strided_slice %23 {offsets = [0, 1, 0], sizes = [8, 8, 32], strides = [1, 1, 1]} : vector<8x10x32xbf16> to vector<8x8x32xbf16>
    %26 = vector.extract_strided_slice %23 {offsets = [0, 2, 0], sizes = [8, 8, 32], strides = [1, 1, 1]} : vector<8x10x32xbf16> to vector<8x8x32xbf16>
    %27 = tpu.concatenate %24, %25, %26 in 2 : vector<8x8x32xbf16>, vector<8x8x32xbf16>, vector<8x8x32xbf16> -> vector<8x8x96xbf16>
    %28 = vector.shape_cast %27 : vector<8x8x96xbf16> to vector<64x96xbf16>
    %c2 = arith.constant 2 : index
    %c0_10 = arith.constant 0 : index
    %c0_11 = arith.constant 0 : index
    %29 = vector.load %arg3[%c2, %c0_10, %c0_11] : memref<3x96x32xbf16, #tpu.memory_space<vmem>>, vector<1x96x32xbf16>
    %30 = vector.shape_cast %29 : vector<1x96x32xbf16> to vector<96x32xbf16>
    %cst_12 = arith.constant dense<0.000000e+00> : vector<64x32xf32>
    %31 = tpu.matmul %28, %30, %cst_12 {dimension_numbers = #tpu.dot_dimension_numbers<[1], [0], [0], [1], [0, 0, 1, 1], [], []>} : vector<64x96xbf16>, vector<96x32xbf16>, vector<64x32xf32> -> vector<64x32xf32>
    %32 = arith.addf %22, %31 : vector<64x32xf32>
    %c0_13 = arith.constant 0 : index
    %c0_14 = arith.constant 0 : index
    %33 = vector.load %arg4[%c0_13, %c0_14] : memref<1x32xf32, #tpu.memory_space<vmem>>, vector<1x32xf32>
    %34 = vector.broadcast %33 : vector<1x32xf32> to vector<64x32xf32>
    %35 = arith.addf %32, %34 : vector<64x32xf32>
    %36 = vector.shape_cast %35 : vector<64x32xf32> to vector<8x8x32xf32>
    %cst_15 = arith.constant 0.000000e+00 : f32
    %37 = vector.broadcast %cst_15 : f32 to vector<8x8x32xf32>
    %38 = arith.maximumf %36, %37 : vector<8x8x32xf32>
    %39 = arith.truncf %38 : vector<8x8x32xf32> to vector<8x8x32xbf16>
    %c0_16 = arith.constant 0 : index
    %c0_17 = arith.constant 0 : index
    %c0_18 = arith.constant 0 : index
    %c0_19 = arith.constant 0 : index
    %40 = vector.load %arg5[%c0_16, %c0_17, %c0_18, %c0_19] : memref<1x8x8x32xbf16, #tpu.memory_space<vmem>>, vector<1x8x8x32xbf16>
    %41 = vector.shape_cast %40 : vector<1x8x8x32xbf16> to vector<8x8x32xbf16>
    %42 = vector.shape_cast %39 : vector<8x8x32xbf16> to vector<1x8x8x32xbf16>
    tpu.vector_store %arg5[%c0_16, %c0_17, %c0_18, %c0_19], %42 {strides = array<i32>} : memref<1x8x8x32xbf16, #tpu.memory_space<vmem>>, vector<1x8x8x32xbf16>,
    return
  }
  func.func @transform_0(%arg0: i32, %arg1: i32) -> (i32, i32, i32, i32) {
    %c0_i32 = arith.constant 0 : i32
    %c0_i32_0 = arith.constant 0 : i32
    %c0_i32_1 = arith.constant 0 : i32
    %c0_i32_2 = arith.constant 0 : i32
    return %arg0, %c0_i32, %c0_i32_0, %c0_i32_1 : i32, i32, i32, i32
  }
  func.func @transform_1(%arg0: i32, %arg1: i32) -> (i32, i32, i32) {
    %c0_i32 = arith.constant 0 : i32
    %c0_i32_0 = arith.constant 0 : i32
    %c0_i32_1 = arith.constant 0 : i32
    %c0_i32_2 = arith.constant 0 : i32
    return %c0_i32, %c0_i32_0, %c0_i32_1 : i32, i32, i32
  }
  func.func @transform_2(%arg0: i32, %arg1: i32) -> (i32, i32) {
    %c0_i32 = arith.constant 0 : i32
    %c0_i32_0 = arith.constant 0 : i32
    %c0_i32_1 = arith.constant 0 : i32
    return %c0_i32, %c0_i32_0 : i32, i32
  }
  func.func @transform_3(%arg0: i32, %arg1: i32) -> (i32, i32, i32, i32) {
    %c0_i32 = arith.constant 0 : i32
    %c0_i32_0 = arith.constant 0 : i32
    %c0_i32_1 = arith.constant 0 : i32
    return %arg0, %arg1, %c0_i32, %c0_i32_0 : i32, i32, i32, i32
  }
}

module attributes {stable_mosaic.version = 11 : i64} {
  func.func @_gemm_kernel(%arg0: i32, %arg1: memref<32x288xbf16, #tpu.memory_space<vmem>>, %arg2: memref<288x64xbf16, #tpu.memory_space<vmem>>, %arg3: memref<1x64xf32, #tpu.memory_space<vmem>>, %arg4: memref<32x64xbf16, #tpu.memory_space<vmem>>) attributes {dimension_semantics = [#tpu.dimension_semantics<parallel>], iteration_bounds = array<i64: 1>, scalar_prefetch = 0 : i64, scratch_operands = 0 : i64, tpu.core_type = #tpu.core_type<tc>, window_params = [{transform_indices = @transform_0, window_bounds = array<i64: 32, 288>}, {pipeline_mode = #tpu.pipeline_mode<synchronous>, transform_indices = @transform_1, window_bounds = array<i64: 288, 64>}, {pipeline_mode = #tpu.pipeline_mode<synchronous>, transform_indices = @transform_2, window_bounds = array<i64: 1, 64>}, {transform_indices = @transform_3, window_bounds = array<i64: 32, 64>}]} {
    %c0 = arith.constant 0 : index
    %c0_0 = arith.constant 0 : index
    %0 = vector.load %arg1[%c0, %c0_0] : memref<32x288xbf16, #tpu.memory_space<vmem>>, vector<32x288xbf16>
    %c0_1 = arith.constant 0 : index
    %c0_2 = arith.constant 0 : index
    %1 = vector.load %arg2[%c0_1, %c0_2] : memref<288x64xbf16, #tpu.memory_space<vmem>>, vector<288x64xbf16>
    %cst = arith.constant dense<0.000000e+00> : vector<32x64xf32>
    %2 = tpu.matmul %0, %1, %cst {dimension_numbers = #tpu.dot_dimension_numbers<[1], [0], [0], [1], [0, 0, 1, 1], [], []>} : vector<32x288xbf16>, vector<288x64xbf16>, vector<32x64xf32> -> vector<32x64xf32>
    %c0_3 = arith.constant 0 : index
    %c0_4 = arith.constant 0 : index
    %3 = vector.load %arg3[%c0_3, %c0_4] : memref<1x64xf32, #tpu.memory_space<vmem>>, vector<1x64xf32>
    %4 = vector.broadcast %3 : vector<1x64xf32> to vector<32x64xf32>
    %5 = arith.addf %2, %4 : vector<32x64xf32>
    %cst_5 = arith.constant 0.000000e+00 : f32
    %6 = vector.broadcast %cst_5 : f32 to vector<32x64xf32>
    %7 = arith.maximumf %5, %6 : vector<32x64xf32>
    %8 = arith.truncf %7 : vector<32x64xf32> to vector<32x64xbf16>
    %c0_6 = arith.constant 0 : index
    %c0_7 = arith.constant 0 : index
    %9 = vector.load %arg4[%c0_6, %c0_7] : memref<32x64xbf16, #tpu.memory_space<vmem>>, vector<32x64xbf16>
    tpu.vector_store %arg4[%c0_6, %c0_7], %8 {strides = array<i32>} : memref<32x64xbf16, #tpu.memory_space<vmem>>, vector<32x64xbf16>,
    return
  }
  func.func @transform_0(%arg0: i32) -> (i32, i32) {
    %c0_i32 = arith.constant 0 : i32
    %c0_i32_0 = arith.constant 0 : i32
    return %arg0, %c0_i32 : i32, i32
  }
  func.func @transform_1(%arg0: i32) -> (i32, i32) {
    %c0_i32 = arith.constant 0 : i32
    %c0_i32_0 = arith.constant 0 : i32
    %c0_i32_1 = arith.constant 0 : i32
    return %c0_i32, %c0_i32_0 : i32, i32
  }
  func.func @transform_2(%arg0: i32) -> (i32, i32) {
    %c0_i32 = arith.constant 0 : i32
    %c0_i32_0 = arith.constant 0 : i32
    %c0_i32_1 = arith.constant 0 : i32
    return %c0_i32, %c0_i32_0 : i32, i32
  }
  func.func @transform_3(%arg0: i32) -> (i32, i32) {
    %c0_i32 = arith.constant 0 : i32
    %c0_i32_0 = arith.constant 0 : i32
    return %arg0, %c0_i32 : i32, i32
  }
}

module attributes {stable_mosaic.version = 11 : i64} {
  func.func @_conv3x3_band_kernel(%arg0: i32, %arg1: i32, %arg2: memref<1x6x6x64xbf16, #tpu.memory_space<vmem>>, %arg3: memref<3x192x64xbf16, #tpu.memory_space<vmem>>, %arg4: memref<1x64xf32, #tpu.memory_space<vmem>>, %arg5: memref<1x4x4x64xbf16, #tpu.memory_space<vmem>>) attributes {dimension_semantics = [#tpu.dimension_semantics<parallel>, #tpu.dimension_semantics<parallel>], iteration_bounds = array<i64: 2, 1>, scalar_prefetch = 0 : i64, scratch_operands = 0 : i64, tpu.core_type = #tpu.core_type<tc>, window_params = [{transform_indices = @transform_0, window_bounds = array<i64: 1, 6, 6, 64>}, {pipeline_mode = #tpu.pipeline_mode<synchronous>, transform_indices = @transform_1, window_bounds = array<i64: 3, 192, 64>}, {pipeline_mode = #tpu.pipeline_mode<synchronous>, transform_indices = @transform_2, window_bounds = array<i64: 1, 64>}, {transform_indices = @transform_3, window_bounds = array<i64: 1, 4, 4, 64>}]} {
    %c0 = arith.constant 0 : index
    %c0_0 = arith.constant 0 : index
    %c0_1 = arith.constant 0 : index
    %c0_2 = arith.constant 0 : index
    %0 = vector.load %arg2[%c0, %c0_0, %c0_1, %c0_2] : memref<1x6x6x64xbf16, #tpu.memory_space<vmem>>, vector<1x6x6x64xbf16>
    %1 = vector.shape_cast %0 : vector<1x6x6x64xbf16> to vector<6x6x64xbf16>
    %cst = arith.constant 0.000000e+00 : f32
    %2 = vector.broadcast %cst : f32 to vector<16x64xf32>
    %3 = vector.extract_strided_slice %1 {offsets = [0, 0, 0], sizes = [4, 6, 64], strides = [1, 1, 1]} : vector<6x6x64xbf16> to vector<4x6x64xbf16>
    %4 = vector.extract_strided_slice %3 {offsets = [0, 0, 0], sizes = [4, 4, 64], strides = [1, 1, 1]} : vector<4x6x64xbf16> to vector<4x4x64xbf16>
    %5 = vector.extract_strided_slice %3 {offsets = [0, 1, 0], sizes = [4, 4, 64], strides = [1, 1, 1]} : vector<4x6x64xbf16> to vector<4x4x64xbf16>
    %6 = vector.extract_strided_slice %3 {offsets = [0, 2, 0], sizes = [4, 4, 64], strides = [1, 1, 1]} : vector<4x6x64xbf16> to vector<4x4x64xbf16>
    %7 = tpu.concatenate %4, %5, %6 in 2 : vector<4x4x64xbf16>, vector<4x4x64xbf16>, vector<4x4x64xbf16> -> vector<4x4x192xbf16>
    %8 = vector.shape_cast %7 : vector<4x4x192xbf16> to vector<16x192xbf16>
    %c0_3 = arith.constant 0 : index
    %c0_4 = arith.constant 0 : index
    %c0_5 = arith.constant 0 : index
    %9 = vector.load %arg3[%c0_3, %c0_4, %c0_5] : memref<3x192x64xbf16, #tpu.memory_space<vmem>>, vector<1x192x64xbf16>
    %10 = vector.shape_cast %9 : vector<1x192x64xbf16> to vector<192x64xbf16>
    %cst_6 = arith.constant dense<0.000000e+00> : vector<16x64xf32>
    %11 = tpu.matmul %8, %10, %cst_6 {dimension_numbers = #tpu.dot_dimension_numbers<[1], [0], [0], [1], [0, 0, 1, 1], [], []>} : vector<16x192xbf16>, vector<192x64xbf16>, vector<16x64xf32> -> vector<16x64xf32>
    %12 = arith.addf %2, %11 : vector<16x64xf32>
    %13 = vector.extract_strided_slice %1 {offsets = [1, 0, 0], sizes = [4, 6, 64], strides = [1, 1, 1]} : vector<6x6x64xbf16> to vector<4x6x64xbf16>
    %14 = vector.extract_strided_slice %13 {offsets = [0, 0, 0], sizes = [4, 4, 64], strides = [1, 1, 1]} : vector<4x6x64xbf16> to vector<4x4x64xbf16>
    %15 = vector.extract_strided_slice %13 {offsets = [0, 1, 0], sizes = [4, 4, 64], strides = [1, 1, 1]} : vector<4x6x64xbf16> to vector<4x4x64xbf16>
    %16 = vector.extract_strided_slice %13 {offsets = [0, 2, 0], sizes = [4, 4, 64], strides = [1, 1, 1]} : vector<4x6x64xbf16> to vector<4x4x64xbf16>
    %17 = tpu.concatenate %14, %15, %16 in 2 : vector<4x4x64xbf16>, vector<4x4x64xbf16>, vector<4x4x64xbf16> -> vector<4x4x192xbf16>
    %18 = vector.shape_cast %17 : vector<4x4x192xbf16> to vector<16x192xbf16>
    %c1 = arith.constant 1 : index
    %c0_7 = arith.constant 0 : index
    %c0_8 = arith.constant 0 : index
    %19 = vector.load %arg3[%c1, %c0_7, %c0_8] : memref<3x192x64xbf16, #tpu.memory_space<vmem>>, vector<1x192x64xbf16>
    %20 = vector.shape_cast %19 : vector<1x192x64xbf16> to vector<192x64xbf16>
    %cst_9 = arith.constant dense<0.000000e+00> : vector<16x64xf32>
    %21 = tpu.matmul %18, %20, %cst_9 {dimension_numbers = #tpu.dot_dimension_numbers<[1], [0], [0], [1], [0, 0, 1, 1], [], []>} : vector<16x192xbf16>, vector<192x64xbf16>, vector<16x64xf32> -> vector<16x64xf32>
    %22 = arith.addf %12, %21 : vector<16x64xf32>
    %23 = vector.extract_strided_slice %1 {offsets = [2, 0, 0], sizes = [4, 6, 64], strides = [1, 1, 1]} : vector<6x6x64xbf16> to vector<4x6x64xbf16>
    %24 = vector.extract_strided_slice %23 {offsets = [0, 0, 0], sizes = [4, 4, 64], strides = [1, 1, 1]} : vector<4x6x64xbf16> to vector<4x4x64xbf16>
    %25 = vector.extract_strided_slice %23 {offsets = [0, 1, 0], sizes = [4, 4, 64], strides = [1, 1, 1]} : vector<4x6x64xbf16> to vector<4x4x64xbf16>
    %26 = vector.extract_strided_slice %23 {offsets = [0, 2, 0], sizes = [4, 4, 64], strides = [1, 1, 1]} : vector<4x6x64xbf16> to vector<4x4x64xbf16>
    %27 = tpu.concatenate %24, %25, %26 in 2 : vector<4x4x64xbf16>, vector<4x4x64xbf16>, vector<4x4x64xbf16> -> vector<4x4x192xbf16>
    %28 = vector.shape_cast %27 : vector<4x4x192xbf16> to vector<16x192xbf16>
    %c2 = arith.constant 2 : index
    %c0_10 = arith.constant 0 : index
    %c0_11 = arith.constant 0 : index
    %29 = vector.load %arg3[%c2, %c0_10, %c0_11] : memref<3x192x64xbf16, #tpu.memory_space<vmem>>, vector<1x192x64xbf16>
    %30 = vector.shape_cast %29 : vector<1x192x64xbf16> to vector<192x64xbf16>
    %cst_12 = arith.constant dense<0.000000e+00> : vector<16x64xf32>
    %31 = tpu.matmul %28, %30, %cst_12 {dimension_numbers = #tpu.dot_dimension_numbers<[1], [0], [0], [1], [0, 0, 1, 1], [], []>} : vector<16x192xbf16>, vector<192x64xbf16>, vector<16x64xf32> -> vector<16x64xf32>
    %32 = arith.addf %22, %31 : vector<16x64xf32>
    %c0_13 = arith.constant 0 : index
    %c0_14 = arith.constant 0 : index
    %33 = vector.load %arg4[%c0_13, %c0_14] : memref<1x64xf32, #tpu.memory_space<vmem>>, vector<1x64xf32>
    %34 = vector.broadcast %33 : vector<1x64xf32> to vector<16x64xf32>
    %35 = arith.addf %32, %34 : vector<16x64xf32>
    %36 = vector.shape_cast %35 : vector<16x64xf32> to vector<4x4x64xf32>
    %37 = arith.truncf %36 : vector<4x4x64xf32> to vector<4x4x64xbf16>
    %c0_15 = arith.constant 0 : index
    %c0_16 = arith.constant 0 : index
    %c0_17 = arith.constant 0 : index
    %c0_18 = arith.constant 0 : index
    %38 = vector.load %arg5[%c0_15, %c0_16, %c0_17, %c0_18] : memref<1x4x4x64xbf16, #tpu.memory_space<vmem>>, vector<1x4x4x64xbf16>
    %39 = vector.shape_cast %38 : vector<1x4x4x64xbf16> to vector<4x4x64xbf16>
    %40 = vector.shape_cast %37 : vector<4x4x64xbf16> to vector<1x4x4x64xbf16>
    tpu.vector_store %arg5[%c0_15, %c0_16, %c0_17, %c0_18], %40 {strides = array<i32>} : memref<1x4x4x64xbf16, #tpu.memory_space<vmem>>, vector<1x4x4x64xbf16>,
    return
  }
  func.func @transform_0(%arg0: i32, %arg1: i32) -> (i32, i32, i32, i32) {
    %c0_i32 = arith.constant 0 : i32
    %c0_i32_0 = arith.constant 0 : i32
    %c0_i32_1 = arith.constant 0 : i32
    %c0_i32_2 = arith.constant 0 : i32
    return %arg0, %c0_i32, %c0_i32_0, %c0_i32_1 : i32, i32, i32, i32
  }
  func.func @transform_1(%arg0: i32, %arg1: i32) -> (i32, i32, i32) {
    %c0_i32 = arith.constant 0 : i32
    %c0_i32_0 = arith.constant 0 : i32
    %c0_i32_1 = arith.constant 0 : i32
    %c0_i32_2 = arith.constant 0 : i32
    return %c0_i32, %c0_i32_0, %c0_i32_1 : i32, i32, i32
  }
  func.func @transform_2(%arg0: i32, %arg1: i32) -> (i32, i32) {
    %c0_i32 = arith.constant 0 : i32
    %c0_i32_0 = arith.constant 0 : i32
    %c0_i32_1 = arith.constant 0 : i32
    return %c0_i32, %c0_i32_0 : i32, i32
  }
  func.func @transform_3(%arg0: i32, %arg1: i32) -> (i32, i32, i32, i32) {
    %c0_i32 = arith.constant 0 : i32
    %c0_i32_0 = arith.constant 0 : i32
    %c0_i32_1 = arith.constant 0 : i32
    return %arg0, %arg1, %c0_i32, %c0_i32_0 : i32, i32, i32, i32
  }
}

module attributes {stable_mosaic.version = 11 : i64} {
  func.func @_conv3x3_band_kernel(%arg0: i32, %arg1: i32, %arg2: memref<1x6x6x64xbf16, #tpu.memory_space<vmem>>, %arg3: memref<1x4x4x64xbf16, #tpu.memory_space<vmem>>, %arg4: memref<3x192x64xbf16, #tpu.memory_space<vmem>>, %arg5: memref<1x64xf32, #tpu.memory_space<vmem>>, %arg6: memref<1x4x4x64xbf16, #tpu.memory_space<vmem>>) attributes {dimension_semantics = [#tpu.dimension_semantics<parallel>, #tpu.dimension_semantics<parallel>], iteration_bounds = array<i64: 2, 1>, scalar_prefetch = 0 : i64, scratch_operands = 0 : i64, tpu.core_type = #tpu.core_type<tc>, window_params = [{transform_indices = @transform_0, window_bounds = array<i64: 1, 6, 6, 64>}, {transform_indices = @transform_1, window_bounds = array<i64: 1, 4, 4, 64>}, {pipeline_mode = #tpu.pipeline_mode<synchronous>, transform_indices = @transform_2, window_bounds = array<i64: 3, 192, 64>}, {pipeline_mode = #tpu.pipeline_mode<synchronous>, transform_indices = @transform_3, window_bounds = array<i64: 1, 64>}, {transform_indices = @transform_4, window_bounds = array<i64: 1, 4, 4, 64>}]} {
    %c0 = arith.constant 0 : index
    %c0_0 = arith.constant 0 : index
    %c0_1 = arith.constant 0 : index
    %c0_2 = arith.constant 0 : index
    %0 = vector.load %arg2[%c0, %c0_0, %c0_1, %c0_2] : memref<1x6x6x64xbf16, #tpu.memory_space<vmem>>, vector<1x6x6x64xbf16>
    %1 = vector.shape_cast %0 : vector<1x6x6x64xbf16> to vector<6x6x64xbf16>
    %cst = arith.constant 0.000000e+00 : f32
    %2 = vector.broadcast %cst : f32 to vector<16x64xf32>
    %3 = vector.extract_strided_slice %1 {offsets = [0, 0, 0], sizes = [4, 6, 64], strides = [1, 1, 1]} : vector<6x6x64xbf16> to vector<4x6x64xbf16>
    %4 = vector.extract_strided_slice %3 {offsets = [0, 0, 0], sizes = [4, 4, 64], strides = [1, 1, 1]} : vector<4x6x64xbf16> to vector<4x4x64xbf16>
    %5 = vector.extract_strided_slice %3 {offsets = [0, 1, 0], sizes = [4, 4, 64], strides = [1, 1, 1]} : vector<4x6x64xbf16> to vector<4x4x64xbf16>
    %6 = vector.extract_strided_slice %3 {offsets = [0, 2, 0], sizes = [4, 4, 64], strides = [1, 1, 1]} : vector<4x6x64xbf16> to vector<4x4x64xbf16>
    %7 = tpu.concatenate %4, %5, %6 in 2 : vector<4x4x64xbf16>, vector<4x4x64xbf16>, vector<4x4x64xbf16> -> vector<4x4x192xbf16>
    %8 = vector.shape_cast %7 : vector<4x4x192xbf16> to vector<16x192xbf16>
    %c0_3 = arith.constant 0 : index
    %c0_4 = arith.constant 0 : index
    %c0_5 = arith.constant 0 : index
    %9 = vector.load %arg4[%c0_3, %c0_4, %c0_5] : memref<3x192x64xbf16, #tpu.memory_space<vmem>>, vector<1x192x64xbf16>
    %10 = vector.shape_cast %9 : vector<1x192x64xbf16> to vector<192x64xbf16>
    %cst_6 = arith.constant dense<0.000000e+00> : vector<16x64xf32>
    %11 = tpu.matmul %8, %10, %cst_6 {dimension_numbers = #tpu.dot_dimension_numbers<[1], [0], [0], [1], [0, 0, 1, 1], [], []>} : vector<16x192xbf16>, vector<192x64xbf16>, vector<16x64xf32> -> vector<16x64xf32>
    %12 = arith.addf %2, %11 : vector<16x64xf32>
    %13 = vector.extract_strided_slice %1 {offsets = [1, 0, 0], sizes = [4, 6, 64], strides = [1, 1, 1]} : vector<6x6x64xbf16> to vector<4x6x64xbf16>
    %14 = vector.extract_strided_slice %13 {offsets = [0, 0, 0], sizes = [4, 4, 64], strides = [1, 1, 1]} : vector<4x6x64xbf16> to vector<4x4x64xbf16>
    %15 = vector.extract_strided_slice %13 {offsets = [0, 1, 0], sizes = [4, 4, 64], strides = [1, 1, 1]} : vector<4x6x64xbf16> to vector<4x4x64xbf16>
    %16 = vector.extract_strided_slice %13 {offsets = [0, 2, 0], sizes = [4, 4, 64], strides = [1, 1, 1]} : vector<4x6x64xbf16> to vector<4x4x64xbf16>
    %17 = tpu.concatenate %14, %15, %16 in 2 : vector<4x4x64xbf16>, vector<4x4x64xbf16>, vector<4x4x64xbf16> -> vector<4x4x192xbf16>
    %18 = vector.shape_cast %17 : vector<4x4x192xbf16> to vector<16x192xbf16>
    %c1 = arith.constant 1 : index
    %c0_7 = arith.constant 0 : index
    %c0_8 = arith.constant 0 : index
    %19 = vector.load %arg4[%c1, %c0_7, %c0_8] : memref<3x192x64xbf16, #tpu.memory_space<vmem>>, vector<1x192x64xbf16>
    %20 = vector.shape_cast %19 : vector<1x192x64xbf16> to vector<192x64xbf16>
    %cst_9 = arith.constant dense<0.000000e+00> : vector<16x64xf32>
    %21 = tpu.matmul %18, %20, %cst_9 {dimension_numbers = #tpu.dot_dimension_numbers<[1], [0], [0], [1], [0, 0, 1, 1], [], []>} : vector<16x192xbf16>, vector<192x64xbf16>, vector<16x64xf32> -> vector<16x64xf32>
    %22 = arith.addf %12, %21 : vector<16x64xf32>
    %23 = vector.extract_strided_slice %1 {offsets = [2, 0, 0], sizes = [4, 6, 64], strides = [1, 1, 1]} : vector<6x6x64xbf16> to vector<4x6x64xbf16>
    %24 = vector.extract_strided_slice %23 {offsets = [0, 0, 0], sizes = [4, 4, 64], strides = [1, 1, 1]} : vector<4x6x64xbf16> to vector<4x4x64xbf16>
    %25 = vector.extract_strided_slice %23 {offsets = [0, 1, 0], sizes = [4, 4, 64], strides = [1, 1, 1]} : vector<4x6x64xbf16> to vector<4x4x64xbf16>
    %26 = vector.extract_strided_slice %23 {offsets = [0, 2, 0], sizes = [4, 4, 64], strides = [1, 1, 1]} : vector<4x6x64xbf16> to vector<4x4x64xbf16>
    %27 = tpu.concatenate %24, %25, %26 in 2 : vector<4x4x64xbf16>, vector<4x4x64xbf16>, vector<4x4x64xbf16> -> vector<4x4x192xbf16>
    %28 = vector.shape_cast %27 : vector<4x4x192xbf16> to vector<16x192xbf16>
    %c2 = arith.constant 2 : index
    %c0_10 = arith.constant 0 : index
    %c0_11 = arith.constant 0 : index
    %29 = vector.load %arg4[%c2, %c0_10, %c0_11] : memref<3x192x64xbf16, #tpu.memory_space<vmem>>, vector<1x192x64xbf16>
    %30 = vector.shape_cast %29 : vector<1x192x64xbf16> to vector<192x64xbf16>
    %cst_12 = arith.constant dense<0.000000e+00> : vector<16x64xf32>
    %31 = tpu.matmul %28, %30, %cst_12 {dimension_numbers = #tpu.dot_dimension_numbers<[1], [0], [0], [1], [0, 0, 1, 1], [], []>} : vector<16x192xbf16>, vector<192x64xbf16>, vector<16x64xf32> -> vector<16x64xf32>
    %32 = arith.addf %22, %31 : vector<16x64xf32>
    %c0_13 = arith.constant 0 : index
    %c0_14 = arith.constant 0 : index
    %33 = vector.load %arg5[%c0_13, %c0_14] : memref<1x64xf32, #tpu.memory_space<vmem>>, vector<1x64xf32>
    %34 = vector.broadcast %33 : vector<1x64xf32> to vector<16x64xf32>
    %35 = arith.addf %32, %34 : vector<16x64xf32>
    %36 = vector.shape_cast %35 : vector<16x64xf32> to vector<4x4x64xf32>
    %c0_15 = arith.constant 0 : index
    %c0_16 = arith.constant 0 : index
    %c0_17 = arith.constant 0 : index
    %c0_18 = arith.constant 0 : index
    %37 = vector.load %arg3[%c0_15, %c0_16, %c0_17, %c0_18] : memref<1x4x4x64xbf16, #tpu.memory_space<vmem>>, vector<1x4x4x64xbf16>
    %38 = vector.shape_cast %37 : vector<1x4x4x64xbf16> to vector<4x4x64xbf16>
    %39 = arith.extf %38 : vector<4x4x64xbf16> to vector<4x4x64xf32>
    %40 = arith.addf %36, %39 : vector<4x4x64xf32>
    %41 = arith.truncf %40 : vector<4x4x64xf32> to vector<4x4x64xbf16>
    %c0_19 = arith.constant 0 : index
    %c0_20 = arith.constant 0 : index
    %c0_21 = arith.constant 0 : index
    %c0_22 = arith.constant 0 : index
    %42 = vector.load %arg6[%c0_19, %c0_20, %c0_21, %c0_22] : memref<1x4x4x64xbf16, #tpu.memory_space<vmem>>, vector<1x4x4x64xbf16>
    %43 = vector.shape_cast %42 : vector<1x4x4x64xbf16> to vector<4x4x64xbf16>
    %44 = vector.shape_cast %41 : vector<4x4x64xbf16> to vector<1x4x4x64xbf16>
    tpu.vector_store %arg6[%c0_19, %c0_20, %c0_21, %c0_22], %44 {strides = array<i32>} : memref<1x4x4x64xbf16, #tpu.memory_space<vmem>>, vector<1x4x4x64xbf16>,
    return
  }
  func.func @transform_0(%arg0: i32, %arg1: i32) -> (i32, i32, i32, i32) {
    %c0_i32 = arith.constant 0 : i32
    %c0_i32_0 = arith.constant 0 : i32
    %c0_i32_1 = arith.constant 0 : i32
    %c0_i32_2 = arith.constant 0 : i32
    return %arg0, %c0_i32, %c0_i32_0, %c0_i32_1 : i32, i32, i32, i32
  }
  func.func @transform_1(%arg0: i32, %arg1: i32) -> (i32, i32, i32, i32) {
    %c0_i32 = arith.constant 0 : i32
    %c0_i32_0 = arith.constant 0 : i32
    %c0_i32_1 = arith.constant 0 : i32
    return %arg0, %arg1, %c0_i32, %c0_i32_0 : i32, i32, i32, i32
  }
  func.func @transform_2(%arg0: i32, %arg1: i32) -> (i32, i32, i32) {
    %c0_i32 = arith.constant 0 : i32
    %c0_i32_0 = arith.constant 0 : i32
    %c0_i32_1 = arith.constant 0 : i32
    %c0_i32_2 = arith.constant 0 : i32
    return %c0_i32, %c0_i32_0, %c0_i32_1 : i32, i32, i32
  }
  func.func @transform_3(%arg0: i32, %arg1: i32) -> (i32, i32) {
    %c0_i32 = arith.constant 0 : i32
    %c0_i32_0 = arith.constant 0 : i32
    %c0_i32_1 = arith.constant 0 : i32
    return %c0_i32, %c0_i32_0 : i32, i32
  }
  func.func @transform_4(%arg0: i32, %arg1: i32) -> (i32, i32, i32, i32) {
    %c0_i32 = arith.constant 0 : i32
    %c0_i32_0 = arith.constant 0 : i32
    %c0_i32_1 = arith.constant 0 : i32
    return %arg0, %arg1, %c0_i32, %c0_i32_0 : i32, i32, i32, i32
  }
}

module attributes {stable_mosaic.version = 11 : i64} {
  func.func @_imdb_chain_kernel(%arg0: i32, %arg1: i32, %arg2: memref<1x12x12x64xbf16, #tpu.memory_space<vmem>>, %arg3: memref<3x192x64xbf16, #tpu.memory_space<vmem>>, %arg4: memref<1x64xf32, #tpu.memory_space<vmem>>, %arg5: memref<3x144x64xbf16, #tpu.memory_space<vmem>>, %arg6: memref<1x64xf32, #tpu.memory_space<vmem>>, %arg7: memref<3x144x64xbf16, #tpu.memory_space<vmem>>, %arg8: memref<1x64xf32, #tpu.memory_space<vmem>>, %arg9: memref<3x144x16xbf16, #tpu.memory_space<vmem>>, %arg10: memref<1x16xf32, #tpu.memory_space<vmem>>, %arg11: memref<1x4x4x64xbf16, #tpu.memory_space<vmem>>) attributes {dimension_semantics = [#tpu.dimension_semantics<parallel>, #tpu.dimension_semantics<parallel>], iteration_bounds = array<i64: 2, 1>, scalar_prefetch = 0 : i64, scratch_operands = 0 : i64, tpu.core_type = #tpu.core_type<tc>, window_params = [{transform_indices = @transform_0, window_bounds = array<i64: 1, 12, 12, 64>}, {pipeline_mode = #tpu.pipeline_mode<synchronous>, transform_indices = @transform_1, window_bounds = array<i64: 3, 192, 64>}, {pipeline_mode = #tpu.pipeline_mode<synchronous>, transform_indices = @transform_2, window_bounds = array<i64: 1, 64>}, {pipeline_mode = #tpu.pipeline_mode<synchronous>, transform_indices = @transform_3, window_bounds = array<i64: 3, 144, 64>}, {pipeline_mode = #tpu.pipeline_mode<synchronous>, transform_indices = @transform_4, window_bounds = array<i64: 1, 64>}, {pipeline_mode = #tpu.pipeline_mode<synchronous>, transform_indices = @transform_5, window_bounds = array<i64: 3, 144, 64>}, {pipeline_mode = #tpu.pipeline_mode<synchronous>, transform_indices = @transform_6, window_bounds = array<i64: 1, 64>}, {pipeline_mode = #tpu.pipeline_mode<synchronous>, transform_indices = @transform_7, window_bounds = array<i64: 3, 144, 16>}, {pipeline_mode = #tpu.pipeline_mode<synchronous>, transform_indices = @transform_8, window_bounds = array<i64: 1, 16>}, {transform_indices = @transform_9, window_bounds = array<i64: 1, 4, 4, 64>}]} {
    %c0 = arith.constant 0 : index
    %c0_0 = arith.constant 0 : index
    %c0_1 = arith.constant 0 : index
    %c0_2 = arith.constant 0 : index
    %0 = vector.load %arg2[%c0, %c0_0, %c0_1, %c0_2] : memref<1x12x12x64xbf16, #tpu.memory_space<vmem>>, vector<1x12x12x64xbf16>
    %1 = vector.shape_cast %0 : vector<1x12x12x64xbf16> to vector<12x12x64xbf16>
    %cst = arith.constant 0.000000e+00 : f32
    %2 = vector.broadcast %cst : f32 to vector<100x64xf32>
    %3 = vector.extract_strided_slice %1 {offsets = [0, 0, 0], sizes = [10, 12, 64], strides = [1, 1, 1]} : vector<12x12x64xbf16> to vector<10x12x64xbf16>
    %4 = vector.extract_strided_slice %3 {offsets = [0, 0, 0], sizes = [10, 10, 64], strides = [1, 1, 1]} : vector<10x12x64xbf16> to vector<10x10x64xbf16>
    %5 = vector.extract_strided_slice %3 {offsets = [0, 1, 0], sizes = [10, 10, 64], strides = [1, 1, 1]} : vector<10x12x64xbf16> to vector<10x10x64xbf16>
    %6 = vector.extract_strided_slice %3 {offsets = [0, 2, 0], sizes = [10, 10, 64], strides = [1, 1, 1]} : vector<10x12x64xbf16> to vector<10x10x64xbf16>
    %7 = tpu.concatenate %4, %5, %6 in 2 : vector<10x10x64xbf16>, vector<10x10x64xbf16>, vector<10x10x64xbf16> -> vector<10x10x192xbf16>
    %8 = vector.shape_cast %7 : vector<10x10x192xbf16> to vector<100x192xbf16>
    %c0_3 = arith.constant 0 : index
    %c0_4 = arith.constant 0 : index
    %c0_5 = arith.constant 0 : index
    %9 = vector.load %arg3[%c0_3, %c0_4, %c0_5] : memref<3x192x64xbf16, #tpu.memory_space<vmem>>, vector<1x192x64xbf16>
    %10 = vector.shape_cast %9 : vector<1x192x64xbf16> to vector<192x64xbf16>
    %cst_6 = arith.constant dense<0.000000e+00> : vector<100x64xf32>
    %11 = tpu.matmul %8, %10, %cst_6 {dimension_numbers = #tpu.dot_dimension_numbers<[1], [0], [0], [1], [0, 0, 1, 1], [], []>} : vector<100x192xbf16>, vector<192x64xbf16>, vector<100x64xf32> -> vector<100x64xf32>
    %12 = arith.addf %2, %11 : vector<100x64xf32>
    %13 = vector.extract_strided_slice %1 {offsets = [1, 0, 0], sizes = [10, 12, 64], strides = [1, 1, 1]} : vector<12x12x64xbf16> to vector<10x12x64xbf16>
    %14 = vector.extract_strided_slice %13 {offsets = [0, 0, 0], sizes = [10, 10, 64], strides = [1, 1, 1]} : vector<10x12x64xbf16> to vector<10x10x64xbf16>
    %15 = vector.extract_strided_slice %13 {offsets = [0, 1, 0], sizes = [10, 10, 64], strides = [1, 1, 1]} : vector<10x12x64xbf16> to vector<10x10x64xbf16>
    %16 = vector.extract_strided_slice %13 {offsets = [0, 2, 0], sizes = [10, 10, 64], strides = [1, 1, 1]} : vector<10x12x64xbf16> to vector<10x10x64xbf16>
    %17 = tpu.concatenate %14, %15, %16 in 2 : vector<10x10x64xbf16>, vector<10x10x64xbf16>, vector<10x10x64xbf16> -> vector<10x10x192xbf16>
    %18 = vector.shape_cast %17 : vector<10x10x192xbf16> to vector<100x192xbf16>
    %c1 = arith.constant 1 : index
    %c0_7 = arith.constant 0 : index
    %c0_8 = arith.constant 0 : index
    %19 = vector.load %arg3[%c1, %c0_7, %c0_8] : memref<3x192x64xbf16, #tpu.memory_space<vmem>>, vector<1x192x64xbf16>
    %20 = vector.shape_cast %19 : vector<1x192x64xbf16> to vector<192x64xbf16>
    %cst_9 = arith.constant dense<0.000000e+00> : vector<100x64xf32>
    %21 = tpu.matmul %18, %20, %cst_9 {dimension_numbers = #tpu.dot_dimension_numbers<[1], [0], [0], [1], [0, 0, 1, 1], [], []>} : vector<100x192xbf16>, vector<192x64xbf16>, vector<100x64xf32> -> vector<100x64xf32>
    %22 = arith.addf %12, %21 : vector<100x64xf32>
    %23 = vector.extract_strided_slice %1 {offsets = [2, 0, 0], sizes = [10, 12, 64], strides = [1, 1, 1]} : vector<12x12x64xbf16> to vector<10x12x64xbf16>
    %24 = vector.extract_strided_slice %23 {offsets = [0, 0, 0], sizes = [10, 10, 64], strides = [1, 1, 1]} : vector<10x12x64xbf16> to vector<10x10x64xbf16>
    %25 = vector.extract_strided_slice %23 {offsets = [0, 1, 0], sizes = [10, 10, 64], strides = [1, 1, 1]} : vector<10x12x64xbf16> to vector<10x10x64xbf16>
    %26 = vector.extract_strided_slice %23 {offsets = [0, 2, 0], sizes = [10, 10, 64], strides = [1, 1, 1]} : vector<10x12x64xbf16> to vector<10x10x64xbf16>
    %27 = tpu.concatenate %24, %25, %26 in 2 : vector<10x10x64xbf16>, vector<10x10x64xbf16>, vector<10x10x64xbf16> -> vector<10x10x192xbf16>
    %28 = vector.shape_cast %27 : vector<10x10x192xbf16> to vector<100x192xbf16>
    %c2 = arith.constant 2 : index
    %c0_10 = arith.constant 0 : index
    %c0_11 = arith.constant 0 : index
    %29 = vector.load %arg3[%c2, %c0_10, %c0_11] : memref<3x192x64xbf16, #tpu.memory_space<vmem>>, vector<1x192x64xbf16>
    %30 = vector.shape_cast %29 : vector<1x192x64xbf16> to vector<192x64xbf16>
    %cst_12 = arith.constant dense<0.000000e+00> : vector<100x64xf32>
    %31 = tpu.matmul %28, %30, %cst_12 {dimension_numbers = #tpu.dot_dimension_numbers<[1], [0], [0], [1], [0, 0, 1, 1], [], []>} : vector<100x192xbf16>, vector<192x64xbf16>, vector<100x64xf32> -> vector<100x64xf32>
    %32 = arith.addf %22, %31 : vector<100x64xf32>
    %c0_13 = arith.constant 0 : index
    %c0_14 = arith.constant 0 : index
    %33 = vector.load %arg4[%c0_13, %c0_14] : memref<1x64xf32, #tpu.memory_space<vmem>>, vector<1x64xf32>
    %34 = vector.broadcast %33 : vector<1x64xf32> to vector<100x64xf32>
    %35 = arith.addf %32, %34 : vector<100x64xf32>
    %36 = vector.shape_cast %35 : vector<100x64xf32> to vector<10x10x64xf32>
    %cst_15 = arith.constant 0.000000e+00 : f32
    %37 = vector.broadcast %cst_15 : f32 to vector<10x10x64xf32>
    %38 = arith.maximumf %36, %37 : vector<10x10x64xf32>
    %39 = vector.extract_strided_slice %38 {offsets = [3, 3, 0], sizes = [4, 4, 16], strides = [1, 1, 1]} : vector<10x10x64xf32> to vector<4x4x16xf32>
    %40 = vector.extract_strided_slice %38 {offsets = [0, 0, 16], sizes = [10, 10, 48], strides = [1, 1, 1]} : vector<10x10x64xf32> to vector<10x10x48xf32>
    %41 = arith.truncf %40 : vector<10x10x48xf32> to vector<10x10x48xbf16>
    %cst_16 = arith.constant 0.000000e+00 : f32
    %42 = vector.broadcast %cst_16 : f32 to vector<64x64xf32>
    %43 = vector.extract_strided_slice %41 {offsets = [0, 0, 0], sizes = [8, 10, 48], strides = [1, 1, 1]} : vector<10x10x48xbf16> to vector<8x10x48xbf16>
    %44 = vector.extract_strided_slice %43 {offsets = [0, 0, 0], sizes = [8, 8, 48], strides = [1, 1, 1]} : vector<8x10x48xbf16> to vector<8x8x48xbf16>
    %45 = vector.extract_strided_slice %43 {offsets = [0, 1, 0], sizes = [8, 8, 48], strides = [1, 1, 1]} : vector<8x10x48xbf16> to vector<8x8x48xbf16>
    %46 = vector.extract_strided_slice %43 {offsets = [0, 2, 0], sizes = [8, 8, 48], strides = [1, 1, 1]} : vector<8x10x48xbf16> to vector<8x8x48xbf16>
    %47 = tpu.concatenate %44, %45, %46 in 2 : vector<8x8x48xbf16>, vector<8x8x48xbf16>, vector<8x8x48xbf16> -> vector<8x8x144xbf16>
    %48 = vector.shape_cast %47 : vector<8x8x144xbf16> to vector<64x144xbf16>
    %c0_17 = arith.constant 0 : index
    %c0_18 = arith.constant 0 : index
    %c0_19 = arith.constant 0 : index
    %49 = vector.load %arg5[%c0_17, %c0_18, %c0_19] : memref<3x144x64xbf16, #tpu.memory_space<vmem>>, vector<1x144x64xbf16>
    %50 = vector.shape_cast %49 : vector<1x144x64xbf16> to vector<144x64xbf16>
    %cst_20 = arith.constant dense<0.000000e+00> : vector<64x64xf32>
    %51 = tpu.matmul %48, %50, %cst_20 {dimension_numbers = #tpu.dot_dimension_numbers<[1], [0], [0], [1], [0, 0, 1, 1], [], []>} : vector<64x144xbf16>, vector<144x64xbf16>, vector<64x64xf32> -> vector<64x64xf32>
    %52 = arith.addf %42, %51 : vector<64x64xf32>
    %53 = vector.extract_strided_slice %41 {offsets = [1, 0, 0], sizes = [8, 10, 48], strides = [1, 1, 1]} : vector<10x10x48xbf16> to vector<8x10x48xbf16>
    %54 = vector.extract_strided_slice %53 {offsets = [0, 0, 0], sizes = [8, 8, 48], strides = [1, 1, 1]} : vector<8x10x48xbf16> to vector<8x8x48xbf16>
    %55 = vector.extract_strided_slice %53 {offsets = [0, 1, 0], sizes = [8, 8, 48], strides = [1, 1, 1]} : vector<8x10x48xbf16> to vector<8x8x48xbf16>
    %56 = vector.extract_strided_slice %53 {offsets = [0, 2, 0], sizes = [8, 8, 48], strides = [1, 1, 1]} : vector<8x10x48xbf16> to vector<8x8x48xbf16>
    %57 = tpu.concatenate %54, %55, %56 in 2 : vector<8x8x48xbf16>, vector<8x8x48xbf16>, vector<8x8x48xbf16> -> vector<8x8x144xbf16>
    %58 = vector.shape_cast %57 : vector<8x8x144xbf16> to vector<64x144xbf16>
    %c1_21 = arith.constant 1 : index
    %c0_22 = arith.constant 0 : index
    %c0_23 = arith.constant 0 : index
    %59 = vector.load %arg5[%c1_21, %c0_22, %c0_23] : memref<3x144x64xbf16, #tpu.memory_space<vmem>>, vector<1x144x64xbf16>
    %60 = vector.shape_cast %59 : vector<1x144x64xbf16> to vector<144x64xbf16>
    %cst_24 = arith.constant dense<0.000000e+00> : vector<64x64xf32>
    %61 = tpu.matmul %58, %60, %cst_24 {dimension_numbers = #tpu.dot_dimension_numbers<[1], [0], [0], [1], [0, 0, 1, 1], [], []>} : vector<64x144xbf16>, vector<144x64xbf16>, vector<64x64xf32> -> vector<64x64xf32>
    %62 = arith.addf %52, %61 : vector<64x64xf32>
    %63 = vector.extract_strided_slice %41 {offsets = [2, 0, 0], sizes = [8, 10, 48], strides = [1, 1, 1]} : vector<10x10x48xbf16> to vector<8x10x48xbf16>
    %64 = vector.extract_strided_slice %63 {offsets = [0, 0, 0], sizes = [8, 8, 48], strides = [1, 1, 1]} : vector<8x10x48xbf16> to vector<8x8x48xbf16>
    %65 = vector.extract_strided_slice %63 {offsets = [0, 1, 0], sizes = [8, 8, 48], strides = [1, 1, 1]} : vector<8x10x48xbf16> to vector<8x8x48xbf16>
    %66 = vector.extract_strided_slice %63 {offsets = [0, 2, 0], sizes = [8, 8, 48], strides = [1, 1, 1]} : vector<8x10x48xbf16> to vector<8x8x48xbf16>
    %67 = tpu.concatenate %64, %65, %66 in 2 : vector<8x8x48xbf16>, vector<8x8x48xbf16>, vector<8x8x48xbf16> -> vector<8x8x144xbf16>
    %68 = vector.shape_cast %67 : vector<8x8x144xbf16> to vector<64x144xbf16>
    %c2_25 = arith.constant 2 : index
    %c0_26 = arith.constant 0 : index
    %c0_27 = arith.constant 0 : index
    %69 = vector.load %arg5[%c2_25, %c0_26, %c0_27] : memref<3x144x64xbf16, #tpu.memory_space<vmem>>, vector<1x144x64xbf16>
    %70 = vector.shape_cast %69 : vector<1x144x64xbf16> to vector<144x64xbf16>
    %cst_28 = arith.constant dense<0.000000e+00> : vector<64x64xf32>
    %71 = tpu.matmul %68, %70, %cst_28 {dimension_numbers = #tpu.dot_dimension_numbers<[1], [0], [0], [1], [0, 0, 1, 1], [], []>} : vector<64x144xbf16>, vector<144x64xbf16>, vector<64x64xf32> -> vector<64x64xf32>
    %72 = arith.addf %62, %71 : vector<64x64xf32>
    %c0_29 = arith.constant 0 : index
    %c0_30 = arith.constant 0 : index
    %73 = vector.load %arg6[%c0_29, %c0_30] : memref<1x64xf32, #tpu.memory_space<vmem>>, vector<1x64xf32>
    %74 = vector.broadcast %73 : vector<1x64xf32> to vector<64x64xf32>
    %75 = arith.addf %72, %74 : vector<64x64xf32>
    %76 = vector.shape_cast %75 : vector<64x64xf32> to vector<8x8x64xf32>
    %cst_31 = arith.constant 0.000000e+00 : f32
    %77 = vector.broadcast %cst_31 : f32 to vector<8x8x64xf32>
    %78 = arith.maximumf %76, %77 : vector<8x8x64xf32>
    %79 = vector.extract_strided_slice %78 {offsets = [2, 2, 0], sizes = [4, 4, 16], strides = [1, 1, 1]} : vector<8x8x64xf32> to vector<4x4x16xf32>
    %80 = vector.extract_strided_slice %78 {offsets = [0, 0, 16], sizes = [8, 8, 48], strides = [1, 1, 1]} : vector<8x8x64xf32> to vector<8x8x48xf32>
    %81 = arith.truncf %80 : vector<8x8x48xf32> to vector<8x8x48xbf16>
    %cst_32 = arith.constant 0.000000e+00 : f32
    %82 = vector.broadcast %cst_32 : f32 to vector<36x64xf32>
    %83 = vector.extract_strided_slice %81 {offsets = [0, 0, 0], sizes = [6, 8, 48], strides = [1, 1, 1]} : vector<8x8x48xbf16> to vector<6x8x48xbf16>
    %84 = vector.extract_strided_slice %83 {offsets = [0, 0, 0], sizes = [6, 6, 48], strides = [1, 1, 1]} : vector<6x8x48xbf16> to vector<6x6x48xbf16>
    %85 = vector.extract_strided_slice %83 {offsets = [0, 1, 0], sizes = [6, 6, 48], strides = [1, 1, 1]} : vector<6x8x48xbf16> to vector<6x6x48xbf16>
    %86 = vector.extract_strided_slice %83 {offsets = [0, 2, 0], sizes = [6, 6, 48], strides = [1, 1, 1]} : vector<6x8x48xbf16> to vector<6x6x48xbf16>
    %87 = tpu.concatenate %84, %85, %86 in 2 : vector<6x6x48xbf16>, vector<6x6x48xbf16>, vector<6x6x48xbf16> -> vector<6x6x144xbf16>
    %88 = vector.shape_cast %87 : vector<6x6x144xbf16> to vector<36x144xbf16>
    %c0_33 = arith.constant 0 : index
    %c0_34 = arith.constant 0 : index
    %c0_35 = arith.constant 0 : index
    %89 = vector.load %arg7[%c0_33, %c0_34, %c0_35] : memref<3x144x64xbf16, #tpu.memory_space<vmem>>, vector<1x144x64xbf16>
    %90 = vector.shape_cast %89 : vector<1x144x64xbf16> to vector<144x64xbf16>
    %cst_36 = arith.constant dense<0.000000e+00> : vector<36x64xf32>
    %91 = tpu.matmul %88, %90, %cst_36 {dimension_numbers = #tpu.dot_dimension_numbers<[1], [0], [0], [1], [0, 0, 1, 1], [], []>} : vector<36x144xbf16>, vector<144x64xbf16>, vector<36x64xf32> -> vector<36x64xf32>
    %92 = arith.addf %82, %91 : vector<36x64xf32>
    %93 = vector.extract_strided_slice %81 {offsets = [1, 0, 0], sizes = [6, 8, 48], strides = [1, 1, 1]} : vector<8x8x48xbf16> to vector<6x8x48xbf16>
    %94 = vector.extract_strided_slice %93 {offsets = [0, 0, 0], sizes = [6, 6, 48], strides = [1, 1, 1]} : vector<6x8x48xbf16> to vector<6x6x48xbf16>
    %95 = vector.extract_strided_slice %93 {offsets = [0, 1, 0], sizes = [6, 6, 48], strides = [1, 1, 1]} : vector<6x8x48xbf16> to vector<6x6x48xbf16>
    %96 = vector.extract_strided_slice %93 {offsets = [0, 2, 0], sizes = [6, 6, 48], strides = [1, 1, 1]} : vector<6x8x48xbf16> to vector<6x6x48xbf16>
    %97 = tpu.concatenate %94, %95, %96 in 2 : vector<6x6x48xbf16>, vector<6x6x48xbf16>, vector<6x6x48xbf16> -> vector<6x6x144xbf16>
    %98 = vector.shape_cast %97 : vector<6x6x144xbf16> to vector<36x144xbf16>
    %c1_37 = arith.constant 1 : index
    %c0_38 = arith.constant 0 : index
    %c0_39 = arith.constant 0 : index
    %99 = vector.load %arg7[%c1_37, %c0_38, %c0_39] : memref<3x144x64xbf16, #tpu.memory_space<vmem>>, vector<1x144x64xbf16>
    %100 = vector.shape_cast %99 : vector<1x144x64xbf16> to vector<144x64xbf16>
    %cst_40 = arith.constant dense<0.000000e+00> : vector<36x64xf32>
    %101 = tpu.matmul %98, %100, %cst_40 {dimension_numbers = #tpu.dot_dimension_numbers<[1], [0], [0], [1], [0, 0, 1, 1], [], []>} : vector<36x144xbf16>, vector<144x64xbf16>, vector<36x64xf32> -> vector<36x64xf32>
    %102 = arith.addf %92, %101 : vector<36x64xf32>
    %103 = vector.extract_strided_slice %81 {offsets = [2, 0, 0], sizes = [6, 8, 48], strides = [1, 1, 1]} : vector<8x8x48xbf16> to vector<6x8x48xbf16>
    %104 = vector.extract_strided_slice %103 {offsets = [0, 0, 0], sizes = [6, 6, 48], strides = [1, 1, 1]} : vector<6x8x48xbf16> to vector<6x6x48xbf16>
    %105 = vector.extract_strided_slice %103 {offsets = [0, 1, 0], sizes = [6, 6, 48], strides = [1, 1, 1]} : vector<6x8x48xbf16> to vector<6x6x48xbf16>
    %106 = vector.extract_strided_slice %103 {offsets = [0, 2, 0], sizes = [6, 6, 48], strides = [1, 1, 1]} : vector<6x8x48xbf16> to vector<6x6x48xbf16>
    %107 = tpu.concatenate %104, %105, %106 in 2 : vector<6x6x48xbf16>, vector<6x6x48xbf16>, vector<6x6x48xbf16> -> vector<6x6x144xbf16>
    %108 = vector.shape_cast %107 : vector<6x6x144xbf16> to vector<36x144xbf16>
    %c2_41 = arith.constant 2 : index
    %c0_42 = arith.constant 0 : index
    %c0_43 = arith.constant 0 : index
    %109 = vector.load %arg7[%c2_41, %c0_42, %c0_43] : memref<3x144x64xbf16, #tpu.memory_space<vmem>>, vector<1x144x64xbf16>
    %110 = vector.shape_cast %109 : vector<1x144x64xbf16> to vector<144x64xbf16>
    %cst_44 = arith.constant dense<0.000000e+00> : vector<36x64xf32>
    %111 = tpu.matmul %108, %110, %cst_44 {dimension_numbers = #tpu.dot_dimension_numbers<[1], [0], [0], [1], [0, 0, 1, 1], [], []>} : vector<36x144xbf16>, vector<144x64xbf16>, vector<36x64xf32> -> vector<36x64xf32>
    %112 = arith.addf %102, %111 : vector<36x64xf32>
    %c0_45 = arith.constant 0 : index
    %c0_46 = arith.constant 0 : index
    %113 = vector.load %arg8[%c0_45, %c0_46] : memref<1x64xf32, #tpu.memory_space<vmem>>, vector<1x64xf32>
    %114 = vector.broadcast %113 : vector<1x64xf32> to vector<36x64xf32>
    %115 = arith.addf %112, %114 : vector<36x64xf32>
    %116 = vector.shape_cast %115 : vector<36x64xf32> to vector<6x6x64xf32>
    %cst_47 = arith.constant 0.000000e+00 : f32
    %117 = vector.broadcast %cst_47 : f32 to vector<6x6x64xf32>
    %118 = arith.maximumf %116, %117 : vector<6x6x64xf32>
    %119 = vector.extract_strided_slice %118 {offsets = [1, 1, 0], sizes = [4, 4, 16], strides = [1, 1, 1]} : vector<6x6x64xf32> to vector<4x4x16xf32>
    %120 = vector.extract_strided_slice %118 {offsets = [0, 0, 16], sizes = [6, 6, 48], strides = [1, 1, 1]} : vector<6x6x64xf32> to vector<6x6x48xf32>
    %121 = arith.truncf %120 : vector<6x6x48xf32> to vector<6x6x48xbf16>
    %cst_48 = arith.constant 0.000000e+00 : f32
    %122 = vector.broadcast %cst_48 : f32 to vector<16x16xf32>
    %123 = vector.extract_strided_slice %121 {offsets = [0, 0, 0], sizes = [4, 6, 48], strides = [1, 1, 1]} : vector<6x6x48xbf16> to vector<4x6x48xbf16>
    %124 = vector.extract_strided_slice %123 {offsets = [0, 0, 0], sizes = [4, 4, 48], strides = [1, 1, 1]} : vector<4x6x48xbf16> to vector<4x4x48xbf16>
    %125 = vector.extract_strided_slice %123 {offsets = [0, 1, 0], sizes = [4, 4, 48], strides = [1, 1, 1]} : vector<4x6x48xbf16> to vector<4x4x48xbf16>
    %126 = vector.extract_strided_slice %123 {offsets = [0, 2, 0], sizes = [4, 4, 48], strides = [1, 1, 1]} : vector<4x6x48xbf16> to vector<4x4x48xbf16>
    %127 = tpu.concatenate %124, %125, %126 in 2 : vector<4x4x48xbf16>, vector<4x4x48xbf16>, vector<4x4x48xbf16> -> vector<4x4x144xbf16>
    %128 = vector.shape_cast %127 : vector<4x4x144xbf16> to vector<16x144xbf16>
    %c0_49 = arith.constant 0 : index
    %c0_50 = arith.constant 0 : index
    %c0_51 = arith.constant 0 : index
    %129 = vector.load %arg9[%c0_49, %c0_50, %c0_51] : memref<3x144x16xbf16, #tpu.memory_space<vmem>>, vector<1x144x16xbf16>
    %130 = vector.shape_cast %129 : vector<1x144x16xbf16> to vector<144x16xbf16>
    %cst_52 = arith.constant dense<0.000000e+00> : vector<16x16xf32>
    %131 = tpu.matmul %128, %130, %cst_52 {dimension_numbers = #tpu.dot_dimension_numbers<[1], [0], [0], [1], [0, 0, 1, 1], [], []>} : vector<16x144xbf16>, vector<144x16xbf16>, vector<16x16xf32> -> vector<16x16xf32>
    %132 = arith.addf %122, %131 : vector<16x16xf32>
    %133 = vector.extract_strided_slice %121 {offsets = [1, 0, 0], sizes = [4, 6, 48], strides = [1, 1, 1]} : vector<6x6x48xbf16> to vector<4x6x48xbf16>
    %134 = vector.extract_strided_slice %133 {offsets = [0, 0, 0], sizes = [4, 4, 48], strides = [1, 1, 1]} : vector<4x6x48xbf16> to vector<4x4x48xbf16>
    %135 = vector.extract_strided_slice %133 {offsets = [0, 1, 0], sizes = [4, 4, 48], strides = [1, 1, 1]} : vector<4x6x48xbf16> to vector<4x4x48xbf16>
    %136 = vector.extract_strided_slice %133 {offsets = [0, 2, 0], sizes = [4, 4, 48], strides = [1, 1, 1]} : vector<4x6x48xbf16> to vector<4x4x48xbf16>
    %137 = tpu.concatenate %134, %135, %136 in 2 : vector<4x4x48xbf16>, vector<4x4x48xbf16>, vector<4x4x48xbf16> -> vector<4x4x144xbf16>
    %138 = vector.shape_cast %137 : vector<4x4x144xbf16> to vector<16x144xbf16>
    %c1_53 = arith.constant 1 : index
    %c0_54 = arith.constant 0 : index
    %c0_55 = arith.constant 0 : index
    %139 = vector.load %arg9[%c1_53, %c0_54, %c0_55] : memref<3x144x16xbf16, #tpu.memory_space<vmem>>, vector<1x144x16xbf16>
    %140 = vector.shape_cast %139 : vector<1x144x16xbf16> to vector<144x16xbf16>
    %cst_56 = arith.constant dense<0.000000e+00> : vector<16x16xf32>
    %141 = tpu.matmul %138, %140, %cst_56 {dimension_numbers = #tpu.dot_dimension_numbers<[1], [0], [0], [1], [0, 0, 1, 1], [], []>} : vector<16x144xbf16>, vector<144x16xbf16>, vector<16x16xf32> -> vector<16x16xf32>
    %142 = arith.addf %132, %141 : vector<16x16xf32>
    %143 = vector.extract_strided_slice %121 {offsets = [2, 0, 0], sizes = [4, 6, 48], strides = [1, 1, 1]} : vector<6x6x48xbf16> to vector<4x6x48xbf16>
    %144 = vector.extract_strided_slice %143 {offsets = [0, 0, 0], sizes = [4, 4, 48], strides = [1, 1, 1]} : vector<4x6x48xbf16> to vector<4x4x48xbf16>
    %145 = vector.extract_strided_slice %143 {offsets = [0, 1, 0], sizes = [4, 4, 48], strides = [1, 1, 1]} : vector<4x6x48xbf16> to vector<4x4x48xbf16>
    %146 = vector.extract_strided_slice %143 {offsets = [0, 2, 0], sizes = [4, 4, 48], strides = [1, 1, 1]} : vector<4x6x48xbf16> to vector<4x4x48xbf16>
    %147 = tpu.concatenate %144, %145, %146 in 2 : vector<4x4x48xbf16>, vector<4x4x48xbf16>, vector<4x4x48xbf16> -> vector<4x4x144xbf16>
    %148 = vector.shape_cast %147 : vector<4x4x144xbf16> to vector<16x144xbf16>
    %c2_57 = arith.constant 2 : index
    %c0_58 = arith.constant 0 : index
    %c0_59 = arith.constant 0 : index
    %149 = vector.load %arg9[%c2_57, %c0_58, %c0_59] : memref<3x144x16xbf16, #tpu.memory_space<vmem>>, vector<1x144x16xbf16>
    %150 = vector.shape_cast %149 : vector<1x144x16xbf16> to vector<144x16xbf16>
    %cst_60 = arith.constant dense<0.000000e+00> : vector<16x16xf32>
    %151 = tpu.matmul %148, %150, %cst_60 {dimension_numbers = #tpu.dot_dimension_numbers<[1], [0], [0], [1], [0, 0, 1, 1], [], []>} : vector<16x144xbf16>, vector<144x16xbf16>, vector<16x16xf32> -> vector<16x16xf32>
    %152 = arith.addf %142, %151 : vector<16x16xf32>
    %c0_61 = arith.constant 0 : index
    %c0_62 = arith.constant 0 : index
    %153 = vector.load %arg10[%c0_61, %c0_62] : memref<1x16xf32, #tpu.memory_space<vmem>>, vector<1x16xf32>
    %154 = vector.broadcast %153 : vector<1x16xf32> to vector<16x16xf32>
    %155 = arith.addf %152, %154 : vector<16x16xf32>
    %156 = vector.shape_cast %155 : vector<16x16xf32> to vector<4x4x16xf32>
    %157 = tpu.concatenate %39, %79, %119, %156 in 2 : vector<4x4x16xf32>, vector<4x4x16xf32>, vector<4x4x16xf32>, vector<4x4x16xf32> -> vector<4x4x64xf32>
    %158 = arith.truncf %157 : vector<4x4x64xf32> to vector<4x4x64xbf16>
    %c0_63 = arith.constant 0 : index
    %c0_64 = arith.constant 0 : index
    %c0_65 = arith.constant 0 : index
    %c0_66 = arith.constant 0 : index
    %159 = vector.load %arg11[%c0_63, %c0_64, %c0_65, %c0_66] : memref<1x4x4x64xbf16, #tpu.memory_space<vmem>>, vector<1x4x4x64xbf16>
    %160 = vector.shape_cast %159 : vector<1x4x4x64xbf16> to vector<4x4x64xbf16>
    %161 = vector.shape_cast %158 : vector<4x4x64xbf16> to vector<1x4x4x64xbf16>
    tpu.vector_store %arg11[%c0_63, %c0_64, %c0_65, %c0_66], %161 {strides = array<i32>} : memref<1x4x4x64xbf16, #tpu.memory_space<vmem>>, vector<1x4x4x64xbf16>,
    return
  }
  func.func @transform_0(%arg0: i32, %arg1: i32) -> (i32, i32, i32, i32) {
    %c0_i32 = arith.constant 0 : i32
    %c0_i32_0 = arith.constant 0 : i32
    %c0_i32_1 = arith.constant 0 : i32
    %c0_i32_2 = arith.constant 0 : i32
    return %arg0, %c0_i32, %c0_i32_0, %c0_i32_1 : i32, i32, i32, i32
  }
  func.func @transform_1(%arg0: i32, %arg1: i32) -> (i32, i32, i32) {
    %c0_i32 = arith.constant 0 : i32
    %c0_i32_0 = arith.constant 0 : i32
    %c0_i32_1 = arith.constant 0 : i32
    %c0_i32_2 = arith.constant 0 : i32
    return %c0_i32, %c0_i32_0, %c0_i32_1 : i32, i32, i32
  }
  func.func @transform_2(%arg0: i32, %arg1: i32) -> (i32, i32) {
    %c0_i32 = arith.constant 0 : i32
    %c0_i32_0 = arith.constant 0 : i32
    %c0_i32_1 = arith.constant 0 : i32
    return %c0_i32, %c0_i32_0 : i32, i32
  }
  func.func @transform_3(%arg0: i32, %arg1: i32) -> (i32, i32, i32) {
    %c0_i32 = arith.constant 0 : i32
    %c0_i32_0 = arith.constant 0 : i32
    %c0_i32_1 = arith.constant 0 : i32
    %c0_i32_2 = arith.constant 0 : i32
    return %c0_i32, %c0_i32_0, %c0_i32_1 : i32, i32, i32
  }
  func.func @transform_4(%arg0: i32, %arg1: i32) -> (i32, i32) {
    %c0_i32 = arith.constant 0 : i32
    %c0_i32_0 = arith.constant 0 : i32
    %c0_i32_1 = arith.constant 0 : i32
    return %c0_i32, %c0_i32_0 : i32, i32
  }
  func.func @transform_5(%arg0: i32, %arg1: i32) -> (i32, i32, i32) {
    %c0_i32 = arith.constant 0 : i32
    %c0_i32_0 = arith.constant 0 : i32
    %c0_i32_1 = arith.constant 0 : i32
    %c0_i32_2 = arith.constant 0 : i32
    return %c0_i32, %c0_i32_0, %c0_i32_1 : i32, i32, i32
  }
  func.func @transform_6(%arg0: i32, %arg1: i32) -> (i32, i32) {
    %c0_i32 = arith.constant 0 : i32
    %c0_i32_0 = arith.constant 0 : i32
    %c0_i32_1 = arith.constant 0 : i32
    return %c0_i32, %c0_i32_0 : i32, i32
  }
  func.func @transform_7(%arg0: i32, %arg1: i32) -> (i32, i32, i32) {
    %c0_i32 = arith.constant 0 : i32
    %c0_i32_0 = arith.constant 0 : i32
    %c0_i32_1 = arith.constant 0 : i32
    %c0_i32_2 = arith.constant 0 : i32
    return %c0_i32, %c0_i32_0, %c0_i32_1 : i32, i32, i32
  }
  func.func @transform_8(%arg0: i32, %arg1: i32) -> (i32, i32) {
    %c0_i32 = arith.constant 0 : i32
    %c0_i32_0 = arith.constant 0 : i32
    %c0_i32_1 = arith.constant 0 : i32
    return %c0_i32, %c0_i32_0 : i32, i32
  }
  func.func @transform_9(%arg0: i32, %arg1: i32) -> (i32, i32, i32, i32) {
    %c0_i32 = arith.constant 0 : i32
    %c0_i32_0 = arith.constant 0 : i32
    %c0_i32_1 = arith.constant 0 : i32
    return %arg0, %arg1, %c0_i32, %c0_i32_0 : i32, i32, i32, i32
  }
}

module attributes {stable_mosaic.version = 11 : i64} {
  func.func @_cca_c5_kernel(%arg0: i32, %arg1: i32, %arg2: memref<1x16x64xbf16, #tpu.memory_space<vmem>>, %arg3: memref<1x1x64xf32, #tpu.memory_space<vmem>>, %arg4: memref<64x64xbf16, #tpu.memory_space<vmem>>, %arg5: memref<1x64xf32, #tpu.memory_space<vmem>>, %arg6: memref<1x16x64xbf16, #tpu.memory_space<vmem>>, %arg7: memref<1x16x64xbf16, #tpu.memory_space<vmem>>) attributes {dimension_semantics = [#tpu.dimension_semantics<parallel>, #tpu.dimension_semantics<parallel>], iteration_bounds = array<i64: 2, 1>, scalar_prefetch = 0 : i64, scratch_operands = 0 : i64, tpu.core_type = #tpu.core_type<tc>, window_params = [{transform_indices = @transform_0, window_bounds = array<i64: 1, 16, 64>}, {transform_indices = @transform_1, window_bounds = array<i64: 1, 1, 64>}, {pipeline_mode = #tpu.pipeline_mode<synchronous>, transform_indices = @transform_2, window_bounds = array<i64: 64, 64>}, {pipeline_mode = #tpu.pipeline_mode<synchronous>, transform_indices = @transform_3, window_bounds = array<i64: 1, 64>}, {transform_indices = @transform_4, window_bounds = array<i64: 1, 16, 64>}, {transform_indices = @transform_5, window_bounds = array<i64: 1, 16, 64>}]} {
    %c0 = arith.constant 0 : index
    %c0_0 = arith.constant 0 : index
    %c0_1 = arith.constant 0 : index
    %0 = vector.load %arg2[%c0, %c0_0, %c0_1] : memref<1x16x64xbf16, #tpu.memory_space<vmem>>, vector<1x16x64xbf16>
    %1 = vector.shape_cast %0 : vector<1x16x64xbf16> to vector<16x64xbf16>
    %2 = arith.extf %1 : vector<16x64xbf16> to vector<16x64xf32>
    %c0_2 = arith.constant 0 : index
    %c0_3 = arith.constant 0 : index
    %c0_4 = arith.constant 0 : index
    %3 = vector.load %arg3[%c0_2, %c0_3, %c0_4] : memref<1x1x64xf32, #tpu.memory_space<vmem>>, vector<1x1x64xf32>
    %4 = vector.shape_cast %3 : vector<1x1x64xf32> to vector<1x64xf32>
    %5 = vector.broadcast %4 : vector<1x64xf32> to vector<16x64xf32>
    %6 = arith.mulf %2, %5 : vector<16x64xf32>
    %7 = arith.truncf %6 : vector<16x64xf32> to vector<16x64xbf16>
    %c0_5 = arith.constant 0 : index
    %c0_6 = arith.constant 0 : index
    %8 = vector.load %arg4[%c0_5, %c0_6] : memref<64x64xbf16, #tpu.memory_space<vmem>>, vector<64x64xbf16>
    %cst = arith.constant dense<0.000000e+00> : vector<16x64xf32>
    %9 = tpu.matmul %7, %8, %cst {dimension_numbers = #tpu.dot_dimension_numbers<[1], [0], [0], [1], [0, 0, 1, 1], [], []>} : vector<16x64xbf16>, vector<64x64xbf16>, vector<16x64xf32> -> vector<16x64xf32>
    %c0_7 = arith.constant 0 : index
    %c0_8 = arith.constant 0 : index
    %10 = vector.load %arg5[%c0_7, %c0_8] : memref<1x64xf32, #tpu.memory_space<vmem>>, vector<1x64xf32>
    %11 = vector.broadcast %10 : vector<1x64xf32> to vector<16x64xf32>
    %12 = arith.addf %9, %11 : vector<16x64xf32>
    %c0_9 = arith.constant 0 : index
    %c0_10 = arith.constant 0 : index
    %c0_11 = arith.constant 0 : index
    %13 = vector.load %arg6[%c0_9, %c0_10, %c0_11] : memref<1x16x64xbf16, #tpu.memory_space<vmem>>, vector<1x16x64xbf16>
    %14 = vector.shape_cast %13 : vector<1x16x64xbf16> to vector<16x64xbf16>
    %15 = arith.extf %14 : vector<16x64xbf16> to vector<16x64xf32>
    %16 = arith.addf %12, %15 : vector<16x64xf32>
    %17 = arith.truncf %16 : vector<16x64xf32> to vector<16x64xbf16>
    %c0_12 = arith.constant 0 : index
    %c0_13 = arith.constant 0 : index
    %c0_14 = arith.constant 0 : index
    %18 = vector.load %arg7[%c0_12, %c0_13, %c0_14] : memref<1x16x64xbf16, #tpu.memory_space<vmem>>, vector<1x16x64xbf16>
    %19 = vector.shape_cast %18 : vector<1x16x64xbf16> to vector<16x64xbf16>
    %20 = vector.shape_cast %17 : vector<16x64xbf16> to vector<1x16x64xbf16>
    tpu.vector_store %arg7[%c0_12, %c0_13, %c0_14], %20 {strides = array<i32>} : memref<1x16x64xbf16, #tpu.memory_space<vmem>>, vector<1x16x64xbf16>,
    return
  }
  func.func @transform_0(%arg0: i32, %arg1: i32) -> (i32, i32, i32) {
    %c0_i32 = arith.constant 0 : i32
    %c0_i32_0 = arith.constant 0 : i32
    return %arg0, %arg1, %c0_i32 : i32, i32, i32
  }
  func.func @transform_1(%arg0: i32, %arg1: i32) -> (i32, i32, i32) {
    %c0_i32 = arith.constant 0 : i32
    %c0_i32_0 = arith.constant 0 : i32
    %c0_i32_1 = arith.constant 0 : i32
    return %arg0, %c0_i32, %c0_i32_0 : i32, i32, i32
  }
  func.func @transform_2(%arg0: i32, %arg1: i32) -> (i32, i32) {
    %c0_i32 = arith.constant 0 : i32
    %c0_i32_0 = arith.constant 0 : i32
    %c0_i32_1 = arith.constant 0 : i32
    return %c0_i32, %c0_i32_0 : i32, i32
  }
  func.func @transform_3(%arg0: i32, %arg1: i32) -> (i32, i32) {
    %c0_i32 = arith.constant 0 : i32
    %c0_i32_0 = arith.constant 0 : i32
    %c0_i32_1 = arith.constant 0 : i32
    return %c0_i32, %c0_i32_0 : i32, i32
  }
  func.func @transform_4(%arg0: i32, %arg1: i32) -> (i32, i32, i32) {
    %c0_i32 = arith.constant 0 : i32
    %c0_i32_0 = arith.constant 0 : i32
    return %arg0, %arg1, %c0_i32 : i32, i32, i32
  }
  func.func @transform_5(%arg0: i32, %arg1: i32) -> (i32, i32, i32) {
    %c0_i32 = arith.constant 0 : i32
    %c0_i32_0 = arith.constant 0 : i32
    return %arg0, %arg1, %c0_i32 : i32, i32, i32
  }
}

module attributes {stable_mosaic.version = 11 : i64} {
  func.func @_concat_gemm_kernel(%arg0: i32, %arg1: memref<32x64xbf16, #tpu.memory_space<vmem>>, %arg2: memref<32x64xbf16, #tpu.memory_space<vmem>>, %arg3: memref<32x64xbf16, #tpu.memory_space<vmem>>, %arg4: memref<32x64xbf16, #tpu.memory_space<vmem>>, %arg5: memref<32x64xbf16, #tpu.memory_space<vmem>>, %arg6: memref<32x64xbf16, #tpu.memory_space<vmem>>, %arg7: memref<32x64xbf16, #tpu.memory_space<vmem>>, %arg8: memref<32x64xbf16, #tpu.memory_space<vmem>>, %arg9: memref<32x64xbf16, #tpu.memory_space<vmem>>, %arg10: memref<32x64xbf16, #tpu.memory_space<vmem>>, %arg11: memref<32x64xbf16, #tpu.memory_space<vmem>>, %arg12: memref<32x64xbf16, #tpu.memory_space<vmem>>, %arg13: memref<32x64xbf16, #tpu.memory_space<vmem>>, %arg14: memref<32x64xbf16, #tpu.memory_space<vmem>>, %arg15: memref<32x64xbf16, #tpu.memory_space<vmem>>, %arg16: memref<32x64xbf16, #tpu.memory_space<vmem>>, %arg17: memref<1024x64xbf16, #tpu.memory_space<vmem>>, %arg18: memref<1x64xf32, #tpu.memory_space<vmem>>, %arg19: memref<32x64xbf16, #tpu.memory_space<vmem>>) attributes {dimension_semantics = [#tpu.dimension_semantics<parallel>], iteration_bounds = array<i64: 1>, scalar_prefetch = 0 : i64, scratch_operands = 0 : i64, tpu.core_type = #tpu.core_type<tc>, window_params = [{transform_indices = @transform_0, window_bounds = array<i64: 32, 64>}, {transform_indices = @transform_1, window_bounds = array<i64: 32, 64>}, {transform_indices = @transform_2, window_bounds = array<i64: 32, 64>}, {transform_indices = @transform_3, window_bounds = array<i64: 32, 64>}, {transform_indices = @transform_4, window_bounds = array<i64: 32, 64>}, {transform_indices = @transform_5, window_bounds = array<i64: 32, 64>}, {transform_indices = @transform_6, window_bounds = array<i64: 32, 64>}, {transform_indices = @transform_7, window_bounds = array<i64: 32, 64>}, {transform_indices = @transform_8, window_bounds = array<i64: 32, 64>}, {transform_indices = @transform_9, window_bounds = array<i64: 32, 64>}, {transform_indices = @transform_10, window_bounds = array<i64: 32, 64>}, {transform_indices = @transform_11, window_bounds = array<i64: 32, 64>}, {transform_indices = @transform_12, window_bounds = array<i64: 32, 64>}, {transform_indices = @transform_13, window_bounds = array<i64: 32, 64>}, {transform_indices = @transform_14, window_bounds = array<i64: 32, 64>}, {transform_indices = @transform_15, window_bounds = array<i64: 32, 64>}, {pipeline_mode = #tpu.pipeline_mode<synchronous>, transform_indices = @transform_16, window_bounds = array<i64: 1024, 64>}, {pipeline_mode = #tpu.pipeline_mode<synchronous>, transform_indices = @transform_17, window_bounds = array<i64: 1, 64>}, {transform_indices = @transform_18, window_bounds = array<i64: 32, 64>}]} {
    %cst = arith.constant 0.000000e+00 : f32
    %0 = vector.broadcast %cst : f32 to vector<32x64xf32>
    %c0 = arith.constant 0 : index
    %c0_0 = arith.constant 0 : index
    %1 = vector.load %arg1[%c0, %c0_0] : memref<32x64xbf16, #tpu.memory_space<vmem>>, vector<32x64xbf16>
    %c0_1 = arith.constant 0 : index
    %c0_2 = arith.constant 0 : index
    %2 = vector.load %arg17[%c0_1, %c0_2] : memref<1024x64xbf16, #tpu.memory_space<vmem>>, vector<64x64xbf16>
    %cst_3 = arith.constant dense<0.000000e+00> : vector<32x64xf32>
    %3 = tpu.matmul %1, %2, %cst_3 {dimension_numbers = #tpu.dot_dimension_numbers<[1], [0], [0], [1], [0, 0, 1, 1], [], []>} : vector<32x64xbf16>, vector<64x64xbf16>, vector<32x64xf32> -> vector<32x64xf32>
    %4 = arith.addf %0, %3 : vector<32x64xf32>
    %c0_4 = arith.constant 0 : index
    %c0_5 = arith.constant 0 : index
    %5 = vector.load %arg2[%c0_4, %c0_5] : memref<32x64xbf16, #tpu.memory_space<vmem>>, vector<32x64xbf16>
    %c64 = arith.constant 64 : index
    %c0_6 = arith.constant 0 : index
    %6 = vector.load %arg17[%c64, %c0_6] : memref<1024x64xbf16, #tpu.memory_space<vmem>>, vector<64x64xbf16>
    %cst_7 = arith.constant dense<0.000000e+00> : vector<32x64xf32>
    %7 = tpu.matmul %5, %6, %cst_7 {dimension_numbers = #tpu.dot_dimension_numbers<[1], [0], [0], [1], [0, 0, 1, 1], [], []>} : vector<32x64xbf16>, vector<64x64xbf16>, vector<32x64xf32> -> vector<32x64xf32>
    %8 = arith.addf %4, %7 : vector<32x64xf32>
    %c0_8 = arith.constant 0 : index
    %c0_9 = arith.constant 0 : index
    %9 = vector.load %arg3[%c0_8, %c0_9] : memref<32x64xbf16, #tpu.memory_space<vmem>>, vector<32x64xbf16>
    %c128 = arith.constant 128 : index
    %c0_10 = arith.constant 0 : index
    %10 = vector.load %arg17[%c128, %c0_10] : memref<1024x64xbf16, #tpu.memory_space<vmem>>, vector<64x64xbf16>
    %cst_11 = arith.constant dense<0.000000e+00> : vector<32x64xf32>
    %11 = tpu.matmul %9, %10, %cst_11 {dimension_numbers = #tpu.dot_dimension_numbers<[1], [0], [0], [1], [0, 0, 1, 1], [], []>} : vector<32x64xbf16>, vector<64x64xbf16>, vector<32x64xf32> -> vector<32x64xf32>
    %12 = arith.addf %8, %11 : vector<32x64xf32>
    %c0_12 = arith.constant 0 : index
    %c0_13 = arith.constant 0 : index
    %13 = vector.load %arg4[%c0_12, %c0_13] : memref<32x64xbf16, #tpu.memory_space<vmem>>, vector<32x64xbf16>
    %c192 = arith.constant 192 : index
    %c0_14 = arith.constant 0 : index
    %14 = vector.load %arg17[%c192, %c0_14] : memref<1024x64xbf16, #tpu.memory_space<vmem>>, vector<64x64xbf16>
    %cst_15 = arith.constant dense<0.000000e+00> : vector<32x64xf32>
    %15 = tpu.matmul %13, %14, %cst_15 {dimension_numbers = #tpu.dot_dimension_numbers<[1], [0], [0], [1], [0, 0, 1, 1], [], []>} : vector<32x64xbf16>, vector<64x64xbf16>, vector<32x64xf32> -> vector<32x64xf32>
    %16 = arith.addf %12, %15 : vector<32x64xf32>
    %c0_16 = arith.constant 0 : index
    %c0_17 = arith.constant 0 : index
    %17 = vector.load %arg5[%c0_16, %c0_17] : memref<32x64xbf16, #tpu.memory_space<vmem>>, vector<32x64xbf16>
    %c256 = arith.constant 256 : index
    %c0_18 = arith.constant 0 : index
    %18 = vector.load %arg17[%c256, %c0_18] : memref<1024x64xbf16, #tpu.memory_space<vmem>>, vector<64x64xbf16>
    %cst_19 = arith.constant dense<0.000000e+00> : vector<32x64xf32>
    %19 = tpu.matmul %17, %18, %cst_19 {dimension_numbers = #tpu.dot_dimension_numbers<[1], [0], [0], [1], [0, 0, 1, 1], [], []>} : vector<32x64xbf16>, vector<64x64xbf16>, vector<32x64xf32> -> vector<32x64xf32>
    %20 = arith.addf %16, %19 : vector<32x64xf32>
    %c0_20 = arith.constant 0 : index
    %c0_21 = arith.constant 0 : index
    %21 = vector.load %arg6[%c0_20, %c0_21] : memref<32x64xbf16, #tpu.memory_space<vmem>>, vector<32x64xbf16>
    %c320 = arith.constant 320 : index
    %c0_22 = arith.constant 0 : index
    %22 = vector.load %arg17[%c320, %c0_22] : memref<1024x64xbf16, #tpu.memory_space<vmem>>, vector<64x64xbf16>
    %cst_23 = arith.constant dense<0.000000e+00> : vector<32x64xf32>
    %23 = tpu.matmul %21, %22, %cst_23 {dimension_numbers = #tpu.dot_dimension_numbers<[1], [0], [0], [1], [0, 0, 1, 1], [], []>} : vector<32x64xbf16>, vector<64x64xbf16>, vector<32x64xf32> -> vector<32x64xf32>
    %24 = arith.addf %20, %23 : vector<32x64xf32>
    %c0_24 = arith.constant 0 : index
    %c0_25 = arith.constant 0 : index
    %25 = vector.load %arg7[%c0_24, %c0_25] : memref<32x64xbf16, #tpu.memory_space<vmem>>, vector<32x64xbf16>
    %c384 = arith.constant 384 : index
    %c0_26 = arith.constant 0 : index
    %26 = vector.load %arg17[%c384, %c0_26] : memref<1024x64xbf16, #tpu.memory_space<vmem>>, vector<64x64xbf16>
    %cst_27 = arith.constant dense<0.000000e+00> : vector<32x64xf32>
    %27 = tpu.matmul %25, %26, %cst_27 {dimension_numbers = #tpu.dot_dimension_numbers<[1], [0], [0], [1], [0, 0, 1, 1], [], []>} : vector<32x64xbf16>, vector<64x64xbf16>, vector<32x64xf32> -> vector<32x64xf32>
    %28 = arith.addf %24, %27 : vector<32x64xf32>
    %c0_28 = arith.constant 0 : index
    %c0_29 = arith.constant 0 : index
    %29 = vector.load %arg8[%c0_28, %c0_29] : memref<32x64xbf16, #tpu.memory_space<vmem>>, vector<32x64xbf16>
    %c448 = arith.constant 448 : index
    %c0_30 = arith.constant 0 : index
    %30 = vector.load %arg17[%c448, %c0_30] : memref<1024x64xbf16, #tpu.memory_space<vmem>>, vector<64x64xbf16>
    %cst_31 = arith.constant dense<0.000000e+00> : vector<32x64xf32>
    %31 = tpu.matmul %29, %30, %cst_31 {dimension_numbers = #tpu.dot_dimension_numbers<[1], [0], [0], [1], [0, 0, 1, 1], [], []>} : vector<32x64xbf16>, vector<64x64xbf16>, vector<32x64xf32> -> vector<32x64xf32>
    %32 = arith.addf %28, %31 : vector<32x64xf32>
    %c0_32 = arith.constant 0 : index
    %c0_33 = arith.constant 0 : index
    %33 = vector.load %arg9[%c0_32, %c0_33] : memref<32x64xbf16, #tpu.memory_space<vmem>>, vector<32x64xbf16>
    %c512 = arith.constant 512 : index
    %c0_34 = arith.constant 0 : index
    %34 = vector.load %arg17[%c512, %c0_34] : memref<1024x64xbf16, #tpu.memory_space<vmem>>, vector<64x64xbf16>
    %cst_35 = arith.constant dense<0.000000e+00> : vector<32x64xf32>
    %35 = tpu.matmul %33, %34, %cst_35 {dimension_numbers = #tpu.dot_dimension_numbers<[1], [0], [0], [1], [0, 0, 1, 1], [], []>} : vector<32x64xbf16>, vector<64x64xbf16>, vector<32x64xf32> -> vector<32x64xf32>
    %36 = arith.addf %32, %35 : vector<32x64xf32>
    %c0_36 = arith.constant 0 : index
    %c0_37 = arith.constant 0 : index
    %37 = vector.load %arg10[%c0_36, %c0_37] : memref<32x64xbf16, #tpu.memory_space<vmem>>, vector<32x64xbf16>
    %c576 = arith.constant 576 : index
    %c0_38 = arith.constant 0 : index
    %38 = vector.load %arg17[%c576, %c0_38] : memref<1024x64xbf16, #tpu.memory_space<vmem>>, vector<64x64xbf16>
    %cst_39 = arith.constant dense<0.000000e+00> : vector<32x64xf32>
    %39 = tpu.matmul %37, %38, %cst_39 {dimension_numbers = #tpu.dot_dimension_numbers<[1], [0], [0], [1], [0, 0, 1, 1], [], []>} : vector<32x64xbf16>, vector<64x64xbf16>, vector<32x64xf32> -> vector<32x64xf32>
    %40 = arith.addf %36, %39 : vector<32x64xf32>
    %c0_40 = arith.constant 0 : index
    %c0_41 = arith.constant 0 : index
    %41 = vector.load %arg11[%c0_40, %c0_41] : memref<32x64xbf16, #tpu.memory_space<vmem>>, vector<32x64xbf16>
    %c640 = arith.constant 640 : index
    %c0_42 = arith.constant 0 : index
    %42 = vector.load %arg17[%c640, %c0_42] : memref<1024x64xbf16, #tpu.memory_space<vmem>>, vector<64x64xbf16>
    %cst_43 = arith.constant dense<0.000000e+00> : vector<32x64xf32>
    %43 = tpu.matmul %41, %42, %cst_43 {dimension_numbers = #tpu.dot_dimension_numbers<[1], [0], [0], [1], [0, 0, 1, 1], [], []>} : vector<32x64xbf16>, vector<64x64xbf16>, vector<32x64xf32> -> vector<32x64xf32>
    %44 = arith.addf %40, %43 : vector<32x64xf32>
    %c0_44 = arith.constant 0 : index
    %c0_45 = arith.constant 0 : index
    %45 = vector.load %arg12[%c0_44, %c0_45] : memref<32x64xbf16, #tpu.memory_space<vmem>>, vector<32x64xbf16>
    %c704 = arith.constant 704 : index
    %c0_46 = arith.constant 0 : index
    %46 = vector.load %arg17[%c704, %c0_46] : memref<1024x64xbf16, #tpu.memory_space<vmem>>, vector<64x64xbf16>
    %cst_47 = arith.constant dense<0.000000e+00> : vector<32x64xf32>
    %47 = tpu.matmul %45, %46, %cst_47 {dimension_numbers = #tpu.dot_dimension_numbers<[1], [0], [0], [1], [0, 0, 1, 1], [], []>} : vector<32x64xbf16>, vector<64x64xbf16>, vector<32x64xf32> -> vector<32x64xf32>
    %48 = arith.addf %44, %47 : vector<32x64xf32>
    %c0_48 = arith.constant 0 : index
    %c0_49 = arith.constant 0 : index
    %49 = vector.load %arg13[%c0_48, %c0_49] : memref<32x64xbf16, #tpu.memory_space<vmem>>, vector<32x64xbf16>
    %c768 = arith.constant 768 : index
    %c0_50 = arith.constant 0 : index
    %50 = vector.load %arg17[%c768, %c0_50] : memref<1024x64xbf16, #tpu.memory_space<vmem>>, vector<64x64xbf16>
    %cst_51 = arith.constant dense<0.000000e+00> : vector<32x64xf32>
    %51 = tpu.matmul %49, %50, %cst_51 {dimension_numbers = #tpu.dot_dimension_numbers<[1], [0], [0], [1], [0, 0, 1, 1], [], []>} : vector<32x64xbf16>, vector<64x64xbf16>, vector<32x64xf32> -> vector<32x64xf32>
    %52 = arith.addf %48, %51 : vector<32x64xf32>
    %c0_52 = arith.constant 0 : index
    %c0_53 = arith.constant 0 : index
    %53 = vector.load %arg14[%c0_52, %c0_53] : memref<32x64xbf16, #tpu.memory_space<vmem>>, vector<32x64xbf16>
    %c832 = arith.constant 832 : index
    %c0_54 = arith.constant 0 : index
    %54 = vector.load %arg17[%c832, %c0_54] : memref<1024x64xbf16, #tpu.memory_space<vmem>>, vector<64x64xbf16>
    %cst_55 = arith.constant dense<0.000000e+00> : vector<32x64xf32>
    %55 = tpu.matmul %53, %54, %cst_55 {dimension_numbers = #tpu.dot_dimension_numbers<[1], [0], [0], [1], [0, 0, 1, 1], [], []>} : vector<32x64xbf16>, vector<64x64xbf16>, vector<32x64xf32> -> vector<32x64xf32>
    %56 = arith.addf %52, %55 : vector<32x64xf32>
    %c0_56 = arith.constant 0 : index
    %c0_57 = arith.constant 0 : index
    %57 = vector.load %arg15[%c0_56, %c0_57] : memref<32x64xbf16, #tpu.memory_space<vmem>>, vector<32x64xbf16>
    %c896 = arith.constant 896 : index
    %c0_58 = arith.constant 0 : index
    %58 = vector.load %arg17[%c896, %c0_58] : memref<1024x64xbf16, #tpu.memory_space<vmem>>, vector<64x64xbf16>
    %cst_59 = arith.constant dense<0.000000e+00> : vector<32x64xf32>
    %59 = tpu.matmul %57, %58, %cst_59 {dimension_numbers = #tpu.dot_dimension_numbers<[1], [0], [0], [1], [0, 0, 1, 1], [], []>} : vector<32x64xbf16>, vector<64x64xbf16>, vector<32x64xf32> -> vector<32x64xf32>
    %60 = arith.addf %56, %59 : vector<32x64xf32>
    %c0_60 = arith.constant 0 : index
    %c0_61 = arith.constant 0 : index
    %61 = vector.load %arg16[%c0_60, %c0_61] : memref<32x64xbf16, #tpu.memory_space<vmem>>, vector<32x64xbf16>
    %c960 = arith.constant 960 : index
    %c0_62 = arith.constant 0 : index
    %62 = vector.load %arg17[%c960, %c0_62] : memref<1024x64xbf16, #tpu.memory_space<vmem>>, vector<64x64xbf16>
    %cst_63 = arith.constant dense<0.000000e+00> : vector<32x64xf32>
    %63 = tpu.matmul %61, %62, %cst_63 {dimension_numbers = #tpu.dot_dimension_numbers<[1], [0], [0], [1], [0, 0, 1, 1], [], []>} : vector<32x64xbf16>, vector<64x64xbf16>, vector<32x64xf32> -> vector<32x64xf32>
    %64 = arith.addf %60, %63 : vector<32x64xf32>
    %c0_64 = arith.constant 0 : index
    %c0_65 = arith.constant 0 : index
    %65 = vector.load %arg18[%c0_64, %c0_65] : memref<1x64xf32, #tpu.memory_space<vmem>>, vector<1x64xf32>
    %66 = vector.broadcast %65 : vector<1x64xf32> to vector<32x64xf32>
    %67 = arith.addf %64, %66 : vector<32x64xf32>
    %cst_66 = arith.constant 0.000000e+00 : f32
    %68 = vector.broadcast %cst_66 : f32 to vector<32x64xf32>
    %69 = arith.maximumf %67, %68 : vector<32x64xf32>
    %70 = arith.truncf %69 : vector<32x64xf32> to vector<32x64xbf16>
    %c0_67 = arith.constant 0 : index
    %c0_68 = arith.constant 0 : index
    %71 = vector.load %arg19[%c0_67, %c0_68] : memref<32x64xbf16, #tpu.memory_space<vmem>>, vector<32x64xbf16>
    tpu.vector_store %arg19[%c0_67, %c0_68], %70 {strides = array<i32>} : memref<32x64xbf16, #tpu.memory_space<vmem>>, vector<32x64xbf16>,
    return
  }
  func.func @transform_0(%arg0: i32) -> (i32, i32) {
    %c0_i32 = arith.constant 0 : i32
    %c0_i32_0 = arith.constant 0 : i32
    return %arg0, %c0_i32 : i32, i32
  }
  func.func @transform_1(%arg0: i32) -> (i32, i32) {
    %c0_i32 = arith.constant 0 : i32
    %c0_i32_0 = arith.constant 0 : i32
    return %arg0, %c0_i32 : i32, i32
  }
  func.func @transform_2(%arg0: i32) -> (i32, i32) {
    %c0_i32 = arith.constant 0 : i32
    %c0_i32_0 = arith.constant 0 : i32
    return %arg0, %c0_i32 : i32, i32
  }
  func.func @transform_3(%arg0: i32) -> (i32, i32) {
    %c0_i32 = arith.constant 0 : i32
    %c0_i32_0 = arith.constant 0 : i32
    return %arg0, %c0_i32 : i32, i32
  }
  func.func @transform_4(%arg0: i32) -> (i32, i32) {
    %c0_i32 = arith.constant 0 : i32
    %c0_i32_0 = arith.constant 0 : i32
    return %arg0, %c0_i32 : i32, i32
  }
  func.func @transform_5(%arg0: i32) -> (i32, i32) {
    %c0_i32 = arith.constant 0 : i32
    %c0_i32_0 = arith.constant 0 : i32
    return %arg0, %c0_i32 : i32, i32
  }
  func.func @transform_6(%arg0: i32) -> (i32, i32) {
    %c0_i32 = arith.constant 0 : i32
    %c0_i32_0 = arith.constant 0 : i32
    return %arg0, %c0_i32 : i32, i32
  }
  func.func @transform_7(%arg0: i32) -> (i32, i32) {
    %c0_i32 = arith.constant 0 : i32
    %c0_i32_0 = arith.constant 0 : i32
    return %arg0, %c0_i32 : i32, i32
  }
  func.func @transform_8(%arg0: i32) -> (i32, i32) {
    %c0_i32 = arith.constant 0 : i32
    %c0_i32_0 = arith.constant 0 : i32
    return %arg0, %c0_i32 : i32, i32
  }
  func.func @transform_9(%arg0: i32) -> (i32, i32) {
    %c0_i32 = arith.constant 0 : i32
    %c0_i32_0 = arith.constant 0 : i32
    return %arg0, %c0_i32 : i32, i32
  }
  func.func @transform_10(%arg0: i32) -> (i32, i32) {
    %c0_i32 = arith.constant 0 : i32
    %c0_i32_0 = arith.constant 0 : i32
    return %arg0, %c0_i32 : i32, i32
  }
  func.func @transform_11(%arg0: i32) -> (i32, i32) {
    %c0_i32 = arith.constant 0 : i32
    %c0_i32_0 = arith.constant 0 : i32
    return %arg0, %c0_i32 : i32, i32
  }
  func.func @transform_12(%arg0: i32) -> (i32, i32) {
    %c0_i32 = arith.constant 0 : i32
    %c0_i32_0 = arith.constant 0 : i32
    return %arg0, %c0_i32 : i32, i32
  }
  func.func @transform_13(%arg0: i32) -> (i32, i32) {
    %c0_i32 = arith.constant 0 : i32
    %c0_i32_0 = arith.constant 0 : i32
    return %arg0, %c0_i32 : i32, i32
  }
  func.func @transform_14(%arg0: i32) -> (i32, i32) {
    %c0_i32 = arith.constant 0 : i32
    %c0_i32_0 = arith.constant 0 : i32
    return %arg0, %c0_i32 : i32, i32
  }
  func.func @transform_15(%arg0: i32) -> (i32, i32) {
    %c0_i32 = arith.constant 0 : i32
    %c0_i32_0 = arith.constant 0 : i32
    return %arg0, %c0_i32 : i32, i32
  }
  func.func @transform_16(%arg0: i32) -> (i32, i32) {
    %c0_i32 = arith.constant 0 : i32
    %c0_i32_0 = arith.constant 0 : i32
    %c0_i32_1 = arith.constant 0 : i32
    return %c0_i32, %c0_i32_0 : i32, i32
  }
  func.func @transform_17(%arg0: i32) -> (i32, i32) {
    %c0_i32 = arith.constant 0 : i32
    %c0_i32_0 = arith.constant 0 : i32
    %c0_i32_1 = arith.constant 0 : i32
    return %c0_i32, %c0_i32_0 : i32, i32
  }
  func.func @transform_18(%arg0: i32) -> (i32, i32) {
    %c0_i32 = arith.constant 0 : i32
    %c0_i32_0 = arith.constant 0 : i32
    return %arg0, %c0_i32 : i32, i32
  }
}

module attributes {stable_mosaic.version = 11 : i64} {
  func.func @_conv3x3_band_kernel(%arg0: i32, %arg1: i32, %arg2: memref<1x10x10x16xbf16, #tpu.memory_space<vmem>>, %arg3: memref<3x48x12xbf16, #tpu.memory_space<vmem>>, %arg4: memref<1x12xf32, #tpu.memory_space<vmem>>, %arg5: memref<1x8x8x12xbf16, #tpu.memory_space<vmem>>) attributes {dimension_semantics = [#tpu.dimension_semantics<parallel>, #tpu.dimension_semantics<parallel>], iteration_bounds = array<i64: 2, 1>, scalar_prefetch = 0 : i64, scratch_operands = 0 : i64, tpu.core_type = #tpu.core_type<tc>, window_params = [{transform_indices = @transform_0, window_bounds = array<i64: 1, 10, 10, 16>}, {pipeline_mode = #tpu.pipeline_mode<synchronous>, transform_indices = @transform_1, window_bounds = array<i64: 3, 48, 12>}, {pipeline_mode = #tpu.pipeline_mode<synchronous>, transform_indices = @transform_2, window_bounds = array<i64: 1, 12>}, {transform_indices = @transform_3, window_bounds = array<i64: 1, 8, 8, 12>}]} {
    %c0 = arith.constant 0 : index
    %c0_0 = arith.constant 0 : index
    %c0_1 = arith.constant 0 : index
    %c0_2 = arith.constant 0 : index
    %0 = vector.load %arg2[%c0, %c0_0, %c0_1, %c0_2] : memref<1x10x10x16xbf16, #tpu.memory_space<vmem>>, vector<1x10x10x16xbf16>
    %1 = vector.shape_cast %0 : vector<1x10x10x16xbf16> to vector<10x10x16xbf16>
    %cst = arith.constant 0.000000e+00 : f32
    %2 = vector.broadcast %cst : f32 to vector<64x12xf32>
    %3 = vector.extract_strided_slice %1 {offsets = [0, 0, 0], sizes = [8, 10, 16], strides = [1, 1, 1]} : vector<10x10x16xbf16> to vector<8x10x16xbf16>
    %4 = vector.extract_strided_slice %3 {offsets = [0, 0, 0], sizes = [8, 8, 16], strides = [1, 1, 1]} : vector<8x10x16xbf16> to vector<8x8x16xbf16>
    %5 = vector.extract_strided_slice %3 {offsets = [0, 1, 0], sizes = [8, 8, 16], strides = [1, 1, 1]} : vector<8x10x16xbf16> to vector<8x8x16xbf16>
    %6 = vector.extract_strided_slice %3 {offsets = [0, 2, 0], sizes = [8, 8, 16], strides = [1, 1, 1]} : vector<8x10x16xbf16> to vector<8x8x16xbf16>
    %7 = tpu.concatenate %4, %5, %6 in 2 : vector<8x8x16xbf16>, vector<8x8x16xbf16>, vector<8x8x16xbf16> -> vector<8x8x48xbf16>
    %8 = vector.shape_cast %7 : vector<8x8x48xbf16> to vector<64x48xbf16>
    %c0_3 = arith.constant 0 : index
    %c0_4 = arith.constant 0 : index
    %c0_5 = arith.constant 0 : index
    %9 = vector.load %arg3[%c0_3, %c0_4, %c0_5] : memref<3x48x12xbf16, #tpu.memory_space<vmem>>, vector<1x48x12xbf16>
    %10 = vector.shape_cast %9 : vector<1x48x12xbf16> to vector<48x12xbf16>
    %cst_6 = arith.constant dense<0.000000e+00> : vector<64x12xf32>
    %11 = tpu.matmul %8, %10, %cst_6 {dimension_numbers = #tpu.dot_dimension_numbers<[1], [0], [0], [1], [0, 0, 1, 1], [], []>} : vector<64x48xbf16>, vector<48x12xbf16>, vector<64x12xf32> -> vector<64x12xf32>
    %12 = arith.addf %2, %11 : vector<64x12xf32>
    %13 = vector.extract_strided_slice %1 {offsets = [1, 0, 0], sizes = [8, 10, 16], strides = [1, 1, 1]} : vector<10x10x16xbf16> to vector<8x10x16xbf16>
    %14 = vector.extract_strided_slice %13 {offsets = [0, 0, 0], sizes = [8, 8, 16], strides = [1, 1, 1]} : vector<8x10x16xbf16> to vector<8x8x16xbf16>
    %15 = vector.extract_strided_slice %13 {offsets = [0, 1, 0], sizes = [8, 8, 16], strides = [1, 1, 1]} : vector<8x10x16xbf16> to vector<8x8x16xbf16>
    %16 = vector.extract_strided_slice %13 {offsets = [0, 2, 0], sizes = [8, 8, 16], strides = [1, 1, 1]} : vector<8x10x16xbf16> to vector<8x8x16xbf16>
    %17 = tpu.concatenate %14, %15, %16 in 2 : vector<8x8x16xbf16>, vector<8x8x16xbf16>, vector<8x8x16xbf16> -> vector<8x8x48xbf16>
    %18 = vector.shape_cast %17 : vector<8x8x48xbf16> to vector<64x48xbf16>
    %c1 = arith.constant 1 : index
    %c0_7 = arith.constant 0 : index
    %c0_8 = arith.constant 0 : index
    %19 = vector.load %arg3[%c1, %c0_7, %c0_8] : memref<3x48x12xbf16, #tpu.memory_space<vmem>>, vector<1x48x12xbf16>
    %20 = vector.shape_cast %19 : vector<1x48x12xbf16> to vector<48x12xbf16>
    %cst_9 = arith.constant dense<0.000000e+00> : vector<64x12xf32>
    %21 = tpu.matmul %18, %20, %cst_9 {dimension_numbers = #tpu.dot_dimension_numbers<[1], [0], [0], [1], [0, 0, 1, 1], [], []>} : vector<64x48xbf16>, vector<48x12xbf16>, vector<64x12xf32> -> vector<64x12xf32>
    %22 = arith.addf %12, %21 : vector<64x12xf32>
    %23 = vector.extract_strided_slice %1 {offsets = [2, 0, 0], sizes = [8, 10, 16], strides = [1, 1, 1]} : vector<10x10x16xbf16> to vector<8x10x16xbf16>
    %24 = vector.extract_strided_slice %23 {offsets = [0, 0, 0], sizes = [8, 8, 16], strides = [1, 1, 1]} : vector<8x10x16xbf16> to vector<8x8x16xbf16>
    %25 = vector.extract_strided_slice %23 {offsets = [0, 1, 0], sizes = [8, 8, 16], strides = [1, 1, 1]} : vector<8x10x16xbf16> to vector<8x8x16xbf16>
    %26 = vector.extract_strided_slice %23 {offsets = [0, 2, 0], sizes = [8, 8, 16], strides = [1, 1, 1]} : vector<8x10x16xbf16> to vector<8x8x16xbf16>
    %27 = tpu.concatenate %24, %25, %26 in 2 : vector<8x8x16xbf16>, vector<8x8x16xbf16>, vector<8x8x16xbf16> -> vector<8x8x48xbf16>
    %28 = vector.shape_cast %27 : vector<8x8x48xbf16> to vector<64x48xbf16>
    %c2 = arith.constant 2 : index
    %c0_10 = arith.constant 0 : index
    %c0_11 = arith.constant 0 : index
    %29 = vector.load %arg3[%c2, %c0_10, %c0_11] : memref<3x48x12xbf16, #tpu.memory_space<vmem>>, vector<1x48x12xbf16>
    %30 = vector.shape_cast %29 : vector<1x48x12xbf16> to vector<48x12xbf16>
    %cst_12 = arith.constant dense<0.000000e+00> : vector<64x12xf32>
    %31 = tpu.matmul %28, %30, %cst_12 {dimension_numbers = #tpu.dot_dimension_numbers<[1], [0], [0], [1], [0, 0, 1, 1], [], []>} : vector<64x48xbf16>, vector<48x12xbf16>, vector<64x12xf32> -> vector<64x12xf32>
    %32 = arith.addf %22, %31 : vector<64x12xf32>
    %c0_13 = arith.constant 0 : index
    %c0_14 = arith.constant 0 : index
    %33 = vector.load %arg4[%c0_13, %c0_14] : memref<1x12xf32, #tpu.memory_space<vmem>>, vector<1x12xf32>
    %34 = vector.broadcast %33 : vector<1x12xf32> to vector<64x12xf32>
    %35 = arith.addf %32, %34 : vector<64x12xf32>
    %36 = vector.shape_cast %35 : vector<64x12xf32> to vector<8x8x12xf32>
    %37 = arith.truncf %36 : vector<8x8x12xf32> to vector<8x8x12xbf16>
    %c0_15 = arith.constant 0 : index
    %c0_16 = arith.constant 0 : index
    %c0_17 = arith.constant 0 : index
    %c0_18 = arith.constant 0 : index
    %38 = vector.load %arg5[%c0_15, %c0_16, %c0_17, %c0_18] : memref<1x8x8x12xbf16, #tpu.memory_space<vmem>>, vector<1x8x8x12xbf16>
    %39 = vector.shape_cast %38 : vector<1x8x8x12xbf16> to vector<8x8x12xbf16>
    %40 = vector.shape_cast %37 : vector<8x8x12xbf16> to vector<1x8x8x12xbf16>
    tpu.vector_store %arg5[%c0_15, %c0_16, %c0_17, %c0_18], %40 {strides = array<i32>} : memref<1x8x8x12xbf16, #tpu.memory_space<vmem>>, vector<1x8x8x12xbf16>,
    return
  }
  func.func @transform_0(%arg0: i32, %arg1: i32) -> (i32, i32, i32, i32) {
    %c0_i32 = arith.constant 0 : i32
    %c0_i32_0 = arith.constant 0 : i32
    %c0_i32_1 = arith.constant 0 : i32
    %c0_i32_2 = arith.constant 0 : i32
    return %arg0, %c0_i32, %c0_i32_0, %c0_i32_1 : i32, i32, i32, i32
  }
  func.func @transform_1(%arg0: i32, %arg1: i32) -> (i32, i32, i32) {
    %c0_i32 = arith.constant 0 : i32
    %c0_i32_0 = arith.constant 0 : i32
    %c0_i32_1 = arith.constant 0 : i32
    %c0_i32_2 = arith.constant 0 : i32
    return %c0_i32, %c0_i32_0, %c0_i32_1 : i32, i32, i32
  }
  func.func @transform_2(%arg0: i32, %arg1: i32) -> (i32, i32) {
    %c0_i32 = arith.constant 0 : i32
    %c0_i32_0 = arith.constant 0 : i32
    %c0_i32_1 = arith.constant 0 : i32
    return %c0_i32, %c0_i32_0 : i32, i32
  }
  func.func @transform_3(%arg0: i32, %arg1: i32) -> (i32, i32, i32, i32) {
    %c0_i32 = arith.constant 0 : i32
    %c0_i32_0 = arith.constant 0 : i32
    %c0_i32_1 = arith.constant 0 : i32
    return %arg0, %arg1, %c0_i32, %c0_i32_0 : i32, i32, i32, i32
  }
}

</mosaic_0001>

<bundles_post_ra>
// kernel: animenet5_forward.44
= control target key start
LH: loop header
LB: loop body
LE: loop exit
PB: predicated region body
PF: predicated region fallthrough
CT: control target
= control target key end

     0   :  { %vm118_vm0 = vcmask 1044480   ;;  %vm119_vm1 = vcmask 1045504   ;;  %vm93_vm2 = vcmask 220160   ;;  %v419_v1 = vmov 65535   ;;  %s545_s1 = inlined_call_operand.vmem [shape: bf16[27,32], index: 1, kind: input, shape index: {}]   ;;  %s546_s0 = inlined_call_operand.vmem [shape: bf16[128,27], index: 0, kind: input, shape index: {}]   ;;  %s547_s2 = inlined_call_operand.vmem [shape: f32[1,32], index: 2, kind: input, shape index: {}]   ;;  %s548_s3 = inlined_call_operand.vmem [shape: bf16[128,32], index: 3, kind: output, shape index: {}]  }
   0x1   :  { %v409_v0 = vld [vmem:[%s545_s1] sm:$0xff]   ;;  %v120_v2 = vsel %vm118_vm0, 4294967295, %v419_v1  ;;  %v410_v3 = vld [vmem:[%s545_s1 + $0x8] sm:$0x3f]   ;;  %v415_v10 = vld [vmem:[%s546_s0 + $0x10] sm:$0xff]   ;;  %vm302_vm3 = vcmask 257024  }
   0x2   :  { %384 = vmatprep.subr.bf16.mxu0 %v409_v0  ;;  %404 = vmatprep.subr.bf16.mxu1 %v409_v0  ;;  %v121_v4 = vsel %vm119_vm1, %v120_v2, 0  ;;  %v411_v5 = vld [vmem:[%s546_s0] sm:$0xff]   ;;  %v413_v8 = vld [vmem:[%s546_s0 + $0x8] sm:$0xff]   ;;  %v416_v11 = vld [vmem:[%s546_s0 + $0x30] sm:$0xff]  }
   0x3   :  { %385 = vmatpush3.bf16.msra.mxu0 %v409_v0  ;;  %406 = vmatpush3.bf16.msra.mxu1 %v409_v0  ;;  %v123_v6 = vand.u32 %v410_v3, %v121_v4  ;;  %v412_v7 = vld [vmem:[%s546_s0 + $0x20] sm:$0xff]   ;;  %v414_v9 = vld [vmem:[%s546_s0 + $0x28] sm:$0xff]   ;;  %v417_v12 = vld [vmem:[%s546_s0 + $0x18] sm:$0xff]  }
   0x4   :  { %388 = vmatprep.mubr.msk.bf16.mxu0 %vm93_vm2, %v411_v5  ;;  %396 = vmatprep.mubr.msk.bf16.mxu1 %vm93_vm2, %v412_v7  ;;  %v418_v13 = vld [vmem:[%s546_s0 + $0x38] sm:$0xff]   ;;  %v323_v14 = vld [vmem:[%s547_s2] ss:$0 sm:$0xff] }
   0x5   :  { %386 = vmatprep.subr.bf16.mxu0 %v123_v6  ;;  %405 = vmatprep.subr.bf16.mxu1 %v123_v6 }
   0x7   :  { %387 = vmatpush3.bf16.msra.mxu0 %v123_v6  ;;  %407 = vmatpush3.bf16.msra.mxu1 %v123_v6 }
   0xa   :  { %389 = vmatmul.mubr.msk.bf16.vlgmr.msra.gmra.mrb[0].mxu0 %vm93_vm2, %v413_v8  ;;  %397 = vmatmul.mubr.msk.bf16.vlgmr.msra.gmra.mrb[0].mxu1 %vm93_vm2, %v414_v9 }
   0xb   :  { %392 = vmatprep.mubr.msk.bf16.mxu0 %vm93_vm2, %v415_v10  ;;  %400 = vmatprep.mubr.msk.bf16.mxu1 %vm93_vm2, %v416_v11 }
  0x12   :  { %393 = vmatmul.mubr.msk.bf16.gmra.mrb[4].mxu0 %vm93_vm2, %v417_v12  ;;  %401 = vmatmul.mubr.msk.bf16.gmra.mrb[4].mxu1 %vm93_vm2, %v418_v13 }
  0xdd   :  { %v390_v15 = vpop.f32.mrb[0].mxu0  ;;  %v398_v16 = vpop.f32.mrb[0].mxu1 }
  0xde   :  { %v168_v17 = vadd.f32 %v390_v15, %v323_v14  ;;  %v200_v18 = vadd.f32 %v398_v16, %v323_v14  ;;  %v159_v19 = vpop.f32.mrb[1].mxu0  ;;  %v191_v20 = vpop.f32.mrb[1].mxu1 }
  0xdf   :  { %v160_v21 = vadd.f32 %v323_v14, %v159_v19  ;;  %v192_v22 = vadd.f32 %v323_v14, %v191_v20  ;;  %v391_v23 = vpop.f32.mrb[2].mxu0  ;;  %v399_v24 = vpop.f32.mrb[2].mxu1 }
  0xe0   :  { %v224_v25 = vmax.f32 %v168_v17, 0.0  ;;  %v232_v26 = vmax.f32 %v200_v18, 0.0  ;;  %v171_v27 = vadd.f32 %v391_v23, %v323_v14  ;;  %v203_v28 = vadd.f32 %v399_v24, %v323_v14  ;;  %v162_v29 = vpop.f32.mrb[3].mxu0  ;;  %v194_v30 = vpop.f32.mrb[3].mxu1 }
  0xe1   :  { %v222_v31 = vmax.f32 %v160_v21, 0.0  ;;  %v230_v32 = vmax.f32 %v192_v22, 0.0  ;;  %v163_v33 = vadd.f32 %v323_v14, %v162_v29  ;;  %v195_v34 = vadd.f32 %v323_v14, %v194_v30 }
  0xe2   :  { %v360_v35 = vpack.c.bf16 %v224_v25, %v224_v25  ;;  %v368_v36 = vpack.c.bf16 %v232_v26, %v232_v26  ;;  %v225_v37 = vmax.f32 %v171_v27, 0.0  ;;  %v233_v38 = vmax.f32 %v203_v28, 0.0 }
  0xe3   :  { %v358_v39 = vpack.c.bf16 %v222_v31, %v222_v31  ;;  %v366_v40 = vpack.c.bf16 %v230_v32, %v230_v32  ;;  %v223_v41 = vmax.f32 %v163_v33, 0.0  ;;  %v231_v42 = vmax.f32 %v195_v34, 0.0 }
  0xe4   :  { %305 = vst.msk [vmem:[%s548_s3 + $0x8] sm:$0xf] %vm302_vm3, %v360_v35  ;;  %313 = vst.msk [vmem:[%s548_s3 + $0x28] sm:$0xf] %vm302_vm3, %v368_v36  ;;  %v361_v43 = vpack.c.bf16 %v225_v37, %v225_v37  ;;  %v369_v44 = vpack.c.bf16 %v233_v38, %v233_v38 }
  0xe5   :  { %303 = vst.msk [vmem:[%s548_s3] sm:$0xf] %vm302_vm3, %v358_v39  ;;  %311 = vst.msk [vmem:[%s548_s3 + $0x20] sm:$0xf] %vm302_vm3, %v366_v40  ;;  %v359_v45 = vpack.c.bf16 %v223_v41, %v223_v41  ;;  %v367_v46 = vpack.c.bf16 %v231_v42, %v231_v42  ;;  %v394_v47 = vpop.f32.mrb[4].mxu0  ;;  %v402_v48 = vpop.f32.mrb[4].mxu1 }
  0xe6   :  { %306 = vst.msk [vmem:[%s548_s3 + $0xc] sm:$0xf] %vm302_vm3, %v361_v43  ;;  %314 = vst.msk [vmem:[%s548_s3 + $0x2c] sm:$0xf] %vm302_vm3, %v369_v44  ;;  %v184_v49 = vadd.f32 %v394_v47, %v323_v14  ;;  %v216_v50 = vadd.f32 %v402_v48, %v323_v14  ;;  %v175_v51 = vpop.f32.mrb[5].mxu0  ;;  %v207_v52 = vpop.f32.mrb[5].mxu1 }
  0xe7   :  { %304 = vst.msk [vmem:[%s548_s3 + $0x4] sm:$0xf] %vm302_vm3, %v359_v45  ;;  %312 = vst.msk [vmem:[%s548_s3 + $0x24] sm:$0xf] %vm302_vm3, %v367_v46  ;;  %v176_v53 = vadd.f32 %v323_v14, %v175_v51  ;;  %v208_v54 = vadd.f32 %v323_v14, %v207_v52  ;;  %v395_v55 = vpop.f32.mrb[6].mxu0  ;;  %v403_v56 = vpop.f32.mrb[6].mxu1 }
  0xe8   :  { %v228_v57 = vmax.f32 %v184_v49, 0.0  ;;  %v236_v58 = vmax.f32 %v216_v50, 0.0  ;;  %v187_v59 = vadd.f32 %v395_v55, %v323_v14  ;;  %v219_v60 = vadd.f32 %v403_v56, %v323_v14  ;;  %v178_v61 = vpop.f32.mrb[7].mxu0  ;;  %v210_v62 = vpop.f32.mrb[7].mxu1 }
  0xe9   :  { %v226_v63 = vmax.f32 %v176_v53, 0.0  ;;  %v234_v0 = vmax.f32 %v208_v54, 0.0  ;;  %v179_v1 = vadd.f32 %v323_v14, %v178_v61  ;;  %v211_v2 = vadd.f32 %v323_v14, %v210_v62 }
  0xea   :  { %v364_v3 = vpack.c.bf16 %v228_v57, %v228_v57  ;;  %v372_v4 = vpack.c.bf16 %v236_v58, %v236_v58  ;;  %v229_v5 = vmax.f32 %v187_v59, 0.0  ;;  %v237_v6 = vmax.f32 %v219_v60, 0.0 }
  0xeb   :  { %v362_v7 = vpack.c.bf16 %v226_v63, %v226_v63  ;;  %v370_v8 = vpack.c.bf16 %v234_v0, %v234_v0  ;;  %v227_v9 = vmax.f32 %v179_v1, 0.0  ;;  %v235_v10 = vmax.f32 %v211_v2, 0.0 }
  0xec   :  { %309 = vst.msk [vmem:[%s548_s3 + $0x18] sm:$0xf] %vm302_vm3, %v364_v3  ;;  %317 = vst.msk [vmem:[%s548_s3 + $0x38] sm:$0xf] %vm302_vm3, %v372_v4  ;;  %v365_v11 = vpack.c.bf16 %v229_v5, %v229_v5  ;;  %v373_v12 = vpack.c.bf16 %v237_v6, %v237_v6 }
  0xed   :  { %307 = vst.msk [vmem:[%s548_s3 + $0x10] sm:$0xf] %vm302_vm3, %v362_v7  ;;  %315 = vst.msk [vmem:[%s548_s3 + $0x30] sm:$0xf] %vm302_vm3, %v370_v8  ;;  %v363_v13 = vpack.c.bf16 %v227_v9, %v227_v9  ;;  %v371_v14 = vpack.c.bf16 %v235_v10, %v235_v10 }
  0xee   :  { %310 = vst.msk [vmem:[%s548_s3 + $0x1c] sm:$0xf] %vm302_vm3, %v365_v11  ;;  %318 = vst.msk [vmem:[%s548_s3 + $0x3c] sm:$0xf] %vm302_vm3, %v373_v12 }
  0xef   :  { %308 = vst.msk [vmem:[%s548_s3 + $0x14] sm:$0xf] %vm302_vm3, %v363_v13  ;;  %316 = vst.msk [vmem:[%s548_s3 + $0x34] sm:$0xf] %vm302_vm3, %v371_v14 }

// kernel: animenet5_forward.45
= control target key start
LH: loop header
LB: loop body
LE: loop exit
PB: predicated region body
PF: predicated region fallthrough
CT: control target
= control target key end

     0   :  { %s1268_s12 = smov 0   ;;  %s1270_s13 = smov 0   ;;  %s1510_s0 = inlined_call_operand.vmem [shape: bf16[2,10,10,32], index: 0, kind: input, shape index: {}]   ;;  %s1511_s1 = inlined_call_operand.vmem [shape: bf16[3,96,32], index: 1, kind: input, shape index: {}]   ;;  %s1512_s2 = inlined_call_operand.vmem [shape: f32[1,32], index: 2, kind: input, shape index: {}]   ;;  %s1513_s3 = inlined_call_operand.vmem [shape: bf16[2,8,8,32], index: 3, kind: output, shape index: {}]  }
   0x1   :  { %s1272_s14 = smov 0  }
   0x2 LB: > { %s25_s15 = sadd.s32 1, %s1240_s13  ;;  %p968_p0 = scmp.ge.s32.totalorder %s1244_s14, 1  ;;  %s1244_s14 = sphi %s1272_s14, %s13_s14   ;;  %s1240_s13 = sphi %s1270_s13, %s1515_s13   ;;  %s1236_s12 = sphi %s1268_s12, %s1514_s12  }
   0x3   : > { %p27_p1 = scmp.ge.s32.totalorder %s25_s15, 2  ;;  %p151_p2 = scmp.lt.s32.totalorder %s1244_s14, 3 }
   0x5   : > { %s1517_s15 = smov (%p27_p1, %s25_s15), 0  ;;  %p152_p3 = pnand %p968_p0, %p151_p2 }
   0x6   : > { %p179_p4 = scmp.lt.s32.totalorder (!%p152_p3), %s1236_s12, 1  ;;  %v1204_v0 = vld [vmem:[%s1511_s1 + $0x30] sm:$0xff] (!%p152_p3)   ;;  %v1205_v1 = vld [vmem:[%s1511_s1] sm:$0xff] (!%p152_p3)   ;;  %v1206_v2 = vld [vmem:[%s1511_s1 + $0x38] sm:$0xff] (!%p152_p3)   ;;  %s1246_s9 = smov (!%p152_p3), 64   ;;  %vm351_vm0 = vcmask (!%p152_p3), 261120  }
   0x7   : > { %155 = sbr.rel (%p152_p3) target bundleno = 407 (0x197), region = 32  ;;  %1079 = vmatprep.subr.bf16.mxu1 (!%p152_p3), %v1204_v0  ;;  %1099 = vmatprep.subr.bf16.mxu0 (!%p152_p3), %v1205_v1  ;;  %v1207_v3 = vld [vmem:[%s1511_s1 + $0x8] sm:$0xff] (!%p152_p3)   ;;  %v1208_v4 = vld [vmem:[%s1511_s1 + $0x40] sm:$0xff] (!%p152_p3)   ;;  %v1209_v5 = vld [vmem:[%s1511_s1 + $0x10] sm:$0xff] (!%p152_p3)   ;;  %vm376_vm1 = vcmask (!%p152_p3), 523264   ;;  %vm496_vm2 = vcmask (!%p152_p3), 785408  }
   0x8   : > { %1080 = vmatpush3.bf16.msra.mxu1 (!%p152_p3), %v1204_v0  ;;  %1100 = vmatpush3.bf16.msra.mxu0 (!%p152_p3), %v1205_v1  ;;  %v1210_v21 = vld [vmem:[%s1511_s1 + $0x48] sm:$0xff] (!%p152_p3)   ;;  %v1211_v24 = vld [vmem:[%s1511_s1 + $0x18] sm:$0xff] (!%p152_p3)   ;;  %v1212_v39 = vld [vmem:[%s1511_s1 + $0x50] sm:$0xff] (!%p152_p3)   ;;  %vm874_vm3 = vcmask (!%p152_p3), 257024  }
   0x9   : > { %1081 = vmatprep.subr.bf16.mxu1 (!%p152_p3), %v1206_v2  ;;  %1101 = vmatprep.subr.bf16.mxu0 (!%p152_p3), %v1207_v3  ;;  %v1213_v44 = vld [vmem:[%s1511_s1 + $0x20] sm:$0xff] (!%p152_p3)   ;;  %v1214_v50 = vld [vmem:[%s1511_s1 + $0x58] sm:$0xff] (!%p152_p3)   ;;  %v1215_v51 = vld [vmem:[%s1511_s1 + $0x28] sm:$0xff] (!%p152_p3)  }
   0xa   : > { %v1401_v63 = vld [vmem:[%s1511_s1 + $0x60] sm:$0xff] (!%p152_p3)  }
   0xc   : > { %1082 = vmatpush3.bf16.msra.mxu1 (!%p152_p3), %v1206_v2  ;;  %1102 = vmatpush3.bf16.msra.mxu0 (!%p152_p3), %v1207_v3 }
   0xd   : > { %1083 = vmatprep.subr.bf16.mxu1 (!%p152_p3), %v1208_v4  ;;  %1103 = vmatprep.subr.bf16.mxu0 (!%p152_p3), %v1209_v5 }
   0xe   : > { %s1519_s12 = smov (!%p179_p4, %s1236_s12), 1 }
   0xf   : > { %s1167_s22 = smul.u32 80, %s1519_s12  ;;  %s1048_s10 = sshll.u32 %s1519_s12, 5 }
  0x10   : > { %1084 = vmatpush3.bf16.msra.mxu1 %v1208_v4  ;;  %1104 = vmatpush3.bf16.msra.mxu0 %v1209_v5  ;;  %s192_s17 = scalar_lea.vmem %s1513_s3, %s1048_s10 }
  0x11   : > { %s1307_s29 = scalar_lea.vmem %s1510_s0, %s1167_s22  ;;  %1085 = vmatprep.subr.bf16.mxu1 %v1210_v21  ;;  %1105 = vmatprep.subr.bf16.mxu0 %v1211_v24  ;;  %s1247_s22 = smov 32  }
  0x12   : > { %v1313_v6 = vld [vmem:[%s1307_s29 + $0x8] sm:$0xf]  ;;  %v198_v7 = vld [vmem:[%s1307_s29 + $0xc] sm:$0x1]  ;;  %v1317_v8 = vld [vmem:[%s1307_s29] sm:$0xf] }
  0x13   : > { %v1320_v9 = vcombine.low %v1313_v6, %v198_v7  ;;  %v196_v10 = vld [vmem:[%s1307_s29 + $0x4] sm:$0x1]  ;;  %v1324_v11 = vld [vmem:[%s1307_s29 + $0x18] sm:$0xf]  ;;  %v202_v12 = vld [vmem:[%s1307_s29 + $0x1c] sm:$0x1] }
  0x14   : > { %v972_v13 = vcombine.low %v1317_v8, %v196_v10  ;;  %v1329_v14 = vcombine.low %v1324_v11, %v202_v12  ;;  %v1332_v15 = vld [vmem:[%s1307_s29 + $0x10] sm:$0xf]  ;;  %v200_v16 = vld [vmem:[%s1307_s29 + $0x14] sm:$0x1]  ;;  %v1336_v17 = vld [vmem:[%s1307_s29 + $0x20] sm:$0xf]  ;;  %1086 = vmatpush3.bf16.msra.mxu1 %v1210_v21  ;;  %1106 = vmatpush3.bf16.msra.mxu0 %v1211_v24 }
  0x15   : > { %v328_v18 = vrot.slane %v1320_v9, 1  ;;  %v974_v19 = vcombine.low %v1332_v15, %v200_v16  ;;  %v204_v20 = vld [vmem:[%s1307_s29 + $0x24] sm:$0x1]  ;;  %v265_v28 = vshll.u32 %v1320_v9, 16  ;;  %v1355_v31 = vld [vmem:[%s1307_s29 + $0x30] sm:$0xf]  ;;  %1087 = vmatprep.subr.bf16.mxu1 %v1212_v39  ;;  %1107 = vmatprep.subr.bf16.mxu0 %v1213_v44 }
  0x16   : > { %v327_v22 = vrot.slane %v972_v13, 1  ;;  %v1345_v23 = vcombine.low %v1336_v17, %v204_v20  ;;  %v330_v25 = vrot.slane %v1329_v14, 1  ;;  %v256_v26 = vshrl.u32 %v972_v13, 16  ;;  %v1358_v32 = vld [vmem:[%s1307_s29 + $0x28] sm:$0xf] }
  0x17   : > { %337 = vrot.lane.b32.xlu0 %v328_v18, %s1246_s9  ;;  %v258_v27 = vshll.u32 %v972_v13, 16  ;;  %v329_v29 = vrot.slane %v974_v19, 1  ;;  %v272_v30 = vshll.u32 %v974_v19, 16  ;;  %v208_v34 = vld [vmem:[%s1307_s29 + $0x34] sm:$0x1]  ;;  %v270_v37 = vshrl.u32 %v974_v19, 16 }
  0x18   : > { %335 = vrot.lane.b32.xlu1 %v327_v22, %s1246_s9  ;;  %v206_v35 = vld [vmem:[%s1307_s29 + $0x2c] sm:$0x1]  ;;  %v331_v36 = vrot.slane %v1345_v23, 1  ;;  %v263_v38 = vshrl.u32 %v1320_v9, 16  ;;  %v267_v41 = vrot.slane %v265_v28, 1  ;;  %v286_v42 = vshll.u32 %v1345_v23, 16  ;;  %1088 = vmatpush3.bf16.msra.mxu1 %v1212_v39 }
  0x19   : > { %v260_v33 = vrot.slane %v258_v27, 1  ;;  %v1370_v43 = vcombine.low %v1358_v32, %v206_v35  ;;  %v274_v45 = vrot.slane %v272_v30, 1  ;;  %v279_v46 = vshll.u32 %v1329_v14, 16  ;;  %v1379_v48 = vld [vmem:[%s1307_s29 + $0x38] sm:$0xf]  ;;  %1108 = vmatpush3.bf16.msra.mxu0 %v1213_v44  ;;  %1089 = vmatprep.subr.bf16.mxu1 %v1214_v50 }
  0x1a   : > { %v978_v47 = vcombine.low %v1355_v31, %v208_v34  ;;  %v210_v49 = vld [vmem:[%s1307_s29 + $0x3c] sm:$0x1]  ;;  %v277_v52 = vshrl.u32 %v1329_v14, 16  ;;  %v284_v53 = vshrl.u32 %v1345_v23, 16  ;;  %v268_v54 = vor.u32 %v267_v41, %v263_v38  ;;  %v1394_v58 = vld [vmem:[%s1307_s29 + $0x40] sm:$0xf]  ;;  %1109 = vmatprep.subr.bf16.mxu0 %v1215_v51 }
  0x1b   : > { %341 = vrot.lane.b32.xlu0 %v330_v25, %s1246_s9  ;;  %v261_v40 = vor.u32 %v260_v33, %v256_v26  ;;  %v288_v55 = vrot.slane %v286_v42, 1  ;;  %v293_v56 = vshll.u32 %v1370_v43, 16  ;;  %v979_v57 = vcombine.low %v1379_v48, %v210_v49  ;;  %v212_v62 = vld [vmem:[%s1307_s29 + $0x44] sm:$0x1]  ;;  %v1410_v12 = vld [vmem:[%s1307_s29 + $0x48] sm:$0xf] }
  0x1c   : > { %339 = vrot.lane.b32.xlu1 %v329_v29, %s1246_s9  ;;  %v275_v59 = vor.u32 %v274_v45, %v270_v37  ;;  %v281_v60 = vrot.slane %v279_v46, 1  ;;  %v300_v61 = vshll.u32 %v978_v47, 16  ;;  %v298_v0 = vshrl.u32 %v978_v47, 16  ;;  %1090 = vmatpush3.bf16.msra.mxu1 %v1214_v50  ;;  %v214_v13 = vld [vmem:[%s1307_s29 + $0x4c] sm:$0x1] }
  0x1d   : > { %v291_v1 = vshrl.u32 %v1370_v43, 16  ;;  %v289_v2 = vor.u32 %v288_v55, %v284_v53  ;;  %v295_v3 = vrot.slane %v293_v56, 1  ;;  %v307_v4 = vshll.u32 %v979_v57, 16  ;;  %1110 = vmatpush3.bf16.msra.mxu0 %v1215_v51  ;;  %1139 = vmatprep.subr.bf16.mxu1 %v1401_v63 }
  0x1e   : > { %v980_v5 = vcombine.low %v1394_v58, %v212_v62  ;;  %v282_v7 = vor.u32 %v281_v60, %v277_v52  ;;  %v302_v9 = vrot.slane %v300_v61, 1  ;;  %v305_v10 = vshrl.u32 %v979_v57, 16  ;;  %1119 = vmatprep.subr.bf16.mxu0 %v1401_v63  ;;  %v1217_v60 = vld [vmem:[%s1511_s1 + $0x68] sm:$0xff]  }
  0x1f   : > { %311 = vrot.lane.b32.xlu0 %v261_v40, %s1247_s22  ;;  %v296_v14 = vor.u32 %v295_v3, %v291_v1  ;;  %v309_v16 = vrot.slane %v307_v4, 1  ;;  %v1021_v21 = vcombine.low %v1410_v12, %v214_v13  ;;  %v332_v22 = vrot.slane %v1370_v43, 1  ;;  %v1219_v4 = vld [vmem:[%s1511_s1 + $0x78] sm:$0xff]  }
  0x20   : > { %343 = vrot.lane.b32.xlu1 %v331_v36, %s1246_s9  ;;  %v413_v18 = vshll.u32 %v980_v5, 16  ;;  %v303_v19 = vor.u32 %v302_v9, %v298_v0  ;;  %v411_v23 = vshrl.u32 %v980_v5, 16  ;;  %v333_v25 = vrot.slane %v978_v47, 1 }
  0x21   : > { %v310_v20 = vor.u32 %v309_v16, %v305_v10  ;;  %v701_v26 = vshll.u32 %v1021_v21, 16  ;;  %v334_v28 = vrot.slane %v979_v57, 1  ;;  %v699_v29 = vshrl.u32 %v1021_v21, 16  ;;  %v1220_v10 = vld [vmem:[%s1511_s1 + $0x80] sm:$0xff]  }
  0x22   : > { %v415_v24 = vrot.slane %v413_v18, 1  ;;  %v419_v33 = vrot.slane %v980_v5, 1  ;;  %v707_v35 = vrot.slane %v1021_v21, 1  ;;  %v1221_v21 = vld [vmem:[%s1511_s1 + $0x88] sm:$0xff]  }
  0x23   : > { %313 = vrot.lane.b32.xlu0 %v268_v54, %s1247_s22  ;;  %v703_v30 = vrot.slane %v701_v26, 1 }
  0x24   : > { %315 = vrot.lane.b32.xlu1 %v275_v59, %s1247_s22  ;;  %v416_v27 = vor.u32 %v415_v24, %v411_v23 }
  0x25   : > { %v704_v34 = vor.u32 %v703_v30, %v699_v29 }
  0x27   : > { %319 = vrot.lane.b32.xlu0 %v289_v2, %s1247_s22 }
  0x28   : > { %317 = vrot.lane.b32.xlu1 %v282_v7, %s1247_s22 }
  0x2b   : > { %321 = vrot.lane.b32.xlu0 %v296_v14, %s1247_s22 }
  0x2c   : > { %323 = vrot.lane.b32.xlu1 %v303_v19, %s1247_s22 }
  0x2f   : > { %325 = vrot.lane.b32.xlu0 %v310_v20, %s1247_s22 }
  0x30   : > { %345 = vrot.lane.b32.xlu1 %v332_v22, %s1246_s9 }
  0x33   : > { %347 = vrot.lane.b32.xlu0 %v333_v25, %s1246_s9 }
  0x34   : > { %417 = vrot.lane.b32.xlu1 %v416_v27, %s1247_s22 }
  0x37   : > { %349 = vrot.lane.b32.xlu0 %v334_v28, %s1246_s9 }
  0x38   : > { %420 = vrot.lane.b32.xlu1 %v419_v33, %s1246_s9 }
  0x3b   : > { %705 = vrot.lane.b32.xlu0 %v704_v34, %s1247_s22 }
  0x3c   : > { %708 = vrot.lane.b32.xlu1 %v707_v35, %s1246_s9 }
  0x89   : > { %v338_v36 = vpop.permute.xlu0 %337 }
  0x8a   : > { %v336_v37 = vpop.permute.xlu1 %335 }
  0x8d   : > { %v342_v38 = vpop.permute.xlu0 %341 }
  0x8e   : > { %v340_v39 = vpop.permute.xlu1 %339 }
  0x91   : > { %v312_v40 = vpop.permute.xlu0 %311 }
  0x92   : > { %v344_v41 = vpop.permute.xlu1 %343  ;;  %v354_v42 = vsel %vm351_vm0, %v1317_v8, %v312_v40 }
  0x93   : > { %v378_v49 = vsel %vm376_vm1, %v354_v42, %v336_v37 }
  0x95   : > { %v314_v43 = vpop.permute.xlu0 %313 }
  0x96   : > { %v316_v44 = vpop.permute.xlu1 %315  ;;  %v357_v45 = vsel %vm351_vm0, %v1313_v6, %v314_v43  ;;  %v1045_v43 = vld [vmem:[%s1512_s2] ss:$0 sm:$0xff] }
  0x97   : > { %v360_v46 = vsel %vm351_vm0, %v1332_v15, %v316_v44  ;;  %v380_v47 = vsel %vm376_vm1, %v357_v45, %v338_v36 }
  0x98   : > { %v382_v50 = vsel %vm376_vm1, %v360_v46, %v340_v39  ;;  %v1007_v51 = vcombine.low %v378_v49, %v380_v47 }
  0x99   : > { %v320_v52 = vpop.permute.xlu0 %319  ;;  %v993_v53 = vcombine.low %v380_v47, %v382_v50 }
  0x9a   : > { %v318_v8 = vpop.permute.xlu1 %317  ;;  %v366_v54 = vsel %vm351_vm0, %v1336_v17, %v320_v52  ;;  %1111 = vmatprep.mubr.msk.bf16.mxu0 %vm496_vm2, %v1007_v51  ;;  %v1218_v17 = vld [vmem:[%s1511_s1 + $0x70] sm:$0xff]  }
  0x9b   : > { %v363_v6 = vsel %vm351_vm0, %v1324_v11, %v318_v8  ;;  %v386_v15 = vsel %vm376_vm1, %v366_v54, %v344_v41  ;;  %1091 = vmatprep.mubr.msk.bf16.mxu1 %vm496_vm2, %v993_v53 }
  0x9c   : > { %v384_v55 = vsel %vm376_vm1, %v363_v6, %v342_v38 }
  0x9d   : > { %v994_v56 = vcombine.low %v384_v55, %v386_v15  ;;  %v1008_v57 = vcombine.low %v382_v50, %v384_v55  ;;  %v322_v59 = vpop.permute.xlu0 %321 }
  0x9e   : > { %v324_v61 = vpop.permute.xlu1 %323  ;;  %v369_v62 = vsel %vm351_vm0, %v1358_v32, %v322_v59 }
  0x9f   : > { %1092 = vmatmul.mubr.msk.bf16.vlgmr.msra.gmra.mrb[0].mxu1 %vm496_vm2, %v994_v56  ;;  %1112 = vmatmul.mubr.msk.bf16.vlgmr.msra.gmra.mrb[0].mxu0 %vm496_vm2, %v1008_v57  ;;  %v372_v3 = vsel %vm351_vm0, %v1355_v31, %v324_v61 }
  0xa0   : > { %1120 = vmatpush3.bf16.msra.mxu0 %v1401_v63  ;;  %1145 = vmatpush3.bf16.msra.mxu1 %v1401_v63 }
  0xa1   : > { %1121 = vmatprep.subr.bf16.mxu0 %v1217_v60  ;;  %1140 = vmatprep.subr.bf16.mxu1 %v1217_v60  ;;  %v326_v11 = vpop.permute.xlu0 %325 }
  0xa2   : > { %v346_v0 = vpop.permute.xlu1 %345  ;;  %v375_v9 = vsel %vm351_vm0, %v1379_v48, %v326_v11 }
  0xa3   : > { %v388_v1 = vsel %vm376_vm1, %v369_v62, %v346_v0 }
  0xa4   : > { %v1009_v2 = vcombine.low %v386_v15, %v388_v1  ;;  %1122 = vmatpush3.bf16.msra.mxu0 %v1217_v60  ;;  %1146 = vmatpush3.bf16.msra.mxu1 %v1217_v60 }
  0xa5   : > { %1123 = vmatprep.subr.bf16.mxu0 %v1218_v17  ;;  %1141 = vmatprep.subr.bf16.mxu1 %v1218_v17  ;;  %v348_v63 = vpop.permute.xlu0 %347 }
  0xa6   : > { %v418_v5 = vpop.permute.xlu1 %417  ;;  %1115 = vmatprep.mubr.msk.bf16.mxu0 %vm496_vm2, %v1009_v2  ;;  %v390_v32 = vsel %vm376_vm1, %v372_v3, %v348_v63 }
  0xa7   : > { %v995_v7 = vcombine.low %v388_v1, %v390_v32  ;;  %v424_v13 = vsel %vm351_vm0, %v1394_v58, %v418_v5 }
  0xa8   : > { %1124 = vmatpush3.bf16.msra.mxu0 %v1218_v17  ;;  %1147 = vmatpush3.bf16.msra.mxu1 %v1218_v17 }
  0xa9   : > { %1095 = vmatprep.mubr.msk.bf16.mxu1 %vm496_vm2, %v995_v7  ;;  %1125 = vmatprep.subr.bf16.mxu0 %v1219_v4  ;;  %v350_v31 = vpop.permute.xlu0 %349 }
  0xaa   : > { %v421_v14 = vpop.permute.xlu1 %420  ;;  %1142 = vmatprep.subr.bf16.mxu1 %v1219_v4  ;;  %v392_v16 = vsel %vm376_vm1, %v375_v9, %v350_v31 }
  0xab   : > { %v426_v18 = vsel %vm376_vm1, %v424_v13, %v421_v14  ;;  %v1010_v19 = vcombine.low %v390_v32, %v392_v16 }
  0xac   : > { %v996_v20 = vcombine.low %v392_v16, %v426_v18  ;;  %1126 = vmatpush3.bf16.msra.mxu0 %v1219_v4  ;;  %1148 = vmatpush3.bf16.msra.mxu1 %v1219_v4 }
  0xad   : > { %1116 = vmatmul.mubr.msk.bf16.gmra.mrb[4].mxu0 %vm496_vm2, %v1010_v19  ;;  %1127 = vmatprep.subr.bf16.mxu0 %v1220_v10  ;;  %v706_v48 = vpop.permute.xlu0 %705 }
  0xae   : > { %1096 = vmatmul.mubr.msk.bf16.gmra.mrb[4].mxu1 %vm496_vm2, %v996_v20  ;;  %1143 = vmatprep.subr.bf16.mxu1 %v1220_v10  ;;  %v712_v58 = vsel %vm351_vm0, %v1410_v12, %v706_v48  ;;  %v709_v22 = vpop.permute.xlu1 %708 }
  0xaf   : > { %1131 = vmatprep.mubr.msk.bf16.mxu0 %vm496_vm2, %v1008_v57  ;;  %1135 = vmatprep.mubr.msk.bf16.mxu1 %vm496_vm2, %v1010_v19  ;;  %v714_v23 = vsel %vm376_vm1, %v712_v58, %v709_v22 }
  0xb0   : > { %1128 = vmatpush3.bf16.msra.mxu0 %v1220_v10  ;;  %1149 = vmatpush3.bf16.msra.mxu1 %v1220_v10  ;;  %v1034_v24 = vcombine.low %v426_v18, %v714_v23 }
  0xb1   : > { %1129 = vmatprep.subr.bf16.mxu0 %v1221_v21  ;;  %1144 = vmatprep.subr.bf16.mxu1 %v1221_v21 }
  0xb4   : > { %1130 = vmatpush3.bf16.msra.mxu0 %v1221_v21  ;;  %1150 = vmatpush3.bf16.msra.mxu1 %v1221_v21 }
  0xb7   : > { %1132 = vmatmul.mubr.msk.bf16.vlgmr.msra.gmra.mrb[0].mxu0 %vm496_vm2, %v1009_v2  ;;  %1136 = vmatmul.mubr.msk.bf16.vlgmr.msra.gmra.mrb[8].mxu1 %vm496_vm2, %v1034_v24 }
 0x172   : > { %v1093_v25 = vpop.f32.mrb[0].mxu1 }
 0x173   : > { %v543_v12 = vpop.f32.mrb[1].mxu1 }
 0x174   : > { %v1094_v26 = vpop.f32.mrb[2].mxu1 }
 0x175   : > { %v546_v27 = vpop.f32.mrb[3].mxu1 }
 0x180   : > { %v1117_v28 = vpop.f32.mrb[4].mxu0 }
 0x181   : > { %v1097_v29 = vpop.f32.mrb[4].mxu1  ;;  %v678_v30 = vpop.f32.mrb[5].mxu0 }
 0x182   : > { %v687_v33 = vadd.f32 %v1117_v28, %v1097_v29  ;;  %v559_v34 = vpop.f32.mrb[5].mxu1  ;;  %v1118_v35 = vpop.f32.mrb[6].mxu0 }
 0x183   : > { %v679_v36 = vadd.f32 %v678_v30, %v559_v34  ;;  %v1098_v37 = vpop.f32.mrb[6].mxu1  ;;  %v681_v38 = vpop.f32.mrb[7].mxu0 }
 0x184   : > { %v690_v39 = vadd.f32 %v1118_v35, %v1098_v37  ;;  %v562_v40 = vpop.f32.mrb[7].mxu1 }
 0x185   : > { %v682_v41 = vadd.f32 %v681_v38, %v562_v40 }
 0x18a   : > { %v1133_v42 = vpop.f32.mrb[0].mxu0  ;;  %v1137_v44 = vpop.f32.mrb[8].mxu1 }
 0x18b   : > { %v1151_v45 = vadd.f32 %v1133_v42, %v1093_v25  ;;  %v841_v46 = vadd.f32 %v1137_v44, %v687_v33  ;;  %v804_v47 = vpop.f32.mrb[1].mxu0  ;;  %v820_v49 = vpop.f32.mrb[9].mxu1 }
 0x18c   : > { %v1152_v50 = vadd.f32 %v804_v47, %v543_v12  ;;  %v839_v51 = vadd.f32 %v820_v49, %v679_v36  ;;  %v1134_v52 = vpop.f32.mrb[2].mxu0  ;;  %v1138_v53 = vpop.f32.mrb[10].mxu1 }
 0x18d   : > { %v852_v8 = vadd.f32 %v1151_v45, %v1045_v43  ;;  %v856_v54 = vadd.f32 %v1045_v43, %v841_v46  ;;  %v1153_v6 = vadd.f32 %v1134_v52, %v1094_v26  ;;  %v842_v15 = vadd.f32 %v1138_v53, %v690_v39  ;;  %v807_v55 = vpop.f32.mrb[3].mxu0  ;;  %v823_v56 = vpop.f32.mrb[11].mxu1 }
 0x18e   : > { %v850_v57 = vadd.f32 %v1152_v50, %v1045_v43  ;;  %v854_v59 = vadd.f32 %v1045_v43, %v839_v51  ;;  %v1154_v60 = vadd.f32 %v807_v55, %v546_v27  ;;  %v840_v61 = vadd.f32 %v823_v56, %v682_v41 }
 0x18f   : > { %v860_v11 = vmax.f32 %v852_v8, 0.0  ;;  %v864_v17 = vmax.f32 %v856_v54, 0.0  ;;  %v853_v62 = vadd.f32 %v1153_v6, %v1045_v43  ;;  %v857_v0 = vadd.f32 %v1045_v43, %v842_v15 }
 0x190   : > { %v858_v1 = vmax.f32 %v850_v57, 0.0  ;;  %v862_v2 = vmax.f32 %v854_v59, 0.0  ;;  %v851_v3 = vadd.f32 %v1154_v60, %v1045_v43  ;;  %v855_v63 = vadd.f32 %v1045_v43, %v840_v61 }
 0x191   : > { %v868_v4 = vpack.c.bf16 %v860_v11, %v860_v11  ;;  %v872_v5 = vpack.c.bf16 %v864_v17, %v864_v17  ;;  %v861_v32 = vmax.f32 %v853_v62, 0.0  ;;  %v865_v7 = vmax.f32 %v857_v0, 0.0 }
 0x192   : > { %v866_v9 = vpack.c.bf16 %v858_v1, %v858_v1  ;;  %v870_v31 = vpack.c.bf16 %v862_v2, %v862_v2  ;;  %v859_v10 = vmax.f32 %v851_v3, 0.0  ;;  %v863_v13 = vmax.f32 %v855_v63, 0.0 }
 0x193   : > { %877 = vst.msk [vmem:[%s192_s17 + $0x8] sm:$0xf] %vm874_vm3, %v868_v4  ;;  %881 = vst.msk [vmem:[%s192_s17 + $0x18] sm:$0xf] %vm874_vm3, %v872_v5  ;;  %v869_v14 = vpack.c.bf16 %v861_v32, %v861_v32  ;;  %v873_v16 = vpack.c.bf16 %v865_v7, %v865_v7 }
 0x194   : > { %875 = vst.msk [vmem:[%s192_s17] sm:$0xf] %vm874_vm3, %v866_v9  ;;  %879 = vst.msk [vmem:[%s192_s17 + $0x10] sm:$0xf] %vm874_vm3, %v870_v31  ;;  %v867_v18 = vpack.c.bf16 %v859_v10, %v859_v10  ;;  %v871_v19 = vpack.c.bf16 %v863_v13, %v863_v13 }
 0x195   : > { %878 = vst.msk [vmem:[%s192_s17 + $0xc] sm:$0xf] %vm874_vm3, %v869_v14  ;;  %882 = vst.msk [vmem:[%s192_s17 + $0x1c] sm:$0xf] %vm874_vm3, %v873_v16 }
 0x196   : > { %876 = vst.msk [vmem:[%s192_s17 + $0x4] sm:$0xf] %vm874_vm3, %v867_v18  ;;  %880 = vst.msk [vmem:[%s192_s17 + $0x14] sm:$0xf] %vm874_vm3, %v871_v19 }
 0x197 PF: > { %s13_s14 = sadd.s32 1, %s1244_s14   ;;  %s1514_s12 = smov %s1240_s13 }
 0x198   : > { %p10_p5 = scmp.ge.s32.totalorder %s13_s14, 4   ;;  %s1515_s13 = smov %s1517_s15 }
 0x19a   :  { %12 = sbr.rel (!%p10_p5) target bundleno = 2 (0x2), region = 64 }

// kernel: animenet5_forward.46
= control target key start
LH: loop header
LB: loop body
LE: loop exit
PB: predicated region body
PF: predicated region fallthrough
CT: control target
= control target key end

     0   :  { %vm204_vm0 = vcmask 261120   ;;  %vm329_vm1 = vcmask 519168   ;;  %s550_s1 = inlined_call_operand.vmem [shape: bf16[288,64], index: 1, kind: input, shape index: {}]   ;;  %s551_s0 = inlined_call_operand.vmem [shape: bf16[32,288], index: 0, kind: input, shape index: {}]   ;;  %s552_s2 = inlined_call_operand.vmem [shape: f32[1,64], index: 2, kind: input, shape index: {}]   ;;  %s553_s3 = inlined_call_operand.vmem [shape: bf16[32,64], index: 3, kind: output, shape index: {}]  }
   0x1   :  { %v413_v0 = vld [vmem:[%s550_s1 + $0x40] sm:$0xff]   ;;  %v415_v2 = vld [vmem:[%s550_s1 + $0x48] sm:$0xff]   ;;  %v417_v4 = vld [vmem:[%s550_s1 + $0x50] sm:$0xff]  }
   0x2   :  { %v414_v1 = vld [vmem:[%s550_s1] sm:$0xff]   ;;  %373 = vmatprep.subr.bf16.mxu0 %v413_v0  ;;  %v416_v3 = vld [vmem:[%s550_s1 + $0x8] sm:$0xff]   ;;  %v418_v5 = vld [vmem:[%s550_s1 + $0x10] sm:$0xff]  }
   0x3   :  { %374 = vmatpush3.bf16.msra.mxu0 %v414_v1  ;;  %v419_v6 = vld [vmem:[%s550_s1 + $0x58] sm:$0xff]   ;;  %v421_v8 = vld [vmem:[%s550_s1 + $0x60] sm:$0xff]   ;;  %v423_v11 = vld [vmem:[%s550_s1 + $0x68] sm:$0xff]  }
   0x4   :  { %375 = vmatprep.subr.bf16.mxu0 %v415_v2  ;;  %v420_v7 = vld [vmem:[%s550_s1 + $0x18] sm:$0xff]   ;;  %v422_v9 = vld [vmem:[%s550_s1 + $0x20] sm:$0xff]   ;;  %v424_v12 = vld [vmem:[%s550_s1 + $0x28] sm:$0xff]  }
   0x5   :  { %v428_v10 = vld [vmem:[%s550_s1 + $0x80] sm:$0xff]   ;;  %v425_v13 = vld [vmem:[%s550_s1 + $0x70] sm:$0xff]   ;;  %v433_v15 = vld [vmem:[%s550_s1 + $0x88] sm:$0xff]  }
   0x6   :  { %405 = vmatprep.subr.bf16.mxu1 %v428_v10  ;;  %v432_v14 = vld [vmem:[%s551_s0 + $0x4] ss:$12 sps:$4 sm:$0xff]   ;;  %v434_v16 = vld [vmem:[%s551_s0 + $0x8] ss:$12 sps:$4 sm:$0xff]   ;;  %v435_v17 = vld [vmem:[%s551_s0 + $0x20] ss:$12 sps:$4 sm:$0xff]  }
   0x7   :  { %376 = vmatpush3.bf16.msra.mxu0 %v416_v3  ;;  %406 = vmatpush3.bf16.msra.mxu1 %v428_v10  ;;  %v426_v18 = vld [vmem:[%s550_s1 + $0x30] sm:$0xff]   ;;  %v427_v19 = vld [vmem:[%s550_s1 + $0x78] sm:$0xff]   ;;  %v430_v21 = vld [vmem:[%s551_s0] ss:$12 sps:$4 sm:$0xff]  }
   0x8   :  { %377 = vmatprep.subr.bf16.mxu0 %v417_v4  ;;  %243 = vmatprep.mubr.bf16.mxu0 %v432_v14  ;;  %v429_v20 = vld [vmem:[%s550_s1 + $0x38] sm:$0xff]   ;;  %v338_v30 = vld [vmem:[%s552_s2] ss:$0 sm:$0xff] }
   0x9   :  { %407 = vmatprep.subr.bf16.mxu1 %v433_v15  ;;  %409 = vmatprep.mubr.msk.bf16.mxu1 %vm204_vm0, %v434_v16  ;;  %v436_v22 = vld [vmem:[%s551_s0 + $0x1c] ss:$12 sps:$4 sm:$0xff]   ;;  %v438_v23 = vld [vmem:[%s551_s0 + $0x18] ss:$12 sps:$4 sm:$0xff]  }
   0xb   :  { %378 = vmatpush3.bf16.msra.mxu0 %v418_v5  ;;  %408 = vmatpush3.bf16.msra.mxu1 %v433_v15 }
   0xc   :  { %379 = vmatprep.subr.bf16.mxu0 %v419_v6 }
   0xe   :  { %410 = vmatmul.mubr.msk.bf16.vlgmr.msra.gmra.mrb[0].mxu1 %vm204_vm0, %v435_v17 }
   0xf   :  { %380 = vmatpush3.bf16.msra.mxu0 %v420_v7 }
  0x10   :  { %381 = vmatprep.subr.bf16.mxu0 %v421_v8 }
  0x13   :  { %382 = vmatpush3.bf16.msra.mxu0 %v422_v9 }
  0x14   :  { %383 = vmatprep.subr.bf16.mxu0 %v423_v11 }
  0x17   :  { %384 = vmatpush3.bf16.msra.mxu0 %v424_v12 }
  0x18   :  { %385 = vmatprep.subr.bf16.mxu0 %v425_v13 }
  0x1b   :  { %386 = vmatpush3.bf16.msra.mxu0 %v426_v18 }
  0x1c   :  { %387 = vmatprep.subr.bf16.mxu0 %v427_v19 }
  0x1f   :  { %388 = vmatpush3.bf16.msra.mxu0 %v429_v20 }
  0x22   :  { %244 = vmatmul.mubr.bf16.vlgmr.msra.gmra.mrb[0].mxu0 %v430_v21 }
  0x23   :  { %251 = vmatprep.mubr.bf16.mxu0 %v436_v22 }
  0x2a   :  { %252 = vmatmul.mubr.bf16.gmra.mrb[4].mxu0 %v438_v23 }
  0xe1   :  { %v411_v24 = vpop.f32.mrb[0].mxu1 }
  0xe2   :  { %v294_v25 = vpop.f32.mrb[1].mxu1 }
  0xe3   :  { %v412_v26 = vpop.f32.mrb[2].mxu1 }
  0xe4   :  { %v297_v27 = vpop.f32.mrb[3].mxu1 }
  0xf5   :  { %v389_v28 = vpop.f32.mrb[0].mxu0 }
  0xf6   :  { %v390_v29 = vpop.f32.mrb[1].mxu0 }
  0xf7   :  { %v391_v31 = vadd.f32 %v390_v29, %v389_v28  ;;  %v392_v32 = vpop.f32.mrb[2].mxu0 }
  0xf8   :  { %v393_v33 = vpop.f32.mrb[3].mxu0 }
  0xf9   :  { %v394_v34 = vadd.f32 %v393_v33, %v392_v32  ;;  %v246_v35 = vadd.f32 %v391_v31, %v338_v30 }
  0xfb   :  { %v295_v36 = vadd.f32 %v294_v25, %v246_v35  ;;  %v249_v37 = vadd.f32 %v394_v34, %v338_v30 }
  0xfd   :  { %v309_v38 = vmax.f32 %v295_v36, 0.0  ;;  %v298_v39 = vadd.f32 %v297_v27, %v249_v37  ;;  %v395_v40 = vpop.f32.mrb[4].mxu0 }
  0xfe   :  { %v396_v41 = vpop.f32.mrb[5].mxu0 }
  0xff   :  { %v369_v42 = vpack.c.bf16 %v309_v38, %v309_v38  ;;  %v310_v43 = vmax.f32 %v298_v39, 0.0  ;;  %v397_v44 = vadd.f32 %v396_v41, %v395_v40  ;;  %v398_v45 = vpop.f32.mrb[6].mxu0 }
 0x100   :  { %v399_v46 = vpop.f32.mrb[7].mxu0 }
 0x101   :  { %330 = vst.msk [vmem:[%s553_s3] sm:$0xf] %vm329_vm1, %v369_v42  ;;  %v370_v47 = vpack.c.bf16 %v310_v43, %v310_v43  ;;  %v254_v48 = vadd.f32 %v397_v44, %v338_v30  ;;  %v400_v49 = vadd.f32 %v399_v46, %v398_v45 }
 0x103   :  { %331 = vst.msk [vmem:[%s553_s3 + $0x4] sm:$0xf] %vm329_vm1, %v370_v47  ;;  %v303_v50 = vadd.f32 %v411_v24, %v254_v48  ;;  %v257_v51 = vadd.f32 %v400_v49, %v338_v30 }
 0x105   :  { %v311_v52 = vmax.f32 %v303_v50, 0.0  ;;  %v306_v53 = vadd.f32 %v412_v26, %v257_v51 }
 0x107   :  { %v371_v54 = vpack.c.bf16 %v311_v52, %v311_v52  ;;  %v312_v55 = vmax.f32 %v306_v53, 0.0 }
 0x109   :  { %332 = vst.msk [vmem:[%s553_s3 + $0x8] sm:$0xf] %vm329_vm1, %v371_v54  ;;  %v372_v56 = vpack.c.bf16 %v312_v55, %v312_v55 }
 0x10b   :  { %333 = vst.msk [vmem:[%s553_s3 + $0xc] sm:$0xf] %vm329_vm1, %v372_v56 }

// kernel: animenet5_forward.47
= control target key start
LH: loop header
LB: loop body
LE: loop exit
PB: predicated region body
PF: predicated region fallthrough
CT: control target
= control target key end

     0   :  { %s1152_s12 = smov 0   ;;  %s1154_s13 = smov 0   ;;  %s1405_s0 = inlined_call_operand.vmem [shape: bf16[2,6,6,64], index: 0, kind: input, shape index: {}]   ;;  %s1406_s1 = inlined_call_operand.vmem [shape: bf16[3,192,64], index: 1, kind: input, shape index: {}]   ;;  %s1407_s2 = inlined_call_operand.vmem [shape: f32[1,64], index: 2, kind: input, shape index: {}]   ;;  %s1408_s3 = inlined_call_operand.vmem [shape: bf16[2,4,4,64], index: 3, kind: output, shape index: {}]  }
   0x1   :  { %s1156_s14 = smov 0  }
   0x2 LB: > { %s25_s15 = sadd.s32 1, %s1123_s13  ;;  %p934_p0 = scmp.ge.s32.totalorder %s1127_s14, 1  ;;  %s1127_s14 = sphi %s1156_s14, %s13_s14   ;;  %s1123_s13 = sphi %s1154_s13, %s1410_s13   ;;  %s1119_s12 = sphi %s1152_s12, %s1409_s12  }
   0x3   : > { %p27_p1 = scmp.ge.s32.totalorder %s25_s15, 2  ;;  %p151_p2 = scmp.lt.s32.totalorder %s1127_s14, 3 }
   0x5   : > { %s1412_s15 = smov (%p27_p1, %s25_s15), 0  ;;  %p152_p3 = pnand %p934_p0, %p151_p2 }
   0x6   : > { %p179_p4 = scmp.lt.s32.totalorder (!%p152_p3), %s1119_s12, 1  ;;  %v1069_v0 = vld [vmem:[%s1406_s1 + $0x60] sm:$0xff] (!%p152_p3)   ;;  %v1129_v1 = vmov (!%p152_p3), 0   ;;  %v1070_v2 = vld [vmem:[%s1406_s1 + $0x68] sm:$0xff] (!%p152_p3)   ;;  %v1072_v5 = vld [vmem:[%s1406_s1 + $0x70] sm:$0xff] (!%p152_p3)   ;;  %s1130_s11 = smov (!%p152_p3), 64   ;;  %v274_v63 = vlaneseq (!%p152_p3) }
   0x7   : > { %155 = sbr.rel (%p152_p3) target bundleno = 430 (0x1ae), region = 32  ;;  %470 = vmatprep.subr.bf16.mxu0 (!%p152_p3), %v1129_v1  ;;  %605 = vmatprep.subr.bf16.mxu1 (!%p152_p3), %v1129_v1  ;;  %v1071_v3 = vld [vmem:[%s1406_s1] sm:$0xff] (!%p152_p3)   ;;  %v1073_v4 = vld [vmem:[%s1406_s1 + $0x8] sm:$0xff] (!%p152_p3)   ;;  %v1075_v18 = vld [vmem:[%s1406_s1 + $0x10] sm:$0xff] (!%p152_p3)   ;;  %v1131_v61 = vmov (!%p152_p3), 1983009808  }
   0x8   : > { %471 = vmatpush1.bf16.msra.mxu0 (!%p152_p3), %v1069_v0  ;;  %606 = vmatpush1.bf16.msra.mxu1 (!%p152_p3), %v1071_v3  ;;  %v1074_v23 = vld [vmem:[%s1406_s1 + $0x78] sm:$0xff] (!%p152_p3)   ;;  %v1076_v37 = vld [vmem:[%s1406_s1 + $0x80] sm:$0xff] (!%p152_p3)   ;;  %v1078_v45 = vld [vmem:[%s1406_s1 + $0x88] sm:$0xff] (!%p152_p3)   ;;  %v272_v62 = vunpack.c.l.s4 (!%p152_p3), %v1131_v61  ;;  %vm253_vm0 = vcmask (!%p152_p3), 523264   ;;  %v275_v3 = vshrl.u32 (!%p152_p3), %v274_v63, 7  ;;  %vm844_vm1 = vcmask (!%p152_p3), 517120  }
   0x9   : > { %472 = vmatprep.subr.bf16.mxu0 (!%p152_p3), %v1129_v1  ;;  %607 = vmatprep.subr.bf16.mxu1 (!%p152_p3), %v1129_v1  ;;  %v1077_v34 = vld [vmem:[%s1406_s1 + $0x18] sm:$0xff] (!%p152_p3)   ;;  %v1079_v44 = vld [vmem:[%s1406_s1 + $0x20] sm:$0xff] (!%p152_p3)   ;;  %v1081_v48 = vld [vmem:[%s1406_s1 + $0x28] sm:$0xff] (!%p152_p3)  }
   0xa   : > { %v1080_v49 = vld [vmem:[%s1406_s1 + $0x90] sm:$0xff] (!%p152_p3)   ;;  %v1082_v51 = vld [vmem:[%s1406_s1 + $0x98] sm:$0xff] (!%p152_p3)   ;;  %v1084_v53 = vld [vmem:[%s1406_s1 + $0xa0] sm:$0xff] (!%p152_p3)  }
   0xb   : > { %v1083_v50 = vld [vmem:[%s1406_s1 + $0x30] sm:$0xff] (!%p152_p3)   ;;  %v1085_v52 = vld [vmem:[%s1406_s1 + $0x38] sm:$0xff] (!%p152_p3)   ;;  %v1087_v54 = vld [vmem:[%s1406_s1 + $0x40] sm:$0xff] (!%p152_p3)  }
   0xc   : > { %473 = vmatpush1.bf16.msra.mxu0 (!%p152_p3), %v1070_v2  ;;  %608 = vmatpush1.bf16.msra.mxu1 (!%p152_p3), %v1073_v4  ;;  %v1086_v55 = vld [vmem:[%s1406_s1 + $0xa8] sm:$0xff] (!%p152_p3)   ;;  %v1088_v57 = vld [vmem:[%s1406_s1 + $0xb0] sm:$0xff] (!%p152_p3)   ;;  %v1090_v59 = vld [vmem:[%s1406_s1 + $0xb8] sm:$0xff] (!%p152_p3)   ;;  %v273_v2 = vunpack.c.0.s8 (!%p152_p3), %v272_v62 }
   0xd   : > { %474 = vmatprep.subr.bf16.mxu0 (!%p152_p3), %v1129_v1  ;;  %609 = vmatprep.subr.bf16.mxu1 (!%p152_p3), %v1129_v1  ;;  %v1089_v56 = vld [vmem:[%s1406_s1 + $0x48] sm:$0xff] (!%p152_p3)   ;;  %v1091_v58 = vld [vmem:[%s1406_s1 + $0x50] sm:$0xff] (!%p152_p3)   ;;  %v1093_v60 = vld [vmem:[%s1406_s1 + $0x58] sm:$0xff] (!%p152_p3)  }
   0xe   : > { %s1414_s12 = smov (!%p179_p4, %s1119_s12), 1  ;;  %v1104_v61 = vld [vmem:[%s1406_s1 + $0x118] sm:$0xff]  }
   0xf   : > { %s1035_s22 = smul.u32 24, %s1414_s12  ;;  %s1034_s26 = sshll.u32 %s1414_s12, 3 }
  0x10   : > { %475 = vmatpush1.bf16.msra.mxu0 %v1072_v5  ;;  %610 = vmatpush1.bf16.msra.mxu1 %v1075_v18  ;;  %s192_s29 = scalar_lea.vmem %s1408_s3, %s1034_s26 }
  0x11   : > { %s183_s27 = scalar_lea.vmem %s1405_s0, %s1035_s22  ;;  %476 = vmatprep.subr.bf16.mxu0 %v1129_v1  ;;  %611 = vmatprep.subr.bf16.mxu1 %v1129_v1 }
  0x12   : > { %v1195_v6 = vld [vmem:[%s183_s27 + $0xc] sm:$0x7]  ;;  %v1197_v7 = vld [vmem:[%s183_s27 + $0x4] sm:$0x7]  ;;  %v1199_v8 = vld [vmem:[%s183_s27 + $0x10] sm:$0x7] }
  0x13   : > { %v1204_v9 = vcombine.low %v1195_v6, %v1195_v6  ;;  %v1208_v10 = vcombine.low %v1197_v7, %v1197_v7  ;;  %v1212_v11 = vcombine.low %v1199_v8, %v1199_v8  ;;  %v1214_v12 = vld [vmem:[%s183_s27 + $0x8] sm:$0x7]  ;;  %v1216_v13 = vld [vmem:[%s183_s27 + $0x14] sm:$0x7]  ;;  %v1218_v14 = vld [vmem:[%s183_s27] sm:$0x7] }
  0x14   : > { %v1222_v15 = vcombine.low %v1214_v12, %v1214_v12  ;;  %v1226_v16 = vcombine.low %v1216_v13, %v1216_v13  ;;  %v1230_v17 = vcombine.low %v1218_v14, %v1218_v14  ;;  %477 = vmatpush1.bf16.msra.mxu0 %v1074_v23  ;;  %612 = vmatpush1.bf16.msra.mxu1 %v1077_v34 }
  0x15   : > { %v235_v19 = vshrl.u32 %v1204_v9, 16  ;;  %v237_v20 = vshll.u32 %v1204_v9, 16  ;;  %v221_v21 = vshrl.u32 %v1208_v10, 16  ;;  %v223_v22 = vshll.u32 %v1208_v10, 16  ;;  %478 = vmatprep.subr.bf16.mxu0 %v1129_v1  ;;  %613 = vmatprep.subr.bf16.mxu1 %v1129_v1 }
  0x16   : > { %v330_v24 = vshrl.u32 %v1212_v11, 16  ;;  %v332_v25 = vshll.u32 %v1212_v11, 16  ;;  %v230_v26 = vshll.u32 %v1222_v15, 16  ;;  %v228_v29 = vshrl.u32 %v1222_v15, 16 }
  0x17   : > { %v239_v27 = vrot.slane %v237_v20, 1  ;;  %v225_v28 = vrot.slane %v223_v22, 1  ;;  %v652_v30 = vshll.u32 %v1226_v16, 16  ;;  %v216_v33 = vshll.u32 %v1230_v17, 16 }
  0x18   : > { %v334_v31 = vrot.slane %v332_v25, 1  ;;  %v232_v32 = vrot.slane %v230_v26, 1  ;;  %v650_v38 = vshrl.u32 %v1226_v16, 16  ;;  %v214_v39 = vshrl.u32 %v1230_v17, 16  ;;  %479 = vmatpush1.bf16.msra.mxu0 %v1076_v37  ;;  %614 = vmatpush1.bf16.msra.mxu1 %v1079_v44 }
  0x19   : > { %v240_v35 = vor.u32 %v239_v27, %v235_v19  ;;  %v226_v36 = vor.u32 %v225_v28, %v221_v21  ;;  %v654_v42 = vrot.slane %v652_v30, 1  ;;  %v218_v43 = vrot.slane %v216_v33, 1  ;;  %480 = vmatprep.subr.bf16.mxu0 %v1129_v1  ;;  %615 = vmatprep.subr.bf16.mxu1 %v1129_v1 }
  0x1a   : > { %v335_v40 = vor.u32 %v334_v31, %v330_v24  ;;  %v233_v41 = vor.u32 %v232_v32, %v228_v29  ;;  %v252_v0 = vrot.slane %v1204_v9, 1  ;;  %v250_v5 = vrot.slane %v1208_v10, 1 }
  0x1b   : > { %247 = vrot.lane.b32.xlu1 %v240_v35, %s1130_s11  ;;  %243 = vrot.lane.b32.xlu0 %v226_v36, %s1130_s11  ;;  %v655_v46 = vor.u32 %v654_v42, %v650_v38  ;;  %v219_v47 = vor.u32 %v218_v43, %v214_v39  ;;  %v338_v21 = vrot.slane %v1212_v11, 1  ;;  %v251_v22 = vrot.slane %v1222_v15, 1 }
  0x1c   : > { %481 = vmatpush1.bf16.msra.mxu0 %v1078_v45  ;;  %616 = vmatpush1.bf16.msra.mxu1 %v1081_v48  ;;  %v276_v23 = vsub.s32 %v273_v2, %v275_v3  ;;  %v658_v29 = vrot.slane %v1226_v16, 1 }
  0x1d   : > { %482 = vmatprep.subr.bf16.mxu0 %v1129_v1  ;;  %617 = vmatprep.subr.bf16.mxu1 %v1129_v1 }
  0x1f   : > { %336 = vrot.lane.b32.xlu1 %v335_v40, %s1130_s11  ;;  %245 = vrot.lane.b32.xlu0 %v233_v41, %s1130_s11 }
  0x20   : > { %483 = vmatpush1.bf16.msra.mxu0 %v1080_v49  ;;  %618 = vmatpush1.bf16.msra.mxu1 %v1083_v50 }
  0x21   : > { %484 = vmatprep.subr.bf16.mxu0 %v1129_v1  ;;  %619 = vmatprep.subr.bf16.mxu1 %v1129_v1 }
  0x23   : > { %656 = vrot.lane.b32.xlu1 %v655_v46, %s1130_s11  ;;  %241 = vrot.lane.b32.xlu0 %v219_v47, %s1130_s11 }
  0x24   : > { %485 = vmatpush1.bf16.msra.mxu0 %v1082_v51  ;;  %620 = vmatpush1.bf16.msra.mxu1 %v1085_v52  ;;  %v1094_v51 = vld [vmem:[%s1406_s1 + $0xc8] sm:$0xff]   ;;  %v1095_v52 = vld [vmem:[%s1406_s1 + $0xd0] sm:$0xff]  }
  0x25   : > { %486 = vmatprep.subr.bf16.mxu0 %v1129_v1  ;;  %621 = vmatprep.subr.bf16.mxu1 %v1129_v1 }
  0x28   : > { %487 = vmatpush1.bf16.msra.mxu0 %v1084_v53  ;;  %622 = vmatpush1.bf16.msra.mxu1 %v1087_v54  ;;  %v1096_v53 = vld [vmem:[%s1406_s1 + $0xd8] sm:$0xff]   ;;  %v1097_v54 = vld [vmem:[%s1406_s1 + $0xe0] sm:$0xff]  }
  0x29   : > { %488 = vmatprep.subr.bf16.mxu0 %v1129_v1  ;;  %623 = vmatprep.subr.bf16.mxu1 %v1129_v1 }
  0x2c   : > { %489 = vmatpush1.bf16.msra.mxu0 %v1086_v55  ;;  %624 = vmatpush1.bf16.msra.mxu1 %v1089_v56  ;;  %v1098_v55 = vld [vmem:[%s1406_s1 + $0xe8] sm:$0xff]   ;;  %v1099_v56 = vld [vmem:[%s1406_s1 + $0xf0] sm:$0xff]  }
  0x2d   : > { %490 = vmatprep.subr.bf16.mxu0 %v1129_v1  ;;  %625 = vmatprep.subr.bf16.mxu1 %v1129_v1 }
  0x30   : > { %491 = vmatpush1.bf16.msra.mxu0 %v1088_v57  ;;  %626 = vmatpush1.bf16.msra.mxu1 %v1091_v58  ;;  %v1100_v57 = vld [vmem:[%s1406_s1 + $0xf8] sm:$0xff]   ;;  %v1101_v58 = vld [vmem:[%s1406_s1 + $0x100] sm:$0xff]  }
  0x31   : > { %492 = vmatprep.subr.bf16.mxu0 %v1129_v1  ;;  %627 = vmatprep.subr.bf16.mxu1 %v1129_v1 }
  0x34   : > { %493 = vmatpush1.bf16.msra.mxu0 %v1090_v59  ;;  %628 = vmatpush1.bf16.msra.mxu1 %v1093_v60  ;;  %v1102_v59 = vld [vmem:[%s1406_s1 + $0x108] sm:$0xff]   ;;  %v1103_v60 = vld [vmem:[%s1406_s1 + $0x110] sm:$0xff]  }
  0x35   : > { %782 = vmatprep.subr.bf16.mxu0 %v1129_v1 }
  0x8d   : > { %v248_v4 = vpop.permute.xlu1 %247  ;;  %v244_v18 = vpop.permute.xlu0 %243 }
  0x8e   : > { %v265_v19 = vsel %vm253_vm0, %v1195_v6, %v248_v4  ;;  %v259_v20 = vsel %vm253_vm0, %v1197_v7, %v244_v18  ;;  %v249_v7 = vrot.slane %v1230_v17, 1 }
  0x8f   : > { %v294_v24 = vcombine.low %v265_v19, %v252_v0  ;;  %v278_v25 = vcombine.low %v259_v20, %v250_v5 }
  0x91   : > { %v337_v9 = vpop.permute.xlu1 %336  ;;  %v246_v26 = vpop.permute.xlu0 %245  ;;  %v301_v11 = vrot.slane %v294_v24, %v276_v23  ;;  %v285_v30 = vrot.slane %v278_v25, %v276_v23 }
  0x92   : > { %v341_v27 = vsel %vm253_vm0, %v1199_v8, %v337_v9  ;;  %v262_v10 = vsel %vm253_vm0, %v1214_v12, %v246_v26 }
  0x93   : > { %v343_v28 = vcombine.low %v341_v27, %v338_v21  ;;  %v286_v6 = vcombine.low %v262_v10, %v251_v22  ;;  %v1031_v22 = vld [vmem:[%s1407_s2] ss:$0 sm:$0xff] }
  0x95   : > { %v350_v15 = vrot.slane %v343_v28, %v276_v23  ;;  %v293_v31 = vrot.slane %v286_v6, %v276_v23  ;;  %v657_v32 = vpop.permute.xlu1 %656  ;;  %v242_v33 = vpop.permute.xlu0 %241 }
  0x96   : > { %v661_v34 = vsel %vm253_vm0, %v1216_v13, %v657_v32  ;;  %v256_v8 = vsel %vm253_vm0, %v1218_v14, %v242_v33  ;;  %v1092_v13 = vld [vmem:[%s1406_s1 + $0xc0] sm:$0xff]  }
  0x97   : > { %v512_v35 = vcombine.low %v293_v31, %v301_v11  ;;  %v663_v12 = vcombine.low %v661_v34, %v658_v29  ;;  %v270_v36 = vcombine.low %v256_v8, %v249_v7  ;;  %v376_v37 = vcombine.low %v285_v30, %v293_v31 }
  0x98   : > { %v377_v38 = vcombine.low %v301_v11, %v350_v15 }
  0x99   : > { %v670_v16 = vrot.slane %v663_v12, %v276_v23  ;;  %v277_v39 = vrot.slane %v270_v36, %v276_v23  ;;  %v384_v17 = vrot.slane %v376_v37, %v276_v23  ;;  %v526_v45 = vrot.slane %v512_v35, %v276_v23 }
  0x9a   : > { %v391_v40 = vrot.slane %v377_v38, %v276_v23 }
  0x9b   : > { %v696_v41 = vcombine.low %v350_v15, %v670_v16  ;;  %v511_v42 = vcombine.low %v277_v39, %v285_v30 }
  0x9c   : > { %v393_v43 = vcombine.high %v384_v17, %v391_v40  ;;  %v392_v44 = vcombine.low %v384_v17, %v391_v40 }
  0x9d   : > { %v703_v46 = vrot.slane %v696_v41, %v276_v23  ;;  %v519_v14 = vrot.slane %v511_v42, %v276_v23 }
  0x9e   : > { %979 = vmatprep.mubr.msk.bf16.mxu0 %vm253_vm0, %v393_v43 }
  0x9f   : > { %503 = vmatmul.mubr.bf16.vlgmr.msra.gmra.mrb[0].mxu0 %v392_v44  ;;  %v528_v47 = vcombine.high %v519_v14, %v526_v45  ;;  %v705_v48 = vcombine.high %v526_v45, %v703_v46  ;;  %v527_v49 = vcombine.low %v519_v14, %v526_v45  ;;  %v704_v50 = vcombine.low %v526_v45, %v703_v46 }
  0xa0   : > { %783 = vmatpush1.bf16.msra.mxu0 %v1092_v13 }
  0xa1   : > { %992 = vmatprep.mubr.msk.bf16.mxu1 %vm253_vm0, %v528_v47  ;;  %784 = vmatprep.subr.bf16.mxu0 %v1129_v1 }
  0xa2   : > { %1030 = vmatprep.mubr.msk.bf16.mxu0 %vm253_vm0, %v705_v48  ;;  %638 = vmatmul.mubr.bf16.vlgmr.msra.gmra.mrb[0].mxu1 %v527_v49 }
  0xa4   : > { %785 = vmatpush1.bf16.msra.mxu0 %v1094_v51 }
  0xa5   : > { %786 = vmatprep.subr.bf16.mxu0 %v1129_v1 }
  0xa8   : > { %787 = vmatpush1.bf16.msra.mxu0 %v1095_v52 }
  0xa9   : > { %788 = vmatprep.subr.bf16.mxu0 %v1129_v1 }
  0xac   : > { %789 = vmatpush1.bf16.msra.mxu0 %v1096_v53 }
  0xad   : > { %790 = vmatprep.subr.bf16.mxu0 %v1129_v1 }
  0xb0   : > { %791 = vmatpush1.bf16.msra.mxu0 %v1097_v54 }
  0xb1   : > { %792 = vmatprep.subr.bf16.mxu0 %v1129_v1 }
  0xb4   : > { %793 = vmatpush1.bf16.msra.mxu0 %v1098_v55 }
  0xb5   : > { %794 = vmatprep.subr.bf16.mxu0 %v1129_v1 }
  0xb8   : > { %795 = vmatpush1.bf16.msra.mxu0 %v1099_v56 }
  0xb9   : > { %796 = vmatprep.subr.bf16.mxu0 %v1129_v1 }
  0xbc   : > { %797 = vmatpush1.bf16.msra.mxu0 %v1100_v57 }
  0xbd   : > { %798 = vmatprep.subr.bf16.mxu0 %v1129_v1 }
  0xc0   : > { %799 = vmatpush1.bf16.msra.mxu0 %v1101_v58 }
  0xc1   : > { %800 = vmatprep.subr.bf16.mxu0 %v1129_v1 }
  0xc4   : > { %801 = vmatpush1.bf16.msra.mxu0 %v1102_v59 }
  0xc5   : > { %802 = vmatprep.subr.bf16.mxu0 %v1129_v1 }
  0xc8   : > { %803 = vmatpush1.bf16.msra.mxu0 %v1103_v60 }
  0xc9   : > { %804 = vmatprep.subr.bf16.mxu0 %v1129_v1 }
  0xcc   : > { %805 = vmatpush1.bf16.msra.mxu0 %v1104_v61 }
  0xcf   : > { %815 = vmatmul.mubr.bf16.vlgmr.msra.gmra.mrb[4].mxu0 %v704_v50 }
 0x172   : > { %v504_v62 = vpop.f32.mrb[0].mxu0 }
 0x173   : > { %v506_v63 = vpop.f32.mrb[1].mxu0 }
 0x174   : > { %v507_v0 = vpop.f32.mrb[2].mxu0 }
 0x175   : > { %v509_v2 = vpop.f32.mrb[3].mxu0  ;;  %v639_v3 = vpop.f32.mrb[0].mxu1 }
 0x176   : > { %v640_v4 = vadd.f32 %v639_v3, %v504_v62  ;;  %v641_v5 = vpop.f32.mrb[1].mxu1 }
 0x177   : > { %v642_v18 = vpop.f32.mrb[2].mxu1 }
 0x178   : > { %v643_v19 = vadd.f32 %v642_v18, %v507_v0  ;;  %v644_v20 = vpop.f32.mrb[3].mxu1 }
 0x1a2   : > { %v816_v21 = vpop.f32.mrb[4].mxu0 }
 0x1a3   : > { %v823_v23 = vadd.f32 %v816_v21, %v640_v4  ;;  %v818_v1 = vpop.f32.mrb[5].mxu0 }
 0x1a4   : > { %v819_v24 = vpop.f32.mrb[6].mxu0 }
 0x1a5   : > { %v832_v25 = vadd.f32 %v1031_v22, %v823_v23  ;;  %v824_v9 = vadd.f32 %v819_v24, %v643_v19  ;;  %v821_v26 = vpop.f32.mrb[7].mxu0 }
 0x1a7   : > { %v836_v27 = vcombine.high %v832_v25, %v832_v25  ;;  %v840_v10 = vpack.c.bf16 %v832_v25, %v832_v25  ;;  %v833_v28 = vadd.f32 %v1031_v22, %v824_v9 }
 0x1a9   : > { %v841_v6 = vpack.c.bf16 %v836_v27, %v836_v27  ;;  %845 = vst.msk [vmem:[%s192_s29] sm:$0x3] %vm844_vm1, %v840_v10  ;;  %v837_v29 = vcombine.high %v833_v28, %v833_v28  ;;  %v842_v7 = vpack.c.bf16 %v833_v28, %v833_v28 }
 0x1ab   : > { %846 = vst.msk [vmem:[%s192_s29 + $0x2] sm:$0x3] %vm844_vm1, %v841_v6  ;;  %v843_v11 = vpack.c.bf16 %v837_v29, %v837_v29  ;;  %847 = vst.msk [vmem:[%s192_s29 + $0x4] sm:$0x3] %vm844_vm1, %v842_v7 }
 0x1ad   : > { %848 = vst.msk [vmem:[%s192_s29 + $0x6] sm:$0x3] %vm844_vm1, %v843_v11 }
 0x1ae PF: > { %s13_s14 = sadd.s32 1, %s1127_s14   ;;  %s1409_s12 = smov %s1123_s13 }
 0x1af   : > { %p10_p5 = scmp.ge.s32.totalorder %s13_s14, 4   ;;  %s1410_s13 = smov %s1412_s15 }
 0x1b1   :  { %12 = sbr.rel (!%p10_p5) target bundleno = 2 (0x2), region = 64 }

// kernel: animenet5_forward.51
= control target key start
LH: loop header
LB: loop body
LE: loop exit
PB: predicated region body
PF: predicated region fallthrough
CT: control target
= control target key end

     0   :  { %s1253_s15 = smov 0   ;;  %s1255_s16 = smov 0   ;;  %s1509_s0 = inlined_call_operand.vmem [shape: bf16[2,6,6,64], index: 0, kind: input, shape index: {}]   ;;  %s1510_s1 = inlined_call_operand.vmem [shape: bf16[2,4,4,64], index: 1, kind: input, shape index: {}]   ;;  %s1511_s2 = inlined_call_operand.vmem [shape: bf16[3,192,64], index: 2, kind: input, shape index: {}]   ;;  %s1512_s3 = inlined_call_operand.vmem [shape: f32[1,64], index: 3, kind: input, shape index: {}]   ;;  %s1513_s4 = inlined_call_operand.vmem [shape: bf16[2,4,4,64], index: 4, kind: output, shape index: {}]  }
   0x1   :  { %s1257_s17 = smov 0  }
   0x2 LB: > { %s26_s18 = sadd.s32 1, %s1219_s16  ;;  %p1027_p0 = scmp.ge.s32.totalorder %s1223_s17, 1  ;;  %s1223_s17 = sphi %s1257_s17, %s14_s17   ;;  %s1219_s16 = sphi %s1255_s16, %s1515_s16   ;;  %s1215_s15 = sphi %s1253_s15, %s1514_s15  }
   0x3   : > { %p28_p1 = scmp.ge.s32.totalorder %s26_s18, 2  ;;  %p193_p2 = scmp.lt.s32.totalorder %s1223_s17, 3 }
   0x5   : > { %s1517_s18 = smov (%p28_p1, %s26_s18), 0  ;;  %p194_p3 = pnand %p1027_p0, %p193_p2 }
   0x6   : > { %p232_p4 = scmp.lt.s32.totalorder (!%p194_p3), %s1215_s15, 1  ;;  %v1165_v0 = vld [vmem:[%s1511_s2 + $0x60] sm:$0xff] (!%p194_p3)   ;;  %v1225_v1 = vmov (!%p194_p3), 0   ;;  %v1166_v2 = vld [vmem:[%s1511_s2 + $0x68] sm:$0xff] (!%p194_p3)   ;;  %v1168_v5 = vld [vmem:[%s1511_s2 + $0x70] sm:$0xff] (!%p194_p3)   ;;  %s1226_s19 = smov (!%p194_p3), 64   ;;  %v337_v63 = vlaneseq (!%p194_p3) }
   0x7   : > { %197 = sbr.rel (%p194_p3) target bundleno = 432 (0x1b0), region = 36  ;;  %533 = vmatprep.subr.bf16.mxu0 (!%p194_p3), %v1225_v1  ;;  %668 = vmatprep.subr.bf16.mxu1 (!%p194_p3), %v1225_v1  ;;  %v1167_v3 = vld [vmem:[%s1511_s2] sm:$0xff] (!%p194_p3)   ;;  %v1169_v4 = vld [vmem:[%s1511_s2 + $0x8] sm:$0xff] (!%p194_p3)   ;;  %v1171_v18 = vld [vmem:[%s1511_s2 + $0x10] sm:$0xff] (!%p194_p3)   ;;  %v1227_v61 = vmov (!%p194_p3), 1983009808  }
   0x8   : > { %534 = vmatpush1.bf16.msra.mxu0 (!%p194_p3), %v1165_v0  ;;  %669 = vmatpush1.bf16.msra.mxu1 (!%p194_p3), %v1167_v3  ;;  %v1170_v23 = vld [vmem:[%s1511_s2 + $0x78] sm:$0xff] (!%p194_p3)   ;;  %v1172_v37 = vld [vmem:[%s1511_s2 + $0x80] sm:$0xff] (!%p194_p3)   ;;  %v1174_v45 = vld [vmem:[%s1511_s2 + $0x88] sm:$0xff] (!%p194_p3)   ;;  %v335_v62 = vunpack.c.l.s4 (!%p194_p3), %v1227_v61  ;;  %vm316_vm0 = vcmask (!%p194_p3), 523264   ;;  %v338_v3 = vshrl.u32 (!%p194_p3), %v337_v63, 7  ;;  %vm919_vm1 = vcmask (!%p194_p3), 517120  }
   0x9   : > { %535 = vmatprep.subr.bf16.mxu0 (!%p194_p3), %v1225_v1  ;;  %670 = vmatprep.subr.bf16.mxu1 (!%p194_p3), %v1225_v1  ;;  %v1173_v34 = vld [vmem:[%s1511_s2 + $0x18] sm:$0xff] (!%p194_p3)   ;;  %v1175_v44 = vld [vmem:[%s1511_s2 + $0x20] sm:$0xff] (!%p194_p3)   ;;  %v1177_v48 = vld [vmem:[%s1511_s2 + $0x28] sm:$0xff] (!%p194_p3)  }
   0xa   : > { %v1176_v49 = vld [vmem:[%s1511_s2 + $0x90] sm:$0xff] (!%p194_p3)   ;;  %v1178_v51 = vld [vmem:[%s1511_s2 + $0x98] sm:$0xff] (!%p194_p3)   ;;  %v1180_v53 = vld [vmem:[%s1511_s2 + $0xa0] sm:$0xff] (!%p194_p3)  }
   0xb   : > { %v1179_v50 = vld [vmem:[%s1511_s2 + $0x30] sm:$0xff] (!%p194_p3)   ;;  %v1181_v52 = vld [vmem:[%s1511_s2 + $0x38] sm:$0xff] (!%p194_p3)   ;;  %v1183_v54 = vld [vmem:[%s1511_s2 + $0x40] sm:$0xff] (!%p194_p3)  }
   0xc   : > { %536 = vmatpush1.bf16.msra.mxu0 (!%p194_p3), %v1166_v2  ;;  %671 = vmatpush1.bf16.msra.mxu1 (!%p194_p3), %v1169_v4  ;;  %v1182_v55 = vld [vmem:[%s1511_s2 + $0xa8] sm:$0xff] (!%p194_p3)   ;;  %v1184_v57 = vld [vmem:[%s1511_s2 + $0xb0] sm:$0xff] (!%p194_p3)   ;;  %v1186_v59 = vld [vmem:[%s1511_s2 + $0xb8] sm:$0xff] (!%p194_p3)   ;;  %v336_v2 = vunpack.c.0.s8 (!%p194_p3), %v335_v62 }
   0xd   : > { %537 = vmatprep.subr.bf16.mxu0 (!%p194_p3), %v1225_v1  ;;  %672 = vmatprep.subr.bf16.mxu1 (!%p194_p3), %v1225_v1  ;;  %v1185_v56 = vld [vmem:[%s1511_s2 + $0x48] sm:$0xff] (!%p194_p3)   ;;  %v1187_v58 = vld [vmem:[%s1511_s2 + $0x50] sm:$0xff] (!%p194_p3)   ;;  %v1189_v60 = vld [vmem:[%s1511_s2 + $0x58] sm:$0xff] (!%p194_p3)  }
   0xe   : > { %s1519_s15 = smov (!%p232_p4, %s1215_s15), 1  ;;  %v1200_v61 = vld [vmem:[%s1511_s2 + $0x118] sm:$0xff]  }
   0xf   : > { %s1131_s25 = smul.u32 24, %s1519_s15 }
  0x10   : > { %538 = vmatpush1.bf16.msra.mxu0 %v1168_v5  ;;  %673 = vmatpush1.bf16.msra.mxu1 %v1171_v18 }
  0x11   : > { %s236_s30 = scalar_lea.vmem %s1509_s0, %s1131_s25  ;;  %539 = vmatprep.subr.bf16.mxu0 %v1225_v1  ;;  %674 = vmatprep.subr.bf16.mxu1 %v1225_v1 }
  0x12   : > { %v1296_v6 = vld [vmem:[%s236_s30 + $0xc] sm:$0x7]  ;;  %v1298_v7 = vld [vmem:[%s236_s30 + $0x4] sm:$0x7]  ;;  %v1300_v8 = vld [vmem:[%s236_s30 + $0x10] sm:$0x7] }
  0x13   : > { %v1305_v9 = vcombine.low %v1296_v6, %v1296_v6  ;;  %v1309_v10 = vcombine.low %v1298_v7, %v1298_v7  ;;  %v1313_v11 = vcombine.low %v1300_v8, %v1300_v8  ;;  %v1315_v12 = vld [vmem:[%s236_s30 + $0x8] sm:$0x7]  ;;  %v1317_v13 = vld [vmem:[%s236_s30 + $0x14] sm:$0x7]  ;;  %v1319_v14 = vld [vmem:[%s236_s30] sm:$0x7] }
  0x14   : > { %v1323_v15 = vcombine.low %v1315_v12, %v1315_v12  ;;  %v1327_v16 = vcombine.low %v1317_v13, %v1317_v13  ;;  %v1331_v17 = vcombine.low %v1319_v14, %v1319_v14  ;;  %540 = vmatpush1.bf16.msra.mxu0 %v1170_v23  ;;  %675 = vmatpush1.bf16.msra.mxu1 %v1173_v34  ;;  %s1129_s30 = sshll.u32 %s1519_s15, 3 }
  0x15   : > { %v298_v19 = vshrl.u32 %v1305_v9, 16  ;;  %v300_v20 = vshll.u32 %v1305_v9, 16  ;;  %v284_v21 = vshrl.u32 %v1309_v10, 16  ;;  %v286_v22 = vshll.u32 %v1309_v10, 16  ;;  %541 = vmatprep.subr.bf16.mxu0 %v1225_v1  ;;  %676 = vmatprep.subr.bf16.mxu1 %v1225_v1  ;;  %s245_s7 = scalar_lea.vmem %s1510_s1, %s1129_s30  ;;  %s255_s11 = scalar_lea.vmem %s1513_s4, %s1129_s30 }
  0x16   : > { %v393_v24 = vshrl.u32 %v1313_v11, 16  ;;  %v395_v25 = vshll.u32 %v1313_v11, 16  ;;  %v293_v26 = vshll.u32 %v1323_v15, 16  ;;  %v291_v29 = vshrl.u32 %v1323_v15, 16 }
  0x17   : > { %v302_v27 = vrot.slane %v300_v20, 1  ;;  %v288_v28 = vrot.slane %v286_v22, 1  ;;  %v715_v30 = vshll.u32 %v1327_v16, 16  ;;  %v279_v33 = vshll.u32 %v1331_v17, 16 }
  0x18   : > { %v397_v31 = vrot.slane %v395_v25, 1  ;;  %v295_v32 = vrot.slane %v293_v26, 1  ;;  %v713_v38 = vshrl.u32 %v1327_v16, 16  ;;  %v277_v39 = vshrl.u32 %v1331_v17, 16  ;;  %542 = vmatpush1.bf16.msra.mxu0 %v1172_v37  ;;  %677 = vmatpush1.bf16.msra.mxu1 %v1175_v44 }
  0x19   : > { %v303_v35 = vor.u32 %v302_v27, %v298_v19  ;;  %v289_v36 = vor.u32 %v288_v28, %v284_v21  ;;  %v717_v42 = vrot.slane %v715_v30, 1  ;;  %v281_v43 = vrot.slane %v279_v33, 1  ;;  %543 = vmatprep.subr.bf16.mxu0 %v1225_v1  ;;  %678 = vmatprep.subr.bf16.mxu1 %v1225_v1 }
  0x1a   : > { %v398_v40 = vor.u32 %v397_v31, %v393_v24  ;;  %v296_v41 = vor.u32 %v295_v32, %v291_v29  ;;  %v315_v0 = vrot.slane %v1305_v9, 1  ;;  %v313_v5 = vrot.slane %v1309_v10, 1 }
  0x1b   : > { %310 = vrot.lane.b32.xlu1 %v303_v35, %s1226_s19  ;;  %306 = vrot.lane.b32.xlu0 %v289_v36, %s1226_s19  ;;  %v718_v46 = vor.u32 %v717_v42, %v713_v38  ;;  %v282_v47 = vor.u32 %v281_v43, %v277_v39  ;;  %v401_v21 = vrot.slane %v1313_v11, 1  ;;  %v314_v22 = vrot.slane %v1323_v15, 1 }
  0x1c   : > { %544 = vmatpush1.bf16.msra.mxu0 %v1174_v45  ;;  %679 = vmatpush1.bf16.msra.mxu1 %v1177_v48  ;;  %v339_v23 = vsub.s32 %v336_v2, %v338_v3  ;;  %v721_v29 = vrot.slane %v1327_v16, 1 }
  0x1d   : > { %545 = vmatprep.subr.bf16.mxu0 %v1225_v1  ;;  %680 = vmatprep.subr.bf16.mxu1 %v1225_v1 }
  0x1f   : > { %399 = vrot.lane.b32.xlu1 %v398_v40, %s1226_s19  ;;  %308 = vrot.lane.b32.xlu0 %v296_v41, %s1226_s19 }
  0x20   : > { %546 = vmatpush1.bf16.msra.mxu0 %v1176_v49  ;;  %681 = vmatpush1.bf16.msra.mxu1 %v1179_v50 }
  0x21   : > { %547 = vmatprep.subr.bf16.mxu0 %v1225_v1  ;;  %682 = vmatprep.subr.bf16.mxu1 %v1225_v1 }
  0x23   : > { %719 = vrot.lane.b32.xlu1 %v718_v46, %s1226_s19  ;;  %304 = vrot.lane.b32.xlu0 %v282_v47, %s1226_s19 }
  0x24   : > { %548 = vmatpush1.bf16.msra.mxu0 %v1178_v51  ;;  %683 = vmatpush1.bf16.msra.mxu1 %v1181_v52  ;;  %v1190_v51 = vld [vmem:[%s1511_s2 + $0xc8] sm:$0xff]   ;;  %v1191_v52 = vld [vmem:[%s1511_s2 + $0xd0] sm:$0xff]  }
  0x25   : > { %549 = vmatprep.subr.bf16.mxu0 %v1225_v1  ;;  %684 = vmatprep.subr.bf16.mxu1 %v1225_v1 }
  0x28   : > { %550 = vmatpush1.bf16.msra.mxu0 %v1180_v53  ;;  %685 = vmatpush1.bf16.msra.mxu1 %v1183_v54  ;;  %v1192_v53 = vld [vmem:[%s1511_s2 + $0xd8] sm:$0xff]   ;;  %v1193_v54 = vld [vmem:[%s1511_s2 + $0xe0] sm:$0xff]  }
  0x29   : > { %551 = vmatprep.subr.bf16.mxu0 %v1225_v1  ;;  %686 = vmatprep.subr.bf16.mxu1 %v1225_v1 }
  0x2c   : > { %552 = vmatpush1.bf16.msra.mxu0 %v1182_v55  ;;  %687 = vmatpush1.bf16.msra.mxu1 %v1185_v56  ;;  %v1194_v55 = vld [vmem:[%s1511_s2 + $0xe8] sm:$0xff]   ;;  %v1195_v56 = vld [vmem:[%s1511_s2 + $0xf0] sm:$0xff]  }
  0x2d   : > { %553 = vmatprep.subr.bf16.mxu0 %v1225_v1  ;;  %688 = vmatprep.subr.bf16.mxu1 %v1225_v1 }
  0x30   : > { %554 = vmatpush1.bf16.msra.mxu0 %v1184_v57  ;;  %689 = vmatpush1.bf16.msra.mxu1 %v1187_v58  ;;  %v1196_v57 = vld [vmem:[%s1511_s2 + $0xf8] sm:$0xff]   ;;  %v1197_v58 = vld [vmem:[%s1511_s2 + $0x100] sm:$0xff]  }
  0x31   : > { %555 = vmatprep.subr.bf16.mxu0 %v1225_v1  ;;  %690 = vmatprep.subr.bf16.mxu1 %v1225_v1 }
  0x34   : > { %556 = vmatpush1.bf16.msra.mxu0 %v1186_v59  ;;  %691 = vmatpush1.bf16.msra.mxu1 %v1189_v60  ;;  %v1198_v59 = vld [vmem:[%s1511_s2 + $0x108] sm:$0xff]   ;;  %v1199_v60 = vld [vmem:[%s1511_s2 + $0x110] sm:$0xff]  }
  0x35   : > { %845 = vmatprep.subr.bf16.mxu0 %v1225_v1 }
  0x8d   : > { %v311_v4 = vpop.permute.xlu1 %310  ;;  %v307_v18 = vpop.permute.xlu0 %306 }
  0x8e   : > { %v328_v19 = vsel %vm316_vm0, %v1296_v6, %v311_v4  ;;  %v322_v20 = vsel %vm316_vm0, %v1298_v7, %v307_v18  ;;  %v312_v7 = vrot.slane %v1331_v17, 1 }
  0x8f   : > { %v357_v24 = vcombine.low %v328_v19, %v315_v0  ;;  %v341_v25 = vcombine.low %v322_v20, %v313_v5 }
  0x91   : > { %v400_v9 = vpop.permute.xlu1 %399  ;;  %v309_v26 = vpop.permute.xlu0 %308  ;;  %v364_v11 = vrot.slane %v357_v24, %v339_v23  ;;  %v348_v30 = vrot.slane %v341_v25, %v339_v23  ;;  %v905_v24 = vld [vmem:[%s245_s7 + $0x4] sm:$0x3] }
  0x92   : > { %v404_v27 = vsel %vm316_vm0, %v1300_v8, %v400_v9  ;;  %v325_v10 = vsel %vm316_vm0, %v1315_v12, %v309_v26 }
  0x93   : > { %v406_v28 = vcombine.low %v404_v27, %v401_v21  ;;  %v349_v6 = vcombine.low %v325_v10, %v314_v22  ;;  %v903_v21 = vld [vmem:[%s245_s7] sm:$0x3]  ;;  %v906_v10 = vld [vmem:[%s245_s7 + $0x6] sm:$0x3] }
  0x94   : > { %v907_v9 = vunpack.c.l.bf16 %v903_v21 }
  0x95   : > { %v413_v15 = vrot.slane %v406_v28, %v339_v23  ;;  %v356_v31 = vrot.slane %v349_v6, %v339_v23  ;;  %v720_v32 = vpop.permute.xlu1 %719  ;;  %v305_v33 = vpop.permute.xlu0 %304 }
  0x96   : > { %v724_v34 = vsel %vm316_vm0, %v1317_v13, %v720_v32  ;;  %v319_v8 = vsel %vm316_vm0, %v1319_v14, %v305_v33  ;;  %v1188_v13 = vld [vmem:[%s1511_s2 + $0xc0] sm:$0xff]   ;;  %v910_v32 = vunpack.c.l.bf16 %v906_v10 }
  0x97   : > { %v575_v35 = vcombine.low %v356_v31, %v364_v11  ;;  %v726_v12 = vcombine.low %v724_v34, %v721_v29  ;;  %v333_v36 = vcombine.low %v319_v8, %v312_v7  ;;  %v439_v37 = vcombine.low %v348_v30, %v356_v31 }
  0x98   : > { %v440_v38 = vcombine.low %v364_v11, %v413_v15  ;;  %v909_v7 = vunpack.c.l.bf16 %v905_v24 }
  0x99   : > { %v733_v16 = vrot.slane %v726_v12, %v339_v23  ;;  %v340_v39 = vrot.slane %v333_v36, %v339_v23  ;;  %v447_v17 = vrot.slane %v439_v37, %v339_v23  ;;  %v589_v45 = vrot.slane %v575_v35, %v339_v23 }
  0x9a   : > { %v454_v40 = vrot.slane %v440_v38, %v339_v23 }
  0x9b   : > { %v759_v41 = vcombine.low %v413_v15, %v733_v16  ;;  %v574_v42 = vcombine.low %v340_v39, %v348_v30 }
  0x9c   : > { %v456_v43 = vcombine.high %v447_v17, %v454_v40  ;;  %v455_v44 = vcombine.low %v447_v17, %v454_v40 }
  0x9d   : > { %v766_v46 = vrot.slane %v759_v41, %v339_v23  ;;  %v582_v14 = vrot.slane %v574_v42, %v339_v23  ;;  %v904_v23 = vld [vmem:[%s245_s7 + $0x2] sm:$0x3] }
  0x9e   : > { %1074 = vmatprep.mubr.msk.bf16.mxu0 %vm316_vm0, %v456_v43  ;;  %v908_v6 = vunpack.c.l.bf16 %v904_v23 }
  0x9f   : > { %566 = vmatmul.mubr.bf16.vlgmr.msra.gmra.mrb[0].mxu0 %v455_v44  ;;  %v591_v47 = vcombine.high %v582_v14, %v589_v45  ;;  %v768_v48 = vcombine.high %v589_v45, %v766_v46  ;;  %v590_v49 = vcombine.low %v582_v14, %v589_v45  ;;  %v767_v50 = vcombine.low %v589_v45, %v766_v46 }
  0xa0   : > { %846 = vmatpush1.bf16.msra.mxu0 %v1188_v13 }
  0xa1   : > { %1087 = vmatprep.mubr.msk.bf16.mxu1 %vm316_vm0, %v591_v47  ;;  %847 = vmatprep.subr.bf16.mxu0 %v1225_v1 }
  0xa2   : > { %1125 = vmatprep.mubr.msk.bf16.mxu0 %vm316_vm0, %v768_v48  ;;  %701 = vmatmul.mubr.bf16.vlgmr.msra.gmra.mrb[0].mxu1 %v590_v49 }
  0xa4   : > { %848 = vmatpush1.bf16.msra.mxu0 %v1190_v51 }
  0xa5   : > { %849 = vmatprep.subr.bf16.mxu0 %v1225_v1 }
  0xa8   : > { %850 = vmatpush1.bf16.msra.mxu0 %v1191_v52 }
  0xa9   : > { %851 = vmatprep.subr.bf16.mxu0 %v1225_v1 }
  0xac   : > { %852 = vmatpush1.bf16.msra.mxu0 %v1192_v53 }
  0xad   : > { %853 = vmatprep.subr.bf16.mxu0 %v1225_v1 }
  0xb0   : > { %854 = vmatpush1.bf16.msra.mxu0 %v1193_v54 }
  0xb1   : > { %855 = vmatprep.subr.bf16.mxu0 %v1225_v1 }
  0xb4   : > { %856 = vmatpush1.bf16.msra.mxu0 %v1194_v55 }
  0xb5   : > { %857 = vmatprep.subr.bf16.mxu0 %v1225_v1 }
  0xb8   : > { %858 = vmatpush1.bf16.msra.mxu0 %v1195_v56 }
  0xb9   : > { %859 = vmatprep.subr.bf16.mxu0 %v1225_v1 }
  0xbc   : > { %860 = vmatpush1.bf16.msra.mxu0 %v1196_v57 }
  0xbd   : > { %861 = vmatprep.subr.bf16.mxu0 %v1225_v1 }
  0xc0   : > { %862 = vmatpush1.bf16.msra.mxu0 %v1197_v58 }
  0xc1   : > { %863 = vmatprep.subr.bf16.mxu0 %v1225_v1 }
  0xc4   : > { %864 = vmatpush1.bf16.msra.mxu0 %v1198_v59 }
  0xc5   : > { %865 = vmatprep.subr.bf16.mxu0 %v1225_v1 }
  0xc8   : > { %866 = vmatpush1.bf16.msra.mxu0 %v1199_v60 }
  0xc9   : > { %867 = vmatprep.subr.bf16.mxu0 %v1225_v1  ;;  %v1126_v1 = vld [vmem:[%s1512_s3] ss:$0 sm:$0xff] }
  0xcc   : > { %868 = vmatpush1.bf16.msra.mxu0 %v1200_v61 }
  0xcf   : > { %878 = vmatmul.mubr.bf16.vlgmr.msra.gmra.mrb[4].mxu0 %v767_v50 }
 0x172   : > { %v567_v62 = vpop.f32.mrb[0].mxu0 }
 0x173   : > { %v569_v63 = vpop.f32.mrb[1].mxu0 }
 0x174   : > { %v570_v0 = vpop.f32.mrb[2].mxu0 }
 0x175   : > { %v572_v2 = vpop.f32.mrb[3].mxu0  ;;  %v702_v3 = vpop.f32.mrb[0].mxu1 }
 0x176   : > { %v703_v4 = vadd.f32 %v702_v3, %v567_v62  ;;  %v704_v5 = vpop.f32.mrb[1].mxu1 }
 0x177   : > { %v705_v18 = vpop.f32.mrb[2].mxu1 }
 0x178   : > { %v706_v19 = vadd.f32 %v705_v18, %v570_v0  ;;  %v707_v20 = vpop.f32.mrb[3].mxu1 }
 0x1a2   : > { %v879_v22 = vpop.f32.mrb[4].mxu0 }
 0x1a3   : > { %v886_v25 = vadd.f32 %v879_v22, %v703_v4  ;;  %v881_v26 = vpop.f32.mrb[5].mxu0 }
 0x1a4   : > { %v882_v27 = vpop.f32.mrb[6].mxu0 }
 0x1a5   : > { %v895_v28 = vadd.f32 %v1126_v1, %v886_v25  ;;  %v887_v29 = vadd.f32 %v882_v27, %v706_v19  ;;  %v884_v11 = vpop.f32.mrb[7].mxu0 }
 0x1a7   : > { %v899_v30 = vcombine.high %v895_v28, %v895_v28  ;;  %v911_v15 = vadd.f32 %v907_v9, %v895_v28  ;;  %v896_v31 = vadd.f32 %v1126_v1, %v887_v29 }
 0x1a9   : > { %v912_v33 = vadd.f32 %v908_v6, %v899_v30  ;;  %v915_v34 = vpack.c.bf16 %v911_v15, %v911_v15  ;;  %v900_v8 = vcombine.high %v896_v31, %v896_v31  ;;  %v913_v35 = vadd.f32 %v909_v7, %v896_v31 }
 0x1ab   : > { %v916_v12 = vpack.c.bf16 %v912_v33, %v912_v33  ;;  %920 = vst.msk [vmem:[%s255_s11] sm:$0x3] %vm919_vm1, %v915_v34  ;;  %v914_v36 = vadd.f32 %v910_v32, %v900_v8  ;;  %v917_v37 = vpack.c.bf16 %v913_v35, %v913_v35 }
 0x1ad   : > { %921 = vst.msk [vmem:[%s255_s11 + $0x2] sm:$0x3] %vm919_vm1, %v916_v12  ;;  %v918_v38 = vpack.c.bf16 %v914_v36, %v914_v36  ;;  %922 = vst.msk [vmem:[%s255_s11 + $0x4] sm:$0x3] %vm919_vm1, %v917_v37 }
 0x1af   : > { %923 = vst.msk [vmem:[%s255_s11 + $0x6] sm:$0x3] %vm919_vm1, %v918_v38 }
 0x1b0 PF: > { %s14_s17 = sadd.s32 1, %s1223_s17   ;;  %s1514_s15 = smov %s1219_s16 }
 0x1b1   : > { %p11_p5 = scmp.ge.s32.totalorder %s14_s17, 4   ;;  %s1515_s16 = smov %s1517_s18 }
 0x1b3   :  { %13 = sbr.rel (!%p11_p5) target bundleno = 2 (0x2), region = 71 }

// kernel: animenet5_forward.53
= control target key start
LH: loop header
LB: loop body
LE: loop exit
PB: predicated region body
PF: predicated region fallthrough
CT: control target
= control target key end

     0   :  { %s682_s18 = smov 0   ;;  %s684_s19 = smov 0   ;;  %s741_s0 = inlined_call_operand.vmem [shape: bf16[2,16,64], index: 0, kind: input, shape index: {}]   ;;  %s742_s1 = inlined_call_operand.vmem [shape: f32[2,1,64], index: 1, kind: input, shape index: {}]   ;;  %s743_s2 = inlined_call_operand.vmem [shape: bf16[64,64], index: 2, kind: input, shape index: {}]   ;;  %s744_s3 = inlined_call_operand.vmem [shape: f32[1,64], index: 3, kind: input, shape index: {}]   ;;  %s745_s4 = inlined_call_operand.vmem [shape: bf16[2,16,64], index: 4, kind: input, shape index: {}]   ;;  %s746_s5 = inlined_call_operand.vmem [shape: bf16[2,16,64], index: 5, kind: output, shape index: {}]  }
   0x1   :  { %s686_s20 = smov 0  }
   0x2 LB: > { %s27_s21 = sadd.s32 1, %s644_s19  ;;  %p548_p0 = scmp.ge.s32.totalorder %s648_s20, 1  ;;  %s648_s20 = sphi %s686_s20, %s15_s20   ;;  %s644_s19 = sphi %s684_s19, %s748_s19   ;;  %s640_s18 = sphi %s682_s18, %s747_s18  }
   0x3   : > { %p29_p1 = scmp.ge.s32.totalorder %s27_s21, 2  ;;  %p233_p2 = scmp.lt.s32.totalorder %s648_s20, 3 }
   0x5   : > { %s750_s21 = smov (%p29_p1, %s27_s21), 0  ;;  %p234_p3 = pnand %p548_p0, %p233_p2 }
   0x6   : > { %v622_v0 = vld [vmem:[%s743_s2] sm:$0xff] (!%p234_p3)   ;;  %v650_v1 = vmov (!%p234_p3), 0.0   ;;  %v623_v2 = vld [vmem:[%s743_s2 + $0x8] sm:$0xff] (!%p234_p3)   ;;  %vm651_vm0 = vmmov (!%p234_p3), 0   ;;  %p282_p4 = scmp.lt.s32.totalorder (!%p234_p3), %s640_s18, 1  ;;  %v624_v3 = vld [vmem:[%s743_s2 + $0x10] sm:$0xff] (!%p234_p3)  }
   0x7   : > { %237 = sbr.rel (%p234_p3) target bundleno = 245 (0xf5), region = 40  ;;  %584 = vmatprep.subr.bf16.mxu0 (!%p234_p3), %v650_v1  ;;  %592 = vmatprep.mubr.msk.bf16.mxu0 (!%p234_p3), %vm651_vm0, %v650_v1  ;;  %v625_v8 = vld [vmem:[%s743_s2 + $0x18] sm:$0xff] (!%p234_p3)   ;;  %vm368_vm1 = vcmask (!%p234_p3), 523264   ;;  %v556_v13 = vld [vmem:[%s744_s3] ss:$0 sm:$0xff] (!%p234_p3)  ;;  %vm427_vm2 = vcmask (!%p234_p3), 519168  }
   0x8   : > { %585 = vmatpush3.bf16.msra.mxu0 (!%p234_p3), %v622_v0 }
   0x9   : > { %586 = vmatprep.subr.bf16.mxu0 (!%p234_p3), %v650_v1 }
   0xc   : > { %587 = vmatpush3.bf16.msra.mxu0 (!%p234_p3), %v623_v2 }
   0xd   : > { %588 = vmatprep.subr.bf16.mxu0 (!%p234_p3), %v650_v1 }
   0xe   : > { %s752_s18 = smov (!%p282_p4, %s640_s18), 1 }
   0xf   : > { %s709_s28 = sshll.u32 %s752_s18, 3  ;;  %s293_s6 = scalar_lea.vmem %s742_s1, %s752_s18 }
  0x10   : > { %s289_s9 = scalar_lea.vmem %s741_s0, %s709_s28  ;;  %v555_v5 = vld [vmem:[%s293_s6] ss:$0 sm:$0xff]  ;;  %589 = vmatpush3.bf16.msra.mxu0 %v624_v3  ;;  %s302_s14 = scalar_lea.vmem %s745_s4, %s709_s28 }
  0x11   : > { %v572_v4 = vld [vmem:[%s289_s9] sm:$0xff]   ;;  %590 = vmatprep.subr.bf16.mxu0 %v650_v1  ;;  %s312_s22 = scalar_lea.vmem %s746_s5, %s709_s28 }
  0x12   : > { %v573_v6 = vunpack.c.l.bf16 %v572_v4  ;;  %v574_v7 = vunpack.c.h.bf16 %v572_v4  ;;  %v576_v12 = vld [vmem:[%s302_s14] sm:$0xff]  }
  0x13   : > { %v577_v14 = vunpack.c.l.bf16 %v576_v12  ;;  %v578_v18 = vunpack.c.h.bf16 %v576_v12 }
  0x14   : > { %v326_v9 = vmul.f32 %v573_v6, %v555_v5  ;;  %v327_v10 = vmul.f32 %v574_v7, %v555_v5  ;;  %591 = vmatpush3.bf16.msra.mxu0 %v625_v8 }
  0x16   : > { %v328_v11 = vpack.c.bf16 %v327_v10, %v326_v9 }
  0x18   : > { %593 = vmatmul.mubr.msk.bf16.vlgmr.msra.gmra.mrb[0].mxu0 %vm368_vm1, %v328_v11 }
  0xeb   : > { %v406_v15 = vpop.f32.mrb[0].mxu0 }
  0xec   : > { %v407_v16 = vadd.f32 %v556_v13, %v406_v15  ;;  %v594_v17 = vpop.f32.mrb[1].mxu0 }
  0xed   : > { %v409_v19 = vpop.f32.mrb[2].mxu0 }
  0xee   : > { %v417_v20 = vadd.f32 %v577_v14, %v407_v16  ;;  %v410_v21 = vadd.f32 %v556_v13, %v409_v19  ;;  %v595_v22 = vpop.f32.mrb[3].mxu0 }
  0xf0   : > { %v569_v23 = vpack.c.bf16 %v417_v20, %v417_v20  ;;  %v418_v24 = vadd.f32 %v578_v18, %v410_v21 }
  0xf2   : > { %428 = vst.msk [vmem:[%s312_s22] sm:$0xf] %vm427_vm2, %v569_v23  ;;  %v570_v25 = vpack.c.bf16 %v418_v24, %v418_v24 }
  0xf4   : > { %429 = vst.msk [vmem:[%s312_s22 + $0x4] sm:$0xf] %vm427_vm2, %v570_v25 }
  0xf5 PF: > { %s15_s20 = sadd.s32 1, %s648_s20   ;;  %s747_s18 = smov %s644_s19 }
  0xf6   : > { %p12_p5 = scmp.ge.s32.totalorder %s15_s20, 4   ;;  %s748_s19 = smov %s750_s21 }
  0xf8   :  { %14 = sbr.rel (!%p12_p5) target bundleno = 2 (0x2), region = 76 }

// kernel: animenet5_forward.84
= control target key start
LH: loop header
LB: loop body
LE: loop exit
PB: predicated region body
PF: predicated region fallthrough
CT: control target
= control target key end

     0   :  { %vm118_vm0 = vcmask 523264   ;;  %vm1764_vm1 = vcmask 519168   ;;  %s2784_s16 = inlined_call_operand.vmem [shape: bf16[1024,64], index: 16, kind: input, shape index: {}]   ;;  %s2785_s1 = inlined_call_operand.vmem [shape: bf16[32,64], index: 1, kind: input, shape index: {}]   ;;  %s2786_s8 = inlined_call_operand.vmem [shape: bf16[32,64], index: 8, kind: input, shape index: {}]   ;;  %s2787_s0 = inlined_call_operand.vmem [shape: bf16[32,64], index: 0, kind: input, shape index: {}]   ;;  %s2788_s9 = inlined_call_operand.vmem [shape: bf16[32,64], index: 9, kind: input, shape index: {}]   ;;  %s2789_s2 = inlined_call_operand.vmem [shape: bf16[32,64], index: 2, kind: input, shape index: {}]   ;;  %s2790_s10 = inlined_call_operand.vmem [shape: bf16[32,64], index: 10, kind: input, shape index: {}]   ;;  %s2791_s3 = inlined_call_operand.vmem [shape: bf16[32,64], index: 3, kind: input, shape index: {}]   ;;  %s2792_s11 = inlined_call_operand.vmem [shape: bf16[32,64], index: 11, kind: input, shape index: {}]   ;;  %s2793_s4 = inlined_call_operand.vmem [shape: bf16[32,64], index: 4, kind: input, shape index: {}]   ;;  %s2794_s12 = inlined_call_operand.vmem [shape: bf16[32,64], index: 12, kind: input, shape index: {}]   ;;  %s2795_s5 = inlined_call_operand.vmem [shape: bf16[32,64], index: 5, kind: input, shape index: {}]   ;;  %s2796_s13 = inlined_call_operand.vmem [shape: bf16[32,64], index: 13, kind: input, shape index: {}]   ;;  %s2797_s6 = inlined_call_operand.vmem [shape: bf16[32,64], index: 6, kind: input, shape index: {}]   ;;  %s2798_s14 = inlined_call_operand.vmem [shape: bf16[32,64], index: 14, kind: input, shape index: {}]   ;;  %s2799_s7 = inlined_call_operand.vmem [shape: bf16[32,64], index: 7, kind: input, shape index: {}]   ;;  %s2800_s15 = inlined_call_operand.vmem [shape: bf16[32,64], index: 15, kind: input, shape index: {}]   ;;  %s2801_s17 = inlined_call_operand.vmem [shape: f32[1,64], index: 17, kind: input, shape index: {}]   ;;  %s2802_s18 = inlined_call_operand.vmem [shape: bf16[32,64], index: 18, kind: output, shape index: {}]  }
   0x1   :  { %2806 = sst [smem:[#allocation2_spill]] %s2784_s16  ;;  %v2278_v17 = vld [vmem:[%s2787_s0] sm:$0xff]   ;;  %v2282_v24 = vld [vmem:[%s2787_s0 + $0x8] sm:$0xff]  }
   0x2   :  { %2807 = sst [smem:[#allocation3_spill]] %s2785_s1  ;;  %s2809_s29 = sld [smem:[#allocation2_spill]]  ;;  %v2280_v19 = vld [vmem:[%s2788_s9] sm:$0xff]   ;;  %v2283_v25 = vld [vmem:[%s2788_s9 + $0x8] sm:$0xff]  }
   0x3   :  { %2808 = sst [smem:[#allocation4_spill]] %s2786_s8  ;;  %s2810_s30 = sld [smem:[#allocation3_spill]]  ;;  %v2290_v28 = vld [vmem:[%s2789_s2] sm:$0xff]   ;;  %v2294_v36 = vld [vmem:[%s2789_s2 + $0x8] sm:$0xff]  }
   0x4   :  { %s2811_s21 = sld [smem:[#allocation4_spill]]  ;;  %v2292_v29 = vld [vmem:[%s2790_s10] sm:$0xff]   ;;  %v2295_v37 = vld [vmem:[%s2790_s10 + $0x8] sm:$0xff]  }
   0x5   :  { %v2302_v40 = vld [vmem:[%s2791_s3] sm:$0xff]   ;;  %v2306_v48 = vld [vmem:[%s2791_s3 + $0x8] sm:$0xff]  }
   0x6   :  { %v2304_v41 = vld [vmem:[%s2792_s11] sm:$0xff]   ;;  %v2307_v49 = vld [vmem:[%s2792_s11 + $0x8] sm:$0xff]  }
   0x7   :  { %v2314_v52 = vld [vmem:[%s2793_s4] sm:$0xff]   ;;  %v2318_v60 = vld [vmem:[%s2793_s4 + $0x8] sm:$0xff]  }
   0x8   :  { %v2258_v0 = vld [vmem:[%s2809_s29 + $0x20] sm:$0xff]   ;;  %v2260_v2 = vld [vmem:[%s2809_s29 + $0x28] sm:$0xff]   ;;  %v2262_v4 = vld [vmem:[%s2809_s29 + $0x30] sm:$0xff]  }
   0x9   :  { %v2259_v1 = vld [vmem:[%s2809_s29 + $0x100] sm:$0xff]   ;;  %2006 = vmatprep.subr.bf16.mxu1 %v2258_v0  ;;  %v2261_v3 = vld [vmem:[%s2809_s29 + $0x108] sm:$0xff]   ;;  %v2263_v5 = vld [vmem:[%s2809_s29 + $0x110] sm:$0xff]  }
   0xa   :  { %2102 = vmatprep.subr.bf16.mxu0 %v2259_v1  ;;  %2007 = vmatpush3.bf16.msra.mxu1 %v2258_v0  ;;  %v2264_v6 = vld [vmem:[%s2809_s29 + $0x38] sm:$0xff]   ;;  %v2266_v7 = vld [vmem:[%s2810_s30] sm:$0xff]   ;;  %v2270_v12 = vld [vmem:[%s2810_s30 + $0x8] sm:$0xff]  }
   0xb   :  { %2103 = vmatpush3.bf16.msra.mxu0 %v2259_v1  ;;  %2008 = vmatprep.subr.bf16.mxu1 %v2260_v2  ;;  %v2265_v8 = vld [vmem:[%s2809_s29 + $0x118] sm:$0xff]   ;;  %v2268_v9 = vld [vmem:[%s2811_s21] sm:$0xff]   ;;  %v2271_v13 = vld [vmem:[%s2811_s21 + $0x8] sm:$0xff]  }
   0xc   :  { %2104 = vmatprep.subr.bf16.mxu0 %v2261_v3  ;;  %2014 = vmatprep.mubr.msk.bf16.mxu1 %vm118_vm0, %v2266_v7  ;;  %v2267_v10 = vld [vmem:[%s2809_s29] sm:$0xff]   ;;  %v2272_v14 = vld [vmem:[%s2809_s29 + $0x8] sm:$0xff]   ;;  %v2274_v16 = vld [vmem:[%s2809_s29 + $0x10] sm:$0xff]  }
   0xd   :  { %2110 = vmatprep.mubr.msk.bf16.mxu0 %vm118_vm0, %v2268_v9  ;;  %v2269_v11 = vld [vmem:[%s2809_s29 + $0x120] sm:$0xff]   ;;  %v2273_v15 = vld [vmem:[%s2809_s29 + $0x128] sm:$0xff]   ;;  %v2275_v18 = vld [vmem:[%s2809_s29 + $0x130] sm:$0xff]  }
   0xe   :  { %2009 = vmatpush3.bf16.msra.mxu1 %v2260_v2  ;;  %v2276_v20 = vld [vmem:[%s2809_s29 + $0x18] sm:$0xff]   ;;  %v2279_v22 = vld [vmem:[%s2809_s29 + $0x40] sm:$0xff]   ;;  %v2284_v26 = vld [vmem:[%s2809_s29 + $0x48] sm:$0xff]  }
   0xf   :  { %2105 = vmatpush3.bf16.msra.mxu0 %v2261_v3  ;;  %2010 = vmatprep.subr.bf16.mxu1 %v2262_v4  ;;  %v2277_v21 = vld [vmem:[%s2809_s29 + $0x138] sm:$0xff]   ;;  %v2281_v23 = vld [vmem:[%s2809_s29 + $0x140] sm:$0xff]   ;;  %v2285_v27 = vld [vmem:[%s2809_s29 + $0x148] sm:$0xff]  }
  0x10   :  { %2106 = vmatprep.subr.bf16.mxu0 %v2263_v5  ;;  %v2286_v30 = vld [vmem:[%s2809_s29 + $0x50] sm:$0xff]   ;;  %v2288_v32 = vld [vmem:[%s2809_s29 + $0x58] sm:$0xff]   ;;  %v2291_v34 = vld [vmem:[%s2809_s29 + $0x60] sm:$0xff]  }
  0x11   :  { %v2287_v31 = vld [vmem:[%s2809_s29 + $0x150] sm:$0xff]   ;;  %v2289_v33 = vld [vmem:[%s2809_s29 + $0x158] sm:$0xff]   ;;  %v2293_v35 = vld [vmem:[%s2809_s29 + $0x160] sm:$0xff]  }
  0x12   :  { %2011 = vmatpush3.bf16.msra.mxu1 %v2262_v4  ;;  %v2296_v38 = vld [vmem:[%s2809_s29 + $0x68] sm:$0xff]   ;;  %v2298_v42 = vld [vmem:[%s2809_s29 + $0x70] sm:$0xff]   ;;  %v2300_v44 = vld [vmem:[%s2809_s29 + $0x78] sm:$0xff]  }
  0x13   :  { %2107 = vmatpush3.bf16.msra.mxu0 %v2263_v5  ;;  %2012 = vmatprep.subr.bf16.mxu1 %v2264_v6  ;;  %v2297_v39 = vld [vmem:[%s2809_s29 + $0x168] sm:$0xff]   ;;  %v2299_v43 = vld [vmem:[%s2809_s29 + $0x170] sm:$0xff]   ;;  %v2301_v45 = vld [vmem:[%s2809_s29 + $0x178] sm:$0xff]  }
  0x14   :  { %2108 = vmatprep.subr.bf16.mxu0 %v2265_v8  ;;  %v2303_v46 = vld [vmem:[%s2809_s29 + $0x80] sm:$0xff]   ;;  %v2308_v50 = vld [vmem:[%s2809_s29 + $0x88] sm:$0xff]   ;;  %v2310_v54 = vld [vmem:[%s2809_s29 + $0x90] sm:$0xff]  }
  0x15   :  { %v2305_v47 = vld [vmem:[%s2809_s29 + $0x180] sm:$0xff]   ;;  %v2309_v51 = vld [vmem:[%s2809_s29 + $0x188] sm:$0xff]   ;;  %v2311_v55 = vld [vmem:[%s2809_s29 + $0x190] sm:$0xff]  }
  0x16   :  { %2013 = vmatpush3.bf16.msra.mxu1 %v2264_v6  ;;  %v2316_v53 = vld [vmem:[%s2794_s12] sm:$0xff]   ;;  %v2312_v56 = vld [vmem:[%s2809_s29 + $0x98] sm:$0xff]   ;;  %v2319_v61 = vld [vmem:[%s2794_s12 + $0x8] sm:$0xff]  }
  0x17   :  { %2109 = vmatpush3.bf16.msra.mxu0 %v2265_v8  ;;  %2018 = vmatprep.subr.bf16.mxu1 %v2267_v10  ;;  %v2313_v57 = vld [vmem:[%s2809_s29 + $0x198] sm:$0xff]   ;;  %v2315_v58 = vld [vmem:[%s2809_s29 + $0xa0] sm:$0xff]   ;;  %v2320_v62 = vld [vmem:[%s2809_s29 + $0xa8] sm:$0xff]  }
  0x18   :  { %2114 = vmatprep.subr.bf16.mxu0 %v2269_v11  ;;  %v2317_v59 = vld [vmem:[%s2809_s29 + $0x1a0] sm:$0xff]   ;;  %v2321_v63 = vld [vmem:[%s2809_s29 + $0x1a8] sm:$0xff]   ;;  %v2322_v2 = vld [vmem:[%s2809_s29 + $0xb0] sm:$0xff]  }
  0x19   :  { %2015 = vmatmul.mubr.msk.bf16.vlgmr.msra.gmra.mrb[0].mxu1 %vm118_vm0, %v2270_v12  ;;  %v2326_v0 = vld [vmem:[%s2795_s5] sm:$0xff]   ;;  %v2323_v3 = vld [vmem:[%s2809_s29 + $0x1b0] sm:$0xff]   ;;  %v2324_v4 = vld [vmem:[%s2809_s29 + $0xb8] sm:$0xff]  }
  0x1a   :  { %2019 = vmatpush3.bf16.msra.mxu1 %v2267_v10  ;;  %2111 = vmatmul.mubr.msk.bf16.vlgmr.msra.gmra.mrb[0].mxu0 %vm118_vm0, %v2271_v13  ;;  %v2328_v1 = vld [vmem:[%s2796_s13] sm:$0xff]   ;;  %v2325_v5 = vld [vmem:[%s2809_s29 + $0x1b8] sm:$0xff]   ;;  %v2330_v8 = vld [vmem:[%s2795_s5 + $0x8] sm:$0xff]  }
  0x1b   :  { %2115 = vmatpush3.bf16.msra.mxu0 %v2269_v11  ;;  %2020 = vmatprep.subr.bf16.mxu1 %v2272_v14  ;;  %v2327_v6 = vld [vmem:[%s2809_s29 + $0xc0] sm:$0xff]   ;;  %v2331_v9 = vld [vmem:[%s2796_s13 + $0x8] sm:$0xff]  }
  0x1c   :  { %2116 = vmatprep.subr.bf16.mxu0 %v2273_v15  ;;  %2026 = vmatprep.mubr.msk.bf16.mxu1 %vm118_vm0, %v2278_v17  ;;  %v2329_v7 = vld [vmem:[%s2809_s29 + $0x1c0] sm:$0xff]   ;;  %v2332_v10 = vld [vmem:[%s2809_s29 + $0xc8] sm:$0xff]   ;;  %v2337_v17 = vld [vmem:[%s2809_s29 + $0x1d8] sm:$0xff]  }
  0x1d   :  { %2122 = vmatprep.mubr.msk.bf16.mxu0 %vm118_vm0, %v2280_v19  ;;  %v2333_v11 = vld [vmem:[%s2809_s29 + $0x1c8] sm:$0xff]   ;;  %v2338_v12 = vld [vmem:[%s2797_s6] sm:$0xff]  }
  0x1e   :  { %2021 = vmatpush3.bf16.msra.mxu1 %v2272_v14  ;;  %v2340_v13 = vld [vmem:[%s2798_s14] sm:$0xff]   ;;  %v2334_v14 = vld [vmem:[%s2809_s29 + $0xd0] sm:$0xff]  }
  0x1f   :  { %2117 = vmatpush3.bf16.msra.mxu0 %v2273_v15  ;;  %2022 = vmatprep.subr.bf16.mxu1 %v2274_v16  ;;  %v2335_v15 = vld [vmem:[%s2809_s29 + $0x1d0] sm:$0xff]   ;;  %v2341_v19 = vld [vmem:[%s2809_s29 + $0x1e0] sm:$0xff]  }
  0x20   :  { %2118 = vmatprep.subr.bf16.mxu0 %v2275_v18 }
  0x22   :  { %2023 = vmatpush3.bf16.msra.mxu1 %v2274_v16  ;;  %v2336_v16 = vld [vmem:[%s2809_s29 + $0xd8] sm:$0xff]  }
  0x23   :  { %2119 = vmatpush3.bf16.msra.mxu0 %v2275_v18  ;;  %2024 = vmatprep.subr.bf16.mxu1 %v2276_v20  ;;  %v2339_v18 = vld [vmem:[%s2809_s29 + $0xe0] sm:$0xff]  }
  0x24   :  { %2120 = vmatprep.subr.bf16.mxu0 %v2277_v21 }
  0x26   :  { %2025 = vmatpush3.bf16.msra.mxu1 %v2276_v20  ;;  %v2342_v20 = vld [vmem:[%s2797_s6 + $0x8] sm:$0xff]  }
  0x27   :  { %2121 = vmatpush3.bf16.msra.mxu0 %v2277_v21  ;;  %2030 = vmatprep.subr.bf16.mxu1 %v2279_v22  ;;  %v2343_v21 = vld [vmem:[%s2798_s14 + $0x8] sm:$0xff]  }
  0x28   :  { %2126 = vmatprep.subr.bf16.mxu0 %v2281_v23 }
  0x29   :  { %2027 = vmatmul.mubr.msk.bf16.vlgmr.msra.gmra.mrb[0].mxu1 %vm118_vm0, %v2282_v24  ;;  %v2350_v24 = vld [vmem:[%s2799_s7] sm:$0xff]  }
  0x2a   :  { %2031 = vmatpush3.bf16.msra.mxu1 %v2279_v22  ;;  %2123 = vmatmul.mubr.msk.bf16.vlgmr.msra.gmra.mrb[0].mxu0 %vm118_vm0, %v2283_v25  ;;  %v2344_v22 = vld [vmem:[%s2809_s29 + $0xe8] sm:$0xff]   ;;  %v2351_v25 = vld [vmem:[%s2800_s15] sm:$0xff]  }
  0x2b   :  { %2127 = vmatpush3.bf16.msra.mxu0 %v2281_v23  ;;  %2032 = vmatprep.subr.bf16.mxu1 %v2284_v26  ;;  %v2345_v23 = vld [vmem:[%s2809_s29 + $0x1e8] sm:$0xff]  }
  0x2c   :  { %2128 = vmatprep.subr.bf16.mxu0 %v2285_v27  ;;  %2038 = vmatprep.mubr.msk.bf16.mxu1 %vm118_vm0, %v2290_v28  ;;  %v2348_v28 = vld [vmem:[%s2809_s29 + $0xf8] sm:$0xff]  }
  0x2d   :  { %2134 = vmatprep.mubr.msk.bf16.mxu0 %vm118_vm0, %v2292_v29  ;;  %v2349_v29 = vld [vmem:[%s2809_s29 + $0x1f8] sm:$0xff]  }
  0x2e   :  { %2033 = vmatpush3.bf16.msra.mxu1 %v2284_v26  ;;  %v2346_v26 = vld [vmem:[%s2809_s29 + $0xf0] sm:$0xff]  }
  0x2f   :  { %2129 = vmatpush3.bf16.msra.mxu0 %v2285_v27  ;;  %2034 = vmatprep.subr.bf16.mxu1 %v2286_v30  ;;  %v2347_v27 = vld [vmem:[%s2809_s29 + $0x1f0] sm:$0xff]  }
  0x30   :  { %2130 = vmatprep.subr.bf16.mxu0 %v2287_v31 }
  0x32   :  { %2035 = vmatpush3.bf16.msra.mxu1 %v2286_v30  ;;  %v2352_v30 = vld [vmem:[%s2799_s7 + $0x8] sm:$0xff]  }
  0x33   :  { %2131 = vmatpush3.bf16.msra.mxu0 %v2287_v31  ;;  %2036 = vmatprep.subr.bf16.mxu1 %v2288_v32  ;;  %v2353_v31 = vld [vmem:[%s2800_s15 + $0x8] sm:$0xff]  }
  0x34   :  { %2132 = vmatprep.subr.bf16.mxu0 %v2289_v33 }
  0x36   :  { %2037 = vmatpush3.bf16.msra.mxu1 %v2288_v32 }
  0x37   :  { %2133 = vmatpush3.bf16.msra.mxu0 %v2289_v33  ;;  %2042 = vmatprep.subr.bf16.mxu1 %v2291_v34 }
  0x38   :  { %2138 = vmatprep.subr.bf16.mxu0 %v2293_v35 }
  0x39   :  { %2039 = vmatmul.mubr.msk.bf16.vlgmr.msra.gmra.mrb[0].mxu1 %vm118_vm0, %v2294_v36 }
  0x3a   :  { %2043 = vmatpush3.bf16.msra.mxu1 %v2291_v34  ;;  %2135 = vmatmul.mubr.msk.bf16.vlgmr.msra.gmra.mrb[0].mxu0 %vm118_vm0, %v2295_v37  ;;  %v1901_v34 = vld [vmem:[%s2801_s17] ss:$0 sm:$0xff] }
  0x3b   :  { %2139 = vmatpush3.bf16.msra.mxu0 %v2293_v35  ;;  %2044 = vmatprep.subr.bf16.mxu1 %v2296_v38 }
  0x3c   :  { %2140 = vmatprep.subr.bf16.mxu0 %v2297_v39  ;;  %2050 = vmatprep.mubr.msk.bf16.mxu1 %vm118_vm0, %v2302_v40 }
  0x3d   :  { %2146 = vmatprep.mubr.msk.bf16.mxu0 %vm118_vm0, %v2304_v41 }
  0x3e   :  { %2045 = vmatpush3.bf16.msra.mxu1 %v2296_v38 }
  0x3f   :  { %2141 = vmatpush3.bf16.msra.mxu0 %v2297_v39  ;;  %2046 = vmatprep.subr.bf16.mxu1 %v2298_v42 }
  0x40   :  { %2142 = vmatprep.subr.bf16.mxu0 %v2299_v43 }
  0x42   :  { %2047 = vmatpush3.bf16.msra.mxu1 %v2298_v42 }
  0x43   :  { %2143 = vmatpush3.bf16.msra.mxu0 %v2299_v43  ;;  %2048 = vmatprep.subr.bf16.mxu1 %v2300_v44 }
  0x44   :  { %2144 = vmatprep.subr.bf16.mxu0 %v2301_v45 }
  0x46   :  { %2049 = vmatpush3.bf16.msra.mxu1 %v2300_v44 }
  0x47   :  { %2145 = vmatpush3.bf16.msra.mxu0 %v2301_v45  ;;  %2054 = vmatprep.subr.bf16.mxu1 %v2303_v46 }
  0x48   :  { %2150 = vmatprep.subr.bf16.mxu0 %v2305_v47 }
  0x49   :  { %2051 = vmatmul.mubr.msk.bf16.vlgmr.msra.gmra.mrb[0].mxu1 %vm118_vm0, %v2306_v48 }
  0x4a   :  { %2055 = vmatpush3.bf16.msra.mxu1 %v2303_v46  ;;  %2147 = vmatmul.mubr.msk.bf16.vlgmr.msra.gmra.mrb[0].mxu0 %vm118_vm0, %v2307_v49 }
  0x4b   :  { %2151 = vmatpush3.bf16.msra.mxu0 %v2305_v47  ;;  %2056 = vmatprep.subr.bf16.mxu1 %v2308_v50 }
  0x4c   :  { %2152 = vmatprep.subr.bf16.mxu0 %v2309_v51  ;;  %2062 = vmatprep.mubr.msk.bf16.mxu1 %vm118_vm0, %v2314_v52 }
  0x4d   :  { %2158 = vmatprep.mubr.msk.bf16.mxu0 %vm118_vm0, %v2316_v53 }
  0x4e   :  { %2057 = vmatpush3.bf16.msra.mxu1 %v2308_v50 }
  0x4f   :  { %2153 = vmatpush3.bf16.msra.mxu0 %v2309_v51  ;;  %2058 = vmatprep.subr.bf16.mxu1 %v2310_v54 }
  0x50   :  { %2154 = vmatprep.subr.bf16.mxu0 %v2311_v55 }
  0x52   :  { %2059 = vmatpush3.bf16.msra.mxu1 %v2310_v54 }
  0x53   :  { %2155 = vmatpush3.bf16.msra.mxu0 %v2311_v55  ;;  %2060 = vmatprep.subr.bf16.mxu1 %v2312_v56 }
  0x54   :  { %2156 = vmatprep.subr.bf16.mxu0 %v2313_v57 }
  0x56   :  { %2061 = vmatpush3.bf16.msra.mxu1 %v2312_v56 }
  0x57   :  { %2157 = vmatpush3.bf16.msra.mxu0 %v2313_v57  ;;  %2066 = vmatprep.subr.bf16.mxu1 %v2315_v58 }
  0x58   :  { %2162 = vmatprep.subr.bf16.mxu0 %v2317_v59 }
  0x59   :  { %2063 = vmatmul.mubr.msk.bf16.vlgmr.msra.gmra.mrb[0].mxu1 %vm118_vm0, %v2318_v60 }
  0x5a   :  { %2067 = vmatpush3.bf16.msra.mxu1 %v2315_v58  ;;  %2159 = vmatmul.mubr.msk.bf16.vlgmr.msra.gmra.mrb[0].mxu0 %vm118_vm0, %v2319_v61 }
  0x5b   :  { %2163 = vmatpush3.bf16.msra.mxu0 %v2317_v59  ;;  %2068 = vmatprep.subr.bf16.mxu1 %v2320_v62 }
  0x5c   :  { %2164 = vmatprep.subr.bf16.mxu0 %v2321_v63  ;;  %2074 = vmatprep.mubr.msk.bf16.mxu1 %vm118_vm0, %v2326_v0 }
  0x5d   :  { %2170 = vmatprep.mubr.msk.bf16.mxu0 %vm118_vm0, %v2328_v1 }
  0x5e   :  { %2069 = vmatpush3.bf16.msra.mxu1 %v2320_v62 }
  0x5f   :  { %2165 = vmatpush3.bf16.msra.mxu0 %v2321_v63  ;;  %2070 = vmatprep.subr.bf16.mxu1 %v2322_v2 }
  0x60   :  { %2166 = vmatprep.subr.bf16.mxu0 %v2323_v3 }
  0x62   :  { %2071 = vmatpush3.bf16.msra.mxu1 %v2322_v2 }
  0x63   :  { %2167 = vmatpush3.bf16.msra.mxu0 %v2323_v3  ;;  %2072 = vmatprep.subr.bf16.mxu1 %v2324_v4 }
  0x64   :  { %2168 = vmatprep.subr.bf16.mxu0 %v2325_v5 }
  0x66   :  { %2073 = vmatpush3.bf16.msra.mxu1 %v2324_v4 }
  0x67   :  { %2169 = vmatpush3.bf16.msra.mxu0 %v2325_v5  ;;  %2078 = vmatprep.subr.bf16.mxu1 %v2327_v6 }
  0x68   :  { %2174 = vmatprep.subr.bf16.mxu0 %v2329_v7 }
  0x69   :  { %2075 = vmatmul.mubr.msk.bf16.vlgmr.msra.gmra.mrb[0].mxu1 %vm118_vm0, %v2330_v8 }
  0x6a   :  { %2079 = vmatpush3.bf16.msra.mxu1 %v2327_v6  ;;  %2171 = vmatmul.mubr.msk.bf16.vlgmr.msra.gmra.mrb[0].mxu0 %vm118_vm0, %v2331_v9 }
  0x6b   :  { %2175 = vmatpush3.bf16.msra.mxu0 %v2329_v7  ;;  %2080 = vmatprep.subr.bf16.mxu1 %v2332_v10 }
  0x6c   :  { %2176 = vmatprep.subr.bf16.mxu0 %v2333_v11  ;;  %2086 = vmatprep.mubr.msk.bf16.mxu1 %vm118_vm0, %v2338_v12 }
  0x6d   :  { %2182 = vmatprep.mubr.msk.bf16.mxu0 %vm118_vm0, %v2340_v13 }
  0x6e   :  { %2081 = vmatpush3.bf16.msra.mxu1 %v2332_v10 }
  0x6f   :  { %2177 = vmatpush3.bf16.msra.mxu0 %v2333_v11  ;;  %2082 = vmatprep.subr.bf16.mxu1 %v2334_v14 }
  0x70   :  { %2178 = vmatprep.subr.bf16.mxu0 %v2335_v15 }
  0x72   :  { %2083 = vmatpush3.bf16.msra.mxu1 %v2334_v14 }
  0x73   :  { %2179 = vmatpush3.bf16.msra.mxu0 %v2335_v15  ;;  %2084 = vmatprep.subr.bf16.mxu1 %v2336_v16 }
  0x74   :  { %2180 = vmatprep.subr.bf16.mxu0 %v2337_v17 }
  0x76   :  { %2085 = vmatpush3.bf16.msra.mxu1 %v2336_v16 }
  0x77   :  { %2181 = vmatpush3.bf16.msra.mxu0 %v2337_v17  ;;  %2090 = vmatprep.subr.bf16.mxu1 %v2339_v18 }
  0x78   :  { %2186 = vmatprep.subr.bf16.mxu0 %v2341_v19 }
  0x79   :  { %2087 = vmatmul.mubr.msk.bf16.vlgmr.msra.gmra.mrb[0].mxu1 %vm118_vm0, %v2342_v20 }
  0x7a   :  { %2091 = vmatpush3.bf16.msra.mxu1 %v2339_v18  ;;  %2183 = vmatmul.mubr.msk.bf16.vlgmr.msra.gmra.mrb[0].mxu0 %vm118_vm0, %v2343_v21 }
  0x7b   :  { %2187 = vmatpush3.bf16.msra.mxu0 %v2341_v19  ;;  %2092 = vmatprep.subr.bf16.mxu1 %v2344_v22 }
  0x7c   :  { %2188 = vmatprep.subr.bf16.mxu0 %v2345_v23  ;;  %2098 = vmatprep.mubr.msk.bf16.mxu1 %vm118_vm0, %v2350_v24 }
  0x7d   :  { %2194 = vmatprep.mubr.msk.bf16.mxu0 %vm118_vm0, %v2351_v25 }
  0x7e   :  { %2093 = vmatpush3.bf16.msra.mxu1 %v2344_v22 }
  0x7f   :  { %2189 = vmatpush3.bf16.msra.mxu0 %v2345_v23  ;;  %2094 = vmatprep.subr.bf16.mxu1 %v2346_v26 }
  0x80   :  { %2190 = vmatprep.subr.bf16.mxu0 %v2347_v27 }
  0x82   :  { %2095 = vmatpush3.bf16.msra.mxu1 %v2346_v26 }
  0x83   :  { %2191 = vmatpush3.bf16.msra.mxu0 %v2347_v27  ;;  %2096 = vmatprep.subr.bf16.mxu1 %v2348_v28 }
  0x84   :  { %2192 = vmatprep.subr.bf16.mxu0 %v2349_v29 }
  0x86   :  { %2097 = vmatpush3.bf16.msra.mxu1 %v2348_v28 }
  0x87   :  { %2193 = vmatpush3.bf16.msra.mxu0 %v2349_v29 }
  0x89   :  { %2099 = vmatmul.mubr.msk.bf16.vlgmr.msra.gmra.mrb[0].mxu1 %vm118_vm0, %v2352_v30 }
  0x8a   :  { %2195 = vmatmul.mubr.msk.bf16.vlgmr.msra.gmra.mrb[0].mxu0 %vm118_vm0, %v2353_v31 }
 0x15c   :  { %v2100_v32 = vpop.f32.mrb[0].mxu1 }
 0x15d   :  { %v2196_v33 = vpop.f32.mrb[0].mxu0  ;;  %v874_v35 = vpop.f32.mrb[1].mxu1 }
 0x15e   :  { %v2198_v36 = vadd.f32 %v2196_v33, %v2100_v32  ;;  %v1714_v37 = vpop.f32.mrb[1].mxu0  ;;  %v2101_v38 = vpop.f32.mrb[2].mxu1 }
 0x15f   :  { %v2199_v39 = vadd.f32 %v1714_v37, %v874_v35  ;;  %v2197_v40 = vpop.f32.mrb[2].mxu0  ;;  %v877_v41 = vpop.f32.mrb[3].mxu1 }
 0x160   :  { %v1742_v42 = vadd.f32 %v2198_v36, %v1901_v34  ;;  %v2200_v43 = vadd.f32 %v2197_v40, %v2101_v38  ;;  %v1717_v44 = vpop.f32.mrb[3].mxu0 }
 0x161   :  { %v1740_v45 = vadd.f32 %v2199_v39, %v1901_v34  ;;  %v2201_v46 = vadd.f32 %v1717_v44, %v877_v41 }
 0x162   :  { %v1746_v47 = vmax.f32 %v1742_v42, 0.0  ;;  %v1743_v48 = vadd.f32 %v2200_v43, %v1901_v34 }
 0x163   :  { %v1744_v49 = vmax.f32 %v1740_v45, 0.0  ;;  %v1741_v50 = vadd.f32 %v2201_v46, %v1901_v34 }
 0x164   :  { %v1908_v51 = vpack.c.bf16 %v1746_v47, %v1746_v47  ;;  %v1747_v52 = vmax.f32 %v1743_v48, 0.0 }
 0x165   :  { %v1906_v53 = vpack.c.bf16 %v1744_v49, %v1744_v49  ;;  %v1745_v54 = vmax.f32 %v1741_v50, 0.0 }
 0x166   :  { %1767 = vst.msk [vmem:[%s2802_s18 + $0x8] sm:$0xf] %vm1764_vm1, %v1908_v51  ;;  %v1909_v55 = vpack.c.bf16 %v1747_v52, %v1747_v52 }
 0x167   :  { %1765 = vst.msk [vmem:[%s2802_s18] sm:$0xf] %vm1764_vm1, %v1906_v53  ;;  %v1907_v56 = vpack.c.bf16 %v1745_v54, %v1745_v54 }
 0x168   :  { %1768 = vst.msk [vmem:[%s2802_s18 + $0xc] sm:$0xf] %vm1764_vm1, %v1909_v55 }
 0x169   :  { %1766 = vst.msk [vmem:[%s2802_s18 + $0x4] sm:$0xf] %vm1764_vm1, %v1907_v56 }

// kernel: animenet5_forward.87
= control target key start
LH: loop header
LB: loop body
LE: loop exit
PB: predicated region body
PF: predicated region fallthrough
CT: control target
= control target key end

     0   :  { %s1125_s12 = smov 0   ;;  %s1127_s13 = smov 0   ;;  %s1325_s0 = inlined_call_operand.vmem [shape: bf16[2,10,10,16], index: 0, kind: input, shape index: {}]   ;;  %s1326_s1 = inlined_call_operand.vmem [shape: bf16[3,48,12], index: 1, kind: input, shape index: {}]   ;;  %s1327_s2 = inlined_call_operand.vmem [shape: f32[1,12], index: 2, kind: input, shape index: {}]   ;;  %s1328_s3 = inlined_call_operand.vmem [shape: bf16[2,8,8,12], index: 3, kind: output, shape index: {}]  }
   0x1   :  { %s1129_s14 = smov 0  }
   0x2 LB: > { %s25_s15 = sadd.s32 1, %s1097_s13  ;;  %p888_p0 = scmp.ge.s32.totalorder %s1101_s14, 1  ;;  %s1101_s14 = sphi %s1129_s14, %s13_s14   ;;  %s1097_s13 = sphi %s1127_s13, %s1330_s13   ;;  %s1093_s12 = sphi %s1125_s12, %s1329_s12  }
   0x3   : > { %p27_p1 = scmp.ge.s32.totalorder %s25_s15, 2  ;;  %p151_p2 = scmp.lt.s32.totalorder %s1101_s14, 3 }
   0x5   : > { %s1332_s15 = smov (%p27_p1, %s25_s15), 0  ;;  %p152_p3 = pnand %p888_p0, %p151_p2 }
   0x6   : > { %p179_p4 = scmp.lt.s32.totalorder (!%p152_p3), %s1093_s12, 1  ;;  %v1070_v0 = vld [vmem:[%s1326_s1 + $0x18] sm:$0xff] (!%p152_p3)   ;;  %v1071_v1 = vld [vmem:[%s1326_s1] sm:$0xff] (!%p152_p3)   ;;  %v1073_v20 = vld [vmem:[%s1326_s1 + $0x8] sm:$0xff] (!%p152_p3)   ;;  %s1103_s28 = smov (!%p152_p3), 32   ;;  %vm351_vm0 = vcmask (!%p152_p3), 130048  }
   0x7   : > { %155 = sbr.rel (%p152_p3) target bundleno = 404 (0x194), region = 32  ;;  %969 = vmatprep.subr.bf16.mxu1 (!%p152_p3), %v1070_v0  ;;  %983 = vmatprep.subr.bf16.mxu0 (!%p152_p3), %v1071_v1  ;;  %v1072_v17 = vld [vmem:[%s1326_s1 + $0x20] sm:$0xff] (!%p152_p3)   ;;  %v1074_v35 = vld [vmem:[%s1326_s1 + $0x28] sm:$0xff] (!%p152_p3)   ;;  %v1075_v40 = vld [vmem:[%s1326_s1 + $0x10] sm:$0xff] (!%p152_p3)   ;;  %s1104_s6 = smov (!%p152_p3), 16   ;;  %vm376_vm1 = vcmask (!%p152_p3), 261120  }
   0x8   : > { %970 = vmatpush3.bf16.msra.mxu1 (!%p152_p3), %v1070_v0  ;;  %984 = vmatpush3.bf16.msra.mxu0 (!%p152_p3), %v1071_v1  ;;  %v1230_v1 = vld [vmem:[%s1326_s1 + $0x30] sm:$0xff] (!%p152_p3)   ;;  %vm466_vm2 = vcmask (!%p152_p3), 392192   ;;  %vm794_vm3 = vcmask (!%p152_p3), 93184  }
   0x9   : > { %971 = vmatprep.subr.bf16.mxu1 (!%p152_p3), %v1072_v17  ;;  %985 = vmatprep.subr.bf16.mxu0 (!%p152_p3), %v1073_v20 }
   0xc   : > { %972 = vmatpush3.bf16.msra.mxu1 (!%p152_p3), %v1072_v17  ;;  %986 = vmatpush3.bf16.msra.mxu0 (!%p152_p3), %v1073_v20 }
   0xd   : > { %973 = vmatprep.subr.bf16.mxu1 (!%p152_p3), %v1074_v35  ;;  %987 = vmatprep.subr.bf16.mxu0 (!%p152_p3), %v1075_v40 }
   0xe   : > { %s1334_s12 = smov (!%p179_p4, %s1093_s12), 1 }
   0xf   : > { %s1033_s16 = smul.u32 80, %s1334_s12 }
  0x10   : > { %974 = vmatpush3.bf16.msra.mxu1 %v1074_v35  ;;  %988 = vmatpush3.bf16.msra.mxu0 %v1075_v40 }
  0x11   : > { %s1149_s19 = scalar_lea.vmem %s1325_s0, %s1033_s16  ;;  %997 = vmatprep.subr.bf16.mxu0 %v1230_v1  ;;  %1011 = vmatprep.subr.bf16.mxu1 %v1230_v1 }
  0x12   : > { %v1158_v2 = vld [vmem:[%s1149_s19 + $0x8] sm:$0xf]  ;;  %v198_v3 = vld [vmem:[%s1149_s19 + $0xc] sm:$0x1]  ;;  %v1162_v4 = vld [vmem:[%s1149_s19] sm:$0xf] }
  0x13   : > { %v893_v5 = vcombine.low %v1158_v2, %v198_v3  ;;  %v196_v6 = vld [vmem:[%s1149_s19 + $0x4] sm:$0x1]  ;;  %v1167_v7 = vld [vmem:[%s1149_s19 + $0x18] sm:$0xf]  ;;  %v202_v8 = vld [vmem:[%s1149_s19 + $0x1c] sm:$0x1] }
  0x14   : > { %v892_v9 = vcombine.low %v1162_v4, %v196_v6  ;;  %v1172_v10 = vcombine.low %v1167_v7, %v202_v8  ;;  %v1175_v11 = vld [vmem:[%s1149_s19 + $0x10] sm:$0xf]  ;;  %v200_v12 = vld [vmem:[%s1149_s19 + $0x14] sm:$0x1]  ;;  %v1179_v13 = vld [vmem:[%s1149_s19 + $0x20] sm:$0xf] }
  0x15   : > { %v328_v14 = vrot.slane %v893_v5, 1  ;;  %v894_v15 = vcombine.low %v1175_v11, %v200_v12  ;;  %v204_v16 = vld [vmem:[%s1149_s19 + $0x24] sm:$0x1]  ;;  %v265_v24 = vshll.u32 %v893_v5, 16  ;;  %v1194_v27 = vld [vmem:[%s1149_s19 + $0x30] sm:$0xf] }
  0x16   : > { %v327_v18 = vrot.slane %v892_v9, 1  ;;  %v896_v19 = vcombine.low %v1179_v13, %v204_v16  ;;  %v330_v21 = vrot.slane %v1172_v10, 1  ;;  %v256_v22 = vshrl.u32 %v892_v9, 16  ;;  %v1197_v28 = vld [vmem:[%s1149_s19 + $0x28] sm:$0xf] }
  0x17   : > { %337 = vrot.lane.b32.xlu0 %v328_v14, %s1103_s28  ;;  %v258_v23 = vshll.u32 %v892_v9, 16  ;;  %v329_v25 = vrot.slane %v894_v15, 1  ;;  %v272_v26 = vshll.u32 %v894_v15, 16  ;;  %v208_v30 = vld [vmem:[%s1149_s19 + $0x34] sm:$0x1]  ;;  %v270_v33 = vshrl.u32 %v894_v15, 16 }
  0x18   : > { %335 = vrot.lane.b32.xlu1 %v327_v18, %s1103_s28  ;;  %v206_v31 = vld [vmem:[%s1149_s19 + $0x2c] sm:$0x1]  ;;  %v331_v32 = vrot.slane %v896_v19, 1  ;;  %v263_v34 = vshrl.u32 %v893_v5, 16  ;;  %v267_v37 = vrot.slane %v265_v24, 1  ;;  %v286_v38 = vshll.u32 %v896_v19, 16 }
  0x19   : > { %v260_v29 = vrot.slane %v258_v23, 1  ;;  %v897_v39 = vcombine.low %v1197_v28, %v206_v31  ;;  %v274_v41 = vrot.slane %v272_v26, 1  ;;  %v279_v42 = vshll.u32 %v1172_v10, 16  ;;  %v1213_v44 = vld [vmem:[%s1149_s19 + $0x38] sm:$0xf] }
  0x1a   : > { %v898_v43 = vcombine.low %v1194_v27, %v208_v30  ;;  %v210_v45 = vld [vmem:[%s1149_s19 + $0x3c] sm:$0x1]  ;;  %v284_v46 = vshrl.u32 %v896_v19, 16  ;;  %v268_v47 = vor.u32 %v267_v37, %v263_v34  ;;  %v288_v48 = vrot.slane %v286_v38, 1  ;;  %v1221_v55 = vld [vmem:[%s1149_s19 + $0x40] sm:$0xf] }
  0x1b   : > { %341 = vrot.lane.b32.xlu0 %v330_v21, %s1103_s28  ;;  %v261_v36 = vor.u32 %v260_v29, %v256_v22  ;;  %v293_v49 = vshll.u32 %v897_v39, 16  ;;  %v899_v50 = vcombine.low %v1213_v44, %v210_v45  ;;  %v275_v51 = vor.u32 %v274_v41, %v270_v33  ;;  %v212_v56 = vld [vmem:[%s1149_s19 + $0x44] sm:$0x1]  ;;  %v214_v12 = vld [vmem:[%s1149_s19 + $0x4c] sm:$0x1] }
  0x1c   : > { %339 = vrot.lane.b32.xlu1 %v329_v25, %s1103_s28  ;;  %v277_v52 = vshrl.u32 %v1172_v10, 16  ;;  %v281_v53 = vrot.slane %v279_v42, 1  ;;  %v300_v54 = vshll.u32 %v898_v43, 16  ;;  %v289_v57 = vor.u32 %v288_v48, %v284_v46  ;;  %v1237_v10 = vld [vmem:[%s1149_s19 + $0x48] sm:$0xf]  ;;  %s947_s19 = sshll.u32 %s1334_s12, 5 }
  0x1d   : > { %v291_v58 = vshrl.u32 %v897_v39, 16  ;;  %v295_v59 = vrot.slane %v293_v49, 1  ;;  %v307_v60 = vshll.u32 %v899_v50, 16  ;;  %v298_v62 = vshrl.u32 %v898_v43, 16  ;;  %s192_s22 = scalar_lea.vmem %s1328_s3, %s947_s19 }
  0x1e   : > { %v282_v61 = vor.u32 %v281_v53, %v277_v52  ;;  %v302_v63 = vrot.slane %v300_v54, 1  ;;  %v900_v0 = vcombine.low %v1221_v55, %v212_v56  ;;  %v305_v5 = vshrl.u32 %v899_v50, 16  ;;  %v1077_v53 = vld [vmem:[%s1326_s1 + $0x38] sm:$0xff]  }
  0x1f   : > { %311 = vrot.lane.b32.xlu0 %v261_v36, %s1104_s6  ;;  %v296_v3 = vor.u32 %v295_v59, %v291_v58  ;;  %v309_v6 = vrot.slane %v307_v60, 1  ;;  %v929_v15 = vcombine.low %v1237_v10, %v214_v12  ;;  %v332_v16 = vrot.slane %v897_v39, 1 }
  0x20   : > { %343 = vrot.lane.b32.xlu1 %v331_v32, %s1103_s28  ;;  %v303_v8 = vor.u32 %v302_v63, %v298_v62  ;;  %v407_v9 = vshll.u32 %v900_v0, 16  ;;  %v405_v17 = vshrl.u32 %v900_v0, 16  ;;  %v333_v19 = vrot.slane %v898_v43, 1 }
  0x21   : > { %v310_v14 = vor.u32 %v309_v6, %v305_v5  ;;  %v653_v20 = vshll.u32 %v929_v15, 16  ;;  %v334_v22 = vrot.slane %v899_v50, 1  ;;  %v651_v23 = vshrl.u32 %v929_v15, 16 }
  0x22   : > { %v409_v18 = vrot.slane %v407_v9, 1  ;;  %v413_v25 = vrot.slane %v900_v0, 1  ;;  %v659_v29 = vrot.slane %v929_v15, 1 }
  0x23   : > { %313 = vrot.lane.b32.xlu0 %v268_v47, %s1104_s6  ;;  %v655_v24 = vrot.slane %v653_v20, 1 }
  0x24   : > { %315 = vrot.lane.b32.xlu1 %v275_v51, %s1104_s6  ;;  %v410_v21 = vor.u32 %v409_v18, %v405_v17 }
  0x25   : > { %v656_v26 = vor.u32 %v655_v24, %v651_v23 }
  0x27   : > { %319 = vrot.lane.b32.xlu0 %v289_v57, %s1104_s6 }
  0x28   : > { %317 = vrot.lane.b32.xlu1 %v282_v61, %s1104_s6 }
  0x2b   : > { %321 = vrot.lane.b32.xlu0 %v296_v3, %s1104_s6 }
  0x2c   : > { %323 = vrot.lane.b32.xlu1 %v303_v8, %s1104_s6 }
  0x2f   : > { %325 = vrot.lane.b32.xlu0 %v310_v14, %s1104_s6 }
  0x30   : > { %345 = vrot.lane.b32.xlu1 %v332_v16, %s1103_s28 }
  0x33   : > { %347 = vrot.lane.b32.xlu0 %v333_v19, %s1103_s28 }
  0x34   : > { %411 = vrot.lane.b32.xlu1 %v410_v21, %s1104_s6 }
  0x37   : > { %349 = vrot.lane.b32.xlu0 %v334_v22, %s1103_s28 }
  0x38   : > { %414 = vrot.lane.b32.xlu1 %v413_v25, %s1103_s28 }
  0x3b   : > { %657 = vrot.lane.b32.xlu0 %v656_v26, %s1104_s6 }
  0x3c   : > { %660 = vrot.lane.b32.xlu1 %v659_v29, %s1103_s28 }
  0x89   : > { %v338_v30 = vpop.permute.xlu0 %337 }
  0x8a   : > { %v336_v31 = vpop.permute.xlu1 %335 }
  0x8d   : > { %v342_v32 = vpop.permute.xlu0 %341 }
  0x8e   : > { %v340_v33 = vpop.permute.xlu1 %339 }
  0x91   : > { %v312_v34 = vpop.permute.xlu0 %311 }
  0x92   : > { %v344_v35 = vpop.permute.xlu1 %343  ;;  %v354_v36 = vsel %vm351_vm0, %v1162_v4, %v312_v34  ;;  %v944_v34 = vld [vmem:[%s1327_s2] ss:$0 sm:$0xff] }
  0x93   : > { %v378_v42 = vsel %vm376_vm1, %v354_v36, %v336_v31 }
  0x95   : > { %v314_v37 = vpop.permute.xlu0 %313 }
  0x96   : > { %v316_v38 = vpop.permute.xlu1 %315  ;;  %v357_v39 = vsel %vm351_vm0, %v1158_v2, %v314_v37 }
  0x97   : > { %v360_v40 = vsel %vm351_vm0, %v1175_v11, %v316_v38  ;;  %v380_v41 = vsel %vm376_vm1, %v357_v39, %v338_v30 }
  0x98   : > { %v382_v43 = vsel %vm376_vm1, %v360_v40, %v340_v33  ;;  %v918_v45 = vcombine.low %v378_v42, %v380_v41 }
  0x99   : > { %v320_v46 = vpop.permute.xlu0 %319  ;;  %v907_v47 = vcombine.low %v380_v41, %v382_v43 }
  0x9a   : > { %v318_v4 = vpop.permute.xlu1 %317  ;;  %v366_v48 = vsel %vm351_vm0, %v1179_v13, %v320_v46  ;;  %989 = vmatprep.mubr.msk.bf16.mxu0 %vm466_vm2, %v918_v45  ;;  %v1078_v13 = vld [vmem:[%s1326_s1 + $0x40] sm:$0xff]  }
  0x9b   : > { %v363_v2 = vsel %vm351_vm0, %v1167_v7, %v318_v4  ;;  %v386_v11 = vsel %vm376_vm1, %v366_v48, %v344_v35  ;;  %975 = vmatprep.mubr.msk.bf16.mxu1 %vm466_vm2, %v907_v47 }
  0x9c   : > { %v384_v49 = vsel %vm376_vm1, %v363_v2, %v342_v32 }
  0x9d   : > { %v908_v50 = vcombine.low %v384_v49, %v386_v11  ;;  %v919_v51 = vcombine.low %v382_v43, %v384_v49  ;;  %v322_v52 = vpop.permute.xlu0 %321 }
  0x9e   : > { %v324_v54 = vpop.permute.xlu1 %323  ;;  %v369_v56 = vsel %vm351_vm0, %v1197_v28, %v322_v52 }
  0x9f   : > { %976 = vmatmul.mubr.msk.bf16.vlgmr.msra.gmra.mrb[0].mxu1 %vm466_vm2, %v908_v50  ;;  %990 = vmatmul.mubr.msk.bf16.vlgmr.msra.gmra.mrb[0].mxu0 %vm466_vm2, %v919_v51  ;;  %v372_v60 = vsel %vm351_vm0, %v1194_v27, %v324_v54 }
  0xa0   : > { %998 = vmatpush3.bf16.msra.mxu0 %v1230_v1  ;;  %1014 = vmatpush3.bf16.msra.mxu1 %v1230_v1 }
  0xa1   : > { %v326_v7 = vpop.permute.xlu0 %325  ;;  %999 = vmatprep.subr.bf16.mxu0 %v1077_v53  ;;  %1012 = vmatprep.subr.bf16.mxu1 %v1077_v53 }
  0xa2   : > { %v346_v57 = vpop.permute.xlu1 %345  ;;  %v375_v28 = vsel %vm351_vm0, %v1213_v44, %v326_v7 }
  0xa3   : > { %v388_v58 = vsel %vm376_vm1, %v369_v56, %v346_v57 }
  0xa4   : > { %v920_v59 = vcombine.low %v386_v11, %v388_v58  ;;  %1000 = vmatpush3.bf16.msra.mxu0 %v1077_v53  ;;  %1015 = vmatpush3.bf16.msra.mxu1 %v1077_v53 }
  0xa5   : > { %v348_v61 = vpop.permute.xlu0 %347  ;;  %1001 = vmatprep.subr.bf16.mxu0 %v1078_v13  ;;  %1013 = vmatprep.subr.bf16.mxu1 %v1078_v13 }
  0xa6   : > { %v412_v62 = vpop.permute.xlu1 %411  ;;  %993 = vmatprep.mubr.msk.bf16.mxu0 %vm466_vm2, %v920_v59  ;;  %v390_v63 = vsel %vm376_vm1, %v372_v60, %v348_v61 }
  0xa7   : > { %v909_v0 = vcombine.low %v388_v58, %v390_v63  ;;  %v418_v27 = vsel %vm351_vm0, %v1221_v55, %v412_v62 }
  0xa8   : > { %1002 = vmatpush3.bf16.msra.mxu0 %v1078_v13  ;;  %1016 = vmatpush3.bf16.msra.mxu1 %v1078_v13 }
  0xa9   : > { %979 = vmatprep.mubr.msk.bf16.mxu1 %vm466_vm2, %v909_v0  ;;  %v350_v1 = vpop.permute.xlu0 %349 }
  0xaa   : > { %v415_v3 = vpop.permute.xlu1 %414  ;;  %v392_v5 = vsel %vm376_vm1, %v375_v28, %v350_v1 }
  0xab   : > { %v420_v6 = vsel %vm376_vm1, %v418_v27, %v415_v3  ;;  %v921_v8 = vcombine.low %v390_v63, %v392_v5 }
  0xac   : > { %v910_v9 = vcombine.low %v392_v5, %v420_v6 }
  0xad   : > { %994 = vmatmul.mubr.msk.bf16.gmra.mrb[4].mxu0 %vm466_vm2, %v921_v8  ;;  %v658_v12 = vpop.permute.xlu0 %657 }
  0xae   : > { %980 = vmatmul.mubr.msk.bf16.gmra.mrb[4].mxu1 %vm466_vm2, %v910_v9  ;;  %v664_v44 = vsel %vm351_vm0, %v1237_v10, %v658_v12  ;;  %v661_v14 = vpop.permute.xlu1 %660  ;;  %1003 = vmatprep.mubr.msk.bf16.mxu0 %vm466_vm2, %v919_v51 }
  0xaf   : > { %1007 = vmatprep.mubr.msk.bf16.mxu1 %vm466_vm2, %v921_v8  ;;  %v666_v55 = vsel %vm376_vm1, %v664_v44, %v661_v14 }
  0xb0   : > { %v936_v15 = vcombine.low %v420_v6, %v666_v55 }
  0xb5   : > { %1004 = vmatmul.mubr.msk.bf16.vlgmr.msra.gmra.mrb[0].mxu0 %vm466_vm2, %v920_v59 }
  0xb6   : > { %1008 = vmatmul.mubr.msk.bf16.vlgmr.msra.gmra.mrb[8].mxu1 %vm466_vm2, %v936_v15 }
 0x172   : > { %v977_v16 = vpop.f32.mrb[0].mxu1 }
 0x173   : > { %v513_v17 = vpop.f32.mrb[1].mxu1 }
 0x174   : > { %v978_v18 = vpop.f32.mrb[2].mxu1 }
 0x175   : > { %v516_v19 = vpop.f32.mrb[3].mxu1 }
 0x180   : > { %v995_v20 = vpop.f32.mrb[4].mxu0 }
 0x181   : > { %v981_v21 = vpop.f32.mrb[4].mxu1  ;;  %v630_v10 = vpop.f32.mrb[5].mxu0 }
 0x182   : > { %v639_v22 = vadd.f32 %v995_v20, %v981_v21  ;;  %v529_v23 = vpop.f32.mrb[5].mxu1  ;;  %v996_v24 = vpop.f32.mrb[6].mxu0 }
 0x183   : > { %v631_v25 = vadd.f32 %v630_v10, %v529_v23  ;;  %v982_v26 = vpop.f32.mrb[6].mxu1  ;;  %v633_v29 = vpop.f32.mrb[7].mxu0 }
 0x184   : > { %v642_v30 = vadd.f32 %v996_v24, %v982_v26  ;;  %v532_v31 = vpop.f32.mrb[7].mxu1 }
 0x185   : > { %v634_v32 = vadd.f32 %v633_v29, %v532_v31 }
 0x188   : > { %v1005_v33 = vpop.f32.mrb[0].mxu0 }
 0x189   : > { %v1017_v35 = vadd.f32 %v1005_v33, %v977_v16  ;;  %v1009_v36 = vpop.f32.mrb[8].mxu1  ;;  %v732_v37 = vpop.f32.mrb[1].mxu0 }
 0x18a   : > { %v769_v38 = vadd.f32 %v1009_v36, %v639_v22  ;;  %v1018_v39 = vadd.f32 %v732_v37, %v513_v17  ;;  %v748_v40 = vpop.f32.mrb[9].mxu1  ;;  %v1006_v41 = vpop.f32.mrb[2].mxu0 }
 0x18b   : > { %v780_v42 = vadd.f32 %v1017_v35, %v944_v34  ;;  %v767_v43 = vadd.f32 %v748_v40, %v631_v25  ;;  %v1019_v45 = vadd.f32 %v1006_v41, %v978_v18  ;;  %v1010_v46 = vpop.f32.mrb[10].mxu1  ;;  %v735_v47 = vpop.f32.mrb[3].mxu0 }
 0x18c   : > { %v784_v4 = vadd.f32 %v944_v34, %v769_v38  ;;  %v778_v48 = vadd.f32 %v1018_v39, %v944_v34  ;;  %v770_v2 = vadd.f32 %v1010_v46, %v642_v30  ;;  %v1020_v11 = vadd.f32 %v735_v47, %v516_v19  ;;  %v751_v49 = vpop.f32.mrb[11].mxu1 }
 0x18d   : > { %v788_v50 = vpack.c.bf16 %v780_v42, %v780_v42  ;;  %v782_v51 = vadd.f32 %v944_v34, %v767_v43  ;;  %v781_v52 = vadd.f32 %v1019_v45, %v944_v34  ;;  %v768_v53 = vadd.f32 %v751_v49, %v634_v32 }
 0x18e   : > { %v792_v54 = vpack.c.bf16 %v784_v4, %v784_v4  ;;  %v786_v7 = vpack.c.bf16 %v778_v48, %v778_v48  ;;  %v785_v13 = vadd.f32 %v944_v34, %v770_v2  ;;  %v779_v56 = vadd.f32 %v1020_v11, %v944_v34 }
 0x18f   : > { %797 = vst.msk [vmem:[%s192_s22 + $0x8] sm:$0xf] %vm794_vm3, %v788_v50  ;;  %v790_v57 = vpack.c.bf16 %v782_v51, %v782_v51  ;;  %v789_v58 = vpack.c.bf16 %v781_v52, %v781_v52  ;;  %v783_v59 = vadd.f32 %v944_v34, %v768_v53 }
 0x190   : > { %801 = vst.msk [vmem:[%s192_s22 + $0x18] sm:$0xf] %vm794_vm3, %v792_v54  ;;  %795 = vst.msk [vmem:[%s192_s22] sm:$0xf] %vm794_vm3, %v786_v7  ;;  %v793_v60 = vpack.c.bf16 %v785_v13, %v785_v13  ;;  %v787_v61 = vpack.c.bf16 %v779_v56, %v779_v56 }
 0x191   : > { %799 = vst.msk [vmem:[%s192_s22 + $0x10] sm:$0xf] %vm794_vm3, %v790_v57  ;;  %798 = vst.msk [vmem:[%s192_s22 + $0xc] sm:$0xf] %vm794_vm3, %v789_v58  ;;  %v791_v62 = vpack.c.bf16 %v783_v59, %v783_v59 }
 0x192   : > { %802 = vst.msk [vmem:[%s192_s22 + $0x1c] sm:$0xf] %vm794_vm3, %v793_v60  ;;  %796 = vst.msk [vmem:[%s192_s22 + $0x4] sm:$0xf] %vm794_vm3, %v787_v61 }
 0x193   : > { %800 = vst.msk [vmem:[%s192_s22 + $0x14] sm:$0xf] %vm794_vm3, %v791_v62 }
 0x194 PF: > { %s13_s14 = sadd.s32 1, %s1101_s14   ;;  %s1329_s12 = smov %s1097_s13 }
 0x195   : > { %p10_p5 = scmp.ge.s32.totalorder %s13_s14, 4   ;;  %s1330_s13 = smov %s1332_s15 }
 0x197   :  { %12 = sbr.rel (!%p10_p5) target bundleno = 2 (0x2), region = 64 }

// kernel: animenet5_forward.52
= control target key start
LH: loop header
LB: loop body
LE: loop exit
PB: predicated region body
PF: predicated region fallthrough
CT: control target
= control target key end

     0   :  { %s7250_s30 = smov 0   ;;  %s7252_s10 = smov 0   ;;  %s9209_s0 = inlined_call_operand.vmem [shape: bf16[2,12,12,64], index: 0, kind: input, shape index: {}]   ;;  %s9210_s1 = inlined_call_operand.vmem [shape: bf16[3,192,64], index: 1, kind: input, shape index: {}]   ;;  %s9211_s2 = inlined_call_operand.vmem [shape: f32[1,64], index: 2, kind: input, shape index: {}]   ;;  %s9212_s3 = inlined_call_operand.vmem [shape: bf16[3,144,64], index: 3, kind: input, shape index: {}]   ;;  %s9213_s4 = inlined_call_operand.vmem [shape: f32[1,64], index: 4, kind: input, shape index: {}]   ;;  %s9214_s5 = inlined_call_operand.vmem [shape: bf16[3,144,64], index: 5, kind: input, shape index: {}]   ;;  %s9215_s6 = inlined_call_operand.vmem [shape: f32[1,64], index: 6, kind: input, shape index: {}]   ;;  %s9216_s7 = inlined_call_operand.vmem [shape: bf16[3,144,16], index: 7, kind: input, shape index: {}]   ;;  %s9217_s8 = inlined_call_operand.vmem [shape: f32[1,16], index: 8, kind: input, shape index: {}]   ;;  %s9218_s9 = inlined_call_operand.vmem [shape: bf16[2,4,4,64], index: 9, kind: output, shape index: {}]  }
   0x1   :  { %s7254_s11 = smov 0  }
   0x2 LB: > { %s31_s12 = sadd.s32 1, %s7185_s10  ;;  %p6603_p0 = scmp.ge.s32.totalorder %s7189_s11, 1  ;;  %s7189_s11 = sphi %s7254_s11, %s19_s11   ;;  %s7185_s10 = sphi %s7252_s10, %s9236_s10   ;;  %s7181_s30 = sphi %s7250_s30, %s9235_s30  }
   0x3   : > { %p33_p1 = scmp.ge.s32.totalorder %s31_s12, 2  ;;  %p301_p2 = scmp.lt.s32.totalorder %s7189_s11, 3 }
   0x5   : > { %s9238_s12 = smov (%p33_p1, %s31_s12), 0  ;;  %p302_p3 = pnand %p6603_p0, %p301_p2 }
   0x6   : > { %p341_p4 = scmp.lt.s32.totalorder (!%p302_p3), %s7181_s30, 1  ;;  %v7049_v0 = vld [vmem:[%s9210_s1 + $0x60] sm:$0xff] (!%p302_p3)   ;;  %v9219_v1 = vmov (!%p302_p3), 0   ;;  %v7050_v2 = vld [vmem:[%s9210_s1 + $0x68] sm:$0xff] (!%p302_p3)   ;;  %v7051_v3 = vld [vmem:[%s9210_s1 + $0x70] sm:$0xff] (!%p302_p3)   ;;  %s7192_s14 = smov (!%p302_p3), 64  }
   0x7   : > { %305 = sbr.rel (%p302_p3) target bundleno = 1858 (0x742), region = 56  ;;  %1588 = vmatprep.subr.bf16.mxu0 (!%p302_p3), %v9219_v1  ;;  %2195 = vmatprep.subr.bf16.mxu1 (!%p302_p3), %v9219_v1  ;;  %v7054_v4 = vld [vmem:[%s9210_s1] sm:$0xff] (!%p302_p3)   ;;  %v7052_v7 = vld [vmem:[%s9210_s1 + $0x78] sm:$0xff] (!%p302_p3)   ;;  %v7056_v18 = vld [vmem:[%s9210_s1 + $0x8] sm:$0xff] (!%p302_p3)   ;;  %vm531_vm0 = vcmask (!%p302_p3), 523264   ;;  %s7195_s18 = smov (!%p302_p3), 112  }
   0x8   : > { %1589 = vmatpush1.bf16.msra.mxu0 (!%p302_p3), %v7049_v0  ;;  %2196 = vmatpush1.bf16.msra.mxu1 (!%p302_p3), %v7054_v4  ;;  %v7053_v25 = vld [vmem:[%s9210_s1 + $0x80] sm:$0xff] (!%p302_p3)   ;;  %v7058_v36 = vld [vmem:[%s9210_s1 + $0x10] sm:$0xff] (!%p302_p3)   ;;  %v7055_v39 = vld [vmem:[%s9210_s1 + $0x88] sm:$0xff] (!%p302_p3)   ;;  %s7196_s24 = smov (!%p302_p3), 80   ;;  %s7197_s29 = smov (!%p302_p3), 32   ;;  %vm3803_vm1 = vcmask (!%p302_p3), 130048  }
   0x9   : > { %1590 = vmatprep.subr.bf16.mxu0 (!%p302_p3), %v9219_v1  ;;  %2197 = vmatprep.subr.bf16.mxu1 (!%p302_p3), %v9219_v1  ;;  %v7057_v51 = vld [vmem:[%s9210_s1 + $0x90] sm:$0xff] (!%p302_p3)   ;;  %v7060_v56 = vld [vmem:[%s9210_s1 + $0x18] sm:$0xff] (!%p302_p3)   ;;  %vm3611_vm2 = vcmask (!%p302_p3), 392192   ;;  %vm3636_vm3 = vcmask (!%p302_p3), 785408   ;;  %s7198_s16 = smov (!%p302_p3), 16   ;;  %vm6397_vm4 = vcmask (!%p302_p3), 261120  }
   0xa   : > { %v7059_v0 = vld [vmem:[%s9210_s1 + $0x98] sm:$0xff] (!%p302_p3)   ;;  %vm6446_vm5 = vsmask.f32 (!%p302_p3), 1280  ;;  %vm6447_vm6 = vsmask.f32 (!%p302_p3), 3336  ;;  %vm6513_vm11 = vcmask (!%p302_p3), 517120  }
   0xb   : > { %vm6448_vm7 = vmor (!%p302_p3), %vm6446_vm5, %vm6447_vm6  ;;  %vm6449_vm8 = vsmask.f32 (!%p302_p3), 5392  ;;  %vm6451_vm9 = vsmask.f32 (!%p302_p3), 7448 }
   0xc   : > { %1591 = vmatpush1.bf16.msra.mxu0 (!%p302_p3), %v7050_v2  ;;  %2198 = vmatpush1.bf16.msra.mxu1 (!%p302_p3), %v7056_v18  ;;  %v7065_v18 = vld [vmem:[%s9210_s1 + $0xb0] sm:$0xff] (!%p302_p3)   ;;  %vm6450_vm10 = vmor (!%p302_p3), %vm6448_vm7, %vm6449_vm8 }
   0xd   : > { %1592 = vmatprep.subr.bf16.mxu0 (!%p302_p3), %v9219_v1  ;;  %2199 = vmatprep.subr.bf16.mxu1 (!%p302_p3), %v9219_v1  ;;  %vm9181_vm12 = vmor (!%p302_p3), %vm6450_vm10, %vm6451_vm9 }
   0xe   : > { %s9240_s30 = smov (!%p341_p4, %s7181_s30), 1 }
   0xf   : > { %s6973_s17 = smul.u32 96, %s9240_s30  ;;  %s6972_s19 = sshll.u32 %s9240_s30, 3 }
  0x10   : > { %1593 = vmatpush1.bf16.msra.mxu0 %v7051_v3  ;;  %2200 = vmatpush1.bf16.msra.mxu1 %v7058_v36  ;;  %s354_s30 = scalar_lea.vmem %s9218_s9, %s6972_s19 }
  0x11   : > { %s7286_s22 = scalar_lea.vmem %s9209_s0, %s6973_s17  ;;  %1594 = vmatprep.subr.bf16.mxu0 %v9219_v1  ;;  %2201 = vmatprep.subr.bf16.mxu1 %v9219_v1  ;;  %s7199_s17 = smov 48  }
  0x12   : > { %v7292_v5 = vld [vmem:[%s7286_s22 + $0x8] sm:$0x3f]   ;;  %v7296_v6 = vld [vmem:[%s7286_s22 + $0x18] sm:$0x3f]   ;;  %v7307_v12 = vld [vmem:[%s7286_s22 + $0x10] sm:$0x3f]  }
  0x13   : > { %v439_v8 = vshrl.u32 %v7292_v5, 16  ;;  %v441_v9 = vshll.u32 %v7292_v5, 16  ;;  %v453_v10 = vshrl.u32 %v7296_v6, 16  ;;  %v455_v11 = vshll.u32 %v7296_v6, 16  ;;  %v7310_v14 = vld [vmem:[%s7286_s22 + $0x20] sm:$0x3f]  }
  0x14   : > { %v446_v16 = vshrl.u32 %v7307_v12, 16  ;;  %v448_v17 = vshll.u32 %v7307_v12, 16  ;;  %v460_v20 = vshrl.u32 %v7310_v14, 16  ;;  %v462_v21 = vshll.u32 %v7310_v14, 16  ;;  %v7321_v22 = vld [vmem:[%s7286_s22 + $0x28] sm:$0x3f]   ;;  %1595 = vmatpush1.bf16.msra.mxu0 %v7052_v7  ;;  %2202 = vmatpush1.bf16.msra.mxu1 %v7060_v56 }
  0x15   : > { %v443_v13 = vrot.slane %v441_v9, 1  ;;  %v457_v15 = vrot.slane %v455_v11, 1  ;;  %v467_v27 = vshrl.u32 %v7321_v22, 16  ;;  %v469_v28 = vshll.u32 %v7321_v22, 16  ;;  %v7330_v29 = vld [vmem:[%s7286_s22 + $0x30] sm:$0x3f]   ;;  %1596 = vmatprep.subr.bf16.mxu0 %v9219_v1  ;;  %2203 = vmatprep.subr.bf16.mxu1 %v9219_v1 }
  0x16   : > { %v450_v24 = vrot.slane %v448_v17, 1  ;;  %v464_v26 = vrot.slane %v462_v21, 1  ;;  %v7335_v31 = vld [vmem:[%s7286_s22 + $0x38] sm:$0x3f]   ;;  %v474_v34 = vshrl.u32 %v7330_v29, 16  ;;  %v476_v35 = vshll.u32 %v7330_v29, 16 }
  0x17   : > { %v444_v19 = vor.u32 %v443_v13, %v439_v8  ;;  %v458_v23 = vor.u32 %v457_v15, %v453_v10  ;;  %v471_v33 = vrot.slane %v469_v28, 1  ;;  %v483_v37 = vshll.u32 %v7335_v31, 16  ;;  %v7345_v38 = vld [vmem:[%s7286_s22 + $0x48] sm:$0x3f]   ;;  %v7356_v45 = vld [vmem:[%s7286_s22] sm:$0x3f]  }
  0x18   : > { %v451_v30 = vor.u32 %v450_v24, %v446_v16  ;;  %v465_v32 = vor.u32 %v464_v26, %v460_v20  ;;  %1597 = vmatpush1.bf16.msra.mxu0 %v7053_v25  ;;  %v478_v41 = vrot.slane %v476_v35, 1  ;;  %v481_v42 = vshrl.u32 %v7335_v31, 16  ;;  %v7359_v47 = vld [vmem:[%s7286_s22 + $0x40] sm:$0x3f]   ;;  %v7371_v55 = vld [vmem:[%s7286_s22 + $0x50] sm:$0x3f]  }
  0x19   : > { %503 = vrot.lane.b32.xlu0 %v444_v19, %s7192_s14  ;;  %507 = vrot.lane.b32.xlu1 %v458_v23, %s7192_s14  ;;  %v472_v40 = vor.u32 %v471_v33, %v467_v27  ;;  %v485_v43 = vrot.slane %v483_v37, 1  ;;  %v497_v44 = vshll.u32 %v7345_v38, 16  ;;  %v495_v48 = vshrl.u32 %v7345_v38, 16  ;;  %v7048_v61 = vld [vmem:[%s7286_s22 + $0x58] sm:$0x3f]   ;;  %v7061_v10 = vld [vmem:[%s9210_s1 + $0xa0] sm:$0xff]  }
  0x1a   : > { %1598 = vmatprep.subr.bf16.mxu0 %v9219_v1  ;;  %v479_v46 = vor.u32 %v478_v41, %v474_v34  ;;  %v434_v50 = vshll.u32 %v7356_v45, 16  ;;  %v488_v53 = vshrl.u32 %v7359_v47, 16  ;;  %v490_v54 = vshll.u32 %v7359_v47, 16  ;;  %v7062_v13 = vld [vmem:[%s9210_s1 + $0x20] sm:$0xff]   ;;  %v7063_v15 = vld [vmem:[%s9210_s1 + $0xa8] sm:$0xff]   ;;  %v7066_v19 = vld [vmem:[%s9210_s1 + $0x30] sm:$0xff]  }
  0x1b   : > { %v499_v49 = vrot.slane %v497_v44, 1  ;;  %v486_v52 = vor.u32 %v485_v43, %v481_v42  ;;  %v432_v57 = vshrl.u32 %v7356_v45, 16  ;;  %v992_v59 = vshrl.u32 %v7371_v55, 16  ;;  %2204 = vmatpush1.bf16.msra.mxu1 %v7062_v13  ;;  %v7064_v17 = vld [vmem:[%s9210_s1 + $0x28] sm:$0xff]   ;;  %v7067_v20 = vld [vmem:[%s9210_s1 + $0xb8] sm:$0xff]   ;;  %v7070_v23 = vld [vmem:[%s9210_s1 + $0x40] sm:$0xff]  }
  0x1c   : > { %1599 = vmatpush1.bf16.msra.mxu0 %v7055_v39  ;;  %v492_v58 = vrot.slane %v490_v54, 1  ;;  %v994_v60 = vshll.u32 %v7371_v55, 16  ;;  %v436_v63 = vrot.slane %v434_v50, 1  ;;  %v2289_v4 = vshrl.u32 %v7048_v61, 16  ;;  %2205 = vmatprep.subr.bf16.mxu1 %v9219_v1  ;;  %v7068_v21 = vld [vmem:[%s9210_s1 + $0x38] sm:$0xff]   ;;  %v7071_v24 = vld [vmem:[%s9210_s1 + $0x48] sm:$0xff]  }
  0x1d   : > { %505 = vrot.lane.b32.xlu0 %v451_v30, %s7192_s14  ;;  %509 = vrot.lane.b32.xlu1 %v465_v32, %s7192_s14  ;;  %v500_v62 = vor.u32 %v499_v49, %v495_v48  ;;  %v2291_v7 = vshll.u32 %v7048_v61, 16  ;;  %v7073_v25 = vld [vmem:[%s9210_s1 + $0x50] sm:$0xff]   ;;  %v7075_v26 = vld [vmem:[%s9210_s1 + $0x58] sm:$0xff]   ;;  %v7193_v27 = vmov 1966171168   ;;  %v567_v30 = vlaneseq }
  0x1e   : > { %1600 = vmatprep.subr.bf16.mxu0 %v9219_v1  ;;  %v493_v2 = vor.u32 %v492_v58, %v488_v53  ;;  %v996_v3 = vrot.slane %v994_v60, 1  ;;  %v437_v11 = vor.u32 %v436_v63, %v432_v57  ;;  %v565_v28 = vunpack.c.l.s4 %v7193_v27 }
  0x1f   : > { %v2293_v9 = vrot.slane %v2291_v7, 1  ;;  %2206 = vmatpush1.bf16.msra.mxu1 %v7064_v17  ;;  %v7442_v33 = vshrl.u32 %v567_v30, 7  ;;  %v522_v34 = vrot.slane %v7292_v5, 1  ;;  %v524_v35 = vrot.slane %v7296_v6, 1 }
  0x20   : > { %1601 = vmatpush1.bf16.msra.mxu0 %v7057_v51  ;;  %v997_v8 = vor.u32 %v996_v3, %v992_v59  ;;  %2207 = vmatprep.subr.bf16.mxu1 %v9219_v1  ;;  %v566_v32 = vunpack.c.0.s8 %v565_v28  ;;  %v523_v43 = vrot.slane %v7307_v12, 1  ;;  %v526_v63 = vrot.slane %v7321_v22, 1 }
  0x21   : > { %511 = vrot.lane.b32.xlu0 %v472_v40, %s7192_s14  ;;  %513 = vrot.lane.b32.xlu1 %v479_v46, %s7192_s14  ;;  %v2294_v16 = vor.u32 %v2293_v9, %v2289_v4  ;;  %v521_v3 = vrot.slane %v7356_v45, 1  ;;  %v9221_v17 = vrot.slane %v7359_v47, 1 }
  0x22   : > { %1602 = vmatprep.subr.bf16.mxu0 %v9219_v1  ;;  %v7447_v37 = vsub.s32 %v566_v32, %v7442_v33 }
  0x23   : > { %2208 = vmatpush1.bf16.msra.mxu1 %v7066_v19 }
  0x24   : > { %1603 = vmatpush1.bf16.msra.mxu0 %v7059_v0  ;;  %2209 = vmatprep.subr.bf16.mxu1 %v9219_v1 }
  0x25   : > { %515 = vrot.lane.b32.xlu0 %v486_v52, %s7192_s14  ;;  %517 = vrot.lane.b32.xlu1 %v493_v2, %s7192_s14  ;;  %v527_v2 = vrot.slane %v7330_v29, 1 }
  0x26   : > { %1604 = vmatprep.subr.bf16.mxu0 %v9219_v1 }
  0x27   : > { %2210 = vmatpush1.bf16.msra.mxu1 %v7068_v21 }
  0x28   : > { %1605 = vmatpush1.bf16.msra.mxu0 %v7061_v10  ;;  %2211 = vmatprep.subr.bf16.mxu1 %v9219_v1 }
  0x29   : > { %519 = vrot.lane.b32.xlu0 %v500_v62, %s7192_s14  ;;  %998 = vrot.lane.b32.xlu1 %v997_v8, %s7192_s14 }
  0x2a   : > { %1606 = vmatprep.subr.bf16.mxu0 %v9219_v1 }
  0x2b   : > { %2212 = vmatpush1.bf16.msra.mxu1 %v7070_v23 }
  0x2c   : > { %1607 = vmatpush1.bf16.msra.mxu0 %v7063_v15  ;;  %2213 = vmatprep.subr.bf16.mxu1 %v9219_v1 }
  0x2d   : > { %501 = vrot.lane.b32.xlu0 %v437_v11, %s7192_s14  ;;  %2295 = vrot.lane.b32.xlu1 %v2294_v16, %s7192_s14  ;;  %v530_v16 = vrot.slane %v7345_v38, 1 }
  0x2e   : > { %1608 = vmatprep.subr.bf16.mxu0 %v9219_v1 }
  0x2f   : > { %2214 = vmatpush1.bf16.msra.mxu1 %v7071_v24 }
  0x30   : > { %1609 = vmatpush1.bf16.msra.mxu0 %v7065_v18  ;;  %2215 = vmatprep.subr.bf16.mxu1 %v9219_v1 }
  0x31   : > { %1610 = vmatprep.subr.bf16.mxu0 %v9219_v1 }
  0x33   : > { %2216 = vmatpush1.bf16.msra.mxu1 %v7073_v25 }
  0x34   : > { %1611 = vmatpush1.bf16.msra.mxu0 %v7067_v20  ;;  %2217 = vmatprep.subr.bf16.mxu1 %v9219_v1 }
  0x35   : > { %2725 = vmatprep.subr.bf16.mxu0 %v9219_v1 }
  0x37   : > { %2218 = vmatpush1.bf16.msra.mxu1 %v7075_v26 }
  0x38   : > { %3816 = vmatprep.subr.bf16.mxu1 %v9219_v1 }
  0x8b   : > { %v504_v36 = vpop.permute.xlu0 %503  ;;  %v508_v40 = vpop.permute.xlu1 %507 }
  0x8c   : > { %v535_v39 = vsel %vm531_vm0, %v7292_v5, %v504_v36  ;;  %v539_v42 = vsel %vm531_vm0, %v7296_v6, %v508_v40  ;;  %v525_v5 = vrot.slane %v7310_v14, 1 }
  0x8d   : > { %v602_v41 = vcombine.low %v535_v39, %v522_v34  ;;  %v682_v44 = vcombine.low %v539_v42, %v524_v35  ;;  %v603_v57 = vcombine.high %v535_v39, %v522_v34  ;;  %v683_v58 = vcombine.high %v539_v42, %v524_v35 }
  0x8f   : > { %v506_v46 = vpop.permute.xlu0 %505  ;;  %v610_v48 = vrot.slane %v602_v41, %v7447_v37  ;;  %v510_v51 = vpop.permute.xlu1 %509  ;;  %v690_v52 = vrot.slane %v682_v44, %v7447_v37  ;;  %v617_v4 = vrot.slane %v603_v57, %v7447_v37  ;;  %v697_v7 = vrot.slane %v683_v58, %v7447_v37 }
  0x90   : > { %v537_v49 = vsel %vm531_vm0, %v7307_v12, %v506_v46  ;;  %v541_v54 = vsel %vm531_vm0, %v7310_v14, %v510_v51  ;;  %v528_v14 = vrot.slane %v7335_v31, 1 }
  0x91   : > { %v642_v50 = vcombine.low %v537_v49, %v523_v43  ;;  %v618_v53 = vcombine.high %v610_v48, %v610_v48  ;;  %v698_v59 = vcombine.high %v690_v52, %v690_v52  ;;  %v722_v60 = vcombine.low %v541_v54, %v525_v5 }
  0x92   : > { %v7466_v12 = vrot.slane %v690_v52, %v7447_v37  ;;  %v643_v62 = vcombine.high %v537_v49, %v523_v43  ;;  %v7480_v11 = vrot.slane %v610_v48, %v7447_v37  ;;  %v7499_v26 = vrot.slane %v617_v4, %v7447_v37 }
  0x93   : > { %v650_v6 = vrot.slane %v642_v50, %v7447_v37  ;;  %v512_v56 = vpop.permute.xlu0 %511  ;;  %v7463_v61 = vrot.slane %v618_v53, %v7447_v37  ;;  %v7475_v8 = vrot.slane %v698_v59, %v7447_v37  ;;  %v514_v10 = vpop.permute.xlu1 %513  ;;  %v730_v13 = vrot.slane %v722_v60, %v7447_v37 }
  0x94   : > { %v543_v9 = vsel %vm531_vm0, %v7321_v22, %v512_v56  ;;  %v720_v19 = vcombine.high %v7466_v12, %v7466_v12  ;;  %v657_v20 = vrot.slane %v643_v62, %v7447_v37  ;;  %v545_v24 = vsel %vm531_vm0, %v7330_v29, %v514_v10 }
  0x95   : > { %v658_v0 = vcombine.high %v650_v6, %v650_v6  ;;  %v641_v18 = vcombine.high %v7463_v61, %v7463_v61  ;;  %v721_v22 = vcombine.high %v7475_v8, %v7475_v8  ;;  %v762_v23 = vcombine.low %v543_v9, %v526_v63 }
  0x96   : > { %v7502_v27 = vrot.slane %v697_v7, %v7447_v37  ;;  %v723_v28 = vcombine.high %v541_v54, %v525_v5  ;;  %v802_v30 = vcombine.low %v545_v24, %v527_v2  ;;  %v7505_v32 = vrot.slane %v650_v6, %v7447_v37 }
  0x97   : > { %v516_v15 = vpop.permute.xlu0 %515  ;;  %v7493_v21 = vrot.slane %v658_v0, %v7447_v37  ;;  %v738_v34 = vcombine.high %v730_v13, %v730_v13  ;;  %v770_v35 = vrot.slane %v762_v23, %v7447_v37  ;;  %v1742_v29 = vcombine.low %v641_v18, %v7499_v26 }
  0x98   : > { %v1808_v39 = vcombine.low %v7475_v8, %v720_v19  ;;  %v1809_v40 = vcombine.low %v721_v22, %v7502_v27  ;;  %v672_v41 = vrot.slane %v657_v20, %v7447_v37  ;;  %v1136_v42 = vcombine.low %v7466_v12, %v7475_v8 }
  0x99   : > { %v6643_v43 = vcombine.high %v7466_v12, %v7475_v8  ;;  %v681_v44 = vcombine.high %v7493_v21, %v7493_v21  ;;  %v810_v46 = vrot.slane %v802_v30, %v7447_v37  ;;  %v1743_v49 = vcombine.low %v7505_v32, %v7493_v21 }
  0x9a   : > { %v737_v50 = vrot.slane %v723_v28, %v7447_v37  ;;  %v763_v51 = vcombine.high %v543_v9, %v526_v63  ;;  %v778_v52 = vcombine.high %v770_v35, %v770_v35  ;;  %v6667_v5 = vcombine.high %v7505_v32, %v7493_v21 }
  0x9b   : > { %v520_v48 = vpop.permute.xlu0 %519  ;;  %v7527_v53 = vrot.slane %v738_v34, %v7447_v37  ;;  %v803_v54 = vcombine.high %v545_v24, %v527_v2  ;;  %v547_v6 = vsel %vm531_vm0, %v7335_v31, %v516_v15  ;;  %v7532_v56 = vrot.slane %v1742_v29, %v7447_v37 }
  0x9c   : > { %v7535_v57 = vrot.slane %v1808_v39, %v7447_v37  ;;  %v7538_v58 = vrot.slane %v1809_v40, %v7447_v37  ;;  %v1745_v59 = vcombine.low %v672_v41, %v7466_v12  ;;  %v1135_v60 = vcombine.low %v681_v44, %v672_v41 }
  0x9d   : > { %v7542_v62 = vrot.slane %v730_v13, %v7447_v37  ;;  %v761_v63 = vcombine.high %v7527_v53, %v7527_v53  ;;  %v818_v0 = vcombine.high %v810_v46, %v810_v46  ;;  %v7547_v2 = vrot.slane %v1743_v49, %v7447_v37 }
  0x9e   : > { %v777_v4 = vrot.slane %v763_v51, %v7447_v37  ;;  %v7551_v7 = vrot.slane %v778_v52, %v7447_v37  ;;  %v842_v9 = vcombine.low %v547_v6, %v528_v14  ;;  %v7556_v10 = vrot.slane %v6667_v5, %v7447_v37 }
  0x9f   : > { %v752_v13 = vrot.slane %v737_v50, %v7447_v37  ;;  %v7560_v15 = vrot.slane %v770_v35, %v7447_v37  ;;  %v817_v18 = vrot.slane %v803_v54, %v7447_v37  ;;  %v502_v19 = vpop.permute.xlu0 %501  ;;  %v7564_v22 = vrot.slane %v1745_v59, %v7447_v37 }
  0xa0   : > { %v760_v20 = vcombine.high %v7542_v62, %v7542_v62  ;;  %v1810_v23 = vcombine.low %v7542_v62, %v7527_v53  ;;  %v6668_v24 = vcombine.high %v7542_v62, %v7527_v53  ;;  %v7575_v34 = vrot.slane %v810_v46, %v7447_v37 }
  0xa1   : > { %v1202_v28 = vcombine.low %v761_v63, %v752_v13  ;;  %v800_v30 = vcombine.high %v7560_v15, %v7560_v15  ;;  %v7578_v35 = vrot.slane %v818_v0, %v7447_v37  ;;  %v7581_v29 = vrot.slane %v777_v4, %v7447_v37 }
  0xa2   : > { %v801_v39 = vcombine.high %v7551_v7, %v7551_v7  ;;  %v850_v40 = vrot.slane %v842_v9, %v7447_v37  ;;  %v533_v41 = vsel %vm531_vm0, %v7356_v45, %v502_v19  ;;  %v1138_v44 = vcombine.low %v7502_v27, %v7542_v62  ;;  %v7069_v27 = vld [vmem:[%s9210_s1 + $0xc0] sm:$0xff]  }
  0xa3   : > { %v832_v46 = vrot.slane %v817_v18, %v7447_v37  ;;  %v841_v49 = vcombine.high %v7578_v35, %v7578_v35  ;;  %v843_v50 = vcombine.high %v547_v6, %v528_v14  ;;  %v7596_v51 = vrot.slane %v1135_v60, %v7447_v37 }
  0xa4   : > { %v7599_v52 = vrot.slane %v1810_v23, %v7447_v37  ;;  %v1874_v5 = vcombine.low %v752_v13, %v7560_v15  ;;  %v562_v54 = vcombine.low %v533_v41, %v521_v3  ;;  %v7605_v59 = vrot.slane %v1202_v28, %v7447_v37  ;;  %v518_v13 = vpop.permute.xlu1 %517 }
  0xa5   : > { %v7608_v63 = vrot.slane %v6668_v24, %v7447_v37  ;;  %v1875_v31 = vcombine.low %v7551_v7, %v800_v30  ;;  %v1877_v14 = vcombine.low %v7575_v34, %v7578_v35  ;;  %v1876_v6 = vcombine.low %v801_v39, %v7581_v29 }
  0xa6   : > { %v6669_v60 = vcombine.high %v7575_v34, %v7578_v35  ;;  %v858_v0 = vcombine.high %v850_v40, %v850_v40  ;;  %v551_v4 = vsel %vm531_vm0, %v7345_v38, %v520_v48  ;;  %v1269_v18 = vcombine.low %v841_v49, %v832_v46 }
  0xa7   : > { %v857_v19 = vrot.slane %v843_v50, %v7447_v37  ;;  %v1203_v23 = vcombine.low %v7560_v15, %v7551_v7  ;;  %v7628_v28 = vrot.slane %v1874_v5, %v7447_v37  ;;  %v570_v48 = vrot.slane %v562_v54, %v7447_v37 }
  0xa8   : > { %v7632_v30 = vrot.slane %v1875_v31, %v7447_v37  ;;  %v7635_v39 = vrot.slane %v850_v40, %v7447_v37  ;;  %v922_v49 = vcombine.low %v551_v4, %v530_v16  ;;  %v923_v50 = vcombine.high %v551_v4, %v530_v16 }
  0xa9   : > { %v7642_v9 = vrot.slane %v1876_v6, %v7447_v37  ;;  %v7645_v5 = vrot.slane %v1877_v14, %v7447_v37  ;;  %v7648_v54 = vrot.slane %v6669_v60, %v7447_v37  ;;  %v7651_v31 = vrot.slane %v858_v0, %v7447_v37 }
  0xaa   : > { %v7654_v40 = vrot.slane %v1269_v18, %v7447_v37  ;;  %v7657_v1 = vrot.slane %v857_v19, %v7447_v37  ;;  %v880_v38 = vcombine.high %v7635_v39, %v7635_v39  ;;  %v563_v16 = vcombine.high %v533_v41, %v521_v3 }
  0xab   : > { %v578_v14 = vcombine.high %v570_v48, %v570_v48  ;;  %v549_v6 = vsel %vm531_vm0, %v7359_v47, %v518_v13  ;;  %v680_v60 = vcombine.high %v7505_v32, %v7505_v32  ;;  %v1069_v0 = vcombine.low %v7480_v11, %v7463_v61 }
  0xac   : > { %v1941_v18 = vcombine.low %v832_v46, %v7635_v39  ;;  %v7673_v19 = vrot.slane %v922_v49, %v7447_v37  ;;  %v937_v45 = vrot.slane %v923_v50, %v7447_v37  ;;  %v6642_v13 = vcombine.high %v7480_v11, %v7463_v61 }
  0xad   : > { %v1071_v25 = vcombine.low %v7499_v26, %v7505_v32  ;;  %v7685_v4 = vcombine.low %v7651_v31, %v880_v38  ;;  %v577_v46 = vrot.slane %v563_v16, %v7447_v37  ;;  %v882_v49 = vcombine.low %v549_v6, %v9221_v17 }
  0xae   : > { %v1072_v50 = vcombine.low %v7493_v21, %v680_v60  ;;  %v585_v3 = vrot.slane %v570_v48, %v7447_v37  ;;  %v599_v41 = vrot.slane %v578_v14, %v7447_v37  ;;  %v1079_v36 = vrot.slane %v1069_v0, %v7447_v37 }
  0xaf   : > { %v1086_v24 = vrot.slane %v6642_v13, %v7447_v37  ;;  %v7696_v26 = vrot.slane %v1941_v18, %v7447_v37  ;;  %v938_v32 = vcombine.high %v7673_v19, %v7673_v19  ;;  %v1093_v38 = vrot.slane %v1071_v25, %v7447_v37 }
  0xb0   : > { %v1100_v16 = vrot.slane %v1072_v50, %v7447_v37  ;;  %v7704_v21 = vrot.slane %v7673_v19, %v7447_v37  ;;  %v1152_v60 = vrot.slane %v1136_v42, %v7447_v37  ;;  %v7711_v0 = vrot.slane %v937_v45, %v7447_v37 }
  0xb1   : > { %v1102_v48 = vcombine.high %v1079_v36, %v1086_v24  ;;  %v1101_v14 = vcombine.low %v1079_v36, %v1086_v24  ;;  %v592_v18 = vrot.slane %v577_v46, %v7447_v37  ;;  %v7715_v25 = vrot.slane %v882_v49, %v7447_v37 }
  0xb2   : > { %v1104_v13 = vcombine.high %v1093_v38, %v1100_v16  ;;  %v1676_v50 = vcombine.low %v585_v3, %v599_v41  ;;  %v6666_v17 = vcombine.high %v585_v3, %v599_v41  ;;  %v1103_v19 = vcombine.low %v1093_v38, %v1100_v16 }
  0xb3   : > { %v1159_v36 = vrot.slane %v6643_v43, %v7447_v37  ;;  %v1118_v24 = vrot.slane %v1102_v48, %v7447_v37  ;;  %v1166_v45 = vrot.slane %v1138_v44, %v7447_v37  ;;  %v1168_v46 = vcombine.high %v7596_v51, %v1152_v60 }
  0xb4   : > { %v1132_v42 = vrot.slane %v1104_v13, %v7447_v37  ;;  %v1111_v49 = vrot.slane %v1101_v14, %v7447_v37  ;;  %v1125_v3 = vrot.slane %v1103_v19, %v7447_v37  ;;  %v1201_v12 = vcombine.low %v7527_v53, %v760_v20  ;;  %v999_v20 = vpop.permute.xlu1 %998 }
  0xb5   : > { %v7735_v8 = vrot.slane %v1203_v23, %v7447_v37  ;;  %v1170_v44 = vcombine.high %v1159_v36, %v1166_v45  ;;  %v1184_v41 = vrot.slane %v1168_v46, %v7447_v37  ;;  %v1167_v38 = vcombine.low %v7596_v51, %v1152_v60 }
  0xb6   : > { %v1134_v43 = vcombine.low %v1118_v24, %v1132_v42  ;;  %v1133_v16 = vcombine.low %v1111_v49, %v1125_v3  ;;  %v1169_v48 = vcombine.low %v1159_v36, %v1166_v45  ;;  %v1211_v14 = vrot.slane %v1201_v12, %v7447_v37 }
  0xb7   : > { %v9222_v53 = vcombine.high %v7560_v15, %v7551_v7  ;;  %v1678_v23 = vcombine.low %v592_v18, %v7480_v11  ;;  %v1198_v13 = vrot.slane %v1170_v44, %v7447_v37  ;;  %v1002_v19 = vsel %vm531_vm0, %v7371_v55, %v999_v20 }
  0xb8   : > { %6659 = vmatprep.mubr.msk.bf16.mxu0 %vm531_vm0, %v1134_v43  ;;  %v9223_v51 = vcombine.high %v7480_v11, %v7480_v11  ;;  %v9224_v36 = vrot.slane %v7359_v47, 1  ;;  %v1234_v7 = vcombine.high %v1211_v14, %v7605_v59  ;;  %v9225_v18 = vrot.slane %v7371_v55, 1 }
  0xb9   : > { %v1232_v62 = vrot.slane %v9222_v53, %v7447_v37  ;;  %1621 = vmatmul.mubr.bf16.vlgmr.msra.gmra.mrb[0].mxu0 %v1133_v16  ;;  %v898_v45 = vcombine.high %v7715_v25, %v7715_v25  ;;  %v1200_v46 = vcombine.low %v1184_v41, %v1198_v13  ;;  %v1686_v47 = vrot.slane %v1676_v50, %v7447_v37 }
  0xba   : > { %v1679_v60 = vcombine.low %v7463_v61, %v9223_v51  ;;  %v883_v24 = vcombine.high %v549_v6, %v9224_v36  ;;  %v1004_v42 = vcombine.low %v1002_v19, %v9225_v18  ;;  %2726 = vmatpush1.bf16.msra.mxu0 %v7069_v27  ;;  %v7072_v61 = vld [vmem:[%s9210_s1 + $0xc8] sm:$0xff]   ;;  %v1693_v11 = vrot.slane %v6666_v17, %v7447_v37 }
  0xbb   : > { %v1236_v15 = vcombine.high %v7735_v8, %v1232_v62  ;;  %v9226_v6 = vcombine.high %v7651_v31, %v7651_v31  ;;  %v9227_v3 = vmov 0   ;;  %v1177_v12 = vrot.slane %v1167_v38, %v7447_v37  ;;  %6660 = vmatprep.mubr.msk.bf16.mxu0 %vm531_vm0, %v1200_v46 }
  0xbc   : > { %2727 = vmatprep.subr.bf16.mxu0 %v9227_v3  ;;  %v1191_v43 = vrot.slane %v1169_v48, %v7447_v37  ;;  %v1250_v27 = vrot.slane %v1234_v7, %v7447_v37  ;;  %v1700_v50 = vrot.slane %v1678_v23, %v7447_v37  ;;  %v1707_v17 = vrot.slane %v1679_v60, %v7447_v37  ;;  %v7074_v23 = vld [vmem:[%s9210_s1 + $0xd0] sm:$0xff]  }
  0xbd   : > { %v1943_v49 = vcombine.low %v9226_v6, %v7657_v1  ;;  %v1264_v44 = vrot.slane %v1236_v15, %v7447_v37  ;;  %v1709_v41 = vcombine.high %v1686_v47, %v1693_v11  ;;  %v7783_v16 = vrot.slane %v7685_v4, %v7447_v37 }
  0xbe   : > { %v7786_v53 = vrot.slane %v938_v32, %v7447_v37  ;;  %v960_v38 = vcombine.high %v7704_v21, %v7704_v21  ;;  %v1012_v48 = vrot.slane %v1004_v42, %v7447_v37  ;;  %v897_v20 = vrot.slane %v883_v24, %v7447_v37  ;;  %2728 = vmatpush1.bf16.msra.mxu0 %v7072_v61 }
  0xbf   : > { %v7793_v13 = vrot.slane %v898_v45, %v7447_v37  ;;  %v1711_v4 = vcombine.high %v1700_v50, %v1707_v17  ;;  %v1725_v51 = vrot.slane %v1709_v41, %v7447_v37  ;;  %v1199_v32 = vcombine.low %v1177_v12, %v1191_v43  ;;  %2729 = vmatprep.subr.bf16.mxu0 %v9227_v3 }
  0xc0   : > { %v1233_v60 = vcombine.low %v1211_v14, %v7605_v59  ;;  %v1235_v36 = vcombine.low %v7735_v8, %v1232_v62  ;;  %v1708_v7 = vcombine.low %v1686_v47, %v1693_v11  ;;  %v7803_v24 = vrot.slane %v1943_v49, %v7447_v37  ;;  %v7076_v14 = vld [vmem:[%s9210_s1 + $0xd8] sm:$0xff]  }
  0xc1   : > { %v1266_v15 = vcombine.low %v1250_v27, %v1264_v44  ;;  %v1739_v18 = vrot.slane %v1711_v4, %v7447_v37  ;;  %v1710_v42 = vcombine.low %v1700_v50, %v1707_v17  ;;  %v7808_v45 = vrot.slane %v7715_v25, %v7447_v37  ;;  %1629 = vmatmul.mubr.bf16.gmra.mrb[4].mxu0 %v1199_v32 }
  0xc2   : > { %v9228_v46 = vrot.slane %v7371_v55, 1  ;;  %v1020_v6 = vcombine.high %v1012_v48, %v1012_v48  ;;  %v1718_v59 = vrot.slane %v1708_v7, %v7447_v37  ;;  %v7814_v8 = vrot.slane %v897_v20, %v7447_v37  ;;  %2730 = vmatpush1.bf16.msra.mxu0 %v7074_v23 }
  0xc3   : > { %6661 = vmatprep.mubr.msk.bf16.mxu0 %vm531_vm0, %v1266_v15  ;;  %v1741_v62 = vcombine.low %v1725_v51, %v1739_v18  ;;  %v1732_v25 = vrot.slane %v1710_v42, %v7447_v37  ;;  %v921_v55 = vcombine.high %v7793_v13, %v7793_v13  ;;  %2731 = vmatprep.subr.bf16.mxu0 %v9227_v3  ;;  %v7077_v51 = vld [vmem:[%s9210_s1 + $0xe0] sm:$0xff]  }
  0xc4   : > { %v1005_v61 = vcombine.high %v1002_v19, %v9228_v46  ;;  %v1243_v19 = vrot.slane %v1233_v60, %v7447_v37  ;;  %v1257_v47 = vrot.slane %v1235_v36, %v7447_v37  ;;  %v9229_v11 = vcombine.high %v7575_v34, %v7575_v34 }
  0xc5   : > { %6683 = vmatprep.mubr.msk.bf16.mxu1 %vm531_vm0, %v1741_v62  ;;  %v1740_v12 = vcombine.low %v1718_v59, %v1732_v25  ;;  %v9230_v43 = vcombine.low %v7581_v29, %v7575_v34  ;;  %v9231_v44 = vcombine.low %v7635_v39, %v7651_v31  ;;  %v1775_v17 = vcombine.high %v7532_v56, %v7547_v2 }
  0xc6   : > { %v1268_v49 = vcombine.low %v7578_v35, %v9229_v11  ;;  %v920_v41 = vcombine.high %v7808_v45, %v7808_v45  ;;  %v1019_v35 = vrot.slane %v1005_v61, %v7447_v37  ;;  %v7845_v20 = vrot.slane %v1020_v6, %v7447_v37  ;;  %2732 = vmatpush1.bf16.msra.mxu0 %v7076_v14 }
  0xc7   : > { %v1277_v27 = vrot.slane %v9230_v43, %v7447_v37  ;;  %v1298_v50 = vrot.slane %v9231_v44, %v7447_v37  ;;  %2228 = vmatmul.mubr.bf16.vlgmr.msra.gmra.mrb[0].mxu1 %v1740_v12  ;;  %v1777_v29 = vcombine.high %v7556_v10, %v7564_v22  ;;  %v1791_v4 = vrot.slane %v1775_v17, %v7447_v37 }
  0xc8   : > { %v1284_v23 = vrot.slane %v1268_v49, %v7447_v37  ;;  %v1336_v32 = vcombine.low %v921_v55, %v7814_v8  ;;  %v7857_v60 = vrot.slane %v1012_v48, %v7447_v37  ;;  %v1265_v36 = vcombine.low %v1243_v19, %v1257_v47  ;;  %2733 = vmatprep.subr.bf16.mxu0 %v9227_v3 }
  0xc9   : > { %v1302_v34 = vcombine.high %v7654_v40, %v1298_v50  ;;  %v1805_v18 = vrot.slane %v1777_v29, %v7447_v37  ;;  %v1301_v46 = vcombine.low %v7654_v40, %v1298_v50  ;;  %v1334_v61 = vcombine.low %v7657_v1, %v7808_v45  ;;  %v7078_v40 = vld [vmem:[%s9210_s1 + $0xe8] sm:$0xff]  }
  0xca   : > { %v1300_v7 = vcombine.high %v1277_v27, %v1284_v23  ;;  %v1299_v42 = vcombine.low %v1277_v27, %v1284_v23  ;;  %v7866_v6 = vrot.slane %v1019_v35, %v7447_v37  ;;  %v1043_v48 = vcombine.high %v7845_v20, %v7845_v20  ;;  %1637 = vmatmul.mubr.bf16.gmra.mrb[8].mxu0 %v1265_v36 }
  0xcb   : > { %v1330_v15 = vrot.slane %v1302_v34, %v7447_v37  ;;  %v1399_v14 = vcombine.low %v7704_v21, %v7786_v53  ;;  %v6646_v62 = vcombine.high %v7704_v21, %v7786_v53  ;;  %v1807_v25 = vcombine.low %v1791_v4, %v1805_v18  ;;  %2734 = vmatpush1.bf16.msra.mxu0 %v7077_v51  ;;  %v7079_v4 = vld [vmem:[%s9210_s1 + $0xf0] sm:$0xff]  }
  0xcc   : > { %v1316_v59 = vrot.slane %v1300_v7, %v7447_v37  ;;  %v1774_v1 = vcombine.low %v7532_v56, %v7547_v2  ;;  %v1364_v55 = vrot.slane %v1336_v32, %v7447_v37  ;;  %2735 = vmatprep.subr.bf16.mxu0 %v9227_v3  ;;  %v1309_v47 = vrot.slane %v1299_v42, %v7447_v37 }
  0xcd   : > { %v1323_v11 = vrot.slane %v1301_v46, %v7447_v37  ;;  %v1042_v49 = vcombine.high %v7857_v60, %v7857_v60  ;;  %6684 = vmatprep.mubr.msk.bf16.mxu1 %vm531_vm0, %v1807_v25  ;;  %v1776_v56 = vcombine.low %v7556_v10, %v7564_v22  ;;  %v1335_v43 = vcombine.low %v7793_v13, %v920_v41 }
  0xce   : > { %v1332_v19 = vcombine.low %v1316_v59, %v1330_v15  ;;  %v1784_v12 = vrot.slane %v1774_v1, %v7447_v37  ;;  %v1401_v27 = vcombine.low %v7711_v0, %v7857_v60  ;;  %v1465_v44 = vcombine.low %v1043_v48, %v7866_v6 }
  0xcf   : > { %v9232_v50 = vcombine.high %v7635_v39, %v7651_v31  ;;  %v1350_v35 = vrot.slane %v1334_v61, %v7447_v37  ;;  %v1798_v23 = vrot.slane %v1776_v56, %v7447_v37  ;;  %2736 = vmatpush1.bf16.msra.mxu0 %v7078_v40  ;;  %v1357_v34 = vrot.slane %v1335_v43, %v7447_v37  ;;  %v7080_v40 = vld [vmem:[%s9210_s1 + $0xf8] sm:$0xff]  }
  0xd0   : > { %6662 = vmatprep.mubr.msk.bf16.mxu0 %vm531_vm0, %v1332_v19  ;;  %v1841_v41 = vcombine.high %v7535_v57, %v7538_v58  ;;  %v1843_v29 = vcombine.high %v7599_v52, %v7608_v63  ;;  %v1331_v51 = vcombine.low %v1309_v47, %v1323_v11  ;;  %2737 = vmatprep.subr.bf16.mxu0 %v9227_v3 }
  0xd1   : > { %v1343_v17 = vrot.slane %v9232_v50, %v7447_v37  ;;  %v1840_v32 = vcombine.low %v7535_v57, %v7538_v58  ;;  %v1806_v36 = vcombine.low %v1784_v12, %v1798_v23  ;;  %v1368_v7 = vcombine.high %v1357_v34, %v1364_v55 }
  0xd2   : > { %v1857_v15 = vrot.slane %v1841_v41, %v7447_v37  ;;  %v1871_v18 = vrot.slane %v1843_v29, %v7447_v37  ;;  %1645 = vmatmul.mubr.bf16.gmra.mrb[12].mxu0 %v1331_v51  ;;  %v1367_v46 = vcombine.low %v1357_v34, %v1364_v55  ;;  %v1842_v48 = vcombine.low %v7599_v52, %v7608_v63  ;;  %v7081_v41 = vld [vmem:[%s9210_s1 + $0x100] sm:$0xff]  }
  0xd3   : > { %v1366_v39 = vcombine.high %v1343_v17, %v1350_v35  ;;  %v1365_v31 = vcombine.low %v1343_v17, %v1350_v35  ;;  %2236 = vmatmul.mubr.bf16.gmra.mrb[4].mxu1 %v1806_v36  ;;  %v1396_v59 = vrot.slane %v1368_v7, %v7447_v37  ;;  %2738 = vmatpush1.bf16.msra.mxu0 %v7079_v4 }
  0xd4   : > { %v1873_v25 = vcombine.low %v1857_v15, %v1871_v18  ;;  %v1850_v1 = vrot.slane %v1840_v32, %v7447_v37  ;;  %v1389_v19 = vrot.slane %v1367_v46, %v7447_v37  ;;  %v1864_v55 = vrot.slane %v1842_v48, %v7447_v37  ;;  %2739 = vmatprep.subr.bf16.mxu0 %v9227_v3 }
  0xd5   : > { %v1382_v42 = vrot.slane %v1366_v39, %v7447_v37  ;;  %v1375_v61 = vrot.slane %v1365_v31, %v7447_v37  ;;  %v1907_v47 = vcombine.high %v7628_v28, %v7632_v30  ;;  %v1909_v11 = vcombine.high %v7642_v9, %v7645_v5 }
  0xd6   : > { %6685 = vmatprep.mubr.msk.bf16.mxu1 %vm531_vm0, %v1873_v25  ;;  %v1402_v12 = vcombine.low %v7845_v20, %v1042_v49  ;;  %v1409_v43 = vrot.slane %v1399_v14, %v7447_v37  ;;  %v1416_v50 = vrot.slane %v6646_v62, %v7447_v37  ;;  %v2009_v17 = vcombine.low %v7786_v53, %v960_v38 }
  0xd7   : > { %v1398_v56 = vcombine.low %v1382_v42, %v1396_v59  ;;  %v7939_v35 = vrot.slane %v1465_v44, %v7447_v37  ;;  %v1923_v23 = vrot.slane %v1907_v47, %v7447_v37  ;;  %v1937_v34 = vrot.slane %v1909_v11, %v7447_v37  ;;  %2740 = vmatpush1.bf16.msra.mxu0 %v7080_v40 }
  0xd8   : > { %v1423_v49 = vrot.slane %v1401_v27, %v7447_v37  ;;  %v1430_v14 = vrot.slane %v1402_v12, %v7447_v37  ;;  %v1432_v62 = vcombine.high %v1409_v43, %v1416_v50  ;;  %v1397_v38 = vcombine.low %v1375_v61, %v1389_v19  ;;  %2741 = vmatprep.subr.bf16.mxu0 %v9227_v3  ;;  %v7082_v61 = vld [vmem:[%s9210_s1 + $0x108] sm:$0xff]   ;;  %v7083_v12 = vld [vmem:[%s9210_s1 + $0x110] sm:$0xff]  }
  0xd9   : > { %6663 = vmatprep.mubr.msk.bf16.mxu0 %vm531_vm0, %v1398_v56  ;;  %v1872_v29 = vcombine.low %v1850_v1, %v1864_v55  ;;  %v1431_v44 = vcombine.low %v1409_v43, %v1416_v50  ;;  %v1906_v4 = vcombine.low %v7628_v28, %v7632_v30  ;;  %v1908_v27 = vcombine.low %v7642_v9, %v7645_v5 }
  0xda   : > { %v1434_v51 = vcombine.high %v1423_v49, %v1430_v14  ;;  %v1448_v39 = vrot.slane %v1432_v62, %v7447_v37  ;;  %v1433_v31 = vcombine.low %v1423_v49, %v1430_v14  ;;  %v6670_v32 = vcombine.high %v7808_v45, %v7793_v13  ;;  %1653 = vmatmul.mubr.bf16.gmra.mrb[16].mxu0 %v1397_v38  ;;  %v7084_v38 = vld [vmem:[%s9210_s1 + $0x118] sm:$0xff]  }
  0xdb   : > { %v2008_v36 = vcombine.low %v7814_v8, %v7704_v21  ;;  %v1939_v7 = vcombine.low %v1923_v23, %v1937_v34  ;;  %v1973_v15 = vcombine.high %v7648_v54, %v7696_v26  ;;  %v2006_v18 = vcombine.low %v7808_v45, %v7793_v13  ;;  %2244 = vmatmul.mubr.bf16.gmra.mrb[8].mxu1 %v1872_v29 }
  0xdc   : > { %v1462_v42 = vrot.slane %v1434_v51, %v7447_v37  ;;  %2742 = vmatpush1.bf16.msra.mxu0 %v7081_v41  ;;  %v1473_v46 = vcombine.high %v7939_v35, %v7939_v35  ;;  %v1441_v21 = vrot.slane %v1431_v44, %v7447_v37  ;;  %v1455_v8 = vrot.slane %v1433_v31, %v7447_v37 }
  0xdd   : > { %6686 = vmatprep.mubr.msk.bf16.mxu1 %vm531_vm0, %v1939_v7  ;;  %v1975_v13 = vcombine.high %v7783_v16, %v7803_v24  ;;  %2743 = vmatprep.subr.bf16.mxu0 %v9227_v3  ;;  %v7976_v45 = vrot.slane %v2009_v17, %v7447_v37  ;;  %v1916_v59 = vrot.slane %v1906_v4, %v7447_v37 }
  0xde   : > { %v1464_v48 = vcombine.low %v1448_v39, %v1462_v42  ;;  %v1930_v25 = vrot.slane %v1908_v27, %v7447_v37  ;;  %v7981_v1 = vrot.slane %v6670_v32, %v7447_v37  ;;  %v7984_v40 = vrot.slane %v2008_v36, %v7447_v37 }
  0xdf   : > { %v1989_v19 = vrot.slane %v1973_v15, %v7447_v37  ;;  %v2003_v55 = vrot.slane %v1975_v13, %v7447_v37  ;;  %v7990_v47 = vrot.slane %v2006_v18, %v7447_v37  ;;  %v1463_v11 = vcombine.low %v1441_v21, %v1455_v8  ;;  %v2296_v15 = vpop.permute.xlu1 %2295  ;;  %v7166_v21 = vld [vmem:[%s7286_s22 + $0x58] sm:$0x3f]  }
  0xe0   : > { %6664 = vmatprep.mubr.msk.bf16.mxu0 %vm531_vm0, %v1464_v48  ;;  %2744 = vmatpush1.bf16.msra.mxu0 %v7082_v61  ;;  %v1487_v56 = vrot.slane %v1473_v46, %v7447_v37  ;;  %v1938_v43 = vcombine.low %v1916_v59, %v1930_v25  ;;  %v1972_v50 = vcombine.low %v7648_v54, %v7696_v26  ;;  %v2297_v8 = vrot.slane %v7166_v21, 1 }
  0xe1   : > { %2745 = vmatprep.subr.bf16.mxu0 %v9227_v3  ;;  %v1974_v17 = vcombine.low %v7783_v16, %v7803_v24  ;;  %v2367_v23 = vcombine.high %v7547_v2, %v7556_v10  ;;  %v2005_v34 = vcombine.low %v1989_v19, %v2003_v55  ;;  %v2039_v49 = vcombine.high %v7990_v47, %v7981_v1 }
  0xe2   : > { %1661 = vmatmul.mubr.bf16.gmra.mrb[20].mxu0 %v1463_v11  ;;  %v2041_v14 = vcombine.high %v7984_v40, %v7976_v45  ;;  %v961_v62 = vcombine.high %v7786_v53, %v7786_v53  ;;  %v2369_v41 = vcombine.high %v7564_v22, %v7535_v57  ;;  %v1982_v29 = vrot.slane %v1972_v50, %v7447_v37 }
  0xe3   : > { %2252 = vmatmul.mubr.bf16.gmra.mrb[12].mxu1 %v1938_v43  ;;  %6665 = vmatprep.mubr.msk.bf16.mxu0 %vm531_vm0, %v1487_v56  ;;  %v1996_v44 = vrot.slane %v1974_v17, %v7447_v37  ;;  %v2383_v4 = vrot.slane %v2367_v23, %v7447_v37  ;;  %v2055_v53 = vrot.slane %v2039_v49, %v7447_v37 }
  0xe4   : > { %6687 = vmatprep.mubr.msk.bf16.mxu1 %vm531_vm0, %v2005_v34  ;;  %2746 = vmatpush1.bf16.msra.mxu0 %v7083_v12  ;;  %v2069_v51 = vrot.slane %v2041_v14, %v7447_v37  ;;  %v2072_v39 = vcombine.low %v961_v62, %v7711_v0  ;;  %v2397_v31 = vrot.slane %v2369_v41, %v7447_v37 }
  0xe5   : > { %2747 = vmatprep.subr.bf16.mxu0 %v9227_v3  ;;  %v1480_v27 = vrot.slane %v7939_v35, %v7447_v37  ;;  %v2038_v32 = vcombine.low %v7990_v47, %v7981_v1  ;;  %v2040_v36 = vcombine.low %v7984_v40, %v7976_v45  ;;  %v2366_v7 = vcombine.low %v7547_v2, %v7556_v10 }
  0xe6   : > { %v2004_v18 = vcombine.low %v1982_v29, %v1996_v44  ;;  %v2399_v42 = vcombine.low %v2383_v4, %v2397_v31  ;;  %v2401_v0 = vcombine.high %v7538_v58, %v7599_v52  ;;  %v2403_v46 = vcombine.high %v7608_v63, %v7628_v28 }
  0xe7   : > { %v2071_v35 = vcombine.low %v2055_v53, %v2069_v51  ;;  %v2368_v61 = vcombine.low %v7564_v22, %v7535_v57  ;;  %v8042_v2 = vrot.slane %v2072_v39, %v7447_v37  ;;  %v2299_v10 = vsel %vm531_vm0, %v7166_v21, %v2296_v15 }
  0xe8   : > { %2748 = vmatpush1.bf16.msra.mxu0 %v7084_v38  ;;  %v2376_v13 = vrot.slane %v2366_v7, %v7447_v37  ;;  %v2048_v48 = vrot.slane %v2038_v32, %v7447_v37  ;;  %v2062_v59 = vrot.slane %v2040_v36, %v7447_v37  ;;  %v2417_v57 = vrot.slane %v2401_v0, %v7447_v37 }
  0xe9   : > { %4126 = vmatprep.subr.bf16.mxu0 %v9227_v3  ;;  %v2431_v22 = vrot.slane %v2403_v46, %v7447_v37  ;;  %v2390_v25 = vrot.slane %v2368_v61, %v7447_v37  ;;  %v2080_v19 = vcombine.high %v8042_v2, %v8042_v2  ;;  %v2301_v55 = vcombine.low %v2299_v10, %v2297_v8 }
  0xea   : > { %1669 = vmatmul.mubr.bf16.gmra.mrb[24].mxu0 %v1480_v27  ;;  %v2400_v56 = vcombine.low %v7538_v58, %v7599_v52  ;;  %v2402_v12 = vcombine.low %v7608_v63, %v7628_v28  ;;  %v2070_v43 = vcombine.low %v2048_v48, %v2062_v59  ;;  %v2435_v17 = vcombine.high %v7632_v30, %v7642_v9 }
  0xeb   : > { %2260 = vmatmul.mubr.bf16.gmra.mrb[16].mxu1 %v2004_v18  ;;  %6728 = vmatprep.mubr.msk.bf16.mxu0 %vm531_vm0, %v2399_v42  ;;  %v2398_v11 = vcombine.low %v2376_v13, %v2390_v25  ;;  %v2433_v50 = vcombine.low %v2417_v57, %v2431_v22  ;;  %v2437_v23 = vcombine.high %v7645_v5, %v7648_v54 }
  0xec   : > { %6688 = vmatprep.mubr.msk.bf16.mxu1 %vm531_vm0, %v2071_v35  ;;  %v2094_v34 = vrot.slane %v2080_v19, %v7447_v37  ;;  %v2309_v49 = vrot.slane %v2301_v55, %v7447_v37  ;;  %v2410_v58 = vrot.slane %v2400_v56, %v7447_v37  ;;  %v2424_v52 = vrot.slane %v2402_v12, %v7447_v37 }
  0xed   : > { %v2451_v63 = vrot.slane %v2435_v17, %v7447_v37  ;;  %v2465_v28 = vrot.slane %v2437_v23, %v7447_v37  ;;  %v2434_v38 = vcombine.low %v7632_v30, %v7642_v9  ;;  %v2436_v29 = vcombine.low %v7645_v5, %v7648_v54 }
  0xee   : > { %v2317_v14 = vcombine.high %v2309_v49, %v2309_v49  ;;  %v2324_v62 = vrot.slane %v2309_v49, %v7447_v37  ;;  %v2432_v41 = vcombine.low %v2410_v58, %v2424_v52  ;;  %v2087_v44 = vrot.slane %v8042_v2, %v7447_v37 }
  0xef   : > { %v2467_v4 = vcombine.low %v2451_v63, %v2465_v28  ;;  %v2469_v53 = vcombine.high %v7696_v26, %v7783_v16  ;;  %v2471_v51 = vcombine.high %v7803_v24, %v7990_v47  ;;  %v2444_v30 = vrot.slane %v2434_v38, %v7447_v37 }
  0xf0   : > { %v2338_v39 = vrot.slane %v2317_v14, %v7447_v37  ;;  %v2339_v9 = vcombine.high %v2324_v62, %v2324_v62  ;;  %v2458_v5 = vrot.slane %v2436_v29, %v7447_v37  ;;  %v2536_v27 = vcombine.low %v7857_v60, %v7845_v20 }
  0xf1   : > { %v2485_v54 = vrot.slane %v2469_v53, %v7447_v37  ;;  %v2499_v31 = vrot.slane %v2471_v51, %v7447_v37  ;;  %v2302_v32 = vcombine.high %v2299_v10, %v2297_v8  ;;  %v2538_v36 = vcombine.low %v7866_v6, %v2324_v62 }
  0xf2   : > { %2758 = vmatmul.mubr.bf16.vlgmr.msra.gmra.mrb[28].mxu0 %v2398_v11  ;;  %v2539_v7 = vcombine.low %v2338_v39, %v2339_v9  ;;  %v2466_v15 = vcombine.low %v2444_v30, %v2458_v5  ;;  %v2468_v18 = vcombine.low %v7696_v26, %v7783_v16  ;;  %v2470_v42 = vcombine.low %v7803_v24, %v7990_v47 }
  0xf3   : > { %2268 = vmatmul.mubr.bf16.gmra.mrb[20].mxu1 %v2070_v43  ;;  %6729 = vmatprep.mubr.msk.bf16.mxu0 %vm531_vm0, %v2433_v50  ;;  %v6715_v0 = vcombine.high %v7857_v60, %v7845_v20  ;;  %v2501_v46 = vcombine.low %v2485_v54, %v2499_v31  ;;  %v2503_v35 = vcombine.high %v7981_v1, %v7984_v40 }
  0xf4   : > { %6689 = vmatprep.mubr.msk.bf16.mxu1 %vm531_vm0, %v2094_v34  ;;  %v2505_v61 = vcombine.high %v7976_v45, %v8042_v2  ;;  %v2316_v6 = vrot.slane %v2302_v32, %v7447_v37  ;;  %v2560_v26 = vrot.slane %v2538_v36, %v7447_v37  ;;  %v2567_v16 = vrot.slane %v2539_v7, %v7447_v37 }
  0xf5   : > { %v2478_v24 = vrot.slane %v2468_v18, %v7447_v37  ;;  %v2492_v20 = vrot.slane %v2470_v42, %v7447_v37  ;;  %v2519_v60 = vrot.slane %v2503_v35, %v7447_v37  ;;  %v2546_v21 = vrot.slane %v2536_v27, %v7447_v37 }
  0xf6   : > { %v2533_v47 = vrot.slane %v2505_v61, %v7447_v37  ;;  %v2553_v8 = vrot.slane %v6715_v0, %v7447_v37  ;;  %v2331_v10 = vrot.slane %v2316_v6, %v7447_v37  ;;  %v2502_v48 = vcombine.low %v7981_v1, %v7984_v40  ;;  %v7085_v6 = vld [vmem:[%s9212_s3 + $0x48] sm:$0xff]  }
  0xf7   : > { %v2500_v13 = vcombine.low %v2478_v24, %v2492_v20  ;;  %v2504_v59 = vcombine.low %v7976_v45, %v8042_v2  ;;  %v2340_v57 = vcombine.high %v2338_v39, %v2338_v39  ;;  %v2571_v19 = vcombine.high %v2560_v26, %v2567_v16  ;;  %3817 = vmatpush1.bf16.msra.mxu1 %v7085_v6  ;;  %v7086_v24 = vld [vmem:[%s9212_s3 + $0x50] sm:$0xff]  }
  0xf8   : > { %v2535_v22 = vcombine.low %v2519_v60, %v2533_v47  ;;  %v2569_v25 = vcombine.high %v2546_v21, %v2553_v8  ;;  %v2512_v55 = vrot.slane %v2502_v48, %v7447_v37  ;;  %v2568_v40 = vcombine.low %v2546_v21, %v2553_v8  ;;  %3818 = vmatprep.subr.bf16.mxu1 %v9227_v3  ;;  %v7091_v47 = vld [vmem:[%s9212_s3 + $0x98] sm:$0xff]  }
  0xf9   : > { %v2526_v11 = vrot.slane %v2504_v59, %v7447_v37  ;;  %v2602_v56 = vcombine.low %v2340_v57, %v2331_v10  ;;  %v2599_v43 = vrot.slane %v2571_v19, %v7447_v37  ;;  %v2570_v50 = vcombine.low %v2560_v26, %v2567_v16  ;;  %v7089_v26 = vld [vmem:[%s9212_s3 + $0x90] sm:$0xff]  }
  0xfa   : > { %2766 = vmatmul.mubr.bf16.gmra.mrb[32].mxu0 %v2432_v41  ;;  %v2585_v12 = vrot.slane %v2569_v25, %v7447_v37  ;;  %v2578_v17 = vrot.slane %v2568_v40, %v7447_v37  ;;  %v7092_v25 = vld [vmem:[%s9212_s3 + $0xa0] sm:$0xff]  }
  0xfb   : > { %2276 = vmatmul.mubr.bf16.gmra.mrb[24].mxu1 %v2087_v44  ;;  %6730 = vmatprep.mubr.msk.bf16.mxu0 %vm531_vm0, %v2467_v4  ;;  %v2534_v1 = vcombine.low %v2512_v55, %v2526_v11  ;;  %v2609_v45 = vrot.slane %v2602_v56, %v7447_v37  ;;  %v2592_v23 = vrot.slane %v2570_v50, %v7447_v37  ;;  %v7088_v55 = vld [vmem:[%s9212_s3 + $0x60] sm:$0xff]  }
  0xfc   : > { %v2601_v2 = vcombine.low %v2585_v12, %v2599_v43  ;;  %4127 = vmatpush1.bf16.msra.mxu0 %v7089_v26  ;;  %3819 = vmatpush1.bf16.msra.mxu1 %v7086_v24 }
  0xfd   : > { %v2610_v34 = vcombine.high %v2609_v45, %v2609_v45  ;;  %v2600_v49 = vcombine.low %v2578_v17, %v2592_v23  ;;  %v2617_v52 = vrot.slane %v2609_v45, %v7447_v37  ;;  %4128 = vmatprep.subr.bf16.mxu0 %v9227_v3  ;;  %3820 = vmatprep.subr.bf16.mxu1 %v9227_v3  ;;  %v7090_v17 = vld [vmem:[%s9212_s3 + $0x68] sm:$0xff]  }
  0xff   : > { %v2624_v58 = vrot.slane %v2610_v34, %v7447_v37 }
 0x100   : > { %4129 = vmatpush1.bf16.msra.mxu0 %v7091_v47 }
 0x101   : > { %4130 = vmatprep.subr.bf16.mxu0 %v9227_v3 }
 0x102   : > { %2774 = vmatmul.mubr.bf16.gmra.mrb[36].mxu0 %v2466_v15 }
 0x103   : > { %6731 = vmatprep.mubr.msk.bf16.mxu0 %vm531_vm0, %v2501_v46 }
 0x104   : > { %4131 = vmatpush1.bf16.msra.mxu0 %v7092_v25 }
 0x105   : > { %4132 = vmatprep.subr.bf16.mxu0 %v9227_v3 }
 0x10a   : > { %2782 = vmatmul.mubr.bf16.gmra.mrb[40].mxu0 %v2500_v13 }
 0x10b   : > { %6732 = vmatprep.mubr.msk.bf16.mxu0 %vm531_vm0, %v2535_v22  ;;  %v7087_v22 = vld [vmem:[%s9212_s3 + $0x58] sm:$0xff]  }
 0x10c   : > { %3821 = vmatpush1.bf16.msra.mxu1 %v7087_v22 }
 0x10d   : > { %3822 = vmatprep.subr.bf16.mxu1 %v9227_v3 }
 0x110   : > { %3823 = vmatpush1.bf16.msra.mxu1 %v7088_v55 }
 0x111   : > { %3824 = vmatprep.subr.bf16.mxu1 %v9227_v3 }
 0x112   : > { %2790 = vmatmul.mubr.bf16.gmra.mrb[44].mxu0 %v2534_v1 }
 0x113   : > { %6733 = vmatprep.mubr.msk.bf16.mxu0 %vm531_vm0, %v2601_v2 }
 0x114   : > { %3825 = vmatpush1.bf16.msra.mxu1 %v7090_v17 }
 0x115   : > { %3826 = vmatprep.subr.bf16.mxu1 %v9227_v3 }
 0x11a   : > { %2798 = vmatmul.mubr.bf16.gmra.mrb[48].mxu0 %v2600_v49 }
 0x11b   : > { %6734 = vmatprep.mubr.msk.bf16.mxu0 %vm531_vm0, %v2624_v58  ;;  %v7194_v58 = vmov 1983009808  }
 0x122   : > { %2806 = vmatmul.mubr.bf16.gmra.mrb[52].mxu0 %v2617_v52  ;;  %v2861_v52 = vunpack.c.l.s4 %v7194_v58 }
 0x18c   : > { %v1622_v63 = vpop.f32.mrb[0].mxu0 }
 0x18d   : > { %v1624_v28 = vpop.f32.mrb[1].mxu0 }
 0x18e   : > { %v1625_v14 = vpop.f32.mrb[2].mxu0 }
 0x18f   : > { %v1627_v62 = vpop.f32.mrb[3].mxu0 }
 0x194   : > { %v1630_v41 = vpop.f32.mrb[4].mxu0 }
 0x195   : > { %v1632_v38 = vpop.f32.mrb[5].mxu0 }
 0x196   : > { %v1633_v29 = vpop.f32.mrb[6].mxu0 }
 0x197   : > { %v1635_v44 = vpop.f32.mrb[7].mxu0 }
 0x198   : > { %v2862_v44 = vunpack.c.0.s8 %v2861_v52 }
 0x19a   : > { %v2229_v4 = vpop.f32.mrb[0].mxu1 }
 0x19b   : > { %v8127_v53 = vadd.f32 %v2229_v4, %v1622_v63  ;;  %v2231_v51 = vpop.f32.mrb[1].mxu1 }
 0x19c   : > { %v2232_v39 = vpop.f32.mrb[2].mxu1  ;;  %v8182_v51 = vld [vmem:[%s9211_s2] ss:$0 sm:$0xff] }
 0x19d   : > { %v1638_v9 = vpop.f32.mrb[8].mxu0  ;;  %v8129_v30 = vadd.f32 %v2232_v39, %v1625_v14  ;;  %v2234_v5 = vpop.f32.mrb[3].mxu1 }
 0x19e   : > { %v1640_v54 = vpop.f32.mrb[9].mxu0  ;;  %v8186_v5 = vsub.s32 %v2862_v44, %v7442_v33 }
 0x19f   : > { %v1641_v31 = vpop.f32.mrb[10].mxu0 }
 0x1a0   : > { %v1643_v27 = vpop.f32.mrb[11].mxu0 }
 0x1a5   : > { %v1646_v32 = vpop.f32.mrb[12].mxu0 }
 0x1a6   : > { %v2237_v36 = vpop.f32.mrb[4].mxu1  ;;  %v1648_v7 = vpop.f32.mrb[13].mxu0 }
 0x1a7   : > { %v8131_v15 = vadd.f32 %v2237_v36, %v1630_v41  ;;  %v2239_v18 = vpop.f32.mrb[5].mxu1  ;;  %v1649_v42 = vpop.f32.mrb[14].mxu0 }
 0x1a8   : > { %v2240_v0 = vpop.f32.mrb[6].mxu1  ;;  %v1651_v46 = vpop.f32.mrb[15].mxu0 }
 0x1a9   : > { %v8133_v35 = vadd.f32 %v2240_v0, %v1633_v29  ;;  %v2242_v61 = vpop.f32.mrb[7].mxu1 }
 0x1ad   : > { %v1654_v16 = vpop.f32.mrb[16].mxu0 }
 0x1ae   : > { %v2245_v20 = vpop.f32.mrb[8].mxu1  ;;  %v1656_v60 = vpop.f32.mrb[17].mxu0 }
 0x1af   : > { %v8148_v21 = vadd.f32 %v2245_v20, %v1638_v9  ;;  %v2247_v8 = vpop.f32.mrb[9].mxu1  ;;  %v1657_v10 = vpop.f32.mrb[18].mxu0 }
 0x1b0   : > { %v2248_v13 = vpop.f32.mrb[10].mxu1  ;;  %v1659_v48 = vpop.f32.mrb[19].mxu0 }
 0x1b1   : > { %v8151_v59 = vadd.f32 %v2248_v13, %v1641_v31  ;;  %v2250_v57 = vpop.f32.mrb[11].mxu1 }
 0x1b5   : > { %v1662_v19 = vpop.f32.mrb[20].mxu0 }
 0x1b6   : > { %v2253_v11 = vpop.f32.mrb[12].mxu1  ;;  %v1664_v56 = vpop.f32.mrb[21].mxu0 }
 0x1b7   : > { %v8165_v12 = vadd.f32 %v2253_v11, %v1646_v32  ;;  %v2255_v43 = vpop.f32.mrb[13].mxu1  ;;  %v1665_v1 = vpop.f32.mrb[22].mxu0 }
 0x1b8   : > { %v2256_v40 = vpop.f32.mrb[14].mxu1  ;;  %v1667_v50 = vpop.f32.mrb[23].mxu0 }
 0x1b9   : > { %v8168_v45 = vadd.f32 %v2256_v40, %v1649_v42  ;;  %v2258_v2 = vpop.f32.mrb[15].mxu1 }
 0x1bd   : > { %v1670_v23 = vpop.f32.mrb[24].mxu0 }
 0x1be   : > { %v2261_v34 = vpop.f32.mrb[16].mxu1  ;;  %v1672_v49 = vpop.f32.mrb[25].mxu0 }
 0x1bf   : > { %v8175_v63 = vadd.f32 %v2261_v34, %v1654_v16  ;;  %v2263_v28 = vpop.f32.mrb[17].mxu1  ;;  %v1673_v14 = vpop.f32.mrb[26].mxu0 }
 0x1c0   : > { %v2264_v62 = vpop.f32.mrb[18].mxu1  ;;  %v1674_v41 = vpop.f32.mrb[27].mxu0 }
 0x1c1   : > { %v8177_v38 = vadd.f32 %v2264_v62, %v1657_v10  ;;  %v2266_v29 = vpop.f32.mrb[19].mxu1 }
 0x1c5   : > { %v2759_v4 = vpop.f32.mrb[28].mxu0 }
 0x1c6   : > { %v2269_v39 = vpop.f32.mrb[20].mxu1  ;;  %v2813_v9 = vadd.f32 %v2759_v4, %v8127_v53  ;;  %v2761_v54 = vpop.f32.mrb[29].mxu0 }
 0x1c7   : > { %v8188_v31 = vadd.f32 %v2269_v39, %v1662_v19  ;;  %v2271_v27 = vpop.f32.mrb[21].mxu1  ;;  %v2762_v32 = vpop.f32.mrb[30].mxu0 }
 0x1c8   : > { %v2833_v36 = vadd.f32 %v8182_v51, %v2813_v9  ;;  %v2272_v7 = vpop.f32.mrb[22].mxu1  ;;  %v2814_v18 = vadd.f32 %v2762_v32, %v8129_v30  ;;  %v2764_v42 = vpop.f32.mrb[31].mxu0 }
 0x1c9   : > { %v8192_v0 = vadd.f32 %v2272_v7, %v1665_v1  ;;  %v2274_v46 = vpop.f32.mrb[23].mxu1  ;;  %v7094_v42 = vld [vmem:[%s9212_s3 + $0xa8] sm:$0xff]  }
 0x1ca   : > { %v2859_v61 = vcombine.high %v2833_v36, %v2833_v36  ;;  %v2866_v53 = vrot.slane %v2833_v36, %v8186_v5  ;;  %v2834_v33 = vadd.f32 %v8182_v51, %v2814_v18  ;;  %v7093_v18 = vld [vmem:[%s9212_s3 + $0x70] sm:$0xff]   ;;  %4133 = vmatpush1.bf16.msra.mxu0 %v7094_v42 }
 0x1cb   : > { %3827 = vmatpush1.bf16.msra.mxu1 %v7093_v18  ;;  %4134 = vmatprep.subr.bf16.mxu0 %v9227_v3 }
 0x1cc   : > { %v2873_v6 = vrot.slane %v2859_v61, %v8186_v5  ;;  %v2874_v26 = vcombine.high %v2866_v53, %v2866_v53  ;;  %v2876_v16 = vcombine.high %v2834_v33, %v2834_v33  ;;  %v2883_v24 = vrot.slane %v2834_v33, %v8186_v5  ;;  %3828 = vmatprep.subr.bf16.mxu1 %v9227_v3 }
 0x1cd   : > { %v2767_v20 = vpop.f32.mrb[32].mxu0  ;;  %v3121_v19 = vmax.f32 %v2866_v53, 0.0 }
 0x1ce   : > { %v2875_v60 = vcombine.high %v2873_v6, %v2873_v6  ;;  %v2890_v47 = vrot.slane %v2876_v16, %v8186_v5  ;;  %v2277_v30 = vpop.f32.mrb[24].mxu1  ;;  %v2769_v8 = vpop.f32.mrb[33].mxu0  ;;  %v3122_v10 = vmax.f32 %v2874_v26, 0.0  ;;  %v2891_v13 = vcombine.high %v2883_v24, %v2883_v24 }
 0x1cf   : > { %v8199_v48 = vadd.f32 %v2277_v30, %v1670_v23  ;;  %v2815_v57 = vadd.f32 %v2767_v20, %v8131_v15  ;;  %v2279_v22 = vpop.f32.mrb[25].mxu1  ;;  %v2770_v25 = vpop.f32.mrb[34].mxu0  ;;  %v3123_v34 = vmax.f32 %v2873_v6, 0.0  ;;  %v3125_v49 = vmax.f32 %v2883_v24, 0.0 }
 0x1d0   : > { %v3124_v55 = vmax.f32 %v2875_v60, 0.0  ;;  %v2892_v11 = vcombine.high %v2890_v47, %v2890_v47  ;;  %v2280_v56 = vpop.f32.mrb[26].mxu1  ;;  %v2772_v43 = vpop.f32.mrb[35].mxu0  ;;  %v3126_v1 = vmax.f32 %v2891_v13, 0.0  ;;  %v3127_v40 = vmax.f32 %v2890_v47, 0.0 }
 0x1d1   : > { %v2835_v50 = vadd.f32 %v8182_v51, %v2815_v57  ;;  %v2816_v2 = vadd.f32 %v2770_v25, %v8133_v35  ;;  %v2281_v17 = vpop.f32.mrb[27].mxu1  ;;  %v8204_v23 = vcombine.low %v3121_v19, %v3122_v10  ;;  %v8218_v27 = vrot.slane %v3125_v49, %v8186_v5 }
 0x1d2   : > { %v8208_v28 = vcombine.low %v3123_v34, %v3124_v55  ;;  %v3128_v14 = vmax.f32 %v2892_v11, 0.0  ;;  %v3245_v62 = vcombine.low %v3126_v1, %v3127_v40 }
 0x1d3   : > { %v2893_v58 = vcombine.high %v2835_v50, %v2835_v50  ;;  %v2900_v15 = vrot.slane %v2835_v50, %v8186_v5  ;;  %v2836_v52 = vadd.f32 %v8182_v51, %v2816_v2  ;;  %v3229_v54 = vrot.slane %v8204_v23, %v8186_v5 }
 0x1d4   : > { %v3236_v33 = vrot.slane %v8208_v28, %v8186_v5  ;;  %v3253_v6 = vrot.slane %v3245_v62, %v8186_v5 }
 0x1d5   : > { %v3129_v41 = vmax.f32 %v2900_v15, 0.0  ;;  %v2775_v29 = vpop.f32.mrb[36].mxu0  ;;  %v8211_v44 = vrot.slane %v2893_v58, %v8186_v5  ;;  %v2910_v35 = vcombine.high %v2836_v52, %v2836_v52  ;;  %v2917_v4 = vrot.slane %v2836_v52, %v8186_v5 }
 0x1d6   : > { %v2817_v39 = vadd.f32 %v2775_v29, %v8148_v21  ;;  %v2777_v9 = vpop.f32.mrb[37].mxu0  ;;  %v2908_v32 = vcombine.high %v2900_v15, %v2900_v15  ;;  %v7096_v29 = vld [vmem:[%s9212_s3 + $0xb0] sm:$0xff]  }
 0x1d7   : > { %v3246_v36 = vcombine.low %v3128_v14, %v3129_v41  ;;  %v2778_v7 = vpop.f32.mrb[38].mxu0  ;;  %v8227_v21 = vrot.slane %v2910_v35, %v8186_v5  ;;  %v2925_v46 = vcombine.high %v2917_v4, %v2917_v4  ;;  %v2909_v24 = vcombine.high %v8211_v44, %v8211_v44  ;;  %4135 = vmatpush1.bf16.msra.mxu0 %v7096_v29 }
 0x1d8   : > { %v2837_v61 = vadd.f32 %v8182_v51, %v2817_v39  ;;  %v2780_v53 = vpop.f32.mrb[39].mxu0  ;;  %v2818_v16 = vadd.f32 %v2778_v7, %v8151_v59  ;;  %v3130_v47 = vmax.f32 %v2908_v32, 0.0  ;;  %v3131_v59 = vmax.f32 %v8211_v44, 0.0  ;;  %4136 = vmatprep.subr.bf16.mxu0 %v9227_v3 }
 0x1d9   : > { %v3260_v26 = vrot.slane %v3246_v36, %v8186_v5  ;;  %v2926_v20 = vcombine.high %v8227_v21, %v8227_v21  ;;  %v3134_v13 = vmax.f32 %v2925_v46, 0.0  ;;  %v3132_v43 = vmax.f32 %v2909_v24, 0.0 }
 0x1da   : > { %v2927_v60 = vcombine.high %v2837_v61, %v2837_v61  ;;  %v2934_v30 = vrot.slane %v2837_v61, %v8186_v5  ;;  %v2838_v8 = vadd.f32 %v8182_v51, %v2818_v16  ;;  %v3133_v1 = vmax.f32 %v2917_v4, 0.0 }
 0x1db   : > { %v3261_v10 = vcombine.low %v3253_v6, %v3260_v26  ;;  %v3136_v57 = vmax.f32 %v2926_v20, 0.0  ;;  %v3268_v52 = vrot.slane %v3130_v47, %v8186_v5  ;;  %v3135_v28 = vmax.f32 %v8227_v21, 0.0 }
 0x1dc   : > { %v8245_v22 = vrot.slane %v2927_v60, %v8186_v5  ;;  %v2942_v25 = vcombine.high %v2934_v30, %v2934_v30  ;;  %v3137_v19 = vmax.f32 %v2934_v30, 0.0  ;;  %v2944_v55 = vcombine.high %v2838_v8, %v2838_v8 }
 0x1dd   : > { %v2951_v11 = vrot.slane %v2838_v8, %v8186_v5  ;;  %v2783_v56 = vpop.f32.mrb[40].mxu0  ;;  %v3270_v14 = vcombine.low %v3133_v1, %v3134_v13  ;;  %v3269_v18 = vcombine.low %v3131_v59, %v3132_v43  ;;  %v8273_v42 = vpack.c.bf16 %v3268_v52, %v3261_v10 }
 0x1de   : > { %v3139_v40 = vmax.f32 %v8245_v22, 0.0  ;;  %v2819_v50 = vadd.f32 %v2783_v56, %v8165_v12  ;;  %v2785_v2 = vpop.f32.mrb[41].mxu0  ;;  %v3138_v17 = vmax.f32 %v2942_v25, 0.0  ;;  %v8250_v34 = vcombine.low %v3136_v57, %v3137_v19  ;;  %v7095_v12 = vld [vmem:[%s9212_s3 + $0x78] sm:$0xff]  }
 0x1df   : > { %v2958_v49 = vrot.slane %v2944_v55, %v8186_v5  ;;  %v2959_v58 = vcombine.high %v2951_v11, %v2951_v11  ;;  %v2786_v15 = vpop.f32.mrb[42].mxu0  ;;  %v2943_v44 = vcombine.high %v8245_v22, %v8245_v22  ;;  %3829 = vmatpush1.bf16.msra.mxu1 %v7095_v12  ;;  %v8278_v21 = vcombine.low %v3229_v54, %v3236_v33  ;;  %v7097_v2 = vld [vmem:[%s9212_s3 + $0x80] sm:$0xff]  }
 0x1e0   : > { %v2839_v62 = vadd.f32 %v8182_v51, %v2819_v50  ;;  %v2788_v41 = vpop.f32.mrb[43].mxu0  ;;  %v8266_v35 = vcombine.low %v3138_v17, %v3139_v40  ;;  %v8268_v4 = vcombine.low %v3137_v19, %v3138_v17  ;;  %3830 = vmatprep.subr.bf16.mxu1 %v9227_v3  ;;  %v3292_v6 = vrot.slane %v3135_v28, %v8186_v5  ;;  %v7098_v17 = vld [vmem:[%s9212_s3 + $0xb8] sm:$0xff]  }
 0x1e1   : > { %v2960_v39 = vcombine.high %v2958_v49, %v2958_v49  ;;  %v3142_v9 = vmax.f32 %v2959_v58, 0.0  ;;  %v3143_v32 = vmax.f32 %v2958_v49, 0.0  ;;  %v3284_v26 = vrot.slane %v3270_v14, %v8186_v5  ;;  %3501 = vrot.lane.b32.xlu0 %v8273_v42, %s7195_s18  ;;  %4137 = vmatpush1.bf16.msra.mxu0 %v7098_v17 }
 0x1e2   : > { %v2961_v36 = vcombine.high %v2839_v62, %v2839_v62  ;;  %v8271_v7 = vrot.slane %v2839_v62, %v8186_v5  ;;  %v8289_v16 = vmax.f32 %v2943_v44, 0.0  ;;  %v2820_v54 = vadd.f32 %v2786_v15, %v8168_v45  ;;  %4138 = vmatprep.subr.bf16.mxu0 %v9227_v3 }
 0x1e3   : > { %v8282_v46 = vcombine.low %v3142_v9, %v3143_v32  ;;  %v8291_v23 = vmax.f32 %v2960_v39, 0.0  ;;  %v3301_v24 = vrot.slane %v8250_v34, %v8186_v5  ;;  %v3308_v20 = vrot.slane %v8266_v35, %v8186_v5  ;;  %3831 = vmatpush1.bf16.msra.mxu1 %v7097_v2 }
 0x1e4   : > { %v2975_v61 = vrot.slane %v2961_v36, %v8186_v5  ;;  %v2976_v53 = vcombine.high %v8271_v7, %v8271_v7  ;;  %v3141_v60 = vmax.f32 %v2951_v11, 0.0  ;;  %v2840_v59 = vadd.f32 %v8182_v51, %v2820_v54  ;;  %3832 = vmatprep.subr.bf16.mxu1 %v9227_v3 }
 0x1e5   : > { %v2791_v33 = vpop.f32.mrb[44].mxu0  ;;  %v3277_v13 = vrot.slane %v3269_v18, %v8186_v5  ;;  %v3588_v19 = vrot.slane %v8273_v42, 1  ;;  %v8307_v43 = vcombine.low %v3143_v32, %v8291_v23  ;;  %v3145_v49 = vmax.f32 %v8271_v7, 0.0 }
 0x1e6   : > { %v2977_v47 = vcombine.high %v2975_v61, %v2975_v61  ;;  %v2793_v30 = vpop.f32.mrb[45].mxu0  ;;  %v3146_v8 = vmax.f32 %v2976_v53, 0.0  ;;  %v3147_v10 = vmax.f32 %v2975_v61, 0.0  ;;  %v8302_v25 = vcombine.low %v3141_v60, %v3142_v9 }
 0x1e7   : > { %v2794_v57 = vpop.f32.mrb[46].mxu0  ;;  %v2821_v55 = vadd.f32 %v2791_v33, %v8175_v63  ;;  %v2978_v11 = vcombine.high %v2840_v59, %v2840_v59  ;;  %v2985_v1 = vrot.slane %v2840_v59, %v8186_v5  ;;  %v3285_v50 = vcombine.low %v3277_v13, %v3284_v26  ;;  %3597 = vrot.lane.b32.xlu0 %v3588_v19, %s7196_s24  ;;  %v7099_v30 = vld [vmem:[%s9212_s3 + $0x88] sm:$0xff]  }
 0x1e8   : > { %v3148_v45 = vmax.f32 %v2977_v47, 0.0  ;;  %v2796_v56 = vpop.f32.mrb[47].mxu0  ;;  %v2822_v15 = vadd.f32 %v2794_v57, %v8177_v38  ;;  %v8320_v52 = vcombine.low %v3146_v8, %v3147_v10  ;;  %v3525_v32 = vshll.u32 %v8273_v42, 16  ;;  %v7100_v8 = vld [vmem:[%s9212_s3 + $0xc0] sm:$0xff]   ;;  %3833 = vmatpush1.bf16.msra.mxu1 %v7099_v30 }
 0x1e9   : > { %v2841_v63 = vadd.f32 %v8182_v51, %v2821_v55  ;;  %v8323_v28 = vrot.slane %v2978_v11, %v8186_v5  ;;  %v2993_v14 = vcombine.high %v2985_v1, %v2985_v1  ;;  %v3149_v62 = vmax.f32 %v2985_v1, 0.0  ;;  %4139 = vmatpush1.bf16.msra.mxu0 %v7100_v8  ;;  %v7101_v56 = vld [vmem:[%s9212_s3 + $0xc8] sm:$0xff]   ;;  %3959 = vmatprep.subr.bf16.mxu1 %v9227_v3 }
 0x1ea   : > { %v6309_v58 = vcombine.low %v3147_v10, %v3148_v45  ;;  %v8326_v12 = vpack.c.bf16 %v3292_v6, %v3285_v50  ;;  %v3325_v26 = vrot.slane %v8302_v25, %v8186_v5  ;;  %v8347_v54 = vrot.slane %v3145_v49, %v8186_v5  ;;  %4140 = vmatprep.subr.bf16.mxu0 %v9227_v3 }
 0x1eb   : > { %v2995_v29 = vcombine.high %v2841_v63, %v2841_v63  ;;  %v3002_v44 = vrot.slane %v2841_v63, %v8186_v5  ;;  %v2994_v38 = vcombine.high %v8323_v28, %v8323_v28  ;;  %v8332_v39 = vmax.f32 %v2993_v14, 0.0 }
 0x1ec   : > { %v6316_v41 = vrot.slane %v6309_v58, %v8186_v5  ;;  %v8334_v9 = vcombine.low %v3148_v45, %v3149_v62  ;;  %v6323_v7 = vrot.slane %v3149_v62, %v8186_v5  ;;  %3503 = vrot.lane.b32.xlu1 %v8326_v12, %s7195_s18  ;;  %v3523_v60 = vshrl.u32 %v8273_v42, 16 }
 0x1ed   : > { %v2799_v36 = vpop.f32.mrb[48].mxu0  ;;  %v8342_v18 = vrot.slane %v2995_v29, %v8186_v5  ;;  %v3010_v61 = vcombine.high %v3002_v44, %v3002_v44  ;;  %v3153_v53 = vmax.f32 %v3002_v44, 0.0  ;;  %v3152_v33 = vmax.f32 %v2994_v38, 0.0  ;;  %4141 = vmatpush1.bf16.msra.mxu0 %v7101_v56 }
 0x1ee   : > { %v2801_v6 = vpop.f32.mrb[49].mxu0  ;;  %v8356_v10 = vcombine.low %v6316_v41, %v6323_v7  ;;  %v3589_v57 = vrot.slane %v8326_v12, 1  ;;  %v3349_v42 = vrot.slane %v8320_v52, %v8186_v5  ;;  %v3527_v19 = vrot.slane %v3525_v32, 1  ;;  %4142 = vmatprep.subr.bf16.mxu0 %v9227_v3 }
 0x1ef   : > { %v2802_v47 = vpop.f32.mrb[50].mxu0  ;;  %v3011_v59 = vcombine.high %v8342_v18, %v8342_v18  ;;  %v8360_v13 = vmax.f32 %v3010_v61, 0.0  ;;  %v8365_v45 = vcombine.low %v3152_v33, %v3153_v53  ;;  %v2842_v55 = vadd.f32 %v8182_v51, %v2822_v15 }
 0x1f0   : > { %v2804_v25 = vpop.f32.mrb[51].mxu0  ;;  %v3151_v11 = vmax.f32 %v8323_v28, 0.0  ;;  %v3356_v1 = vrot.slane %v8334_v9, %v8186_v5  ;;  %v3364_v50 = vrot.slane %v8332_v39, %v8186_v5  ;;  %3599 = vrot.lane.b32.xlu1 %v3589_v57, %s7196_s24  ;;  %v3528_v49 = vor.u32 %v3527_v19, %v3523_v60 }
 0x1f1   : > { %v3156_v2 = vmax.f32 %v3011_v59, 0.0  ;;  %v8379_v17 = vcombine.low %v3153_v53, %v8360_v13  ;;  %v3012_v58 = vcombine.high %v2842_v55, %v2842_v55  ;;  %v3019_v63 = vrot.slane %v2842_v55, %v8186_v5 }
 0x1f2   : > { %v3530_v15 = vshrl.u32 %v8326_v12, 16  ;;  %v3532_v28 = vshll.u32 %v8326_v12, 16  ;;  %v3309_v14 = vcombine.low %v3301_v24, %v3308_v20  ;;  %v3316_v62 = vrot.slane %v8289_v16, %v8186_v5  ;;  %3573 = vrot.lane.b32.xlu0 %v3528_v49, %s7197_s29 }
 0x1f3   : > { %v3026_v41 = vrot.slane %v3012_v58, %v8186_v5  ;;  %v3027_v29 = vcombine.high %v3019_v63, %v3019_v63  ;;  %v3157_v44 = vmax.f32 %v3019_v63, 0.0  ;;  %v2823_v38 = vadd.f32 %v2799_v36, %v8188_v31  ;;  %v7102_v31 = vld [vmem:[%s9212_s3 + $0xd0] sm:$0xff]  }
 0x1f4   : > { %v3534_v32 = vrot.slane %v3532_v28, 1  ;;  %v3484_v35 = vpack.c.bf16 %v3316_v62, %v3309_v14  ;;  %v3332_v34 = vrot.slane %v8307_v43, %v8186_v5  ;;  %v2824_v24 = vadd.f32 %v2802_v47, %v8192_v0  ;;  %4143 = vmatpush1.bf16.msra.mxu0 %v7102_v31 }
 0x1f5   : > { %v2807_v12 = vpop.f32.mrb[52].mxu0  ;;  %v8400_v16 = vcombine.low %v3151_v11, %v3152_v33  ;;  %v3158_v7 = vmax.f32 %v3027_v29, 0.0  ;;  %v3159_v61 = vmax.f32 %v3026_v41, 0.0  ;;  %v8402_v53 = vcombine.low %v3156_v2, %v3157_v44  ;;  %5080 = vmatprep.subr.bf16.mxu0 %v9227_v3 }
 0x1f6   : > { %v2809_v20 = vpop.f32.mrb[53].mxu0  ;;  %v3380_v36 = vrot.slane %v8379_v17, %v8186_v5  ;;  %v3535_v43 = vor.u32 %v3534_v32, %v3530_v15  ;;  %v2843_v0 = vadd.f32 %v8182_v51, %v2823_v38  ;;  %v3333_v60 = vcombine.low %v3325_v26, %v3332_v34  ;;  %3505 = vrot.lane.b32.xlu0 %v3484_v35, %s7195_s18 }
 0x1f7   : > { %v2810_v6 = vpop.f32.mrb[54].mxu0  ;;  %v3155_v33 = vmax.f32 %v8342_v18, 0.0  ;;  %v3028_v30 = vcombine.high %v3026_v41, %v3026_v41  ;;  %v3390_v8 = vcombine.low %v3158_v7, %v3159_v61  ;;  %v2844_v59 = vadd.f32 %v8182_v51, %v2824_v24 }
 0x1f8   : > { %v2811_v47 = vpop.f32.mrb[55].mxu0  ;;  %3575 = vrot.lane.b32.xlu1 %v3535_v43, %s7197_s29  ;;  %v3029_v57 = vcombine.high %v2843_v0, %v2843_v0  ;;  %v3036_v25 = vrot.slane %v2843_v0, %v8186_v5  ;;  %v3485_v19 = vpack.c.bf16 %v8347_v54, %v3333_v60  ;;  %v3590_v55 = vrot.slane %v3484_v35, 1 }
 0x1f9   : > { %v3397_v18 = vrot.slane %v8402_v53, %v8186_v5  ;;  %v3046_v26 = vcombine.high %v2844_v59, %v2844_v59  ;;  %v3053_v56 = vrot.slane %v2844_v59, %v8186_v5  ;;  %v3539_v11 = vshll.u32 %v3484_v35, 16 }
 0x1fa   : > { %v3404_v2 = vrot.slane %v3390_v8, %v8186_v5  ;;  %v3043_v49 = vrot.slane %v3029_v57, %v8186_v5  ;;  %v3044_v58 = vcombine.high %v3036_v25, %v3036_v25  ;;  %v3537_v63 = vshrl.u32 %v3484_v35, 16  ;;  %3601 = vrot.lane.b32.xlu0 %v3590_v55, %s7196_s24 }
 0x1fb   : > { %v3161_v15 = vmax.f32 %v3036_v25, 0.0  ;;  %v3060_v54 = vrot.slane %v3046_v26, %v8186_v5  ;;  %v3061_v28 = vcombine.high %v3053_v56, %v3053_v56  ;;  %v3541_v14 = vrot.slane %v3539_v11, 1 }
 0x1fc   : > { %v3045_v62 = vcombine.high %v3043_v49, %v3043_v49  ;;  %v3162_v41 = vmax.f32 %v3044_v58, 0.0  ;;  %3507 = vrot.lane.b32.xlu1 %v3485_v19, %s7195_s18  ;;  %v3591_v29 = vrot.slane %v3485_v19, 1  ;;  %v2825_v44 = vadd.f32 %v2807_v12, %v8199_v48 }
 0x1fd   : > { %v3163_v38 = vmax.f32 %v3043_v49, 0.0  ;;  %v3062_v32 = vcombine.high %v3060_v54, %v3060_v54  ;;  %v3166_v34 = vmax.f32 %v3061_v28, 0.0  ;;  %v3167_v24 = vmax.f32 %v3060_v54, 0.0 }
 0x1fe   : > { %v3164_v20 = vmax.f32 %v3045_v62, 0.0  ;;  %v3413_v35 = vcombine.low %v3161_v15, %v3162_v41  ;;  %v3542_v7 = vor.u32 %v3541_v14, %v3537_v63  ;;  %v2845_v61 = vadd.f32 %v8182_v51, %v2825_v44 }
 0x1ff   : > { %v3160_v53 = vmax.f32 %v3028_v30, 0.0  ;;  %v3165_v6 = vmax.f32 %v3053_v56, 0.0  ;;  %v3168_v31 = vmax.f32 %v3062_v32, 0.0  ;;  %v3546_v43 = vshll.u32 %v3485_v19, 16 }
 0x200   : > { %v3414_v0 = vcombine.low %v3163_v38, %v3164_v20  ;;  %v3437_v60 = vcombine.low %v3166_v34, %v3167_v24  ;;  %3603 = vrot.lane.b32.xlu1 %v3591_v29, %s7196_s24  ;;  %3577 = vrot.lane.b32.xlu0 %v3542_v7, %s7197_s29  ;;  %v3069_v48 = vrot.slane %v2845_v61, %v8186_v5  ;;  %v3544_v12 = vshrl.u32 %v3485_v19, 16 }
 0x201   : > { %v3421_v47 = vrot.slane %v3413_v35, %v8186_v5  ;;  %v3548_v8 = vrot.slane %v3546_v43, 1  ;;  %v3357_v51 = vcombine.low %v3349_v42, %v3356_v1  ;;  %v3373_v30 = vrot.slane %v8400_v16, %v8186_v5 }
 0x202   : > { %v3070_v59 = vcombine.high %v3069_v48, %v3069_v48  ;;  %v3169_v57 = vmax.f32 %v3069_v48, 0.0  ;;  %v3388_v25 = vrot.slane %v3155_v33, %v8186_v5  ;;  %v3405_v55 = vcombine.low %v3397_v18, %v3404_v2 }
 0x203   : > { %v3549_v26 = vor.u32 %v3548_v8, %v3544_v12  ;;  %v3486_v19 = vpack.c.bf16 %v3364_v50, %v3357_v51  ;;  %v3381_v9 = vcombine.low %v3373_v30, %v3380_v36  ;;  %v3412_v52 = vrot.slane %v3160_v53, %v8186_v5 }
 0x204   : > { %v3170_v42 = vmax.f32 %v3070_v59, 0.0  ;;  %v3438_v1 = vcombine.low %v3168_v31, %v3169_v57  ;;  %v3428_v16 = vrot.slane %v3414_v0, %v8186_v5  ;;  %v3481_v56 = vpack.c.bf16 %v8218_v27, %v8278_v21 }
 0x205   : > { %v3436_v33 = vrot.slane %v3165_v6, %v8186_v5  ;;  %3579 = vrot.lane.b32.xlu1 %v3549_v26, %s7197_s29  ;;  %3509 = vrot.lane.b32.xlu0 %v3486_v19, %s7195_s18  ;;  %v3487_v39 = vpack.c.bf16 %v3388_v25, %v3381_v9  ;;  %v3553_v50 = vshll.u32 %v3486_v19, 16  ;;  %v3445_v17 = vrot.slane %v3437_v60, %v8186_v5 }
 0x206   : > { %v3452_v36 = vrot.slane %v3438_v1, %v8186_v5  ;;  %v3488_v18 = vpack.c.bf16 %v3412_v52, %v3405_v55  ;;  %v3429_v11 = vcombine.low %v3421_v47, %v3428_v16  ;;  %v3592_v2 = vrot.slane %v3486_v19, 1 }
 0x207   : > { %v3555_v49 = vrot.slane %v3553_v50, 1  ;;  %v3560_v58 = vshll.u32 %v3487_v39, 16  ;;  %v3460_v27 = vrot.slane %v3170_v42, %v8186_v5  ;;  %v6284_v15 = vrot.slane %v8268_v4, %v8186_v5 }
 0x208   : > { %v3453_v63 = vcombine.low %v3445_v17, %v3452_v36  ;;  %v3489_v21 = vpack.c.bf16 %v3436_v33, %v3429_v11  ;;  %v6307_v54 = vrot.slane %v8291_v23, %v8186_v5  ;;  %v3551_v28 = vshrl.u32 %v3486_v19, 16  ;;  %v7104_v11 = vld [vmem:[%s9212_s3 + $0x8] sm:$0xff]  }
 0x209   : > { %3511 = vrot.lane.b32.xlu1 %v3487_v39, %s7195_s18  ;;  %3605 = vrot.lane.b32.xlu0 %v3592_v2, %s7196_s24  ;;  %v6300_v14 = vrot.slane %v8282_v46, %v8186_v5  ;;  %v6332_v62 = vrot.slane %v8365_v45, %v8186_v5  ;;  %v6339_v41 = vrot.slane %v8360_v13, %v8186_v5  ;;  %v3593_v44 = vrot.slane %v3487_v39, 1 }
 0x20a   : > { %v3490_v29 = vpack.c.bf16 %v3460_v27, %v3453_v63  ;;  %v3556_v4 = vor.u32 %v3555_v49, %v3551_v28  ;;  %v3562_v38 = vrot.slane %v3560_v58, 1  ;;  %v3567_v32 = vshll.u32 %v3488_v18, 16 }
 0x20b   : > { %v6291_v23 = vrot.slane %v3139_v40, %v8186_v5  ;;  %v3558_v46 = vshrl.u32 %v3487_v39, 16  ;;  %v8475_v45 = vcombine.low %v6300_v14, %v6307_v54  ;;  %v3701_v20 = vshll.u32 %v3489_v21, 16  ;;  %v7103_v39 = vld [vmem:[%s9212_s3] sm:$0xff]  }
 0x20c   : > { %v3569_v13 = vrot.slane %v3567_v32, 1  ;;  %v8477_v35 = vcombine.low %v6332_v62, %v6339_v41  ;;  %v3565_v22 = vshrl.u32 %v3488_v18, 16  ;;  %v3699_v61 = vshrl.u32 %v3489_v21, 16  ;;  %v7106_v41 = vld [vmem:[%s9212_s3 + $0x18] sm:$0xff]   ;;  %v7107_v32 = vld [vmem:[%s9212_s3 + $0x20] sm:$0xff]  }
 0x20d   : > { %3607 = vrot.lane.b32.xlu1 %v3593_v44, %s7196_s24  ;;  %3581 = vrot.lane.b32.xlu0 %v3556_v4, %s7197_s29  ;;  %v8473_v34 = vcombine.low %v6284_v15, %v6291_v23  ;;  %v3563_v24 = vor.u32 %v3562_v38, %v3558_v46  ;;  %v3703_v7 = vrot.slane %v3701_v20, 1  ;;  %v3594_v6 = vrot.slane %v3488_v18, 1 }
 0x20e   : > { %v3570_v40 = vor.u32 %v3569_v13, %v3565_v22  ;;  %v3518_v31 = vshll.u32 %v3481_v56, 16  ;;  %v3707_v43 = vrot.slane %v3489_v21, 1  ;;  %v4030_v60 = vshll.u32 %v3490_v29, 16  ;;  %v7108_v22 = vld [vmem:[%s9212_s3 + $0x28] sm:$0xff]  }
 0x20f   : > { %v3704_v53 = vor.u32 %v3703_v7, %v3699_v61  ;;  %v3516_v48 = vshrl.u32 %v3481_v56, 16  ;;  %v3587_v12 = vrot.slane %v3481_v56, 1  ;;  %v4028_v51 = vshrl.u32 %v3490_v29, 16 }
 0x210   : > { %v3520_v0 = vrot.slane %v3518_v31, 1  ;;  %v4032_v8 = vrot.slane %v4030_v60, 1  ;;  %v4036_v59 = vrot.slane %v3490_v29, 1  ;;  %v7109_v31 = vld [vmem:[%s9212_s3 + $0x30] sm:$0xff]  }
 0x211   : > { %3583 = vrot.lane.b32.xlu1 %v3563_v24, %s7197_s29  ;;  %3513 = vrot.lane.b32.xlu0 %v3488_v18, %s7195_s18 }
 0x212   : > { %v3521_v47 = vor.u32 %v3520_v0, %v3516_v48  ;;  %v4033_v30 = vor.u32 %v4032_v8, %v4028_v51  ;;  %v7110_v48 = vld [vmem:[%s9212_s3 + $0x38] sm:$0xff]  }
 0x215   : > { %3585 = vrot.lane.b32.xlu1 %v3570_v40, %s7197_s29  ;;  %3696 = vrot.lane.b32.xlu0 %v3489_v21, %s7195_s18  ;;  %v7105_v21 = vld [vmem:[%s9212_s3 + $0x10] sm:$0xff]  }
 0x219   : > { %3705 = vrot.lane.b32.xlu1 %v3704_v53, %s7197_s29  ;;  %3609 = vrot.lane.b32.xlu0 %v3594_v6, %s7196_s24 }
 0x21d   : > { %3708 = vrot.lane.b32.xlu1 %v3707_v43, %s7196_s24  ;;  %3499 = vrot.lane.b32.xlu0 %v3481_v56, %s7195_s18 }
 0x221   : > { %3595 = vrot.lane.b32.xlu0 %v3587_v12, %s7196_s24  ;;  %3571 = vrot.lane.b32.xlu1 %v3521_v47, %s7197_s29 }
 0x225   : > { %4034 = vrot.lane.b32.xlu0 %v4033_v30, %s7197_s29  ;;  %4025 = vrot.lane.b32.xlu1 %v3490_v29, %s7195_s18 }
 0x229   : > { %4037 = vrot.lane.b32.xlu1 %v4036_v59, %s7196_s24 }
 0x253   : > { %v3502_v57 = vpop.permute.xlu0 %3501 }
 0x259   : > { %v8492_v55 = vpop.permute.xlu0 %3597 }
 0x25e   : > { %v3504_v25 = vpop.permute.xlu1 %3503 }
 0x262   : > { %v3600_v26 = vpop.permute.xlu1 %3599 }
 0x263   : > { %v6755_v19 = vcombine.low %v8492_v55, %v3600_v26 }
 0x264   : > { %v3574_v9 = vpop.permute.xlu0 %3573 }
 0x265   : > { %6771 = vmatprep.mubr.msk.bf16.mxu1 %vm3803_vm1, %v6755_v19  ;;  %v3617_v52 = vsel %vm3611_vm2, %v3502_v57, %v3574_v9  ;;  %v7111_v57 = vld [vmem:[%s9212_s3 + $0x40] sm:$0xff]  }
 0x266   : > { %v8500_v56 = vsel %vm3636_vm3, %v3617_v52, %v8492_v55 }
 0x268   : > { %v3506_v42 = vpop.permute.xlu0 %3505 }
 0x26a   : > { %v3576_v1 = vpop.permute.xlu1 %3575 }
 0x26b   : > { %v3620_v16 = vsel %vm3611_vm2, %v3504_v25, %v3576_v1 }
 0x26c   : > { %v3642_v33 = vsel %vm3636_vm3, %v3620_v16, %v3600_v26  ;;  %v3602_v17 = vpop.permute.xlu0 %3601 }
 0x26d   : > { %v6754_v50 = vcombine.low %v8500_v56, %v3642_v33  ;;  %v8507_v18 = vcombine.low %v3600_v26, %v3602_v17 }
 0x26e   : > { %v3508_v36 = vpop.permute.xlu1 %3507 }
 0x26f   : > { %3849 = vmatmul.mubr.bf16.vlgmr.msra.gmra.mrb[28].mxu1 %v6754_v50  ;;  %6825 = vmatprep.mubr.msk.bf16.mxu0 %vm3803_vm1, %v8507_v18 }
 0x270   : > { %3960 = vmatpush1.bf16.msra.mxu1 %v7103_v39 }
 0x271   : > { %3961 = vmatprep.subr.bf16.mxu1 %v9227_v3 }
 0x272   : > { %v3604_v2 = vpop.permute.xlu1 %3603  ;;  %v3578_v49 = vpop.permute.xlu0 %3577 }
 0x273   : > { %v6757_v58 = vcombine.low %v3602_v17, %v3604_v2  ;;  %v3623_v63 = vsel %vm3611_vm2, %v3506_v42, %v3578_v49 }
 0x274   : > { %v3644_v27 = vsel %vm3636_vm3, %v3623_v63, %v3602_v17  ;;  %3962 = vmatpush1.bf16.msra.mxu1 %v7104_v11 }
 0x275   : > { %v8520_v15 = vcombine.low %v3642_v33, %v3644_v27  ;;  %6772 = vmatprep.mubr.msk.bf16.mxu1 %vm3803_vm1, %v6757_v58  ;;  %3963 = vmatprep.subr.bf16.mxu1 %v9227_v3 }
 0x277   : > { %v3580_v54 = vpop.permute.xlu1 %3579  ;;  %v3510_v28 = vpop.permute.xlu0 %3509  ;;  %4159 = vmatmul.mubr.bf16.vlgmr.msra.gmra.mrb[56].mxu0 %v8520_v15 }
 0x278   : > { %v3626_v14 = vsel %vm3611_vm2, %v3508_v36, %v3580_v54  ;;  %3964 = vmatpush1.bf16.msra.mxu1 %v7105_v21 }
 0x279   : > { %v3646_v62 = vsel %vm3636_vm3, %v3626_v14, %v3604_v2  ;;  %3965 = vmatprep.subr.bf16.mxu1 %v9227_v3 }
 0x27a   : > { %v6756_v29 = vcombine.low %v3644_v27, %v3646_v62 }
 0x27b   : > { %v3512_v44 = vpop.permute.xlu1 %3511  ;;  %v3606_v4 = vpop.permute.xlu0 %3605 }
 0x27c   : > { %v8531_v38 = vcombine.low %v3604_v2, %v3606_v4  ;;  %3857 = vmatmul.mubr.bf16.gmra.mrb[32].mxu1 %v6756_v29 }
 0x27d   : > { %3966 = vmatpush1.bf16.msra.mxu1 %v7106_v41 }
 0x27e   : > { %6826 = vmatprep.mubr.msk.bf16.mxu0 %vm3803_vm1, %v8531_v38  ;;  %3967 = vmatprep.subr.bf16.mxu1 %v9227_v3 }
 0x27f   : > { %v3608_v23 = vpop.permute.xlu1 %3607  ;;  %v3582_v46 = vpop.permute.xlu0 %3581 }
 0x280   : > { %v6759_v24 = vcombine.low %v3606_v4, %v3608_v23  ;;  %v3629_v13 = vsel %vm3611_vm2, %v3510_v28, %v3582_v46 }
 0x281   : > { %v3648_v20 = vsel %vm3636_vm3, %v3629_v13, %v3606_v4  ;;  %3968 = vmatpush1.bf16.msra.mxu1 %v7107_v32 }
 0x282   : > { %6773 = vmatprep.mubr.msk.bf16.mxu1 %vm3803_vm1, %v6759_v24  ;;  %v6779_v40 = vcombine.low %v3646_v62, %v3648_v20  ;;  %3969 = vmatprep.subr.bf16.mxu1 %v9227_v3 }
 0x283   : > { %v3584_v7 = vpop.permute.xlu1 %3583  ;;  %v3514_v61 = vpop.permute.xlu0 %3513 }
 0x284   : > { %v3632_v53 = vsel %vm3611_vm2, %v3512_v44, %v3584_v7  ;;  %4167 = vmatmul.mubr.bf16.gmra.mrb[60].mxu0 %v6779_v40 }
 0x285   : > { %v3650_v6 = vsel %vm3636_vm3, %v3632_v53, %v3608_v23  ;;  %3970 = vmatpush1.bf16.msra.mxu1 %v7108_v22 }
 0x286   : > { %v6758_v43 = vcombine.low %v3648_v20, %v3650_v6  ;;  %3971 = vmatprep.subr.bf16.mxu1 %v9227_v3 }
 0x287   : > { %v3586_v0 = vpop.permute.xlu1 %3585  ;;  %v3697_v60 = vpop.permute.xlu0 %3696 }
 0x288   : > { %3865 = vmatmul.mubr.bf16.gmra.mrb[36].mxu1 %v6758_v43  ;;  %v3635_v12 = vsel %vm3611_vm2, %v3514_v61, %v3586_v0  ;;  %v7112_v0 = vld [vmem:[%s9214_s5 + $0x48] sm:$0xff]  }
 0x289   : > { %3972 = vmatpush1.bf16.msra.mxu1 %v7109_v31 }
 0x28a   : > { %3973 = vmatprep.subr.bf16.mxu1 %v9227_v3 }
 0x28b   : > { %v3706_v47 = vpop.permute.xlu1 %3705  ;;  %v3610_v8 = vpop.permute.xlu0 %3609 }
 0x28c   : > { %v3652_v51 = vsel %vm3636_vm3, %v3635_v12, %v3610_v8  ;;  %v6782_v30 = vcombine.low %v3608_v23, %v3610_v8  ;;  %v3712_v25 = vsel %vm3611_vm2, %v3697_v60, %v3706_v47 }
 0x28d   : > { %v6781_v59 = vcombine.low %v3650_v6, %v3652_v51  ;;  %3974 = vmatpush1.bf16.msra.mxu1 %v7110_v48 }
 0x28e   : > { %6827 = vmatprep.mubr.msk.bf16.mxu0 %vm3803_vm1, %v6782_v30  ;;  %3975 = vmatprep.subr.bf16.mxu1 %v9227_v3 }
 0x28f   : > { %v3709_v26 = vpop.permute.xlu1 %3708  ;;  %4175 = vmatmul.mubr.bf16.gmra.mrb[64].mxu0 %v6781_v59  ;;  %v3500_v19 = vpop.permute.xlu0 %3499 }
 0x290   : > { %v3714_v9 = vsel %vm3636_vm3, %v3712_v25, %v3709_v26  ;;  %v6761_v52 = vcombine.low %v3610_v8, %v3709_v26 }
 0x291   : > { %v6760_v42 = vcombine.low %v3652_v51, %v3714_v9  ;;  %3976 = vmatpush1.bf16.msra.mxu1 %v7111_v57 }
 0x292   : > { %6774 = vmatprep.mubr.msk.bf16.mxu1 %vm3803_vm1, %v6761_v52  ;;  %4803 = vmatprep.subr.bf16.mxu1 %v9227_v3 }
 0x293   : > { %3873 = vmatmul.mubr.bf16.gmra.mrb[40].mxu1 %v6760_v42  ;;  %v3596_v1 = vpop.permute.xlu0 %3595  ;;  %v3572_v16 = vpop.permute.xlu1 %3571 }
 0x294   : > { %v6776_v33 = vcombine.low %v3596_v1, %v8492_v55  ;;  %v3614_v39 = vsel %vm3611_vm2, %v3500_v19, %v3572_v16  ;;  %v8599_v19 = vld [vmem:[%s9213_s4] ss:$0 sm:$0xff] }
 0x295   : > { %v3638_v50 = vsel %vm3636_vm3, %v3614_v39, %v3596_v1 }
 0x296   : > { %6792 = vmatprep.mubr.msk.bf16.mxu1 %vm3803_vm1, %v6776_v33  ;;  %v6775_v11 = vcombine.low %v3638_v50, %v8500_v56 }
 0x297   : > { %v4026_v17 = vpop.permute.xlu1 %4025  ;;  %v4035_v36 = vpop.permute.xlu0 %4034 }
 0x298   : > { %v4041_v2 = vsel %vm3611_vm2, %v4026_v17, %v4035_v36 }
 0x29b   : > { %3992 = vmatmul.mubr.bf16.vlgmr.msra.gmra.mrb[44].mxu1 %v6775_v11  ;;  %v4038_v49 = vpop.permute.xlu1 %4037 }
 0x29c   : > { %v4043_v58 = vsel %vm3636_vm3, %v4041_v2, %v4038_v49  ;;  %v6815_v63 = vcombine.low %v3709_v26, %v4038_v49  ;;  %6793 = vmatprep.mubr.msk.bf16.mxu1 %vm3803_vm1, %v8507_v18  ;;  %4804 = vmatpush1.bf16.msra.mxu1 %v7112_v0  ;;  %v7113_v26 = vld [vmem:[%s9214_s5 + $0x50] sm:$0xff]  }
 0x29d   : > { %v6814_v55 = vcombine.low %v3714_v9, %v4043_v58  ;;  %4805 = vmatprep.subr.bf16.mxu1 %v9227_v3 }
 0x29e   : > { %6828 = vmatprep.mubr.msk.bf16.mxu0 %vm3803_vm1, %v6815_v63 }
 0x29f   : > { %4183 = vmatmul.mubr.bf16.gmra.mrb[68].mxu0 %v6814_v55 }
 0x2a0   : > { %4806 = vmatpush1.bf16.msra.mxu1 %v7113_v26 }
 0x2a1   : > { %4807 = vmatprep.subr.bf16.mxu1 %v9227_v3 }
 0x2a3   : > { %4000 = vmatmul.mubr.bf16.gmra.mrb[48].mxu1 %v8520_v15 }
 0x2a4   : > { %6794 = vmatprep.mubr.msk.bf16.mxu1 %vm3803_vm1, %v8531_v38 }
 0x2ab   : > { %4008 = vmatmul.mubr.bf16.gmra.mrb[52].mxu1 %v6779_v40 }
 0x2ac   : > { %6795 = vmatprep.mubr.msk.bf16.mxu1 %vm3803_vm1, %v6782_v30 }
 0x2b3   : > { %4016 = vmatmul.mubr.bf16.gmra.mrb[56].mxu1 %v6781_v59 }
 0x342   : > { %v3850_v56 = vpop.f32.mrb[28].mxu1 }
 0x343   : > { %v3852_v27 = vpop.f32.mrb[29].mxu1 }
 0x344   : > { %v3853_v21 = vpop.f32.mrb[30].mxu1 }
 0x345   : > { %v3855_v54 = vpop.f32.mrb[31].mxu1 }
 0x34a   : > { %v4160_v28 = vpop.f32.mrb[56].mxu0 }
 0x34b   : > { %v4162_v14 = vpop.f32.mrb[57].mxu0 }
 0x34c   : > { %v4163_v18 = vpop.f32.mrb[58].mxu0 }
 0x34d   : > { %v4165_v62 = vpop.f32.mrb[59].mxu0 }
 0x34f   : > { %v3858_v41 = vpop.f32.mrb[32].mxu1 }
 0x350   : > { %v3860_v29 = vpop.f32.mrb[33].mxu1 }
 0x351   : > { %v3861_v44 = vpop.f32.mrb[34].mxu1 }
 0x352   : > { %v3863_v4 = vpop.f32.mrb[35].mxu1 }
 0x357   : > { %v4168_v15 = vpop.f32.mrb[60].mxu0 }
 0x358   : > { %v4170_v32 = vpop.f32.mrb[61].mxu0 }
 0x359   : > { %v4171_v23 = vpop.f32.mrb[62].mxu0 }
 0x35a   : > { %v4173_v38 = vpop.f32.mrb[63].mxu0 }
 0x35b   : > { %v3866_v46 = vpop.f32.mrb[36].mxu1  ;;  %v7114_v38 = vld [vmem:[%s9214_s5 + $0x58] sm:$0xff]  }
 0x35c   : > { %v3868_v24 = vpop.f32.mrb[37].mxu1  ;;  %4808 = vmatpush1.bf16.msra.mxu1 %v7114_v38 }
 0x35d   : > { %v3869_v13 = vpop.f32.mrb[38].mxu1  ;;  %4809 = vmatprep.subr.bf16.mxu1 %v9227_v3 }
 0x35e   : > { %v3871_v20 = vpop.f32.mrb[39].mxu1 }
 0x362   : > { %v4176_v22 = vpop.f32.mrb[64].mxu0 }
 0x363   : > { %v4178_v40 = vpop.f32.mrb[65].mxu0 }
 0x364   : > { %v4179_v7 = vpop.f32.mrb[66].mxu0 }
 0x365   : > { %v4181_v61 = vpop.f32.mrb[67].mxu0 }
 0x366   : > { %v8581_v53 = vpop.f32.mrb[40].mxu1 }
 0x367   : > { %v3876_v6 = vpop.f32.mrb[41].mxu1 }
 0x368   : > { %v8583_v31 = vpop.f32.mrb[42].mxu1 }
 0x369   : > { %v3879_v43 = vpop.f32.mrb[43].mxu1 }
 0x36a   : > { %v7115_v43 = vld [vmem:[%s9214_s5 + $0x60] sm:$0xff]  }
 0x36b   : > { %4810 = vmatpush1.bf16.msra.mxu1 %v7115_v43 }
 0x36c   : > { %4811 = vmatprep.subr.bf16.mxu1 %v9227_v3 }
 0x36e   : > { %v3993_v60 = vpop.f32.mrb[44].mxu1 }
 0x36f   : > { %v3994_v48 = vadd.f32 %v3993_v60, %v3850_v56  ;;  %v3995_v12 = vpop.f32.mrb[45].mxu1 }
 0x370   : > { %v3996_v47 = vpop.f32.mrb[46].mxu1 }
 0x371   : > { %v8589_v8 = vadd.f32 %v4160_v28, %v3994_v48  ;;  %v3997_v51 = vadd.f32 %v3996_v47, %v3853_v21  ;;  %v3998_v30 = vpop.f32.mrb[47].mxu1 }
 0x372   : > { %v8591_v59 = vpop.f32.mrb[68].mxu0 }
 0x373   : > { %v4192_v57 = vadd.f32 %v4163_v18, %v3997_v51  ;;  %v4186_v25 = vpop.f32.mrb[69].mxu0 }
 0x374   : > { %v8601_v9 = vpop.f32.mrb[70].mxu0 }
 0x375   : > { %v4207_v52 = vadd.f32 %v8599_v19, %v4192_v57  ;;  %v4189_v42 = vpop.f32.mrb[71].mxu0 }
 0x376   : > { %v4001_v1 = vpop.f32.mrb[48].mxu1 }
 0x377   : > { %v4215_v16 = vmax.f32 %v4207_v52, 0.0  ;;  %v4002_v33 = vadd.f32 %v4001_v1, %v3858_v41  ;;  %v4003_v39 = vpop.f32.mrb[49].mxu1 }
 0x378   : > { %v4004_v50 = vpop.f32.mrb[50].mxu1 }
 0x379   : > { %v4223_v17 = vpack.c.bf16 %v4215_v16, %v4215_v16  ;;  %v4193_v36 = vadd.f32 %v4168_v15, %v4002_v33  ;;  %v4005_v11 = vadd.f32 %v4004_v50, %v3861_v44  ;;  %v4006_v2 = vpop.f32.mrb[51].mxu1 }
 0x37b   : > { %v4208_v49 = vadd.f32 %v8599_v19, %v4193_v36  ;;  %v4194_v58 = vadd.f32 %v4171_v23, %v4005_v11  ;;  %4238 = vrot.lane.b32.xlu0 %v4223_v17, %s7195_s18  ;;  %v4258_v63 = vshll.u32 %v4223_v17, 16  ;;  %v4303_v27 = vrot.slane %v4223_v17, 1 }
 0x37c   : > { %v4256_v32 = vshrl.u32 %v4223_v17, 16 }
 0x37d   : > { %v4216_v55 = vmax.f32 %v4208_v49, 0.0  ;;  %v4209_v56 = vadd.f32 %v8599_v19, %v4194_v58  ;;  %v4260_v62 = vrot.slane %v4258_v63, 1  ;;  %v7116_v49 = vld [vmem:[%s9214_s5 + $0x68] sm:$0xff]   ;;  %v4206_v63 = vadd.f32 %v8599_v19, %v8589_v8 }
 0x37e   : > { %v4009_v21 = vpop.f32.mrb[52].mxu1  ;;  %4812 = vmatpush1.bf16.msra.mxu1 %v7116_v49 }
 0x37f   : > { %v4224_v54 = vpack.c.bf16 %v4216_v55, %v4216_v55  ;;  %v4217_v28 = vmax.f32 %v4209_v56, 0.0  ;;  %v4010_v14 = vadd.f32 %v4009_v21, %v3866_v46  ;;  %v4011_v18 = vpop.f32.mrb[53].mxu1  ;;  %4310 = vrot.lane.b32.xlu0 %v4303_v27, %s7196_s24  ;;  %v6349_v24 = vrot.slane %v4216_v55, 1  ;;  %4813 = vmatprep.subr.bf16.mxu1 %v9227_v3 }
 0x380   : > { %v4012_v41 = vpop.f32.mrb[54].mxu1  ;;  %v4261_v61 = vor.u32 %v4260_v62, %v4256_v32  ;;  %v7118_v62 = vld [vmem:[%s9214_s5 + $0x78] sm:$0xff]  }
 0x381   : > { %v4225_v29 = vpack.c.bf16 %v4217_v28, %v4217_v28  ;;  %v4195_v44 = vadd.f32 %v4176_v22, %v4010_v14  ;;  %v4013_v4 = vadd.f32 %v4012_v41, %v3869_v13  ;;  %v4014_v15 = vpop.f32.mrb[55].mxu1  ;;  %4240 = vrot.lane.b32.xlu1 %v4224_v54, %s7195_s18  ;;  %v4265_v23 = vshll.u32 %v4224_v54, 16 }
 0x382   : > { %v6350_v20 = vrot.slane %v4217_v28, 1  ;;  %v4263_v22 = vshrl.u32 %v4224_v54, 16  ;;  %v4304_v2 = vrot.slane %v4224_v54, 1  ;;  %v4214_v14 = vmax.f32 %v4206_v63, 0.0 }
 0x383   : > { %v4210_v46 = vadd.f32 %v8599_v19, %v4195_v44  ;;  %v4196_v40 = vadd.f32 %v4179_v7, %v4013_v4  ;;  %4242 = vrot.lane.b32.xlu0 %v4225_v29, %s7195_s18  ;;  %v4272_v6 = vshll.u32 %v4225_v29, 16  ;;  %v4267_v13 = vrot.slane %v4265_v23, 1 }
 0x384   : > { %v8618_v0 = vpack.i.bf16 %v6350_v20, %v6349_v24  ;;  %v4270_v48 = vshrl.u32 %v4225_v29, 16  ;;  %v4305_v39 = vrot.slane %v4225_v29, 1  ;;  %v4222_v32 = vpack.c.bf16 %v4214_v14, %v4214_v14  ;;  %v7120_v24 = vld [vmem:[%s9214_s5 + $0x80] sm:$0xff]   ;;  %v7121_v20 = vld [vmem:[%s9214_s5 + $0x8] sm:$0xff]  }
 0x385   : > { %v4211_v60 = vadd.f32 %v8599_v19, %v4196_v40  ;;  %4292 = vrot.lane.b32.xlu1 %v4261_v61, %s7197_s29  ;;  %v4274_v12 = vrot.slane %v4272_v6, 1  ;;  %v4218_v7 = vmax.f32 %v4210_v46, 0.0  ;;  %v4268_v51 = vor.u32 %v4267_v13, %v4263_v22  ;;  %v7122_v6 = vld [vmem:[%s9214_s5 + $0x88] sm:$0xff]   ;;  %v7123_v22 = vld [vmem:[%s9214_s5 + $0x10] sm:$0xff]  }
 0x386   : > { %v4017_v47 = vpop.f32.mrb[56].mxu1  ;;  %v4251_v61 = vshll.u32 %v4222_v32, 16 }
 0x387   : > { %v4219_v30 = vmax.f32 %v4211_v60, 0.0  ;;  %v4018_v57 = vadd.f32 %v4017_v47, %v8581_v53  ;;  %v4019_v25 = vpop.f32.mrb[57].mxu1  ;;  %v4275_v26 = vor.u32 %v4274_v12, %v4270_v48  ;;  %4294 = vrot.lane.b32.xlu0 %v4268_v51, %s7197_s29  ;;  %v6351_v50 = vrot.slane %v4218_v7, 1  ;;  %v7125_v48 = vld [vmem:[%s9214_s5 + $0x18] sm:$0xff]  }
 0x388   : > { %v4020_v52 = vpop.f32.mrb[58].mxu1  ;;  %v4226_v53 = vpack.c.bf16 %v4218_v7, %v4218_v7  ;;  %v4253_v60 = vrot.slane %v4251_v61, 1  ;;  %v4249_v12 = vshrl.u32 %v4222_v32, 16  ;;  %v4302_v7 = vrot.slane %v4222_v32, 1 }
 0x389   : > { %v4197_v42 = vadd.f32 %v8591_v59, %v4018_v57  ;;  %v4021_v1 = vadd.f32 %v4020_v52, %v8583_v31  ;;  %v4022_v16 = vpop.f32.mrb[59].mxu1  ;;  %4296 = vrot.lane.b32.xlu1 %v4275_v26, %s7197_s29  ;;  %v4227_v33 = vpack.c.bf16 %v4219_v30, %v4219_v30  ;;  %v6352_v17 = vrot.slane %v4219_v30, 1  ;;  %v7127_v57 = vld [vmem:[%s9214_s5 + $0x20] sm:$0xff]   ;;  %v7129_v26 = vld [vmem:[%s9214_s5 + $0x28] sm:$0xff]  }
 0x38a   : > { %v4279_v56 = vshll.u32 %v4226_v53, 16  ;;  %v4306_v8 = vrot.slane %v4226_v53, 1  ;;  %v4277_v29 = vshrl.u32 %v4226_v53, 16  ;;  %v4254_v51 = vor.u32 %v4253_v60, %v4249_v12  ;;  %v7135_v16 = vld [vmem:[%s9214_s5 + $0x40] sm:$0xff]  }
 0x38b   : > { %v4212_v36 = vadd.f32 %v8599_v19, %v4197_v42  ;;  %v4198_v11 = vadd.f32 %v8601_v9, %v4021_v1  ;;  %4314 = vrot.lane.b32.xlu0 %v4305_v39, %s7196_s24  ;;  %v8632_v59 = vpack.i.bf16 %v6352_v17, %v6351_v50  ;;  %v4286_v58 = vshll.u32 %v4227_v33, 16  ;;  %v7117_v9 = vld [vmem:[%s9214_s5 + $0x70] sm:$0xff]   ;;  %v7133_v1 = vld [vmem:[%s9214_s5 + $0x38] sm:$0xff]  }
 0x38c   : > { %v4307_v21 = vrot.slane %v4227_v33, 1  ;;  %v4281_v18 = vrot.slane %v4279_v56, 1  ;;  %4814 = vmatpush1.bf16.msra.mxu1 %v7117_v9  ;;  %v4284_v41 = vshrl.u32 %v4227_v33, 16  ;;  %v7131_v42 = vld [vmem:[%s9214_s5 + $0x30] sm:$0xff]  }
 0x38d   : > { %v4220_v31 = vmax.f32 %v4212_v36, 0.0  ;;  %4312 = vrot.lane.b32.xlu1 %v4304_v2, %s7196_s24  ;;  %v4213_v27 = vadd.f32 %v8599_v19, %v4198_v11  ;;  %v4288_v54 = vrot.slane %v4286_v58, 1  ;;  %4815 = vmatprep.subr.bf16.mxu1 %v9227_v3  ;;  %v7119_v19 = vld [vmem:[%s9214_s5] sm:$0xff]  }
 0x38e   : > { %v4282_v23 = vor.u32 %v4281_v18, %v4277_v29  ;;  %5081 = vmatpush1.bf16.msra.mxu0 %v7119_v19 }
 0x38f   : > { %v4228_v55 = vpack.c.bf16 %v4220_v31, %v4220_v31  ;;  %4246 = vrot.lane.b32.xlu0 %v4227_v33, %s7195_s18  ;;  %v4221_v44 = vmax.f32 %v4213_v27, 0.0  ;;  %v4289_v4 = vor.u32 %v4288_v54, %v4284_v41  ;;  %5082 = vmatprep.subr.bf16.mxu0 %v9227_v3 }
 0x390   : > { %4816 = vmatpush1.bf16.msra.mxu1 %v7118_v62 }
 0x391   : > { %4244 = vrot.lane.b32.xlu1 %v4226_v53, %s7195_s18  ;;  %v4524_v28 = vshll.u32 %v4228_v55, 16  ;;  %v4522_v38 = vshrl.u32 %v4228_v55, 16  ;;  %4817 = vmatprep.subr.bf16.mxu1 %v9227_v3  ;;  %v4229_v46 = vpack.c.bf16 %v4221_v44, %v4221_v44  ;;  %v4530_v43 = vrot.slane %v4228_v55, 1 }
 0x392   : > { %5083 = vmatpush1.bf16.msra.mxu0 %v7121_v20 }
 0x393   : > { %4318 = vrot.lane.b32.xlu0 %v4307_v21, %s7196_s24  ;;  %v4526_v15 = vrot.slane %v4524_v28, 1  ;;  %5084 = vmatprep.subr.bf16.mxu0 %v9227_v3  ;;  %v5142_v13 = vshll.u32 %v4229_v46, 16  ;;  %v5140_v30 = vshrl.u32 %v4229_v46, 16  ;;  %v5148_v52 = vrot.slane %v4229_v46, 1 }
 0x394   : > { %4818 = vmatpush1.bf16.msra.mxu1 %v7120_v24 }
 0x395   : > { %4316 = vrot.lane.b32.xlu1 %v4306_v8, %s7196_s24  ;;  %v4527_v40 = vor.u32 %v4526_v15, %v4522_v38  ;;  %4819 = vmatprep.subr.bf16.mxu1 %v9227_v3  ;;  %v5144_v47 = vrot.slane %v5142_v13, 1 }
 0x396   : > { %5085 = vmatpush1.bf16.msra.mxu0 %v7123_v22 }
 0x397   : > { %4300 = vrot.lane.b32.xlu0 %v4289_v4, %s7197_s29  ;;  %5086 = vmatprep.subr.bf16.mxu0 %v9227_v3  ;;  %v5145_v25 = vor.u32 %v5144_v47, %v5140_v30 }
 0x398   : > { %4820 = vmatpush1.bf16.msra.mxu1 %v7122_v6 }
 0x399   : > { %4298 = vrot.lane.b32.xlu1 %v4282_v23, %s7197_s29  ;;  %5373 = vmatprep.subr.bf16.mxu1 %v9227_v3 }
 0x39a   : > { %5087 = vmatpush1.bf16.msra.mxu0 %v7125_v48 }
 0x39b   : > { %4528 = vrot.lane.b32.xlu0 %v4527_v40, %s7197_s29  ;;  %5088 = vmatprep.subr.bf16.mxu0 %v9227_v3 }
 0x39d   : > { %4519 = vrot.lane.b32.xlu1 %v4228_v55, %s7195_s18 }
 0x39e   : > { %5089 = vmatpush1.bf16.msra.mxu0 %v7127_v57 }
 0x39f   : > { %4236 = vrot.lane.b32.xlu0 %v4222_v32, %s7195_s18  ;;  %5090 = vmatprep.subr.bf16.mxu0 %v9227_v3 }
 0x3a1   : > { %4531 = vrot.lane.b32.xlu1 %v4530_v43, %s7196_s24 }
 0x3a2   : > { %5091 = vmatpush1.bf16.msra.mxu0 %v7129_v26 }
 0x3a3   : > { %4308 = vrot.lane.b32.xlu0 %v4302_v7, %s7196_s24  ;;  %5092 = vmatprep.subr.bf16.mxu0 %v9227_v3 }
 0x3a5   : > { %4290 = vrot.lane.b32.xlu1 %v4254_v51, %s7197_s29 }
 0x3a6   : > { %5093 = vmatpush1.bf16.msra.mxu0 %v7131_v42 }
 0x3a7   : > { %5146 = vrot.lane.b32.xlu0 %v5145_v25, %s7197_s29  ;;  %5094 = vmatprep.subr.bf16.mxu0 %v9227_v3 }
 0x3a9   : > { %5137 = vrot.lane.b32.xlu1 %v4229_v46, %s7195_s18 }
 0x3aa   : > { %5095 = vmatpush1.bf16.msra.mxu0 %v7133_v1 }
 0x3ab   : > { %5096 = vmatprep.subr.bf16.mxu0 %v9227_v3 }
 0x3ad   : > { %5149 = vrot.lane.b32.xlu1 %v5148_v52, %s7196_s24 }
 0x3ae   : > { %5097 = vmatpush1.bf16.msra.mxu0 %v7135_v16 }
 0x3af   : > { %5947 = vmatprep.subr.bf16.mxu0 %v9227_v3 }
 0x3ed   : > { %v4239_v33 = vpop.permute.xlu0 %4238 }
 0x3f1   : > { %v4311_v39 = vpop.permute.xlu0 %4310 }
 0x3f3   : > { %v4241_v50 = vpop.permute.xlu1 %4240 }
 0x3f5   : > { %v4243_v17 = vpop.permute.xlu0 %4242 }
 0x3f7   : > { %v4293_v53 = vpop.permute.xlu1 %4292 }
 0x3f8   : > { %v4325_v36 = vsel %vm3611_vm2, %v4239_v33, %v4293_v53 }
 0x3f9   : > { %v4341_v11 = vsel %vm3636_vm3, %v4325_v36, %v4311_v39  ;;  %v4295_v31 = vpop.permute.xlu0 %4294 }
 0x3fa   : > { %v4380_v2 = vcombine.low %v4341_v11, %v4311_v39  ;;  %v4328_v9 = vsel %vm3611_vm2, %v4241_v50, %v4295_v31 }
 0x3fb   : > { %v4297_v49 = vpop.permute.xlu1 %4296 }
 0x3fc   : > { %v4387_v58 = vrot.slane %v4380_v2, %v7447_v37  ;;  %v4331_v63 = vsel %vm3611_vm2, %v4243_v17, %v4297_v49 }
 0x3fd   : > { %v4315_v56 = vpop.permute.xlu0 %4314 }
 0x3fe   : > { %v4388_v55 = vcombine.high %v4387_v58, %v4387_v58  ;;  %v4345_v27 = vsel %vm3636_vm3, %v4331_v63, %v4315_v56  ;;  %v8717_v14 = vrot.slane %v4387_v58, %v7447_v37 }
 0x3ff   : > { %v4313_v21 = vpop.permute.xlu1 %4312  ;;  %v4428_v54 = vcombine.low %v4345_v27, %v4315_v56 }
 0x400   : > { %v4343_v28 = vsel %vm3636_vm3, %v4328_v9, %v4313_v21  ;;  %v8720_v18 = vrot.slane %v4388_v55, %v7447_v37  ;;  %v8726_v4 = vcombine.high %v8717_v14, %v8717_v14  ;;  %v7124_v55 = vld [vmem:[%s9214_s5 + $0x90] sm:$0xff]  }
 0x401   : > { %v4404_v8 = vcombine.low %v4343_v28, %v4313_v21  ;;  %v4435_v62 = vrot.slane %v4428_v54, %v7447_v37  ;;  %v4247_v41 = vpop.permute.xlu0 %4246 }
 0x402   : > { %v4582_v23 = vcombine.low %v8717_v14, %v8720_v18 }
 0x403   : > { %v4411_v29 = vrot.slane %v4404_v8, %v7447_v37  ;;  %v4245_v19 = vpop.permute.xlu1 %4244  ;;  %v4436_v44 = vcombine.high %v4435_v62, %v4435_v62  ;;  %v8734_v38 = vrot.slane %v4435_v62, %v7447_v37 }
 0x404   : > { %v4592_v48 = vrot.slane %v4582_v23, %v7447_v37  ;;  %v7126_v23 = vld [vmem:[%s9214_s5 + $0x98] sm:$0xff]  }
 0x405   : > { %v4412_v15 = vcombine.high %v4411_v29, %v4411_v29  ;;  %v8729_v32 = vrot.slane %v4411_v29, %v7447_v37  ;;  %v8737_v24 = vrot.slane %v4436_v44, %v7447_v37  ;;  %v4319_v20 = vpop.permute.xlu0 %4318  ;;  %v4451_v21 = vcombine.high %v8734_v38, %v8734_v38 }
 0x407   : > { %v8740_v46 = vrot.slane %v4412_v15, %v7447_v37  ;;  %v8744_v40 = vcombine.high %v8729_v32, %v8729_v32  ;;  %v4583_v61 = vcombine.low %v8726_v4, %v8729_v32  ;;  %v4317_v6 = vpop.permute.xlu1 %4316  ;;  %v4585_v22 = vcombine.low %v8734_v38, %v8737_v24 }
 0x409   : > { %v4584_v13 = vcombine.low %v8740_v46, %v8744_v40  ;;  %v4599_v43 = vrot.slane %v4583_v61, %v7447_v37  ;;  %v4301_v60 = vpop.permute.xlu0 %4300  ;;  %v4613_v12 = vrot.slane %v4585_v22, %v7447_v37  ;;  %v4862_v22 = vcombine.low %v8729_v32, %v8740_v46  ;;  %v7128_v32 = vld [vmem:[%s9214_s5 + $0xa0] sm:$0xff]  }
 0x40a   : > { %v4337_v47 = vsel %vm3611_vm2, %v4247_v41, %v4301_v60 }
 0x40b   : > { %v4606_v7 = vrot.slane %v4584_v13, %v7447_v37  ;;  %v4299_v51 = vpop.permute.xlu1 %4298  ;;  %v4349_v30 = vsel %vm3636_vm3, %v4337_v47, %v4319_v20  ;;  %v4614_v25 = vcombine.low %v4592_v48, %v4599_v43  ;;  %v4615_v26 = vcombine.high %v4592_v48, %v4599_v43 }
 0x40c   : > { %v4334_v57 = vsel %vm3611_vm2, %v4245_v19, %v4299_v51  ;;  %v4476_v42 = vcombine.low %v4349_v30, %v4319_v20  ;;  %v4861_v20 = vcombine.low %v8720_v18, %v8726_v4  ;;  %v4925_v30 = vcombine.low %v8744_v40, %v8734_v38 }
 0x40d   : > { %v4616_v52 = vcombine.low %v4606_v7, %v4613_v12  ;;  %v4347_v1 = vsel %vm3636_vm3, %v4334_v57, %v4317_v6  ;;  %v4617_v16 = vcombine.high %v4606_v7, %v4613_v12  ;;  %v4529_v39 = vpop.permute.xlu0 %4528  ;;  %v4631_v50 = vrot.slane %v4615_v26, %v7447_v37 }
 0x40e   : > { %v4452_v33 = vcombine.low %v4347_v1, %v4317_v6  ;;  %v4483_v17 = vrot.slane %v4476_v42, %v7447_v37  ;;  %v4624_v11 = vrot.slane %v4614_v25, %v7447_v37  ;;  %v4926_v6 = vcombine.low %v8737_v24, %v4451_v21 }
 0x40f   : > { %v4520_v53 = vpop.permute.xlu1 %4519  ;;  %v4645_v36 = vrot.slane %v4617_v16, %v7447_v37  ;;  %v4638_v2 = vrot.slane %v4616_v52, %v7447_v37  ;;  %v8807_v26 = vrot.slane %v4861_v20, %v7447_v37  ;;  %v8822_v40 = vrot.slane %v4862_v22, %v7447_v37 }
 0x410   : > { %v4459_v31 = vrot.slane %v4452_v33, %v7447_v37  ;;  %v4484_v49 = vcombine.high %v4483_v17, %v4483_v17  ;;  %v4491_v54 = vrot.slane %v4483_v17, %v7447_v37  ;;  %v4535_v28 = vsel %vm3611_vm2, %v4520_v53, %v4529_v39 }
 0x411   : > { %v4647_v58 = vcombine.low %v4631_v50, %v4645_v36  ;;  %v4646_v63 = vcombine.low %v4624_v11, %v4638_v2  ;;  %v4237_v27 = vpop.permute.xlu0 %4236  ;;  %v8819_v38 = vrot.slane %v4926_v6, %v7447_v37  ;;  %v7130_v2 = vld [vmem:[%s9214_s5 + $0xa8] sm:$0xff]  }
 0x412   : > { %v4460_v56 = vcombine.high %v4459_v31, %v4459_v31  ;;  %v4467_v9 = vrot.slane %v4459_v31, %v7447_v37  ;;  %v8776_v62 = vrot.slane %v4484_v49, %v7447_v37  ;;  %v8789_v13 = vcombine.high %v4491_v54, %v4491_v54 }
 0x413   : > { %6857 = vmatprep.mubr.msk.bf16.mxu1 %vm3803_vm1, %v4647_v58  ;;  %v4532_v8 = vpop.permute.xlu1 %4531 }
 0x414   : > { %v4474_v41 = vrot.slane %v4460_v56, %v7447_v37  ;;  %v4475_v29 = vcombine.high %v4467_v9, %v4467_v9  ;;  %v4537_v19 = vsel %vm3636_vm3, %v4535_v28, %v4532_v8  ;;  %4836 = vmatmul.mubr.bf16.vlgmr.msra.gmra.mrb[60].mxu1 %v4646_v63  ;;  %v4648_v44 = vcombine.low %v4451_v21, %v4467_v9 }
 0x415   : > { %v4539_v15 = vcombine.low %v4537_v19, %v4532_v8  ;;  %5374 = vmatpush1.bf16.msra.mxu1 %v7124_v55  ;;  %v4309_v60 = vpop.permute.xlu0 %4308  ;;  %v4650_v12 = vcombine.low %v4491_v54, %v8776_v62 }
 0x416   : > { %v4649_v61 = vcombine.low %v4474_v41, %v4475_v29  ;;  %5375 = vmatprep.subr.bf16.mxu1 %v9227_v3  ;;  %v4927_v7 = vcombine.low %v4467_v9, %v4474_v41  ;;  %v4658_v46 = vrot.slane %v4648_v44, %v7447_v37  ;;  %v4928_v57 = vcombine.low %v4475_v29, %v4491_v54  ;;  %v7132_v44 = vld [vmem:[%s9214_s5 + $0xb0] sm:$0xff]  }
 0x417   : > { %v4546_v43 = vrot.slane %v4539_v15, %v7447_v37  ;;  %v4291_v48 = vpop.permute.xlu1 %4290  ;;  %v4672_v31 = vrot.slane %v4650_v12, %v7447_v37 }
 0x418   : > { %v4322_v47 = vsel %vm3611_vm2, %v4237_v27, %v4291_v48  ;;  %v4665_v18 = vrot.slane %v4649_v61, %v7447_v37  ;;  %v8826_v17 = vrot.slane %v4927_v7, %v7447_v37  ;;  %v8836_v49 = vrot.slane %v4928_v57, %v7447_v37 }
 0x419   : > { %v4547_v4 = vcombine.high %v4546_v43, %v4546_v43  ;;  %v8796_v51 = vrot.slane %v4546_v43, %v7447_v37  ;;  %v4339_v24 = vsel %vm3636_vm3, %v4322_v47, %v4309_v60  ;;  %5376 = vmatpush1.bf16.msra.mxu1 %v7126_v23  ;;  %v5147_v11 = vpop.permute.xlu0 %5146  ;;  %v8856_v61 = vrot.slane %v4925_v30, %v7447_v37 }
 0x41a   : > { %v4356_v25 = vcombine.low %v4339_v24, %v4309_v60  ;;  %5377 = vmatprep.subr.bf16.mxu1 %v9227_v3  ;;  %v4681_v33 = vcombine.high %v4658_v46, %v4665_v18  ;;  %v4680_v50 = vcombine.low %v4658_v46, %v4665_v18  ;;  %v4893_v43 = vcombine.low %v8807_v26, %v8822_v40 }
 0x41b   : > { %v8810_v52 = vrot.slane %v4547_v4, %v7447_v37  ;;  %v8814_v42 = vcombine.high %v8796_v51, %v8796_v51  ;;  %v4651_v1 = vcombine.low %v8789_v13, %v8796_v51  ;;  %v5138_v16 = vpop.permute.xlu1 %5137  ;;  %v4894_v7 = vcombine.high %v8807_v26, %v8822_v40 }
 0x41c   : > { %v4363_v39 = vrot.slane %v4356_v25, %v7447_v37  ;;  %v5153_v55 = vsel %vm3611_vm2, %v5138_v16, %v5147_v11  ;;  %v4697_v27 = vrot.slane %v4681_v33, %v7447_v37  ;;  %v4690_v29 = vrot.slane %v4680_v50, %v7447_v37  ;;  %v7136_v11 = vld [vmem:[%s9214_s5 + $0xc0] sm:$0xff]  }
 0x41d   : > { %v4679_v53 = vrot.slane %v4651_v1, %v7447_v37  ;;  %v4714_v36 = vcombine.low %v8810_v52, %v8814_v42  ;;  %5378 = vmatpush1.bf16.msra.mxu1 %v7128_v32  ;;  %v4960_v4 = vcombine.high %v8826_v17, %v8836_v49  ;;  %v7134_v32 = vld [vmem:[%s9214_s5 + $0xb8] sm:$0xff]   ;;  %v5203_v46 = vcombine.high %v8819_v38, %v8826_v17 }
 0x41e   : > { %v4364_v58 = vcombine.high %v4363_v39, %v4363_v39  ;;  %v4371_v63 = vrot.slane %v4363_v39, %v7447_v37  ;;  %5379 = vmatprep.subr.bf16.mxu1 %v9227_v3  ;;  %v4958_v25 = vcombine.high %v8856_v61, %v8819_v38  ;;  %v4922_v1 = vrot.slane %v4894_v7, %v7447_v37 }
 0x41f   : > { %v5150_v56 = vpop.permute.xlu1 %5149  ;;  %v4683_v9 = vcombine.high %v4672_v31, %v4679_v53  ;;  %v4682_v21 = vcombine.low %v4672_v31, %v4679_v53  ;;  %v8843_v54 = vrot.slane %v4714_v36, %v7447_v37  ;;  %v4915_v16 = vrot.slane %v4893_v43, %v7447_v37 }
 0x420   : > { %v4378_v28 = vrot.slane %v4364_v58, %v7447_v37  ;;  %v4379_v8 = vcombine.high %v4371_v63, %v4371_v63  ;;  %v5155_v41 = vsel %vm3636_vm3, %v5153_v55, %v5150_v56  ;;  %v5201_v33 = vcombine.high %v8822_v40, %v8856_v61 }
 0x421   : > { %v5157_v19 = vcombine.low %v5155_v41, %v5150_v56  ;;  %5380 = vmatpush1.bf16.msra.mxu1 %v7130_v2  ;;  %v4711_v15 = vrot.slane %v4683_v9, %v7447_v37  ;;  %v4704_v23 = vrot.slane %v4682_v21, %v7447_v37  ;;  %v4722_v20 = vcombine.high %v8843_v54, %v8843_v54 }
 0x422   : > { %v4859_v6 = vcombine.low %v4371_v63, %v4378_v28  ;;  %v4860_v22 = vcombine.low %v4379_v8, %v8717_v14  ;;  %5381 = vmatprep.subr.bf16.mxu1 %v9227_v3  ;;  %v4991_v39 = vcombine.low %v8776_v62, %v8789_v13  ;;  %v4988_v36 = vrot.slane %v4960_v4, %v7447_v37  ;;  %v7137_v28 = vld [vmem:[%s9214_s5 + $0xc8] sm:$0xff]  }
 0x423   : > { %v5164_v60 = vrot.slane %v5157_v19, %v7447_v37  ;;  %v4713_v48 = vcombine.low %v4697_v27, %v4711_v15  ;;  %v4712_v12 = vcombine.low %v4690_v29, %v4704_v23  ;;  %v4736_v24 = vrot.slane %v4722_v20, %v7447_v37  ;;  %v7138_v20 = vld [vmem:[%s9214_s5 + $0xd0] sm:$0xff]  }
 0x424   : > { %v4869_v47 = vrot.slane %v4859_v6, %v7447_v37  ;;  %v4876_v18 = vrot.slane %v4860_v22, %v7447_v37  ;;  %v5231_v2 = vrot.slane %v5203_v46, %v7447_v37  ;;  %v4974_v13 = vrot.slane %v4958_v25, %v7447_v37 }
 0x425   : > { %v5172_v14 = vrot.slane %v5164_v60, %v7447_v37  ;;  %5382 = vmatpush1.bf16.msra.mxu1 %v7132_v44  ;;  %6858 = vmatprep.mubr.msk.bf16.mxu1 %vm3803_vm1, %v4713_v48  ;;  %v4959_v58 = vcombine.low %v8826_v17, %v8836_v49  ;;  %v5165_v63 = vcombine.high %v5164_v60, %v5164_v60 }
 0x426   : > { %4844 = vmatmul.mubr.bf16.gmra.mrb[64].mxu1 %v4712_v12  ;;  %5383 = vmatprep.subr.bf16.mxu1 %v9227_v3  ;;  %v4891_v30 = vcombine.low %v4869_v47, %v4876_v18  ;;  %v4892_v57 = vcombine.high %v4869_v47, %v4876_v18  ;;  %v4729_v56 = vrot.slane %v8843_v54, %v7447_v37 }
 0x427   : > { %v5235_v26 = vcombine.low %v8814_v42, %v5172_v14  ;;  %6859 = vmatprep.mubr.msk.bf16.mxu1 %vm3803_vm1, %v4736_v24  ;;  %v5234_v42 = vcombine.low %v8796_v51, %v8810_v52  ;;  %v5217_v51 = vrot.slane %v5201_v33, %v7447_v37  ;;  %v4998_v52 = vrot.slane %v4991_v39, %v7447_v37 }
 0x428   : > { %v4908_v50 = vrot.slane %v4892_v57, %v7447_v37  ;;  %v4901_v53 = vrot.slane %v4891_v30, %v7447_v37  ;;  %v4990_v9 = vcombine.low %v4974_v13, %v4988_v36  ;;  %v4957_v8 = vcombine.low %v8856_v61, %v8819_v38 }
 0x429   : > { %5384 = vmatpush1.bf16.msra.mxu1 %v7134_v32  ;;  %v5249_v55 = vrot.slane %v5235_v26, %v7447_v37  ;;  %v5242_v27 = vrot.slane %v5234_v42, %v7447_v37  ;;  %v5233_v21 = vcombine.low %v5217_v51, %v5231_v2  ;;  %v4981_v41 = vrot.slane %v4959_v58, %v7447_v37 }
 0x42a   : > { %5385 = vmatprep.subr.bf16.mxu1 %v9227_v3  ;;  %v4924_v31 = vcombine.low %v4908_v50, %v4922_v1  ;;  %v4923_v62 = vcombine.low %v4901_v53, %v4915_v16  ;;  %v5202_v54 = vcombine.low %v8819_v38, %v8826_v17  ;;  %v5179_v29 = vrot.slane %v5165_v63, %v7447_v37 }
 0x42b   : > { %v5180_v19 = vcombine.high %v5172_v14, %v5172_v14  ;;  %v5253_v44 = vcombine.high %v5242_v27, %v5249_v55  ;;  %v4999_v15 = vcombine.high %v4998_v52, %v4998_v52  ;;  %v5200_v23 = vcombine.low %v8822_v40, %v8856_v61 }
 0x42c   : > { %6869 = vmatprep.mubr.msk.bf16.mxu0 %vm3803_vm1, %v4924_v31  ;;  %v4967_v6 = vrot.slane %v4957_v8, %v7447_v37  ;;  %v5251_v38 = vcombine.high %v8836_v49, %v4998_v52  ;;  %v5224_v17 = vrot.slane %v5202_v54, %v7447_v37  ;;  %v5252_v7 = vcombine.low %v5242_v27, %v5249_v55 }
 0x42d   : > { %5386 = vmatpush1.bf16.msra.mxu1 %v7136_v11  ;;  %5113 = vmatmul.mubr.bf16.vlgmr.msra.gmra.mrb[72].mxu0 %v4923_v62  ;;  %v5284_v22 = vcombine.low %v5179_v29, %v5180_v19  ;;  %v5281_v60 = vrot.slane %v5253_v44, %v7447_v37  ;;  %v5013_v48 = vrot.slane %v4999_v15, %v7447_v37 }
 0x42e   : > { %4852 = vmatmul.mubr.bf16.gmra.mrb[68].mxu1 %v4729_v56  ;;  %6870 = vmatprep.mubr.msk.bf16.mxu0 %vm3803_vm1, %v4990_v9  ;;  %v4989_v43 = vcombine.low %v4967_v6, %v4981_v41  ;;  %v5210_v40 = vrot.slane %v5200_v23, %v7447_v37  ;;  %v5267_v61 = vrot.slane %v5251_v38, %v7447_v37 }
 0x42f   : > { %5387 = vmatprep.subr.bf16.mxu1 %v9227_v3  ;;  %6899 = vmatprep.mubr.msk.bf16.mxu1 %vm3803_vm1, %v5233_v21  ;;  %v5291_v18 = vrot.slane %v5284_v22, %v7447_v37  ;;  %v5250_v4 = vcombine.low %v8836_v49, %v4998_v52  ;;  %v5274_v14 = vrot.slane %v5252_v7, %v7447_v37  ;;  %v7139_v49 = vld [vmem:[%s9216_s7 + $0x48] sm:$0xff]  }
 0x430   : > { %v5232_v12 = vcombine.low %v5210_v40, %v5224_v17  ;;  %v5283_v47 = vcombine.low %v5267_v61, %v5281_v60  ;;  %v5006_v24 = vrot.slane %v4998_v52, %v7447_v37  ;;  %5948 = vmatpush1.bf16.msra.mxu0 %v7139_v49 }
 0x431   : > { %5388 = vmatpush1.bf16.msra.mxu1 %v7137_v28  ;;  %v5292_v32 = vcombine.high %v5291_v18, %v5291_v18  ;;  %v5260_v46 = vrot.slane %v5250_v4, %v7447_v37  ;;  %v5299_v25 = vrot.slane %v5291_v18, %v7447_v37  ;;  %5949 = vmatprep.subr.bf16.mxu0 %v9227_v3  ;;  %v8951_v28 = vld [vmem:[%s9215_s6] ss:$0 sm:$0xff] }
 0x432   : > { %5389 = vmatprep.subr.bf16.mxu1 %v9227_v3 }
 0x433   : > { %v5282_v30 = vcombine.low %v5260_v46, %v5274_v14  ;;  %v5306_v57 = vrot.slane %v5292_v32, %v7447_v37  ;;  %v7140_v46 = vld [vmem:[%s9216_s7 + $0x50] sm:$0xff]  }
 0x434   : > { %5950 = vmatpush1.bf16.msra.mxu0 %v7140_v46 }
 0x435   : > { %5390 = vmatpush1.bf16.msra.mxu1 %v7138_v20  ;;  %5121 = vmatmul.mubr.bf16.gmra.mrb[76].mxu0 %v4989_v43 }
 0x436   : > { %6871 = vmatprep.mubr.msk.bf16.mxu0 %vm3803_vm1, %v5013_v48  ;;  %6064 = vmatprep.subr.bf16.mxu1 %v9227_v3 }
 0x437   : > { %5951 = vmatprep.subr.bf16.mxu0 %v9227_v3 }
 0x438   : > { %5406 = vmatmul.mubr.bf16.vlgmr.msra.gmra.mrb[72].mxu1 %v5232_v12 }
 0x439   : > { %6900 = vmatprep.mubr.msk.bf16.mxu1 %vm3803_vm1, %v5283_v47 }
 0x43d   : > { %5129 = vmatmul.mubr.bf16.gmra.mrb[80].mxu0 %v5006_v24 }
 0x440   : > { %5414 = vmatmul.mubr.bf16.gmra.mrb[76].mxu1 %v5282_v30 }
 0x441   : > { %6901 = vmatprep.mubr.msk.bf16.mxu1 %vm3803_vm1, %v5306_v57 }
 0x448   : > { %5422 = vmatmul.mubr.bf16.gmra.mrb[80].mxu1 %v5299_v25 }
 0x4e7   : > { %v4837_v26 = vpop.f32.mrb[60].mxu1 }
 0x4e8   : > { %v4839_v1 = vpop.f32.mrb[61].mxu1 }
 0x4e9   : > { %v4840_v16 = vpop.f32.mrb[62].mxu1 }
 0x4ea   : > { %v4842_v33 = vpop.f32.mrb[63].mxu1 }
 0x4f9   : > { %v4845_v39 = vpop.f32.mrb[64].mxu1 }
 0x4fa   : > { %v4847_v50 = vpop.f32.mrb[65].mxu1 }
 0x4fb   : > { %v4848_v53 = vpop.f32.mrb[66].mxu1 }
 0x4fc   : > { %v4850_v36 = vpop.f32.mrb[67].mxu1 }
 0x500   : > { %v5114_v42 = vpop.f32.mrb[72].mxu0 }
 0x501   : > { %v5115_v11 = vadd.f32 %v5114_v42, %v4837_v26  ;;  %v4853_v2 = vpop.f32.mrb[68].mxu1  ;;  %v5116_v37 = vpop.f32.mrb[73].mxu0 }
 0x502   : > { %v4855_v31 = vpop.f32.mrb[69].mxu1  ;;  %v5117_v62 = vpop.f32.mrb[74].mxu0 }
 0x503   : > { %v5118_v13 = vadd.f32 %v5117_v62, %v4840_v16  ;;  %v4856_v58 = vpop.f32.mrb[70].mxu1  ;;  %v5119_v63 = vpop.f32.mrb[75].mxu0  ;;  %v7142_v31 = vld [vmem:[%s9216_s7 + $0x58] sm:$0xff]  }
 0x504   : > { %v4857_v55 = vpop.f32.mrb[71].mxu1  ;;  %5952 = vmatpush1.bf16.msra.mxu0 %v7142_v31 }
 0x505   : > { %5953 = vmatprep.subr.bf16.mxu0 %v9227_v3 }
 0x508   : > { %v5122_v51 = vpop.f32.mrb[76].mxu0 }
 0x509   : > { %v5123_v52 = vadd.f32 %v5122_v51, %v4845_v39  ;;  %v5124_v56 = vpop.f32.mrb[77].mxu0  ;;  %v7141_v39 = vld [vmem:[%s9216_s7] sm:$0xff]  }
 0x50a   : > { %v5125_v9 = vpop.f32.mrb[78].mxu0  ;;  %6065 = vmatpush1.bf16.msra.mxu1 %v7141_v39 }
 0x50b   : > { %v5126_v27 = vadd.f32 %v5125_v9, %v4848_v53  ;;  %v5407_v21 = vpop.f32.mrb[72].mxu1  ;;  %v5127_v8 = vpop.f32.mrb[79].mxu0  ;;  %6066 = vmatprep.subr.bf16.mxu1 %v9227_v3 }
 0x50c   : > { %v5429_v41 = vadd.f32 %v5407_v21, %v5115_v11  ;;  %v5409_v54 = vpop.f32.mrb[73].mxu1 }
 0x50d   : > { %v5410_v29 = vpop.f32.mrb[74].mxu1 }
 0x50e   : > { %v5441_v19 = vadd.f32 %v8951_v28, %v5429_v41  ;;  %v5430_v44 = vadd.f32 %v5410_v29, %v5118_v13  ;;  %v5412_v15 = vpop.f32.mrb[75].mxu1 }
 0x510   : > { %v5451_v23 = vcombine.high %v5441_v19, %v5441_v19  ;;  %v5458_v20 = vrot.slane %v5441_v19, %v8186_v5  ;;  %v5442_v6 = vadd.f32 %v8951_v28, %v5430_v44  ;;  %v5130_v38 = vpop.f32.mrb[80].mxu0 }
 0x511   : > { %v5131_v17 = vadd.f32 %v5130_v38, %v4853_v2  ;;  %v5132_v22 = vpop.f32.mrb[81].mxu0 }
 0x512   : > { %v8957_v43 = vrot.slane %v5451_v23, %v8186_v5  ;;  %v5466_v60 = vcombine.high %v5458_v20, %v5458_v20  ;;  %v5468_v48 = vcombine.high %v5442_v6, %v5442_v6  ;;  %v5133_v40 = vpop.f32.mrb[82].mxu0  ;;  %v5475_v61 = vrot.slane %v5442_v6, %v8186_v5 }
 0x513   : > { %v5415_v12 = vpop.f32.mrb[76].mxu1  ;;  %v5134_v7 = vpop.f32.mrb[83].mxu0  ;;  %v5545_v50 = vmax.f32 %v5458_v20, 0.0 }
 0x514   : > { %v5467_v47 = vcombine.high %v8957_v43, %v8957_v43  ;;  %v5482_v18 = vrot.slane %v5468_v48, %v8186_v5  ;;  %v5417_v4 = vpop.f32.mrb[77].mxu1  ;;  %v5483_v14 = vcombine.high %v5475_v61, %v5475_v61  ;;  %v5431_v24 = vadd.f32 %v5415_v12, %v5123_v52 }
 0x515   : > { %v5418_v32 = vpop.f32.mrb[78].mxu1  ;;  %v5546_v30 = vmax.f32 %v5466_v60, 0.0  ;;  %v5549_v49 = vmax.f32 %v5475_v61, 0.0 }
 0x516   : > { %v5548_v57 = vmax.f32 %v5467_v47, 0.0  ;;  %v5484_v25 = vcombine.high %v5482_v18, %v5482_v18  ;;  %v5420_v26 = vpop.f32.mrb[79].mxu1  ;;  %v5550_v1 = vmax.f32 %v5483_v14, 0.0  ;;  %v5443_v16 = vadd.f32 %v8951_v28, %v5431_v24 }
 0x517   : > { %v5432_v33 = vadd.f32 %v5418_v32, %v5126_v27  ;;  %v5551_v53 = vmax.f32 %v5482_v18, 0.0  ;;  %v8976_v62 = vcombine.low %v5545_v50, %v5546_v30  ;;  %v7143_v27 = vld [vmem:[%s9216_s7 + $0x8] sm:$0xff]   ;;  %v5547_v32 = vmax.f32 %v8957_v43, 0.0 }
 0x518   : > { %v5552_v36 = vmax.f32 %v5484_v25, 0.0  ;;  %v5597_v42 = vcombine.low %v5548_v57, %v5549_v49  ;;  %v5485_v11 = vcombine.high %v5443_v16, %v5443_v16  ;;  %v5492_v2 = vrot.slane %v5443_v16, %v8186_v5  ;;  %6067 = vmatpush1.bf16.msra.mxu1 %v7143_v27  ;;  %v7144_v25 = vld [vmem:[%s9216_s7 + $0x60] sm:$0xff]   ;;  %v7147_v27 = vld [vmem:[%s9216_s7 + $0x18] sm:$0xff]  }
 0x519   : > { %v5444_v37 = vadd.f32 %v8951_v28, %v5432_v33  ;;  %v5611_v58 = vrot.slane %v5550_v1, %v8186_v5  ;;  %6068 = vmatprep.subr.bf16.mxu1 %v9227_v3  ;;  %v5588_v57 = vrot.slane %v8976_v62, %v8186_v5  ;;  %5954 = vmatpush1.bf16.msra.mxu0 %v7144_v25  ;;  %v7154_v25 = vld [vmem:[%s9216_s7 + $0x88] sm:$0xff]  }
 0x51a   : > { %v5604_v13 = vrot.slane %v5597_v42, %v8186_v5  ;;  %v5613_v63 = vcombine.low %v5551_v53, %v5552_v36  ;;  %v5499_v55 = vrot.slane %v5485_v11, %v8186_v5  ;;  %v5500_v51 = vcombine.high %v5492_v2, %v5492_v2  ;;  %5955 = vmatprep.subr.bf16.mxu0 %v9227_v3 }
 0x51b   : > { %v5553_v52 = vmax.f32 %v5492_v2, 0.0  ;;  %v5502_v56 = vcombine.high %v5444_v37, %v5444_v37  ;;  %v5423_v9 = vpop.f32.mrb[80].mxu1  ;;  %v5509_v21 = vrot.slane %v5444_v37, %v8186_v5  ;;  %v5595_v31 = vrot.slane %v5547_v32, %v8186_v5 }
 0x51c   : > { %v5433_v8 = vadd.f32 %v5423_v9, %v5131_v17  ;;  %v5425_v41 = vpop.f32.mrb[81].mxu1  ;;  %v8986_v54 = vcombine.low %v5604_v13, %v5611_v58  ;;  %v5620_v29 = vrot.slane %v5613_v63, %v8186_v5  ;;  %v5501_v19 = vcombine.high %v5499_v55, %v5499_v55  ;;  %v7145_v13 = vld [vmem:[%s9216_s7 + $0x10] sm:$0xff]   ;;  %v7146_v58 = vld [vmem:[%s9216_s7 + $0x68] sm:$0xff]  }
 0x51d   : > { %v5554_v44 = vmax.f32 %v5500_v51, 0.0  ;;  %v5555_v15 = vmax.f32 %v5499_v55, 0.0  ;;  %v5627_v23 = vrot.slane %v5553_v52, %v8186_v5  ;;  %v5426_v20 = vpop.f32.mrb[82].mxu1  ;;  %v5516_v6 = vrot.slane %v5502_v56, %v8186_v5  ;;  %6069 = vmatpush1.bf16.msra.mxu1 %v7145_v13  ;;  %5956 = vmatpush1.bf16.msra.mxu0 %v7146_v58 }
 0x51e   : > { %v5517_v38 = vcombine.high %v5509_v21, %v5509_v21  ;;  %v5557_v22 = vmax.f32 %v5509_v21, 0.0  ;;  %v5445_v17 = vadd.f32 %v8951_v28, %v5433_v8  ;;  %v5427_v60 = vpop.f32.mrb[83].mxu1  ;;  %v5556_v48 = vmax.f32 %v5501_v19, 0.0  ;;  %v7148_v21 = vld [vmem:[%s9216_s7 + $0x70] sm:$0xff]   ;;  %6070 = vmatprep.subr.bf16.mxu1 %v9227_v3  ;;  %5957 = vmatprep.subr.bf16.mxu0 %v9227_v3 }
 0x51f   : > { %v5629_v40 = vcombine.low %v5554_v44, %v5555_v15  ;;  %v5684_v61 = vpack.c.bf16 %v8986_v54, %v8986_v54  ;;  %v8996_v12 = vcombine.low %v5620_v29, %v5627_v23  ;;  %v5518_v7 = vcombine.high %v5516_v6, %v5516_v6 }
 0x520   : > { %v5558_v47 = vmax.f32 %v5517_v38, 0.0  ;;  %v5559_v18 = vmax.f32 %v5516_v6, 0.0  ;;  %v5525_v4 = vrot.slane %v5445_v17, %v8186_v5  ;;  %v5643_v24 = vrot.slane %v5556_v48, %v8186_v5  ;;  %v7149_v48 = vld [vmem:[%s9216_s7 + $0x20] sm:$0xff]  }
 0x521   : > { %v5636_v14 = vrot.slane %v5629_v40, %v8186_v5  ;;  %5695 = vrot.lane.b32.xlu0 %v5684_v61, %s7195_s18  ;;  %v5685_v28 = vpack.c.bf16 %v8996_v12, %v8996_v12  ;;  %v5560_v49 = vmax.f32 %v5518_v7, 0.0  ;;  %v5738_v1 = vrot.slane %v5684_v61, 1  ;;  %6071 = vmatpush1.bf16.msra.mxu1 %v7147_v27  ;;  %v7150_v7 = vld [vmem:[%s9216_s7 + $0x78] sm:$0xff]  }
 0x522   : > { %v5645_v46 = vcombine.low %v5557_v22, %v5558_v47  ;;  %v5526_v30 = vcombine.high %v5525_v4, %v5525_v4  ;;  %v5561_v26 = vmax.f32 %v5525_v4, 0.0  ;;  %v5659_v43 = vrot.slane %v5559_v18, %v8186_v5  ;;  %5958 = vmatpush1.bf16.msra.mxu0 %v7148_v21  ;;  %6072 = vmatprep.subr.bf16.mxu1 %v9227_v3  ;;  %v7151_v47 = vld [vmem:[%s9216_s7 + $0x28] sm:$0xff]  }
 0x523   : > { %5697 = vrot.lane.b32.xlu1 %v5685_v28, %s7195_s18  ;;  %v9011_v16 = vcombine.low %v5636_v14, %v5643_v24  ;;  %v5711_v50 = vshll.u32 %v5684_v61, 16  ;;  %v5739_v36 = vrot.slane %v5685_v28, 1  ;;  %v5718_v11 = vshll.u32 %v5685_v28, 16  ;;  %5959 = vmatprep.subr.bf16.mxu0 %v9227_v3  ;;  %v7152_v14 = vld [vmem:[%s9216_s7 + $0x80] sm:$0xff]  }
 0x524   : > { %v5652_v33 = vrot.slane %v5645_v46, %v8186_v5  ;;  %v5562_v39 = vmax.f32 %v5526_v30, 0.0  ;;  %v5661_v53 = vcombine.low %v5560_v49, %v5561_v26  ;;  %v7017_v62 = vpack.i.bf16 %v8996_v12, %v8986_v54 }
 0x525   : > { %5743 = vrot.lane.b32.xlu0 %v5738_v1, %s7196_s24  ;;  %v5686_v42 = vpack.c.bf16 %v9011_v16, %v9011_v16  ;;  %v5713_v2 = vrot.slane %v5711_v50, 1  ;;  %v5709_v55 = vshrl.u32 %v5684_v61, 16  ;;  %v5720_v51 = vrot.slane %v5718_v11, 1  ;;  %6073 = vmatpush1.bf16.msra.mxu1 %v7149_v48  ;;  %v7155_v1 = vld [vmem:[%s9216_s7 + $0x38] sm:$0xff]  }
 0x526   : > { %v9019_v37 = vcombine.low %v5652_v33, %v5659_v43  ;;  %v5675_v63 = vrot.slane %v5562_v39, %v8186_v5  ;;  %v5596_v9 = vcombine.low %v5588_v57, %v5595_v31  ;;  %v5716_v41 = vshrl.u32 %v5685_v28, 16  ;;  %6074 = vmatprep.subr.bf16.mxu1 %v9227_v3  ;;  %5960 = vmatpush1.bf16.msra.mxu0 %v7150_v7  ;;  %v7153_v57 = vld [vmem:[%s9216_s7 + $0x30] sm:$0xff]   ;;  %v7157_v43 = vld [vmem:[%s9216_s7 + $0x40] sm:$0xff]  }
 0x527   : > { %5745 = vrot.lane.b32.xlu1 %v5739_v36, %s7196_s24  ;;  %v5725_v52 = vshll.u32 %v5686_v42, 16  ;;  %v5714_v8 = vor.u32 %v5713_v2, %v5709_v55  ;;  %v5668_v19 = vrot.slane %v5661_v53, %v8186_v5  ;;  %v5723_v23 = vshrl.u32 %v5686_v42, 16  ;;  %5961 = vmatprep.subr.bf16.mxu0 %v9227_v3 }
 0x528   : > { %v5687_v56 = vpack.c.bf16 %v9019_v37, %v9019_v37  ;;  %v5721_v15 = vor.u32 %v5720_v51, %v5716_v41  ;;  %v7022_v6 = vpack.i.bf16 %v9019_v37, %v9011_v16  ;;  %v5683_v17 = vpack.c.bf16 %v5596_v9, %v5596_v9 }
 0x529   : > { %5699 = vrot.lane.b32.xlu0 %v5686_v42, %s7195_s18  ;;  %v5727_v29 = vrot.slane %v5725_v52, 1  ;;  %v5676_v20 = vcombine.low %v5668_v19, %v5675_v63  ;;  %v5740_v18 = vrot.slane %v5686_v42, 1  ;;  %6075 = vmatpush1.bf16.msra.mxu1 %v7151_v47 }
 0x52a   : > { %v5829_v44 = vshll.u32 %v5687_v56, 16  ;;  %v5827_v60 = vshrl.u32 %v5687_v56, 16  ;;  %v5704_v61 = vshll.u32 %v5683_v17, 16  ;;  %v5835_v24 = vrot.slane %v5687_v56, 1  ;;  %6076 = vmatprep.subr.bf16.mxu1 %v9227_v3  ;;  %5962 = vmatpush1.bf16.msra.mxu0 %v7152_v14 }
 0x52b   : > { %5731 = vrot.lane.b32.xlu1 %v5714_v8, %s7197_s29  ;;  %v5728_v38 = vor.u32 %v5727_v29, %v5723_v23  ;;  %v5688_v4 = vpack.c.bf16 %v5676_v20, %v5676_v20  ;;  %v5702_v32 = vshrl.u32 %v5683_v17, 16  ;;  %5963 = vmatprep.subr.bf16.mxu0 %v9227_v3  ;;  %v5737_v49 = vrot.slane %v5683_v17, 1 }
 0x52c   : > { %v5831_v22 = vrot.slane %v5829_v44, 1  ;;  %v5706_v28 = vrot.slane %v5704_v61, 1 }
 0x52d   : > { %5733 = vrot.lane.b32.xlu0 %v5721_v15, %s7197_s29  ;;  %v6111_v46 = vshll.u32 %v5688_v4, 16  ;;  %6077 = vmatpush1.bf16.msra.mxu1 %v7153_v57  ;;  %v6109_v16 = vshrl.u32 %v5688_v4, 16  ;;  %v6117_v39 = vrot.slane %v5688_v4, 1 }
 0x52e   : > { %v5832_v40 = vor.u32 %v5831_v22, %v5827_v60  ;;  %v5707_v30 = vor.u32 %v5706_v28, %v5702_v32  ;;  %5964 = vmatpush1.bf16.msra.mxu0 %v7154_v25  ;;  %6078 = vmatprep.subr.bf16.mxu1 %v9227_v3 }
 0x52f   : > { %5735 = vrot.lane.b32.xlu1 %v5728_v38, %s7197_s29  ;;  %v6113_v26 = vrot.slane %v6111_v46, 1  ;;  %6221 = vmatprep.subr.bf16.mxu0 %v9227_v3 }
 0x531   : > { %5824 = vrot.lane.b32.xlu0 %v5687_v56, %s7195_s18  ;;  %v6114_v33 = vor.u32 %v6113_v26, %v6109_v16  ;;  %6079 = vmatpush1.bf16.msra.mxu1 %v7155_v1  ;;  %v7158_v26 = vld [vmem:[%s9216_s7 + $0x98] sm:$0xff]  }
 0x532   : > { %6080 = vmatprep.subr.bf16.mxu1 %v9227_v3 }
 0x533   : > { %5833 = vrot.lane.b32.xlu1 %v5832_v40, %s7197_s29 }
 0x535   : > { %5747 = vrot.lane.b32.xlu0 %v5740_v18, %s7196_s24  ;;  %6081 = vmatpush1.bf16.msra.mxu1 %v7157_v43 }
 0x537   : > { %5836 = vrot.lane.b32.xlu1 %v5835_v24, %s7196_s24  ;;  %v7156_v24 = vld [vmem:[%s9216_s7 + $0x90] sm:$0xff]  }
 0x539   : > { %5693 = vrot.lane.b32.xlu0 %v5683_v17, %s7195_s18 }
 0x53b   : > { %5729 = vrot.lane.b32.xlu1 %v5707_v30, %s7197_s29 }
 0x53d   : > { %5741 = vrot.lane.b32.xlu0 %v5737_v49, %s7196_s24 }
 0x53f   : > { %6106 = vrot.lane.b32.xlu1 %v5688_v4, %s7195_s18 }
 0x541   : > { %6115 = vrot.lane.b32.xlu0 %v6114_v33, %s7197_s29 }
 0x543   : > { %6118 = vrot.lane.b32.xlu1 %v6117_v39, %s7196_s24  ;;  %v7159_v39 = vld [vmem:[%s9216_s7 + $0xa0] sm:$0xff]  }
 0x545   : > { %7008 = vrot.lane.b32.xlu0 %v8618_v0, %s7198_s16 }
 0x547   : > { %7013 = vrot.lane.b32.xlu1 %v8632_v59, %s7198_s16 }
 0x549   : > { %7018 = vrot.lane.b32.xlu0 %v7017_v62, %s7197_s29 }
 0x54b   : > { %7023 = vrot.lane.b32.xlu1 %v7022_v6, %s7197_s29 }
 0x593   : > { %v5696_v50 = vpop.permute.xlu0 %5695 }
 0x595   : > { %v5698_v53 = vpop.permute.xlu1 %5697 }
 0x597   : > { %v5744_v36 = vpop.permute.xlu0 %5743 }
 0x599   : > { %v5746_v42 = vpop.permute.xlu1 %5745 }
 0x59b   : > { %v5700_v11 = vpop.permute.xlu0 %5699 }
 0x59d   : > { %v5732_v2 = vpop.permute.xlu1 %5731 }
 0x59e   : > { %v5754_v0 = vsel %vm3611_vm2, %v5696_v50, %v5732_v2  ;;  %v7163_v2 = vld [vmem:[%s9216_s7 + $0xc0] sm:$0xff]  }
 0x59f   : > { %v5734_v37 = vpop.permute.xlu0 %5733  ;;  %v5764_v54 = vsel %vm3636_vm3, %v5754_v0, %v5744_v36 }
 0x5a0   : > { %v5757_v31 = vsel %vm3611_vm2, %v5698_v53, %v5734_v37  ;;  %v5781_v63 = vcombine.low %v5764_v54, %v5744_v36  ;;  %v7160_v36 = vld [vmem:[%s9216_s7 + $0xa8] sm:$0xff]  }
 0x5a1   : > { %v5736_v13 = vpop.permute.xlu1 %5735  ;;  %v5766_v59 = vsel %vm3636_vm3, %v5757_v31, %v5746_v42  ;;  %v7164_v37 = vld [vmem:[%s9216_s7 + $0xc8] sm:$0xff]   ;;  %v7165_v31 = vld [vmem:[%s9216_s7 + $0xd0] sm:$0xff]  }
 0x5a2   : > { %v5789_v12 = vcombine.low %v5766_v59, %v5746_v42  ;;  %v5760_v55 = vsel %vm3611_vm2, %v5700_v11, %v5736_v13  ;;  %v5788_v41 = vrot.slane %v5781_v63, %v8186_v5  ;;  %v7161_v42 = vld [vmem:[%s9216_s7 + $0xb0] sm:$0xff]   ;;  %v7162_v11 = vld [vmem:[%s9216_s7 + $0xb8] sm:$0xff]  }
 0x5a3   : > { %v5825_v58 = vpop.permute.xlu0 %5824 }
 0x5a4   : > { %v5796_v56 = vrot.slane %v5789_v12, %v8186_v5 }
 0x5a5   : > { %v5834_v62 = vpop.permute.xlu1 %5833 }
 0x5a6   : > { %v5840_v9 = vsel %vm3611_vm2, %v5825_v58, %v5834_v62  ;;  %v5871_v44 = vcombine.low %v5788_v41, %v5796_v56 }
 0x5a7   : > { %v5748_v51 = vpop.permute.xlu0 %5747 }
 0x5a8   : > { %v5768_v52 = vsel %vm3636_vm3, %v5760_v55, %v5748_v51  ;;  %v5879_v61 = vrot.slane %v5871_v44, %v8186_v5 }
 0x5a9   : > { %v5797_v27 = vcombine.low %v5768_v52, %v5748_v51  ;;  %v5837_v21 = vpop.permute.xlu1 %5836 }
 0x5aa   : > { %v5842_v8 = vsel %vm3636_vm3, %v5840_v9, %v5837_v21  ;;  %v6969_v9 = vld [vmem:[%s9217_s8] ss:$0 sm:$0xff] }
 0x5ab   : > { %v5844_v29 = vcombine.low %v5842_v8, %v5837_v21  ;;  %v5694_v19 = vpop.permute.xlu0 %5693  ;;  %v5804_v15 = vrot.slane %v5797_v27, %v8186_v5 }
 0x5ad   : > { %v5851_v23 = vrot.slane %v5844_v29, %v8186_v5  ;;  %v5730_v20 = vpop.permute.xlu1 %5729  ;;  %v5989_v7 = vcombine.low %v5796_v56, %v5804_v15 }
 0x5ae   : > { %v5751_v6 = vsel %vm3611_vm2, %v5694_v19, %v5730_v20 }
 0x5af   : > { %v5872_v38 = vcombine.low %v5804_v15, %v5851_v23  ;;  %v5742_v22 = vpop.permute.xlu0 %5741  ;;  %v6003_v57 = vrot.slane %v5989_v7, %v8186_v5 }
 0x5b0   : > { %v5762_v17 = vsel %vm3636_vm3, %v5751_v6, %v5742_v22 }
 0x5b1   : > { %v5886_v60 = vrot.slane %v5872_v38, %v8186_v5  ;;  %v5773_v48 = vcombine.low %v5762_v17, %v5742_v22  ;;  %v6107_v40 = vpop.permute.xlu1 %6106 }
 0x5b3   : > { %v5780_v47 = vrot.slane %v5773_v48, %v8186_v5  ;;  %v6116_v18 = vpop.permute.xlu0 %6115  ;;  %v5887_v4 = vcombine.low %v5879_v61, %v5886_v60  ;;  %v5888_v14 = vcombine.high %v5879_v61, %v5886_v60 }
 0x5b4   : > { %v6122_v28 = vsel %vm3611_vm2, %v6107_v40, %v6116_v18 }
 0x5b5   : > { %v5988_v32 = vcombine.low %v5780_v47, %v5788_v41  ;;  %6930 = vmatprep.mubr.msk.bf16.mxu0 %vm3803_vm1, %v5888_v14  ;;  %v6119_v46 = vpop.permute.xlu1 %6118 }
 0x5b6   : > { %v6124_v30 = vsel %vm3636_vm3, %v6122_v28, %v6119_v46  ;;  %5980 = vmatmul.mubr.bf16.vlgmr.msra.gmra.mrb[84].mxu0 %v5887_v4 }
 0x5b7   : > { %v5996_v25 = vrot.slane %v5988_v32, %v8186_v5  ;;  %v6126_v49 = vcombine.low %v6124_v30, %v6119_v46  ;;  %6222 = vmatpush1.bf16.msra.mxu0 %v7156_v24  ;;  %v7009_v60 = vpop.permute.xlu0 %7008 }
 0x5b8   : > { %6223 = vmatprep.subr.bf16.mxu0 %v9227_v3  ;;  %v7011_v7 = vunpack.i.h.bf16 %v7009_v60  ;;  %v7010_v47 = vunpack.i.l.bf16 %v7009_v60 }
 0x5b9   : > { %v6004_v1 = vcombine.low %v5996_v25, %v6003_v57  ;;  %v6133_v16 = vrot.slane %v6126_v49, %v8186_v5  ;;  %v6005_v33 = vcombine.high %v5996_v25, %v6003_v57  ;;  %v7014_v48 = vpop.permute.xlu1 %7013 }
 0x5ba   : > { %v7016_v18 = vunpack.i.h.bf16 %v7014_v48  ;;  %v7015_v4 = vunpack.i.l.bf16 %v7014_v48  ;;  %v6394_v46 = vsel %vm3803_vm1, %v8475_v45, %v7011_v7  ;;  %v6393_v30 = vsel %vm3803_vm1, %v8473_v34, %v7010_v47 }
 0x5bb   : > { %v6153_v43 = vcombine.low %v5851_v23, %v6133_v16  ;;  %6224 = vmatpush1.bf16.msra.mxu0 %v7158_v26  ;;  %6940 = vmatprep.mubr.msk.bf16.mxu1 %vm3803_vm1, %v6005_v33  ;;  %v7019_v40 = vpop.permute.xlu0 %7018 }
 0x5bc   : > { %6097 = vmatmul.mubr.bf16.vlgmr.msra.gmra.mrb[84].mxu1 %v6004_v1  ;;  %6225 = vmatprep.subr.bf16.mxu0 %v9227_v3  ;;  %v7021_v14 = vunpack.i.h.bf16 %v7019_v40  ;;  %v7020_v24 = vunpack.i.l.bf16 %v7019_v40  ;;  %v6396_v25 = vsel %vm3803_vm1, %v8477_v35, %v7016_v18  ;;  %v6395_v49 = vsel %vm3803_vm1, %v8356_v10, %v7015_v4 }
 0x5bd   : > { %v6160_v50 = vrot.slane %v6153_v43, %v8186_v5  ;;  %v7024_v61 = vpop.permute.xlu1 %7023 }
 0x5be   : > { %v7026_v28 = vunpack.i.h.bf16 %v7024_v61  ;;  %v7025_v32 = vunpack.i.l.bf16 %v7024_v61  ;;  %v6398_v16 = vsel %vm6397_vm4, %v6393_v30, %v7020_v24  ;;  %v6399_v33 = vsel %vm6397_vm4, %v6394_v46, %v7021_v14 }
 0x5bf   : > { %6226 = vmatpush1.bf16.msra.mxu0 %v7159_v39  ;;  %v6162_v53 = vcombine.high %v6003_v57, %v6160_v50  ;;  %v6161_v0 = vcombine.low %v6003_v57, %v6160_v50 }
 0x5c0   : > { %6227 = vmatprep.subr.bf16.mxu0 %v9227_v3  ;;  %v6400_v43 = vsel %vm6397_vm4, %v6395_v49, %v7025_v32  ;;  %v6401_v39 = vsel %vm6397_vm4, %v6396_v25, %v7026_v28 }
 0x5c1   : > { %6968 = vmatprep.mubr.msk.bf16.mxu0 %vm3803_vm1, %v6162_v53 }
 0x5c3   : > { %6228 = vmatpush1.bf16.msra.mxu0 %v7160_v36 }
 0x5c4   : > { %6229 = vmatprep.subr.bf16.mxu0 %v9227_v3 }
 0x5c7   : > { %6230 = vmatpush1.bf16.msra.mxu0 %v7161_v42 }
 0x5c8   : > { %6231 = vmatprep.subr.bf16.mxu0 %v9227_v3 }
 0x5cb   : > { %6232 = vmatpush1.bf16.msra.mxu0 %v7162_v11 }
 0x5cc   : > { %6233 = vmatprep.subr.bf16.mxu0 %v9227_v3 }
 0x5cf   : > { %6234 = vmatpush1.bf16.msra.mxu0 %v7163_v2 }
 0x5d0   : > { %6235 = vmatprep.subr.bf16.mxu0 %v9227_v3 }
 0x5d3   : > { %6236 = vmatpush1.bf16.msra.mxu0 %v7164_v37 }
 0x5d4   : > { %6237 = vmatprep.subr.bf16.mxu0 %v9227_v3 }
 0x5d7   : > { %6238 = vmatpush1.bf16.msra.mxu0 %v7165_v31 }
 0x5da   : > { %6254 = vmatmul.mubr.bf16.vlgmr.msra.gmra.mrb[88].mxu0 %v6161_v0 }
 0x689   : > { %v5981_v13 = vpop.f32.mrb[84].mxu0 }
 0x68a   : > { %v5983_v59 = vpop.f32.mrb[85].mxu0 }
 0x68b   : > { %v5984_v58 = vpop.f32.mrb[86].mxu0 }
 0x68c   : > { %v5986_v54 = vpop.f32.mrb[87].mxu0 }
 0x68f   : > { %v6098_v12 = vpop.f32.mrb[84].mxu1 }
 0x690   : > { %v6099_v62 = vadd.f32 %v6098_v12, %v5981_v13  ;;  %v6100_v63 = vpop.f32.mrb[85].mxu1 }
 0x691   : > { %v6101_v55 = vpop.f32.mrb[86].mxu1 }
 0x692   : > { %v6102_v51 = vadd.f32 %v6101_v55, %v5984_v58  ;;  %v6103_v52 = vpop.f32.mrb[87].mxu1 }
 0x6ad   : > { %v6255_v56 = vpop.f32.mrb[88].mxu0 }
 0x6ae   : > { %v6262_v27 = vadd.f32 %v6255_v56, %v6099_v62  ;;  %v6257_v3 = vpop.f32.mrb[89].mxu0 }
 0x6af   : > { %v6258_v21 = vpop.f32.mrb[90].mxu0 }
 0x6b0   : > { %v6271_v8 = vadd.f32 %v6969_v9, %v6262_v27  ;;  %v6263_v41 = vadd.f32 %v6258_v21, %v6102_v51  ;;  %v6260_v29 = vpop.f32.mrb[91].mxu0 }
 0x6b2   : > { %v6275_v19 = vcombine.high %v6271_v8, %v6271_v8  ;;  %v6272_v44 = vadd.f32 %v6969_v9, %v6263_v41  ;;  %v6377_v15 = vrot.slane %v6271_v8, 7 }
 0x6b4   : > { %v6378_v23 = vrot.slane %v6275_v19, 7  ;;  %v6276_v20 = vcombine.high %v6272_v44, %v6272_v44  ;;  %v6379_v6 = vrot.slane %v6272_v44, 7 }
 0x6b6   : > { %v6380_v38 = vrot.slane %v6276_v20, 7  ;;  %v7027_v22 = vpack.i.bf16 %v6378_v23, %v6377_v15 }
 0x6b8   : > { %7028 = vrot.lane.b32.xlu0 %v7027_v22, %s7199_s17  ;;  %v7032_v17 = vpack.i.bf16 %v6380_v38, %v6379_v6 }
 0x6ba   : > { %7033 = vrot.lane.b32.xlu1 %v7032_v17, %s7199_s17 }
 0x72a   : > { %v7029_v57 = vpop.permute.xlu0 %7028 }
 0x72b   : > { %v7031_v26 = vunpack.i.h.bf16 %v7029_v57  ;;  %v7030_v1 = vunpack.i.l.bf16 %v7029_v57 }
 0x72c   : > { %v7034_v50 = vpop.permute.xlu1 %7033 }
 0x72d   : > { %v6403_v53 = vsel %vm3611_vm2, %v6399_v33, %v7031_v26  ;;  %v6402_v45 = vsel %vm3611_vm2, %v6398_v16, %v7030_v1  ;;  %v7036_v36 = vunpack.i.h.bf16 %v7034_v50  ;;  %v7035_v34 = vunpack.i.l.bf16 %v7034_v50 }
 0x72e   : > { %v6407_v42 = vpack.c.bf16 %v6403_v53, %v6403_v53  ;;  %v6406_v35 = vpack.c.bf16 %v6402_v45, %v6402_v45 }
 0x72f   : > { %v6405_v11 = vsel %vm3611_vm2, %v6401_v39, %v7036_v36  ;;  %v6404_v10 = vsel %vm3611_vm2, %v6400_v43, %v7035_v34 }
 0x730   : > { %v6428_v2 = vrot.slane %v6407_v42, %v8186_v5  ;;  %v6420_v37 = vrot.slane %v6406_v35, %v8186_v5  ;;  %v6409_v31 = vpack.c.bf16 %v6405_v11, %v6405_v11  ;;  %v6408_v0 = vpack.c.bf16 %v6404_v10, %v6404_v10 }
 0x732   : > { %v6429_v13 = vcombine.high %v6428_v2, %v6428_v2  ;;  %v6468_v59 = vshrl.u32 %v6428_v2, 16  ;;  %v6471_v58 = vshll.u32 %v6428_v2, 16  ;;  %v6421_v54 = vcombine.high %v6420_v37, %v6420_v37 }
 0x733   : > { %v6454_v12 = vshrl.u32 %v6420_v37, 16  ;;  %v6457_v62 = vshll.u32 %v6420_v37, 16  ;;  %v6444_v63 = vrot.slane %v6409_v31, %v8186_v5  ;;  %v6436_v55 = vrot.slane %v6408_v0, %v8186_v5 }
 0x734   : > { %v6470_v51 = vrot.slane %v6468_v59, 6  ;;  %v6473_v52 = vrot.slane %v6471_v58, 7  ;;  %v6477_v56 = vshll.u32 %v6429_v13, 16  ;;  %v6463_v9 = vshll.u32 %v6421_v54, 16 }
 0x735   : > { %v6456_v27 = vrot.slane %v6454_v12, 6  ;;  %v6459_v3 = vrot.slane %v6457_v62, 7  ;;  %v6445_v21 = vcombine.high %v6444_v63, %v6444_v63  ;;  %v6496_v8 = vshrl.u32 %v6444_v63, 16 }
 0x736   : > { %v6474_v41 = vor.u32 %v6473_v52, %v6470_v51  ;;  %v6479_v29 = vrot.slane %v6477_v56, 7  ;;  %v6499_v19 = vshll.u32 %v6444_v63, 16  ;;  %v6437_v20 = vcombine.high %v6436_v55, %v6436_v55 }
 0x737   : > { %v6460_v5 = vor.u32 %v6459_v3, %v6456_v27  ;;  %v6498_v15 = vrot.slane %v6496_v8, 6  ;;  %v6505_v23 = vshll.u32 %v6445_v21, 16  ;;  %v6482_v22 = vshrl.u32 %v6436_v55, 16 }
 0x738   : > { %v6475_v6 = vrot.slane %v6474_v41, 2  ;;  %v6501_v38 = vrot.slane %v6499_v19, 7  ;;  %v6485_v17 = vshll.u32 %v6436_v55, 16  ;;  %v6465_v48 = vrot.slane %v6463_v9, 7 }
 0x739   : > { %v6461_v60 = vrot.slane %v6460_v5, 2  ;;  %v6491_v40 = vshll.u32 %v6437_v20, 16  ;;  %v6484_v47 = vrot.slane %v6482_v22, 6  ;;  %v6507_v24 = vrot.slane %v6505_v23, 7 }
 0x73a   : > { %v6480_v61 = vsel %vm9181_vm12, %v6475_v6, %v6479_v29  ;;  %v6502_v7 = vor.u32 %v6501_v38, %v6498_v15  ;;  %v6487_v18 = vrot.slane %v6485_v17, 7 }
 0x73b   : > { %6515 = vst.msk [vmem:[%s354_s30 + $0x2] sm:$0x3] %vm6513_vm11, %v6480_v61  ;;  %v6466_v4 = vsel %vm9181_vm12, %v6461_v60, %v6465_v48  ;;  %v6493_v30 = vrot.slane %v6491_v40, 7 }
 0x73c   : > { %6514 = vst.msk [vmem:[%s354_s30] sm:$0x3] %vm6513_vm11, %v6466_v4  ;;  %v6503_v14 = vrot.slane %v6502_v7, 2  ;;  %v6488_v28 = vor.u32 %v6487_v18, %v6484_v47 }
 0x73e   : > { %v6508_v32 = vsel %vm9181_vm12, %v6503_v14, %v6507_v24  ;;  %v6489_v46 = vrot.slane %v6488_v28, 2 }
 0x73f   : > { %6517 = vst.msk [vmem:[%s354_s30 + $0x6] sm:$0x3] %vm6513_vm11, %v6508_v32 }
 0x740   : > { %v6494_v57 = vsel %vm9181_vm12, %v6489_v46, %v6493_v30 }
 0x741   : > { %6516 = vst.msk [vmem:[%s354_s30 + $0x4] sm:$0x3] %vm6513_vm11, %v6494_v57 }
 0x742 PF: > { %s19_s11 = sadd.s32 1, %s7189_s11   ;;  %s9235_s30 = smov %s7185_s10 }
 0x743   : > { %p16_p5 = scmp.ge.s32.totalorder %s19_s11, 4   ;;  %s9236_s10 = smov %s9238_s12 }
 0x745   :  { %18 = sbr.rel (!%p16_p5) target bundleno = 2 (0x2), region = 94 }

</bundles_post_ra>
